<compile_context>
chip_gen: v6e
topology: v6e:2x2x1
jax: 0.10.0
libtpu: 0.0.40
codegen_flags: <defaults>
</compile_context>

<pallas_src>
import functools

import numpy as np
import jax
import jax.numpy as jnp
from jax.experimental import pallas as pl
from jax.experimental.pallas import tpu as pltpu

_HIGHEST = jax.lax.Precision.HIGHEST


# ----------------------------------------------------------------------------
# Fused Pallas kernel: BB batch elements per grid step, everything in VMEM.
# ----------------------------------------------------------------------------
def _fno_fused_kernel(x_ref, w_in_ref, b_in_ref, a_mid_ref, b_mid_ref,
                      w_out1_ref, b_out1_ref, fc2_w_ref, fc2_b_ref, o_ref,
                      *, n_mid):
    f32 = jnp.float32
    x = x_ref[0]                                                   # (BB, S*4)

    # fc0 fused with Fourier layer 0 (no ReLU between them in the original net).
    h = jnp.maximum(
        jnp.dot(x, w_in_ref[...], preferred_element_type=f32) + b_in_ref[...],
        0.0)                                                       # (BB, S*W)

    # Middle Fourier layers: one (BB, S*W) @ (S*W, S*W) MXU matmul each.
    for l in range(n_mid):
        h = jnp.maximum(
            jnp.dot(h, a_mid_ref[l], preferred_element_type=f32) + b_mid_ref[l],
            0.0)

    # Last Fourier layer fused with fc1 (no ReLU between them), then fc1's ReLU.
    h = jnp.maximum(
        jnp.dot(h, w_out1_ref[...], preferred_element_type=f32)
        + b_out1_ref[...], 0.0)                                    # (BB, S*D1)

    # fc2, applied per spatial point via its block-diagonal packing.
    o_ref[0] = (jnp.dot(h, fc2_w_ref[...], preferred_element_type=f32)
                + fc2_b_ref[...]).astype(o_ref.dtype)              # (BB, S*2)


# ----------------------------------------------------------------------------
# Weight folding (wrapper-side, depends only on params — cache in real use).
# ----------------------------------------------------------------------------
def pack_fno_params(params, S):
    """Fold the whole network into 5 lane-dense matmul operands.

    Each Fourier layer (truncated rDFT -> per-mode complex channel mix ->
    truncated irDFT, plus the Conv1d(1x1) W-path) is an affine map on the
    flattened (S*W,) activation, so it precomposes into a single dense
    (S*W, S*W) matrix + bias.  fc0/layer0 and layer_last/fc1 are additionally
    fused because the original network has no ReLU at those boundaries.
    """
    W = params["fc0_w"].shape[1]
    L = len(params["layers"])
    Fr, Fi, Gr, Gi = params["Fr"], params["Fi"], params["Gr"], params["Gi"]

    # P??[p, k, n]: composition of the truncated irDFT (G) and rDFT (F) bases.
    Prr = (jnp.einsum("pk,kn->pkn", Gr, Fr, precision=_HIGHEST)
           + jnp.einsum("pk,kn->pkn", Gi, Fi, precision=_HIGHEST))
    Pri = (jnp.einsum("pk,kn->pkn", Gi, Fr, precision=_HIGHEST)
           - jnp.einsum("pk,kn->pkn", Gr, Fi, precision=_HIGHEST))
    eye_s = jnp.eye(S, dtype=jnp.float32)

    def layer_operator(p):
        # A[n, i, q, o]: spectral path + block-diagonal Conv1d(1x1) W-path.
        a4 = (jnp.einsum("pkn,kio->nipo", Prr, p["wr"], precision=_HIGHEST)
              + jnp.einsum("pkn,kio->nipo", Pri, p["wi"], precision=_HIGHEST)
              + eye_s[:, None, :, None] * p["wmat"][None, :, None, :])
        bias = jnp.tile(p["bias"], (1, S))                         # (1, S*W)
        return a4.reshape(S * W, S * W), bias

    ops = [layer_operator(p) for p in params["layers"]]

    def block_diag(m):                                             # (a,b)->(S*a,S*b)
        a, b = m.shape
        return (eye_s[:, None, :, None] * m[None, :, None, :]).reshape(S * a, S * b)

    fc0_bd = block_diag(params["fc0_w"])                           # (S*4,  S*W)
    fc0_b = jnp.tile(params["fc0_b"], (1, S))                      # (1,    S*W)
    fc1_bd = block_diag(params["fc1_w"])                           # (S*W,  S*D1)
    fc1_b = jnp.tile(params["fc1_b"], (1, S))                      # (1,    S*D1)
    fc2_bd = block_diag(params["fc2_w"])                           # (S*D1, S*2)
    fc2_b = jnp.tile(params["fc2_b"], (1, S))                      # (1,    S*2)

    a0, b0 = ops[0]
    w_in = jnp.dot(fc0_bd, a0, precision=_HIGHEST)                 # (S*4, S*W)
    b_in = jnp.dot(fc0_b, a0, precision=_HIGHEST) + b0             # (1,   S*W)

    a_last, b_last = ops[-1]
    w_out1 = jnp.dot(a_last, fc1_bd, precision=_HIGHEST)           # (S*W, S*D1)
    b_out1 = jnp.dot(b_last, fc1_bd, precision=_HIGHEST) + fc1_b   # (1,   S*D1)

    a_mid = jnp.stack([ops[l][0] for l in range(1, L - 1)], axis=0)  # (L-2,SW,SW)
    b_mid = jnp.stack([ops[l][1] for l in range(1, L - 1)], axis=0)  # (L-2,1, SW)

    return {"w_in": w_in, "b_in": b_in, "a_mid": a_mid, "b_mid": b_mid,
            "w_out1": w_out1, "b_out1": b_out1,
            "fc2_bd": fc2_bd, "fc2_b": fc2_b}


def _pick_batch_block(batch):
    """Batch elements (= MXU rows) per grid step.

    Targets up to 256 rows per step (fine on v5e's 128-row MXU too) while
    keeping >= 2 grid steps whenever B >= 2 so the "parallel" batch axis can
    be split across v7x's two TensorCores.  BB always divides B.
    """
    if batch <= 1:
        return 1
    target = max(1, min(256, batch // 2))
    bb = 1
    for d in range(1, target + 1):
        if batch % d == 0:
            bb = d
    return bb


# ----------------------------------------------------------------------------
# Wrapper: fold weights once, single pallas_call for the whole forward.
# ----------------------------------------------------------------------------
def fno1d_complex_time_forward(params, x, t):
    """Pallas implementation of FNO1dComplexTime.forward.

    x: (B, S, 3) real ; t: (B,) real ; returns complex64 (B, S).
    """
    B, S, _ = x.shape
    width = params["fc0_w"].shape[1]
    d1 = params["fc1_w"].shape[1]
    d2 = params["fc2_w"].shape[1]
    n_layers = len(params["layers"])
    assert n_layers >= 3
    n_mid = n_layers - 2

    packed = pack_fno_params(params, S)   # NOTE: cache across calls in practice.

    # t-feature concat exactly as the PyTorch module, then flatten each batch
    # element's (S, 4) features into one lane-dense row.
    t_feat = jnp.broadcast_to(t.reshape(B, 1, 1).astype(x.dtype), (B, S, 1))
    x4 = jnp.concatenate([x, t_feat], axis=2).reshape(B, S * 4)

    bb = _pick_batch_block(B)
    g = B // bb
    x4 = x4.reshape(g, bb, S * 4)

    sw = S * width
    kernel = functools.partial(_fno_fused_kernel, n_mid=n_mid)

    out3 = pl.pallas_call(
        kernel,
        out_shape=jax.ShapeDtypeStruct((g, bb, S * d2), jnp.float32),
        grid=(g,),
        in_specs=[
            pl.BlockSpec((1, bb, S * 4), lambda i: (i, 0, 0)),        # x4
            pl.BlockSpec((S * 4, sw), lambda i: (0, 0)),              # w_in
            pl.BlockSpec((1, sw), lambda i: (0, 0)),                  # b_in
            pl.BlockSpec((n_mid, sw, sw), lambda i: (0, 0, 0)),       # a_mid
            pl.BlockSpec((n_mid, 1, sw), lambda i: (0, 0, 0)),        # b_mid
            pl.BlockSpec((sw, S * d1), lambda i: (0, 0)),             # w_out1
            pl.BlockSpec((1, S * d1), lambda i: (0, 0)),              # b_out1
            pl.BlockSpec((S * d1, S * d2), lambda i: (0, 0)),         # fc2_bd
            pl.BlockSpec((1, S * d2), lambda i: (0, 0)),              # fc2_b
        ],
        out_specs=pl.BlockSpec((1, bb, S * d2), lambda i: (i, 0, 0)),
        compiler_params=pltpu.CompilerParams(
            # Batch-block axis is parallel -> v7x shards it over its 2 TCs.
            dimension_semantics=("parallel",),
            # ~13 MiB of double-buffered weights + activations; explicit headroom
            # that stays below v7x's 64 MiB physical VMEM.
            vmem_limit_bytes=40 * 1024 * 1024,
        ),
    )(x4, packed["w_in"], packed["b_in"], packed["a_mid"], packed["b_mid"],
      packed["w_out1"], packed["b_out1"], packed["fc2_bd"], packed["fc2_b"])

    out = out3.reshape(B, S, d2)
    # torch.view_as_complex on trailing dim of size 2
    return out[..., 0] + 1j * out[..., 1]                            # (B, S) complex64


# ----------------------------------------------------------------------------
# Parameter / DFT-matrix setup (glue)
# ----------------------------------------------------------------------------
def make_dft_matrices(S, modes):
    n = np.arange(S)
    k = np.arange(modes)
    ang = 2.0 * np.pi * np.outer(k, n) / S
    Fr = np.cos(ang)          # Re of rfft basis e^{-2*pi*i*k*n/S}
    Fi = -np.sin(ang)         # Im of rfft basis
    nfreq = S // 2 + 1
    Gr = np.zeros((S, modes))
    Gi = np.zeros((S, modes))
    # Columns of G are irfft(unit impulse) / irfft(i * unit impulse): exactly the
    # truncated-irfft semantics used by torch.fft.irfft / jnp.fft.irfft.
    for kk in range(modes):
        e = np.zeros(nfreq, dtype=np.complex64)
        e[kk] = 1.0
        Gr[:, kk] = np.fft.irfft(e, n=S)
        e = np.zeros(nfreq, dtype=np.complex64)
        e[kk] = 1.0j
        Gi[:, kk] = np.fft.irfft(e, n=S)
    as_f32 = lambda a: jnp.asarray(a, dtype=jnp.float32)
    return as_f32(Fr), as_f32(Fi), as_f32(Gr), as_f32(Gi)


def init_params(key, S, modes, width):
    keys = jax.random.split(key, 6 + 4 * 4)

    def unif_sym(k, shape, scale):
        return jax.random.uniform(k, shape, jnp.float32, -scale, scale)

    params = {
        "fc0_w": unif_sym(keys[0], (4, width), 1.0 / np.sqrt(4.0)),
        "fc0_b": unif_sym(keys[1], (1, width), 1.0 / np.sqrt(4.0)),
        "fc1_w": unif_sym(keys[2], (width, 128), 1.0 / np.sqrt(width)),
        "fc1_b": unif_sym(keys[3], (1, 128), 1.0 / np.sqrt(width)),
        "fc2_w": unif_sym(keys[4], (128, 2), 1.0 / np.sqrt(128.0)),
        "fc2_b": unif_sym(keys[5], (1, 2), 1.0 / np.sqrt(128.0)),
    }
    spec_scale = 1.0 / (width * width)
    layers = []
    for i in range(4):
        k0, k1, k2, k3 = keys[6 + 4 * i: 6 + 4 * (i + 1)]
        layers.append({
            # stored as (mode, in, out) — torch keeps (in, out, mode)
            "wr": spec_scale * jax.random.uniform(k0, (modes, width, width), jnp.float32),
            "wi": spec_scale * jax.random.uniform(k1, (modes, width, width), jnp.float32),
            # Conv1d(width, width, 1): stored transposed as (in, out)
            "wmat": unif_sym(k2, (width, width), 1.0 / np.sqrt(width)),
            "bias": unif_sym(k3, (1, width), 1.0 / np.sqrt(width)),
        })
    params["layers"] = layers
    params["Fr"], params["Fi"], params["Gr"], params["Gi"] = make_dft_matrices(S, modes)
    return params


# ----------------------------------------------------------------------------
# Pure-JAX reference (mirrors PyTorch semantics exactly, uses real FFTs)
# ----------------------------------------------------------------------------
def reference_forward(params, x, t, modes):
    B, S, _ = x.shape
    t_feat = jnp.broadcast_to(t.reshape(-1, 1, 1), (B, S, 1)).astype(x.dtype)
    h = jnp.concatenate([x, t_feat], axis=2)                  # (B, S, 4)
    h = h @ params["fc0_w"] + params["fc0_b"]                 # (B, S, W)
    h = jnp.transpose(h, (0, 2, 1))                           # (B, W, S) like torch
    W = h.shape[1]
    for i in range(4):
        p = params["layers"][i]
        x_ft = jnp.fft.rfft(h, axis=-1)                       # (B, W, S//2+1)
        w_c = jnp.transpose(p["wr"] + 1j * p["wi"], (1, 2, 0))  # (in, out, modes)
        out_low = jnp.einsum("bix,iox->box", x_ft[:, :, :modes], w_c)
        out_ft = jnp.zeros((B, W, S // 2 + 1), dtype=jnp.complex64)
        out_ft = out_ft.at[:, :, :modes].set(out_low)
        x1 = jnp.fft.irfft(out_ft, n=S, axis=-1)
        x2 = jnp.einsum("io,bis->bos", p["wmat"], h) + p["bias"][0][None, :, None]
        h = x1 + x2
        if i < 3:
            h = jax.nn.relu(h)
    h = jnp.transpose(h, (0, 2, 1))                           # (B, S, W)
    h = jax.nn.relu(h @ params["fc1_w"] + params["fc1_b"])
    h = h @ params["fc2_w"] + params["fc2_b"]
    return h[..., 0] + 1j * h[..., 1]


# ----------------------------------------------------------------------------
if __name__ == "__main__":
    B, S, MODES, WIDTH = 2, 16, 8, 32

    key = jax.random.PRNGKey(0)
    k_params, k_x, k_t = jax.random.split(key, 3)

    params = init_params(k_params, S, MODES, WIDTH)
    x = jax.random.normal(k_x, (B, S, 3), jnp.float32)
    t = jax.random.uniform(k_t, (B,), jnp.float32)

    out = jax.block_until_ready(fno1d_complex_time_forward(params, x, t))

    ref = jax.block_until_ready(reference_forward(params, x, t, MODES))
    np.testing.assert_allclose(np.asarray(out), np.asarray(ref), rtol=5e-2, atol=5e-2)
    assert out.shape == (B, S) and np.iscomplexobj(np.asarray(out))

    print("KERNEL_OK")
</pallas_src>

<mosaic_0001>
module attributes {stable_mosaic.version = 11 : i64} {
  func.func @_fno_fused_kernel(%arg0: i32, %arg1: memref<1x1x64xf32, #tpu.memory_space<vmem>>, %arg2: memref<64x512xf32, #tpu.memory_space<vmem>>, %arg3: memref<1x512xf32, #tpu.memory_space<vmem>>, %arg4: memref<2x512x512xf32, #tpu.memory_space<vmem>>, %arg5: memref<2x1x512xf32, #tpu.memory_space<vmem>>, %arg6: memref<512x2048xf32, #tpu.memory_space<vmem>>, %arg7: memref<1x2048xf32, #tpu.memory_space<vmem>>, %arg8: memref<2048x32xf32, #tpu.memory_space<vmem>>, %arg9: memref<1x32xf32, #tpu.memory_space<vmem>>, %arg10: memref<1x1x32xf32, #tpu.memory_space<vmem>>) attributes {dimension_semantics = [#tpu.dimension_semantics<parallel>], iteration_bounds = array<i64: 2>, scalar_prefetch = 0 : i64, scratch_operands = 0 : i64, tpu.core_type = #tpu.core_type<tc>, window_params = [{transform_indices = @transform_0, window_bounds = array<i64: 1, 1, 64>}, {pipeline_mode = #tpu.pipeline_mode<synchronous>, transform_indices = @transform_1, window_bounds = array<i64: 64, 512>}, {pipeline_mode = #tpu.pipeline_mode<synchronous>, transform_indices = @transform_2, window_bounds = array<i64: 1, 512>}, {pipeline_mode = #tpu.pipeline_mode<synchronous>, transform_indices = @transform_3, window_bounds = array<i64: 2, 512, 512>}, {pipeline_mode = #tpu.pipeline_mode<synchronous>, transform_indices = @transform_4, window_bounds = array<i64: 2, 1, 512>}, {pipeline_mode = #tpu.pipeline_mode<synchronous>, transform_indices = @transform_5, window_bounds = array<i64: 512, 2048>}, {pipeline_mode = #tpu.pipeline_mode<synchronous>, transform_indices = @transform_6, window_bounds = array<i64: 1, 2048>}, {pipeline_mode = #tpu.pipeline_mode<synchronous>, transform_indices = @transform_7, window_bounds = array<i64: 2048, 32>}, {pipeline_mode = #tpu.pipeline_mode<synchronous>, transform_indices = @transform_8, window_bounds = array<i64: 1, 32>}, {transform_indices = @transform_9, window_bounds = array<i64: 1, 1, 32>}]} {
    %c0 = arith.constant 0 : index
    %c0_0 = arith.constant 0 : index
    %c0_1 = arith.constant 0 : index
    %0 = vector.load %arg1[%c0, %c0_0, %c0_1] : memref<1x1x64xf32, #tpu.memory_space<vmem>>, vector<1x1x64xf32>
    %1 = vector.shape_cast %0 : vector<1x1x64xf32> to vector<1x64xf32>
    %c0_2 = arith.constant 0 : index
    %c0_3 = arith.constant 0 : index
    %2 = vector.load %arg2[%c0_2, %c0_3] : memref<64x512xf32, #tpu.memory_space<vmem>>, vector<64x512xf32>
    %cst = arith.constant dense<0.000000e+00> : vector<1x512xf32>
    %3 = tpu.matmul %1, %2, %cst {dimension_numbers = #tpu.dot_dimension_numbers<[1], [0], [0], [1], [0, 0, 1, 1], [], []>} : vector<1x64xf32>, vector<64x512xf32>, vector<1x512xf32> -> vector<1x512xf32>
    %c0_4 = arith.constant 0 : index
    %c0_5 = arith.constant 0 : index
    %4 = vector.load %arg3[%c0_4, %c0_5] : memref<1x512xf32, #tpu.memory_space<vmem>>, vector<1x512xf32>
    %5 = arith.addf %3, %4 : vector<1x512xf32>
    %cst_6 = arith.constant 0.000000e+00 : f32
    %6 = vector.broadcast %cst_6 : f32 to vector<1x512xf32>
    %7 = arith.maximumf %5, %6 : vector<1x512xf32>
    %c0_7 = arith.constant 0 : index
    %c0_8 = arith.constant 0 : index
    %c0_9 = arith.constant 0 : index
    %8 = vector.load %arg4[%c0_7, %c0_8, %c0_9] : memref<2x512x512xf32, #tpu.memory_space<vmem>>, vector<1x512x512xf32>
    %9 = vector.shape_cast %8 : vector<1x512x512xf32> to vector<512x512xf32>
    %cst_10 = arith.constant dense<0.000000e+00> : vector<1x512xf32>
    %10 = tpu.matmul %7, %9, %cst_10 {dimension_numbers = #tpu.dot_dimension_numbers<[1], [0], [0], [1], [0, 0, 1, 1], [], []>} : vector<1x512xf32>, vector<512x512xf32>, vector<1x512xf32> -> vector<1x512xf32>
    %c0_11 = arith.constant 0 : index
    %c0_12 = arith.constant 0 : index
    %c0_13 = arith.constant 0 : index
    %11 = vector.load %arg5[%c0_11, %c0_12, %c0_13] : memref<2x1x512xf32, #tpu.memory_space<vmem>>, vector<1x1x512xf32>
    %12 = vector.shape_cast %11 : vector<1x1x512xf32> to vector<1x512xf32>
    %13 = arith.addf %10, %12 : vector<1x512xf32>
    %cst_14 = arith.constant 0.000000e+00 : f32
    %14 = vector.broadcast %cst_14 : f32 to vector<1x512xf32>
    %15 = arith.maximumf %13, %14 : vector<1x512xf32>
    %c1 = arith.constant 1 : index
    %c0_15 = arith.constant 0 : index
    %c0_16 = arith.constant 0 : index
    %16 = vector.load %arg4[%c1, %c0_15, %c0_16] : memref<2x512x512xf32, #tpu.memory_space<vmem>>, vector<1x512x512xf32>
    %17 = vector.shape_cast %16 : vector<1x512x512xf32> to vector<512x512xf32>
    %cst_17 = arith.constant dense<0.000000e+00> : vector<1x512xf32>
    %18 = tpu.matmul %15, %17, %cst_17 {dimension_numbers = #tpu.dot_dimension_numbers<[1], [0], [0], [1], [0, 0, 1, 1], [], []>} : vector<1x512xf32>, vector<512x512xf32>, vector<1x512xf32> -> vector<1x512xf32>
    %c1_18 = arith.constant 1 : index
    %c0_19 = arith.constant 0 : index
    %c0_20 = arith.constant 0 : index
    %19 = vector.load %arg5[%c1_18, %c0_19, %c0_20] : memref<2x1x512xf32, #tpu.memory_space<vmem>>, vector<1x1x512xf32>
    %20 = vector.shape_cast %19 : vector<1x1x512xf32> to vector<1x512xf32>
    %21 = arith.addf %18, %20 : vector<1x512xf32>
    %cst_21 = arith.constant 0.000000e+00 : f32
    %22 = vector.broadcast %cst_21 : f32 to vector<1x512xf32>
    %23 = arith.maximumf %21, %22 : vector<1x512xf32>
    %c0_22 = arith.constant 0 : index
    %c0_23 = arith.constant 0 : index
    %24 = vector.load %arg6[%c0_22, %c0_23] : memref<512x2048xf32, #tpu.memory_space<vmem>>, vector<512x2048xf32>
    %cst_24 = arith.constant dense<0.000000e+00> : vector<1x2048xf32>
    %25 = tpu.matmul %23, %24, %cst_24 {dimension_numbers = #tpu.dot_dimension_numbers<[1], [0], [0], [1], [0, 0, 1, 1], [], []>} : vector<1x512xf32>, vector<512x2048xf32>, vector<1x2048xf32> -> vector<1x2048xf32>
    %c0_25 = arith.constant 0 : index
    %c0_26 = arith.constant 0 : index
    %26 = vector.load %arg7[%c0_25, %c0_26] : memref<1x2048xf32, #tpu.memory_space<vmem>>, vector<1x2048xf32>
    %27 = arith.addf %25, %26 : vector<1x2048xf32>
    %cst_27 = arith.constant 0.000000e+00 : f32
    %28 = vector.broadcast %cst_27 : f32 to vector<1x2048xf32>
    %29 = arith.maximumf %27, %28 : vector<1x2048xf32>
    %c0_28 = arith.constant 0 : index
    %c0_29 = arith.constant 0 : index
    %30 = vector.load %arg8[%c0_28, %c0_29] : memref<2048x32xf32, #tpu.memory_space<vmem>>, vector<2048x32xf32>
    %cst_30 = arith.constant dense<0.000000e+00> : vector<1x32xf32>
    %31 = tpu.matmul %29, %30, %cst_30 {dimension_numbers = #tpu.dot_dimension_numbers<[1], [0], [0], [1], [0, 0, 1, 1], [], []>} : vector<1x2048xf32>, vector<2048x32xf32>, vector<1x32xf32> -> vector<1x32xf32>
    %c0_31 = arith.constant 0 : index
    %c0_32 = arith.constant 0 : index
    %32 = vector.load %arg9[%c0_31, %c0_32] : memref<1x32xf32, #tpu.memory_space<vmem>>, vector<1x32xf32>
    %33 = arith.addf %31, %32 : vector<1x32xf32>
    %c0_33 = arith.constant 0 : index
    %c0_34 = arith.constant 0 : index
    %c0_35 = arith.constant 0 : index
    %34 = vector.load %arg10[%c0_33, %c0_34, %c0_35] : memref<1x1x32xf32, #tpu.memory_space<vmem>>, vector<1x1x32xf32>
    %35 = vector.shape_cast %34 : vector<1x1x32xf32> to vector<1x32xf32>
    %36 = vector.shape_cast %33 : vector<1x32xf32> to vector<1x1x32xf32>
    tpu.vector_store %arg10[%c0_33, %c0_34, %c0_35], %36 {strides = array<i32>} : memref<1x1x32xf32, #tpu.memory_space<vmem>>, vector<1x1x32xf32>,
    return
  }
  func.func @transform_0(%arg0: i32) -> (i32, i32, i32) {
    %c0_i32 = arith.constant 0 : i32
    %c0_i32_0 = arith.constant 0 : i32
    %c0_i32_1 = arith.constant 0 : i32
    return %arg0, %c0_i32, %c0_i32_0 : i32, i32, i32
  }
  func.func @transform_1(%arg0: i32) -> (i32, i32) {
    %c0_i32 = arith.constant 0 : i32
    %c0_i32_0 = arith.constant 0 : i32
    %c0_i32_1 = arith.constant 0 : i32
    return %c0_i32, %c0_i32_0 : i32, i32
  }
  func.func @transform_2(%arg0: i32) -> (i32, i32) {
    %c0_i32 = arith.constant 0 : i32
    %c0_i32_0 = arith.constant 0 : i32
    %c0_i32_1 = arith.constant 0 : i32
    return %c0_i32, %c0_i32_0 : i32, i32
  }
  func.func @transform_3(%arg0: i32) -> (i32, i32, i32) {
    %c0_i32 = arith.constant 0 : i32
    %c0_i32_0 = arith.constant 0 : i32
    %c0_i32_1 = arith.constant 0 : i32
    %c0_i32_2 = arith.constant 0 : i32
    return %c0_i32, %c0_i32_0, %c0_i32_1 : i32, i32, i32
  }
  func.func @transform_4(%arg0: i32) -> (i32, i32, i32) {
    %c0_i32 = arith.constant 0 : i32
    %c0_i32_0 = arith.constant 0 : i32
    %c0_i32_1 = arith.constant 0 : i32
    %c0_i32_2 = arith.constant 0 : i32
    return %c0_i32, %c0_i32_0, %c0_i32_1 : i32, i32, i32
  }
  func.func @transform_5(%arg0: i32) -> (i32, i32) {
    %c0_i32 = arith.constant 0 : i32
    %c0_i32_0 = arith.constant 0 : i32
    %c0_i32_1 = arith.constant 0 : i32
    return %c0_i32, %c0_i32_0 : i32, i32
  }
  func.func @transform_6(%arg0: i32) -> (i32, i32) {
    %c0_i32 = arith.constant 0 : i32
    %c0_i32_0 = arith.constant 0 : i32
    %c0_i32_1 = arith.constant 0 : i32
    return %c0_i32, %c0_i32_0 : i32, i32
  }
  func.func @transform_7(%arg0: i32) -> (i32, i32) {
    %c0_i32 = arith.constant 0 : i32
    %c0_i32_0 = arith.constant 0 : i32
    %c0_i32_1 = arith.constant 0 : i32
    return %c0_i32, %c0_i32_0 : i32, i32
  }
  func.func @transform_8(%arg0: i32) -> (i32, i32) {
    %c0_i32 = arith.constant 0 : i32
    %c0_i32_0 = arith.constant 0 : i32
    %c0_i32_1 = arith.constant 0 : i32
    return %c0_i32, %c0_i32_0 : i32, i32
  }
  func.func @transform_9(%arg0: i32) -> (i32, i32, i32) {
    %c0_i32 = arith.constant 0 : i32
    %c0_i32_0 = arith.constant 0 : i32
    %c0_i32_1 = arith.constant 0 : i32
    return %arg0, %c0_i32, %c0_i32_0 : i32, i32, i32
  }
}

</mosaic_0001>

<bundles_post_ra>
// kernel: tpu_custom_call.1
= control target key start
LH: loop header
LB: loop body
LE: loop exit
PB: predicated region body
PF: predicated region fallthrough
CT: control target
= control target key end

     0   :  { %s6992_s0 = inlined_call_operand.hbm [shape: f32[2,1,64], index: 0, kind: input, shape index: {}]   ;;  %s6993_s1 = inlined_call_operand.hbm [shape: f32[64,512], index: 1, kind: input, shape index: {}]   ;;  %s6994_s2 = inlined_call_operand.hbm [shape: f32[1,512], index: 2, kind: input, shape index: {}]   ;;  %s6995_s3 = inlined_call_operand.hbm [shape: f32[2,512,512], index: 3, kind: input, shape index: {}]   ;;  %s6996_s4 = inlined_call_operand.hbm [shape: f32[2,1,512], index: 4, kind: input, shape index: {}]   ;;  %s6997_s5 = inlined_call_operand.hbm [shape: f32[512,2048], index: 5, kind: input, shape index: {}]   ;;  %s6998_s6 = inlined_call_operand.hbm [shape: f32[1,2048], index: 6, kind: input, shape index: {}]   ;;  %s6999_s7 = inlined_call_operand.vmem [shape: f32[2048,32], index: 7, kind: input, shape index: {}]   ;;  %s7000_s8 = inlined_call_operand.hbm [shape: f32[1,32], index: 8, kind: input, shape index: {}]   ;;  %s7001_s9 = inlined_call_operand.hbm [shape: f32[2,1,32], index: 9, kind: output, shape index: {}]  }
   0x1   :  { %7006 = sst [smem:[#allocation23_spill]] %s6993_s1 }
   0x2   :  { %7007 = sst [smem:[#allocation24_spill]] %s6994_s2 }
   0x3   :  { %7008 = sst [smem:[#allocation25_spill]] %s6995_s3 }
   0x4   :  { %7009 = sst [smem:[#allocation26_spill]] %s6996_s4 }
   0x5   :  { %14 = vsyncpa [#allocation3], 0 }
   0x6   :  { %16 = vsyncpa [#allocation3 + $0x1], 0 }
   0x7   :  { %17 = vsyncpa [#allocation6], 0 }
   0x8   :  { %18 = vsyncpa [#allocation9], 0 }
   0x9   :  { %19 = vsyncpa [#allocation12], 0 }
   0xa   :  { %20 = vsyncpa [#allocation15], 0 }
   0xb   :  { %21 = vsyncpa [#allocation4], 0 }
   0xc   :  { %23 = vsyncpa [#allocation4 + $0x1], 0  ;;  %s5788_s30 = smov 0   ;;  %s5790_s10 = smov 0  }
   0xd   :  { %s5792_s11 = smov 0   ;;  %s5794_s12 = smov 0  }
   0xe LB: > { %s5722_s13 = smov [#allocation5]   ;;  %s5809_s15 = sadd.s32 4294967295, %s5720_s12   ;;  %s5720_s12 = sphi %s5794_s12, %s7038_s12   ;;  %s5716_s11 = sphi %s5792_s11, %s7037_s11   ;;  %s5712_s10 = sphi %s5790_s10, %s7036_s10   ;;  %s5708_s30 = sphi %s5788_s30, %s7035_s30  }
   0xf   : > { %s266_s14 = sshll.u32 %s5722_s13, 4  ;;  %p5002_p0 = scmp.ge.s32.totalorder %s5720_s12, 1  ;;  %s267_s14 = int_to_ptr.vmem [resolvable:$true] %s266_s14 }
  0x10   : > { %p7002_p1 = scmp.eq.s32.totalorder %s5809_s15, 0  ;;  %p254_p2 = scmp.lt.s32.totalorder %s5720_s12, 3 }
  0x11   : > { %s5723_s17 = smov [#allocation8]   ;;  %s5724_s20 = smov [#allocation11]  }
  0x12   : > { %p5814_p3 = pnand %p5002_p0, %p254_p2  ;;  %s290_s18 = sshll.u32 %s5723_s17, 4  ;;  %s5827_s18 = int_to_ptr.vmem [resolvable:$true] %s290_s18 }
  0x13   : > { %s316_s21 = sshll.u32 %s5724_s20, 4  ;;  %s5441_s23 = scalar_lea.vmem %s267_s14, 4096  ;;  %s5829_s21 = int_to_ptr.vmem [resolvable:$true] %s316_s21 }
  0x14   : > { %s7010_s16 = scalar_select %p5814_p3, 1, 0 }
  0x15   : > { %p5337_p5 = pneg %p5814_p3  ;;  %p5442_p8 = scmp.ne.s32.totalorder %s267_s14, %s5441_s23 }
  0x16   : > { %p5449_p11 = scmp.lt.s32.totalorder %s267_s14, %s267_s14  ;;  %p5450_p12 = scmp.lt.s32.totalorder %s5441_s23, %s5441_s23 }
  0x17   : > { %p5823_p6 = pnand %p5337_p5, %p7002_p1 }
  0x18   : > { %p5451_p13 = por %p5450_p12, %p5449_p11 }
  0x19   : > { %p5833_p7 = pneg %p5823_p6 }
  0x1b   : > { %p5444_p9 = pnand %p5442_p8, %p5833_p7 }
  0x1d   : > { %p5445_p10 = pneg %p5444_p9 }
  0x1f   : > { %p5452_p0 = pnand %p5451_p13, %p5445_p10 }
  0x21   : > { %5455 = shalt.err (!%p5452_p0)
}
  0x22   : > { %s5725_s24 = smov 512   ;;  %s5726_s25 = smov 32  }
  0x23   : > { %s7013_s1 = sld [smem:[#allocation23_spill]]  ;;  %s5467_s28 = scalar_lea.vmem %s5827_s18, 65536 }
  0x24   : > { %p5468_p2 = scmp.ne.s32.totalorder %s5827_s18, %s5467_s28  ;;  %p5475_p9 = scmp.lt.s32.totalorder %s5827_s18, %s5827_s18 }
  0x25   : > { %p5476_p10 = scmp.lt.s32.totalorder %s5467_s28, %s5467_s28 }
  0x26   : > { %p5470_p5 = pnand %p5468_p2, %p5833_p7 }
  0x27   : > { %p5477_p11 = por %p5476_p10, %p5475_p9 }
  0x28   : > { %p5471_p8 = pneg %p5470_p5 }
  0x29   : > { %5340 = dma.hbm_to_vmem [thread:$0]  (!%p5823_p6), %s7013_s1, 4096, %s267_s14, [#allocation6], %s5725_s24, %s5725_s24, %s5726_s25  }
  0x2a   : > { %p5478_p12 = pnand %p5477_p11, %p5471_p8 }
  0x2c   : > { %5481 = shalt.err (!%p5478_p12)
}
  0x2d   : > { %s7014_s3 = sld [smem:[#allocation25_spill]]  ;;  %s5493_s14 = scalar_lea.vmem %s5829_s21, 131072 }
  0x2e   : > { %p5494_p13 = scmp.ne.s32.totalorder %s5829_s21, %s5493_s14  ;;  %p5501_p5 = scmp.lt.s32.totalorder %s5829_s21, %s5829_s21 }
  0x2f   : > { %p5502_p8 = scmp.lt.s32.totalorder %s5493_s14, %s5493_s14 }
  0x30   : > { %p5496_p0 = pnand %p5494_p13, %p5833_p7 }
  0x31   : > { %p5503_p9 = por %p5502_p8, %p5501_p5 }
  0x32   : > { %p5497_p2 = pneg %p5496_p0 }
  0x33   : > { %5346 = dma.hbm_to_vmem [thread:$0]  (!%p5823_p6), %s7014_s3, 65536, %s5827_s18, [#allocation9], %s5725_s24, %s5725_s24, %s5726_s25  }
  0x34   : > { %p5504_p10 = pnand %p5503_p9, %p5497_p2 }
  0x36   : > { %5507 = shalt.err (!%p5504_p10)
}
  0x37   : > { %s5727_s17 = smov 2048   ;;  %s5728_s20 = smov 128  }
  0x38   : > { %5352 = dma.hbm_to_vmem [thread:$0]  (!%p5823_p6), %s6997_s5, 131072, %s5829_s21, [#allocation12], %s5727_s17, %s5727_s17, %s5728_s20  }
  0x39   : > { %s5729_s18 = smov [#allocation7]   ;;  %s5730_s25 = smov [#allocation10]  }
  0x3a   : > { %s280_s24 = sshll.u32 %s5729_s18, 4  ;;  %s303_s27 = sshll.u32 %s5730_s25, 4  ;;  %s281_s24 = int_to_ptr.vmem [resolvable:$true] %s280_s24  ;;  %s304_s27 = int_to_ptr.vmem [resolvable:$true] %s303_s27 }
  0x3b   : > { %s5519_s28 = scalar_lea.vmem %s281_s24, 64  ;;  %p5527_p0 = scmp.lt.s32.totalorder %s281_s24, %s281_s24 }
  0x3c   : > { %p5520_p11 = scmp.ne.s32.totalorder %s281_s24, %s5519_s28  ;;  %p5528_p2 = scmp.lt.s32.totalorder %s5519_s28, %s5519_s28 }
  0x3e   : > { %p5522_p12 = pnand %p5520_p11, %p5833_p7  ;;  %p5529_p5 = por %p5528_p2, %p5527_p0 }
  0x40   : > { %p5523_p13 = pneg %p5522_p12 }
  0x42   : > { %p5530_p8 = pnand %p5529_p5, %p5523_p13 }
  0x44   : > { %5533 = shalt.err (!%p5530_p8)
}
  0x45   : > { %s7015_s2 = sld [smem:[#allocation24_spill]]  ;;  %s5545_s21 = scalar_lea.vmem %s304_s27, 128 }
  0x46   : > { %p5546_p9 = scmp.ne.s32.totalorder %s304_s27, %s5545_s21  ;;  %p5553_p11 = scmp.lt.s32.totalorder %s304_s27, %s304_s27 }
  0x47   : > { %p5554_p12 = scmp.lt.s32.totalorder %s5545_s21, %s5545_s21 }
  0x48   : > { %p5548_p10 = pnand %p5546_p9, %p5833_p7 }
  0x49   : > { %p5555_p1 = por %p5554_p12, %p5553_p11 }
  0x4a   : > { %p5549_p4 = pneg %p5548_p10 }
  0x4b   : > { %5343 = dma.hbm_to_vmem [thread:$0]  (!%p5823_p6), %s7015_s2, 64, %s281_s24, [#allocation6]  }
  0x4c   : > { %p5556_p3 = pnand %p5555_p1, %p5549_p4 }
  0x4e   : > { %5559 = shalt.err (!%p5556_p3)
}
  0x4f   : > { %s5731_s14 = smov 64   ;;  %s5732_s17 = smov 4  }
  0x50   : > { %s7016_s4 = sld [smem:[#allocation26_spill]]  ;;  %s5733_s26 = smov [#allocation13]  }
  0x51   : > { %s330_s18 = sshll.u32 %s5733_s26, 4  ;;  %s5734_s24 = smov [#allocation14]   ;;  %s331_s18 = int_to_ptr.vmem [resolvable:$true] %s330_s18 }
  0x52   : > { %s344_s25 = sshll.u32 %s5734_s24, 4  ;;  %s5571_s28 = scalar_lea.vmem %s331_s18, 256  ;;  %s345_s25 = int_to_ptr.vmem [resolvable:$true] %s344_s25 }
  0x53   : > { %p5572_p13 = scmp.ne.s32.totalorder %s331_s18, %s5571_s28  ;;  %p5579_p3 = scmp.lt.s32.totalorder %s331_s18, %s331_s18 }
  0x54   : > { %p5580_p4 = scmp.lt.s32.totalorder %s5571_s28, %s5571_s28 }
  0x55   : > { %p5574_p0 = pnand %p5572_p13, %p5833_p7 }
  0x56   : > { %5349 = dma.hbm_to_vmem [thread:$0]  (!%p5823_p6), %s7016_s4, 128, %s304_s27, [#allocation9], %s5731_s14, %s5731_s14, %s5732_s17  }
  0x57   : > { %p5575_p1 = pneg %p5574_p0  ;;  %p5581_p2 = por %p5580_p4, %p5579_p3 }
  0x59   : > { %p5582_p5 = pnand %p5581_p2, %p5575_p1 }
  0x5b   : > { %5585 = shalt.err (!%p5582_p5)
}
  0x5c   : > { %5355 = dma.hbm_to_vmem [thread:$0]  (!%p5823_p6), %s6998_s6, 256, %s331_s18, [#allocation12]  }
  0x5d   : > { %s5597_s27 = scalar_lea.vmem %s345_s25, 16  ;;  %s5604_s21 = scalar_lea.vmem %s345_s25, 32 }
  0x5e   : > { %p5598_p8 = scmp.ne.s32.totalorder %s345_s25, %s5597_s27  ;;  %p5605_p11 = scmp.lt.s32.totalorder %s345_s25, %s345_s25 }
  0x5f   : > { %p5606_p12 = scmp.lt.s32.totalorder %s5604_s21, %s5597_s27 }
  0x60   : > { %p5600_p9 = pnand %p5598_p8, %p5833_p7 }
  0x61   : > { %p5607_p13 = por %p5606_p12, %p5605_p11 }
  0x62   : > { %p5601_p10 = pneg %p5600_p9 }
  0x64   : > { %p5608_p0 = pnand %p5607_p13, %p5601_p10 }
  0x66   : > { %5611 = shalt.err (!%p5608_p0)
}
  0x67   : > { %5358 = dma.hbm_to_vmem [thread:$0]  (!%p5823_p6), %s7000_s8, 16, %s345_s25, [#allocation15]  }
  0x68   : > { %s5001_s22 = sadd.s32 4294967294, %s5720_s12   ;;  %s5898_s19 = sadd.s32 1, %s5720_s12  }
  0x69   : > { %s36_s20 = sadd.s32 1, %s5716_s11  ;;  %s33_s23 = ssub.s32 %s5720_s12, %s5898_s19 }
  0x6a   : > { %p43_p7 = scmp.ne.s32.totalorder %s5716_s11, %s5712_s10  ;;  %p34_p1 = scmp.eq.s32.totalorder %s33_s23, 0 }
  0x6b   : > { %p44_p3 = scmp.eq.s32.totalorder %s5720_s12, 0  ;;  %p49_p4 = scmp.ne.s32.totalorder %s5712_s10, %s5708_s30 }
  0x6c   : > { %p241_p2 = scmp.eq.s32.totalorder %s5809_s15, 1  ;;  %p7017_p8 = scmp.eq.s32.totalorder %s5809_s15, 0 }
  0x6d   : > { %s5910_s26 = scalar_select %p34_p1, %s5716_s11, %s36_s20  }
  0x6e   : > { %p45_p5 = por %p44_p3, %p43_p7  ;;  %p5914_p9 = por %p7017_p8, %p49_p4 }
  0x6f   : > { %p5918_p6 = por %p241_p2, %p43_p7  ;;  %p247_p10 = scmp.eq.s32.totalorder %s5001_s22, 1 }
  0x70   : > { %s7018_s18 = scalar_select %p5914_p9, 1, 0 }
  0x71   : > { %s7019_s24 = scalar_select %p5918_p6, 1, 0 }
  0x72   : > { %p5374_p11 = scmp.lt.s32.totalorder %s5720_s12, 2  ;;  %s355_s25 = sand.u32 1, %s5716_s11  }
  0x73   : > { %p5924_p12 = por %p247_p10, %p49_p4  ;;  %s5011_s29 = sshll.u32 %s5720_s12, 4 }
  0x74   : > { %s5932_s21 = scalar_lea.hbm %s6992_s0, %s5011_s29  ;;  %s358_s14 = scalar_lea.vmem [#allocation2], %s355_s25 }
  0x75   : > { %s7020_s28 = scalar_select %p5924_p12, 1, 0 }
  0x76   : > { %s365_s17 = sshll.u32 %s358_s14, 4  ;;  %p5934_p13 = pnand %p5374_p11, %p45_p5  ;;  %s366_s17 = int_to_ptr.vmem [resolvable:$true] %s365_s17 }
  0x77   : > { %s356_s20 = scalar_lea.sflag [#allocation3], %s355_s25  ;;  %s5612_s23 = scalar_lea.hbm %s5932_s21, 16 }
  0x78   : > { %p5613_p0 = scmp.ne.s32.totalorder %s5932_s21, %s5612_s23  ;;  %p5614_p7 = pneg %p5934_p13 }
  0x79   : > { %s5617_s27 = scalar_lea.hbm %s6992_s0, 32  ;;  %p5618_p4 = scmp.lt.s32.totalorder %s5932_s21, %s6992_s0 }
  0x7a   : > { %p5615_p1 = pnand %p5614_p7, %p5613_p0  ;;  %p5619_p2 = scmp.lt.s32.totalorder %s5617_s27, %s5612_s23 }
  0x7c   : > { %p5616_p3 = pneg %p5615_p1  ;;  %p5620_p5 = por %p5619_p2, %p5618_p4 }
  0x7e   : > { %p5621_p8 = pnand %p5620_p5, %p5616_p3 }
  0x80   : > { %5624 = shalt.err (!%p5621_p8)
}
  0x81   : > { %s5625_s14 = scalar_lea.vmem %s366_s17, 16  ;;  %s5735_s25 = smov [#allocation2]  }
  0x82   : > { %p5626_p10 = scmp.ne.s32.totalorder %s366_s17, %s5625_s14  ;;  %s5630_s3 = sshll.u32 %s5735_s25, 4  ;;  %s5631_s3 = int_to_ptr.vmem [resolvable:$false] %s5630_s3 }
  0x83   : > { %s5632_s4 = scalar_lea.vmem %s5631_s3, 32  ;;  %p5633_p0 = scmp.lt.s32.totalorder %s366_s17, %s5631_s3 }
  0x84   : > { %p5628_p11 = pnand %p5626_p10, %p5614_p7  ;;  %p5634_p1 = scmp.lt.s32.totalorder %s5632_s4, %s5625_s14 }
  0x86   : > { %p5629_p12 = pneg %p5628_p11  ;;  %p5635_p6 = por %p5634_p1, %p5633_p0 }
  0x88   : > { %p5636_p9 = pnand %p5635_p6, %p5629_p12 }
  0x8a   : > { %5639 = shalt.err (!%p5636_p9)
}
  0x8b   : > { %5362 = dma.hbm_to_vmem [thread:$0]  (!%p5934_p13), %s5932_s21, 16, %s366_s17, %s356_s20  }
  0x8c   : > { %p7022_p3 = scmp.ne.s32.totalorder %s7010_s16, 0 }
  0x8d   : > { %s5955_s1 = sand.u32 (!%p7022_p3), 1, %s5712_s10   ;;  %p7023_p7 = scmp.ne.s32.totalorder (!%p7022_p3), %s7018_s18, 0 }
  0x8e   : > { %374 = sbr.rel (%p7022_p3) target bundleno = 1785 (0x6f9), region = 56  ;;  %s377_s2 = scalar_lea.sflag (!%p7022_p3), [#allocation3], %s5955_s1 }
  0x8f   : > { %s379_s23 = scalar_lea.vmem (!%p7022_p3), [#allocation2], %s5955_s1 }
  0x93   : > { %5683 = dma.done.wait (%p7023_p7), %s377_s2, 16  }
  0x94   : > { %5685 = vsyncadd (%p7023_p7), %s377_s2, 4294967280  ;;  %p7024_p9 = scmp.eq.s32.totalorder %s5809_s15, 0 }
  0x96   : > { %5687 = dma.done.wait (%p7024_p9), [#allocation6], 4160   ;;  %p7025_p6 = pmov %p7024_p9 }
  0x98   : > { %5689 = vsyncadd (%p7025_p6), [#allocation6], 4294963136  ;;  %p7026_p12 = pmov %p7025_p6 }
  0x99   : > { %p7027_p13 = pmov %p7025_p6 }
  0x9a   : > { %5691 = dma.done.wait (%p7026_p12), [#allocation9], 65664  }
  0x9b   : > { %5693 = vsyncadd (%p7027_p13), [#allocation9], 4294901632  ;;  %p7028_p4 = pmov %p7025_p6 }
  0x9d   : > { %5695 = dma.done.wait (%p7028_p4), [#allocation12], 131328   ;;  %p7029_p2 = pmov %p7028_p4 }
  0x9f   : > { %5697 = vsyncadd (%p7029_p2), [#allocation12], 4294835968  ;;  %p7030_p5 = pmov %p7029_p2 }
  0xa0   : > { %p7031_p8 = pmov %p7029_p2 }
  0xa1   : > { %5699 = dma.done.wait (%p7030_p5), [#allocation15], 16  }
  0xa2   : > { %5701 = vsyncadd (%p7031_p8), [#allocation15], 4294967280  ;;  %v5736_v0 = vmov 0.0   ;;  %v470_v1 = vld [vmem:[#allocation5 + $0xe8] sm:$0xff]  ;;  %v472_v2 = vld [vmem:[#allocation5 + $0xf8] sm:$0xff]  ;;  %vm495_vm0 = vcmask 523264  }
  0xa3   : > { %563 = vmatprep.mubr.f32.mxu0 %v5736_v0  ;;  %634 = vmatprep.mubr.f32.mxu1 %v5736_v0  ;;  %v469_v3 = vld [vmem:[#allocation5 + $0xe0] sm:$0xff]  ;;  %v471_v4 = vld [vmem:[#allocation5 + $0xf0] sm:$0xff]  ;;  %v466_v5 = vld [vmem:[#allocation5 + $0xc8] sm:$0xff]  ;;  %s5022_s16 = sshll.u32 %s5809_s15, 4  ;;  %s439_s18 = scalar_lea.vmem [#allocation16], %s5955_s1  ;;  %vm4856_vm1 = vcmask 253952  }
  0xa4   : > { %515 = vmatprep.subr.mxu0 %v470_v1  ;;  %586 = vmatprep.subr.mxu1 %v472_v2  ;;  %v468_v6 = vld [vmem:[#allocation5 + $0xd8] sm:$0xff]  ;;  %v465_v7 = vld [vmem:[#allocation5 + $0xc0] sm:$0xff]  ;;  %v467_v8 = vld [vmem:[#allocation5 + $0xd0] sm:$0xff]  ;;  %s4871_s21 = sshll.u32 %s439_s18, 4  ;;  %s4869_s20 = scalar_lea.hbm %s7001_s9, %s5022_s16  ;;  %s4872_s21 = int_to_ptr.vmem [resolvable:$true] %s4871_s21 }
  0xa5   : > { %516 = vmatpush1.msra.mxu0 %v469_v3  ;;  %587 = vmatpush1.msra.mxu1 %v471_v4  ;;  %v462_v9 = vld [vmem:[#allocation5 + $0xa8] sm:$0xff]  ;;  %v464_v10 = vld [vmem:[#allocation5 + $0xb8] sm:$0xff]  ;;  %v461_v11 = vld [vmem:[#allocation5 + $0xa0] sm:$0xff]  ;;  %s4859_s29 = scalar_lea.sflag [#allocation4], %s5955_s1  ;;  %s5640_s13 = scalar_lea.vmem %s4872_s21, 16 }
  0xa6   : > { %517 = vmatprep.subr.mxu0 %v466_v5  ;;  %588 = vmatprep.subr.mxu1 %v468_v6  ;;  %v463_v12 = vld [vmem:[#allocation5 + $0xb0] sm:$0xff]  ;;  %v458_v13 = vld [vmem:[#allocation5 + $0x88] sm:$0xff]  ;;  %v460_v14 = vld [vmem:[#allocation5 + $0x98] sm:$0xff]  ;;  %p5641_p10 = scmp.ne.s32.totalorder %s4872_s21, %s5640_s13  ;;  %p7032_p11 = scmp.ne.s32.totalorder %s7019_s24, 0 }
  0xa7   : > { %518 = vmatpush1.msra.mxu0 %v465_v7  ;;  %589 = vmatpush1.msra.mxu1 %v467_v8  ;;  %v457_v15 = vld [vmem:[#allocation5 + $0x80] sm:$0xff]  ;;  %v459_v16 = vld [vmem:[#allocation5 + $0x90] sm:$0xff]  ;;  %v454_v17 = vld [vmem:[#allocation5 + $0x68] sm:$0xff]  ;;  %s5737_s27 = smov [#allocation16]  }
  0xa8   : > { %519 = vmatprep.subr.mxu0 %v462_v9  ;;  %590 = vmatprep.subr.mxu1 %v464_v10  ;;  %v456_v18 = vld [vmem:[#allocation5 + $0x78] sm:$0xff]  ;;  %v453_v19 = vld [vmem:[#allocation5 + $0x60] sm:$0xff]  ;;  %v455_v20 = vld [vmem:[#allocation5 + $0x70] sm:$0xff]  ;;  %p5642_p0 = pnand %p5641_p10, %p7032_p11  ;;  %s5644_s15 = sshll.u32 %s5737_s27, 4  ;;  %s5645_s15 = int_to_ptr.vmem [resolvable:$false] %s5644_s15 }
  0xa9   : > { %520 = vmatpush1.msra.mxu0 %v461_v11  ;;  %591 = vmatpush1.msra.mxu1 %v463_v12  ;;  %v450_v21 = vld [vmem:[#allocation5 + $0x48] sm:$0xff]  ;;  %v452_v22 = vld [vmem:[#allocation5 + $0x58] sm:$0xff]  ;;  %v449_v23 = vld [vmem:[#allocation5 + $0x40] sm:$0xff]  ;;  %s5646_s14 = scalar_lea.vmem %s5645_s15, 32  ;;  %p5647_p3 = scmp.lt.s32.totalorder %s4872_s21, %s5645_s15 }
  0xaa   : > { %521 = vmatprep.subr.mxu0 %v458_v13  ;;  %592 = vmatprep.subr.mxu1 %v460_v14  ;;  %v451_v24 = vld [vmem:[#allocation5 + $0x50] sm:$0xff]  ;;  %v446_v25 = vld [vmem:[#allocation5 + $0x28] sm:$0xff]  ;;  %v448_v26 = vld [vmem:[#allocation5 + $0x38] sm:$0xff]  ;;  %p5643_p1 = pneg %p5642_p0  ;;  %p5648_p7 = scmp.lt.s32.totalorder %s5646_s14, %s5640_s13 }
  0xab   : > { %522 = vmatpush1.msra.mxu0 %v457_v15  ;;  %593 = vmatpush1.msra.mxu1 %v459_v16  ;;  %v445_v27 = vld [vmem:[#allocation5 + $0x20] sm:$0xff]  ;;  %v447_v28 = vld [vmem:[#allocation5 + $0x30] sm:$0xff]  ;;  %v442_v29 = vld [vmem:[#allocation5 + $0x8] sm:$0xff] }
  0xac   : > { %523 = vmatprep.subr.mxu0 %v454_v17  ;;  %594 = vmatprep.subr.mxu1 %v456_v18  ;;  %v444_v30 = vld [vmem:[#allocation5 + $0x18] sm:$0xff]  ;;  %v441_v31 = vld [vmem:[#allocation5] sm:$0xff]  ;;  %v443_v32 = vld [vmem:[#allocation5 + $0x10] sm:$0xff]  ;;  %p5649_p9 = por %p5648_p7, %p5647_p3 }
  0xad   : > { %524 = vmatpush1.msra.mxu0 %v453_v19  ;;  %595 = vmatpush1.msra.mxu1 %v455_v20  ;;  %v440_v33 = vld [vmem:[%s379_s23] sm:$0x1]  ;;  %v706_v34 = vld [vmem:[#allocation8 + $0x1e8] sm:$0xff]  ;;  %v705_v36 = vld [vmem:[#allocation8 + $0x1e0] sm:$0xff] }
  0xae   : > { %525 = vmatprep.subr.mxu0 %v450_v21  ;;  %596 = vmatprep.subr.mxu1 %v452_v22  ;;  %v834_v35 = vld [vmem:[#allocation8 + $0x5e8] sm:$0xff]  ;;  %v833_v37 = vld [vmem:[#allocation8 + $0x5e0] sm:$0xff]  ;;  %p5650_p6 = pnand %p5649_p9, %p5643_p1 }
  0xaf   : > { %526 = vmatpush1.msra.mxu0 %v449_v23  ;;  %597 = vmatpush1.msra.mxu1 %v451_v24  ;;  %v702_v38 = vld [vmem:[#allocation8 + $0x1c8] sm:$0xff]  ;;  %v701_v40 = vld [vmem:[#allocation8 + $0x1c0] sm:$0xff] }
  0xb0   : > { %527 = vmatprep.subr.mxu0 %v446_v25  ;;  %598 = vmatprep.subr.mxu1 %v448_v26  ;;  %v830_v39 = vld [vmem:[#allocation8 + $0x5c8] sm:$0xff]  ;;  %v829_v41 = vld [vmem:[#allocation8 + $0x5c0] sm:$0xff] }
  0xb1   : > { %528 = vmatpush1.msra.mxu0 %v445_v27  ;;  %599 = vmatpush1.msra.mxu1 %v447_v28  ;;  %v698_v42 = vld [vmem:[#allocation8 + $0x1a8] sm:$0xff]  ;;  %v697_v44 = vld [vmem:[#allocation8 + $0x1a0] sm:$0xff] }
  0xb2   : > { %529 = vmatprep.subr.mxu0 %v442_v29  ;;  %600 = vmatprep.subr.mxu1 %v444_v30  ;;  %v826_v43 = vld [vmem:[#allocation8 + $0x5a8] sm:$0xff]  ;;  %v825_v45 = vld [vmem:[#allocation8 + $0x5a0] sm:$0xff] }
  0xb3   : > { %530 = vmatpush1.msra.mxu0 %v441_v31  ;;  %601 = vmatpush1.msra.mxu1 %v443_v32  ;;  %v694_v46 = vld [vmem:[#allocation8 + $0x188] sm:$0xff]  ;;  %v693_v48 = vld [vmem:[#allocation8 + $0x180] sm:$0xff] }
  0xb4   : > { %5020 = vmatmul.mubr.msk.f32.vlgmr.msra.gmra.mxu0 %vm495_vm0, %v440_v33  ;;  %5021 = vmatmul.mubr.msk.f32.vlgmr.msra.gmra.mxu1 %vm495_vm0, %v440_v33  ;;  %v822_v47 = vld [vmem:[#allocation8 + $0x588] sm:$0xff]  ;;  %v821_v49 = vld [vmem:[#allocation8 + $0x580] sm:$0xff] }
  0xb5   : > { %923 = vmatprep.subr.mxu0 %v706_v34  ;;  %994 = vmatprep.subr.mxu1 %v834_v35  ;;  %v690_v50 = vld [vmem:[#allocation8 + $0x168] sm:$0xff]  ;;  %v689_v52 = vld [vmem:[#allocation8 + $0x160] sm:$0xff] }
  0xb6   : > { %924 = vmatpush1.msra.mxu0 %v705_v36  ;;  %995 = vmatpush1.msra.mxu1 %v833_v37  ;;  %v818_v51 = vld [vmem:[#allocation8 + $0x568] sm:$0xff]  ;;  %v817_v53 = vld [vmem:[#allocation8 + $0x560] sm:$0xff] }
  0xb7   : > { %925 = vmatprep.subr.mxu0 %v702_v38  ;;  %996 = vmatprep.subr.mxu1 %v830_v39  ;;  %v686_v54 = vld [vmem:[#allocation8 + $0x148] sm:$0xff]  ;;  %v685_v56 = vld [vmem:[#allocation8 + $0x140] sm:$0xff] }
  0xb8   : > { %926 = vmatpush1.msra.mxu0 %v701_v40  ;;  %997 = vmatpush1.msra.mxu1 %v829_v41  ;;  %v814_v55 = vld [vmem:[#allocation8 + $0x548] sm:$0xff]  ;;  %v813_v57 = vld [vmem:[#allocation8 + $0x540] sm:$0xff] }
  0xb9   : > { %927 = vmatprep.subr.mxu0 %v698_v42  ;;  %998 = vmatprep.subr.mxu1 %v826_v43  ;;  %v682_v58 = vld [vmem:[#allocation8 + $0x128] sm:$0xff]  ;;  %v681_v60 = vld [vmem:[#allocation8 + $0x120] sm:$0xff] }
  0xba   : > { %928 = vmatpush1.msra.mxu0 %v697_v44  ;;  %999 = vmatpush1.msra.mxu1 %v825_v45  ;;  %v810_v59 = vld [vmem:[#allocation8 + $0x528] sm:$0xff]  ;;  %v809_v61 = vld [vmem:[#allocation8 + $0x520] sm:$0xff] }
  0xbb   : > { %929 = vmatprep.subr.mxu0 %v694_v46  ;;  %1000 = vmatprep.subr.mxu1 %v822_v47  ;;  %v678_v62 = vld [vmem:[#allocation8 + $0x108] sm:$0xff]  ;;  %v677_v0 = vld [vmem:[#allocation8 + $0x100] sm:$0xff] }
  0xbc   : > { %930 = vmatpush1.msra.mxu0 %v693_v48  ;;  %1001 = vmatpush1.msra.mxu1 %v821_v49  ;;  %v806_v63 = vld [vmem:[#allocation8 + $0x508] sm:$0xff]  ;;  %v805_v1 = vld [vmem:[#allocation8 + $0x500] sm:$0xff] }
  0xbd   : > { %931 = vmatprep.subr.mxu0 %v690_v50  ;;  %1002 = vmatprep.subr.mxu1 %v818_v51  ;;  %v674_v2 = vld [vmem:[#allocation8 + $0xe8] sm:$0xff]  ;;  %v673_v4 = vld [vmem:[#allocation8 + $0xe0] sm:$0xff] }
  0xbe   : > { %932 = vmatpush1.msra.mxu0 %v689_v52  ;;  %1003 = vmatpush1.msra.mxu1 %v817_v53  ;;  %v802_v3 = vld [vmem:[#allocation8 + $0x4e8] sm:$0xff]  ;;  %v801_v5 = vld [vmem:[#allocation8 + $0x4e0] sm:$0xff] }
  0xbf   : > { %933 = vmatprep.subr.mxu0 %v686_v54  ;;  %1004 = vmatprep.subr.mxu1 %v814_v55  ;;  %v670_v6 = vld [vmem:[#allocation8 + $0xc8] sm:$0xff]  ;;  %v669_v8 = vld [vmem:[#allocation8 + $0xc0] sm:$0xff] }
  0xc0   : > { %934 = vmatpush1.msra.mxu0 %v685_v56  ;;  %1005 = vmatpush1.msra.mxu1 %v813_v57  ;;  %v798_v7 = vld [vmem:[#allocation8 + $0x4c8] sm:$0xff]  ;;  %v797_v9 = vld [vmem:[#allocation8 + $0x4c0] sm:$0xff] }
  0xc1   : > { %935 = vmatprep.subr.mxu0 %v682_v58  ;;  %1006 = vmatprep.subr.mxu1 %v810_v59  ;;  %v666_v10 = vld [vmem:[#allocation8 + $0xa8] sm:$0xff]  ;;  %v665_v12 = vld [vmem:[#allocation8 + $0xa0] sm:$0xff] }
  0xc2   : > { %936 = vmatpush1.msra.mxu0 %v681_v60  ;;  %1007 = vmatpush1.msra.mxu1 %v809_v61  ;;  %v794_v11 = vld [vmem:[#allocation8 + $0x4a8] sm:$0xff]  ;;  %v793_v13 = vld [vmem:[#allocation8 + $0x4a0] sm:$0xff] }
  0xc3   : > { %937 = vmatprep.subr.mxu0 %v678_v62  ;;  %1008 = vmatprep.subr.mxu1 %v806_v63  ;;  %v662_v14 = vld [vmem:[#allocation8 + $0x88] sm:$0xff]  ;;  %v661_v16 = vld [vmem:[#allocation8 + $0x80] sm:$0xff] }
  0xc4   : > { %938 = vmatpush1.msra.mxu0 %v677_v0  ;;  %1009 = vmatpush1.msra.mxu1 %v805_v1  ;;  %v790_v15 = vld [vmem:[#allocation8 + $0x488] sm:$0xff]  ;;  %v789_v17 = vld [vmem:[#allocation8 + $0x480] sm:$0xff] }
  0xc5   : > { %939 = vmatprep.subr.mxu0 %v674_v2  ;;  %1010 = vmatprep.subr.mxu1 %v802_v3  ;;  %v658_v18 = vld [vmem:[#allocation8 + $0x68] sm:$0xff]  ;;  %v657_v20 = vld [vmem:[#allocation8 + $0x60] sm:$0xff] }
  0xc6   : > { %940 = vmatpush1.msra.mxu0 %v673_v4  ;;  %1011 = vmatpush1.msra.mxu1 %v801_v5  ;;  %v786_v19 = vld [vmem:[#allocation8 + $0x468] sm:$0xff]  ;;  %v785_v21 = vld [vmem:[#allocation8 + $0x460] sm:$0xff] }
  0xc7   : > { %941 = vmatprep.subr.mxu0 %v670_v6  ;;  %1012 = vmatprep.subr.mxu1 %v798_v7  ;;  %v654_v22 = vld [vmem:[#allocation8 + $0x48] sm:$0xff]  ;;  %v653_v24 = vld [vmem:[#allocation8 + $0x40] sm:$0xff] }
  0xc8   : > { %942 = vmatpush1.msra.mxu0 %v669_v8  ;;  %1013 = vmatpush1.msra.mxu1 %v797_v9  ;;  %v782_v23 = vld [vmem:[#allocation8 + $0x448] sm:$0xff]  ;;  %v781_v25 = vld [vmem:[#allocation8 + $0x440] sm:$0xff] }
  0xc9   : > { %943 = vmatprep.subr.mxu0 %v666_v10  ;;  %1014 = vmatprep.subr.mxu1 %v794_v11  ;;  %v650_v26 = vld [vmem:[#allocation8 + $0x28] sm:$0xff]  ;;  %v649_v28 = vld [vmem:[#allocation8 + $0x20] sm:$0xff] }
  0xca   : > { %944 = vmatpush1.msra.mxu0 %v665_v12  ;;  %1015 = vmatpush1.msra.mxu1 %v793_v13  ;;  %v778_v27 = vld [vmem:[#allocation8 + $0x428] sm:$0xff]  ;;  %v777_v29 = vld [vmem:[#allocation8 + $0x420] sm:$0xff] }
  0xcb   : > { %945 = vmatprep.subr.mxu0 %v662_v14  ;;  %1016 = vmatprep.subr.mxu1 %v790_v15  ;;  %v646_v30 = vld [vmem:[#allocation8 + $0x8] sm:$0xff]  ;;  %v645_v32 = vld [vmem:[#allocation8] sm:$0xff] }
  0xcc   : > { %946 = vmatpush1.msra.mxu0 %v661_v16  ;;  %1017 = vmatpush1.msra.mxu1 %v789_v17  ;;  %v774_v31 = vld [vmem:[#allocation8 + $0x408] sm:$0xff]  ;;  %v773_v33 = vld [vmem:[#allocation8 + $0x400] sm:$0xff] }
  0xcd   : > { %947 = vmatprep.subr.mxu0 %v658_v18  ;;  %1018 = vmatprep.subr.mxu1 %v786_v19  ;;  %v770_v34 = vld [vmem:[#allocation8 + $0x3e8] sm:$0xff]  ;;  %v769_v36 = vld [vmem:[#allocation8 + $0x3e0] sm:$0xff] }
  0xce   : > { %948 = vmatpush1.msra.mxu0 %v657_v20  ;;  %1019 = vmatpush1.msra.mxu1 %v785_v21  ;;  %v898_v35 = vld [vmem:[#allocation8 + $0x7e8] sm:$0xff]  ;;  %v897_v37 = vld [vmem:[#allocation8 + $0x7e0] sm:$0xff] }
  0xcf   : > { %949 = vmatprep.subr.mxu0 %v654_v22  ;;  %1020 = vmatprep.subr.mxu1 %v782_v23  ;;  %v766_v38 = vld [vmem:[#allocation8 + $0x3c8] sm:$0xff]  ;;  %v765_v40 = vld [vmem:[#allocation8 + $0x3c0] sm:$0xff] }
  0xd0   : > { %950 = vmatpush1.msra.mxu0 %v653_v24  ;;  %1021 = vmatpush1.msra.mxu1 %v781_v25  ;;  %v894_v39 = vld [vmem:[#allocation8 + $0x7c8] sm:$0xff]  ;;  %v893_v41 = vld [vmem:[#allocation8 + $0x7c0] sm:$0xff] }
  0xd1   : > { %951 = vmatprep.subr.mxu0 %v650_v26  ;;  %1022 = vmatprep.subr.mxu1 %v778_v27  ;;  %v762_v42 = vld [vmem:[#allocation8 + $0x3a8] sm:$0xff]  ;;  %v761_v44 = vld [vmem:[#allocation8 + $0x3a0] sm:$0xff] }
  0xd2   : > { %952 = vmatpush1.msra.mxu0 %v649_v28  ;;  %1023 = vmatpush1.msra.mxu1 %v777_v29  ;;  %v890_v43 = vld [vmem:[#allocation8 + $0x7a8] sm:$0xff]  ;;  %v889_v45 = vld [vmem:[#allocation8 + $0x7a0] sm:$0xff] }
  0xd3   : > { %953 = vmatprep.subr.mxu0 %v646_v30  ;;  %1024 = vmatprep.subr.mxu1 %v774_v31  ;;  %v758_v46 = vld [vmem:[#allocation8 + $0x388] sm:$0xff]  ;;  %v757_v48 = vld [vmem:[#allocation8 + $0x380] sm:$0xff] }
  0xd4   : > { %954 = vmatpush1.msra.mxu0 %v645_v32  ;;  %1025 = vmatpush1.msra.mxu1 %v773_v33  ;;  %v886_v47 = vld [vmem:[#allocation8 + $0x788] sm:$0xff]  ;;  %v885_v49 = vld [vmem:[#allocation8 + $0x780] sm:$0xff] }
  0xd5   : > { %955 = vmatprep.subr.mxu0 %v770_v34  ;;  %1026 = vmatprep.subr.mxu1 %v898_v35  ;;  %v754_v50 = vld [vmem:[#allocation8 + $0x368] sm:$0xff]  ;;  %v753_v52 = vld [vmem:[#allocation8 + $0x360] sm:$0xff]  ;;  %v708_v34 = vld [vmem:[#allocation8 + $0x1f8] sm:$0xff] }
  0xd6   : > { %956 = vmatpush2.msra.mxu0 %v769_v36  ;;  %1027 = vmatpush2.msra.mxu1 %v897_v37  ;;  %v882_v51 = vld [vmem:[#allocation8 + $0x768] sm:$0xff]  ;;  %v881_v53 = vld [vmem:[#allocation8 + $0x760] sm:$0xff]  ;;  %v836_v35 = vld [vmem:[#allocation8 + $0x5f8] sm:$0xff]  ;;  %v475_v36 = vlaneseq }
  0xd7   : > { %957 = vmatprep.subr.mxu0 %v766_v38  ;;  %1028 = vmatprep.subr.mxu1 %v894_v39  ;;  %v750_v54 = vld [vmem:[#allocation8 + $0x348] sm:$0xff]  ;;  %v749_v56 = vld [vmem:[#allocation8 + $0x340] sm:$0xff] }
  0xd8   : > { %958 = vmatpush2.msra.mxu0 %v765_v40  ;;  %1029 = vmatpush2.msra.mxu1 %v893_v41  ;;  %v878_v55 = vld [vmem:[#allocation8 + $0x748] sm:$0xff]  ;;  %v877_v57 = vld [vmem:[#allocation8 + $0x740] sm:$0xff]  ;;  %v5981_v37 = vshrl.u32 %v475_v36, 7  ;;  %v473_v40 = vld [vmem:[#allocation7] sm:$0xf] }
  0xd9   : > { %959 = vmatprep.subr.mxu0 %v762_v42  ;;  %1030 = vmatprep.subr.mxu1 %v890_v43  ;;  %v746_v58 = vld [vmem:[#allocation8 + $0x328] sm:$0xff]  ;;  %v745_v60 = vld [vmem:[#allocation8 + $0x320] sm:$0xff]  ;;  %v795_v36 = vld [vmem:[#allocation8 + $0x4b0] sm:$0xff] }
  0xda   : > { %960 = vmatpush2.msra.mxu0 %v761_v44  ;;  %1031 = vmatpush2.msra.mxu1 %v889_v45  ;;  %v874_v59 = vld [vmem:[#allocation8 + $0x728] sm:$0xff]  ;;  %v873_v61 = vld [vmem:[#allocation8 + $0x720] sm:$0xff]  ;;  %v5984_v38 = vsub.s32 2, %v5981_v37  ;;  %v5987_v39 = vsub.s32 0, %v5981_v37  ;;  %v5990_v41 = vsub.s32 1, %v5981_v37  ;;  %v5993_v42 = vsub.s32 3, %v5981_v37 }
  0xdb   : > { %961 = vmatprep.subr.mxu0 %v758_v46  ;;  %1032 = vmatprep.subr.mxu1 %v886_v47  ;;  %v742_v62 = vld [vmem:[#allocation8 + $0x308] sm:$0xff]  ;;  %v741_v0 = vld [vmem:[#allocation8 + $0x300] sm:$0xff] }
  0xdc   : > { %962 = vmatpush2.msra.mxu0 %v757_v48  ;;  %1033 = vmatpush2.msra.mxu1 %v885_v49  ;;  %v870_v63 = vld [vmem:[#allocation8 + $0x708] sm:$0xff]  ;;  %v869_v1 = vld [vmem:[#allocation8 + $0x700] sm:$0xff]  ;;  %v486_v43 = vrot.slane %v473_v40, %v5984_v38  ;;  %v478_v44 = vrot.slane %v473_v40, %v5987_v39  ;;  %v482_v45 = vrot.slane %v473_v40, %v5990_v41 }
  0xdd   : > { %963 = vmatprep.subr.mxu0 %v754_v50  ;;  %1034 = vmatprep.subr.mxu1 %v882_v51  ;;  %v738_v2 = vld [vmem:[#allocation8 + $0x2e8] sm:$0xff]  ;;  %v737_v4 = vld [vmem:[#allocation8 + $0x2e0] sm:$0xff]  ;;  %v490_v46 = vrot.slane %v473_v40, %v5993_v42  ;;  %v664_v40 = vld [vmem:[#allocation8 + $0x98] sm:$0xff] }
  0xde   : > { %964 = vmatpush2.msra.mxu0 %v753_v52  ;;  %1035 = vmatpush2.msra.mxu1 %v881_v53  ;;  %v866_v3 = vld [vmem:[#allocation8 + $0x6e8] sm:$0xff]  ;;  %v865_v5 = vld [vmem:[#allocation8 + $0x6e0] sm:$0xff] }
  0xdf   : > { %965 = vmatprep.subr.mxu0 %v750_v54  ;;  %1036 = vmatprep.subr.mxu1 %v878_v55  ;;  %v734_v6 = vld [vmem:[#allocation8 + $0x2c8] sm:$0xff]  ;;  %v733_v8 = vld [vmem:[#allocation8 + $0x2c0] sm:$0xff] }
  0xe0   : > { %966 = vmatpush2.msra.mxu0 %v749_v56  ;;  %1037 = vmatpush2.msra.mxu1 %v877_v57  ;;  %v862_v7 = vld [vmem:[#allocation8 + $0x6c8] sm:$0xff]  ;;  %v861_v9 = vld [vmem:[#allocation8 + $0x6c0] sm:$0xff] }
  0xe1   : > { %967 = vmatprep.subr.mxu0 %v746_v58  ;;  %1038 = vmatprep.subr.mxu1 %v874_v59  ;;  %v730_v10 = vld [vmem:[#allocation8 + $0x2a8] sm:$0xff]  ;;  %v729_v12 = vld [vmem:[#allocation8 + $0x2a0] sm:$0xff]  ;;  %v707_v59 = vld [vmem:[#allocation8 + $0x1f0] sm:$0xff] }
  0xe2   : > { %968 = vmatpush2.msra.mxu0 %v745_v60  ;;  %1039 = vmatpush2.msra.mxu1 %v873_v61  ;;  %v858_v11 = vld [vmem:[#allocation8 + $0x6a8] sm:$0xff]  ;;  %v857_v13 = vld [vmem:[#allocation8 + $0x6a0] sm:$0xff]  ;;  %v835_v60 = vld [vmem:[#allocation8 + $0x5f0] sm:$0xff] }
  0xe3   : > { %969 = vmatprep.subr.mxu0 %v742_v62  ;;  %1040 = vmatprep.subr.mxu1 %v870_v63  ;;  %v726_v14 = vld [vmem:[#allocation8 + $0x288] sm:$0xff]  ;;  %v725_v16 = vld [vmem:[#allocation8 + $0x280] sm:$0xff]  ;;  %v704_v61 = vld [vmem:[#allocation8 + $0x1d8] sm:$0xff] }
  0xe4   : > { %970 = vmatpush2.msra.mxu0 %v741_v0  ;;  %1041 = vmatpush2.msra.mxu1 %v869_v1  ;;  %v854_v15 = vld [vmem:[#allocation8 + $0x688] sm:$0xff]  ;;  %v853_v17 = vld [vmem:[#allocation8 + $0x680] sm:$0xff]  ;;  %v832_v62 = vld [vmem:[#allocation8 + $0x5d8] sm:$0xff] }
  0xe5   : > { %971 = vmatprep.subr.mxu0 %v738_v2  ;;  %1042 = vmatprep.subr.mxu1 %v866_v3  ;;  %v722_v18 = vld [vmem:[#allocation8 + $0x268] sm:$0xff]  ;;  %v721_v20 = vld [vmem:[#allocation8 + $0x260] sm:$0xff]  ;;  %v703_v63 = vld [vmem:[#allocation8 + $0x1d0] sm:$0xff] }
  0xe6   : > { %972 = vmatpush2.msra.mxu0 %v737_v4  ;;  %1043 = vmatpush2.msra.mxu1 %v865_v5  ;;  %v850_v19 = vld [vmem:[#allocation8 + $0x668] sm:$0xff]  ;;  %v849_v21 = vld [vmem:[#allocation8 + $0x660] sm:$0xff]  ;;  %v831_v0 = vld [vmem:[#allocation8 + $0x5d0] sm:$0xff] }
  0xe7   : > { %973 = vmatprep.subr.mxu0 %v734_v6  ;;  %1044 = vmatprep.subr.mxu1 %v862_v7  ;;  %v718_v22 = vld [vmem:[#allocation8 + $0x248] sm:$0xff]  ;;  %v717_v24 = vld [vmem:[#allocation8 + $0x240] sm:$0xff]  ;;  %v700_v1 = vld [vmem:[#allocation8 + $0x1b8] sm:$0xff] }
  0xe8   : > { %974 = vmatpush2.msra.mxu0 %v733_v8  ;;  %1045 = vmatpush2.msra.mxu1 %v861_v9  ;;  %v846_v23 = vld [vmem:[#allocation8 + $0x648] sm:$0xff]  ;;  %v845_v25 = vld [vmem:[#allocation8 + $0x640] sm:$0xff]  ;;  %v828_v2 = vld [vmem:[#allocation8 + $0x5b8] sm:$0xff] }
  0xe9   : > { %975 = vmatprep.subr.mxu0 %v730_v10  ;;  %1046 = vmatprep.subr.mxu1 %v858_v11  ;;  %v714_v26 = vld [vmem:[#allocation8 + $0x228] sm:$0xff]  ;;  %v713_v28 = vld [vmem:[#allocation8 + $0x220] sm:$0xff]  ;;  %v699_v3 = vld [vmem:[#allocation8 + $0x1b0] sm:$0xff] }
  0xea   : > { %976 = vmatpush2.msra.mxu0 %v729_v12  ;;  %1047 = vmatpush2.msra.mxu1 %v857_v13  ;;  %v842_v27 = vld [vmem:[#allocation8 + $0x628] sm:$0xff]  ;;  %v841_v29 = vld [vmem:[#allocation8 + $0x620] sm:$0xff]  ;;  %v827_v4 = vld [vmem:[#allocation8 + $0x5b0] sm:$0xff] }
  0xeb   : > { %977 = vmatprep.subr.mxu0 %v726_v14  ;;  %1048 = vmatprep.subr.mxu1 %v854_v15  ;;  %v710_v30 = vld [vmem:[#allocation8 + $0x208] sm:$0xff]  ;;  %v709_v32 = vld [vmem:[#allocation8 + $0x200] sm:$0xff]  ;;  %v696_v5 = vld [vmem:[#allocation8 + $0x198] sm:$0xff] }
  0xec   : > { %978 = vmatpush2.msra.mxu0 %v725_v16  ;;  %1049 = vmatpush2.msra.mxu1 %v853_v17  ;;  %v838_v31 = vld [vmem:[#allocation8 + $0x608] sm:$0xff]  ;;  %v837_v33 = vld [vmem:[#allocation8 + $0x600] sm:$0xff]  ;;  %v824_v6 = vld [vmem:[#allocation8 + $0x598] sm:$0xff] }
  0xed   : > { %979 = vmatprep.subr.mxu0 %v722_v18  ;;  %1050 = vmatprep.subr.mxu1 %v850_v19  ;;  %v695_v7 = vld [vmem:[#allocation8 + $0x190] sm:$0xff]  ;;  %v692_v9 = vld [vmem:[#allocation8 + $0x178] sm:$0xff] }
  0xee   : > { %980 = vmatpush2.msra.mxu0 %v721_v20  ;;  %1051 = vmatpush2.msra.mxu1 %v849_v21  ;;  %v823_v8 = vld [vmem:[#allocation8 + $0x590] sm:$0xff]  ;;  %v820_v10 = vld [vmem:[#allocation8 + $0x578] sm:$0xff] }
  0xef   : > { %981 = vmatprep.subr.mxu0 %v718_v22  ;;  %1052 = vmatprep.subr.mxu1 %v846_v23  ;;  %v691_v11 = vld [vmem:[#allocation8 + $0x170] sm:$0xff]  ;;  %v688_v13 = vld [vmem:[#allocation8 + $0x158] sm:$0xff] }
  0xf0   : > { %982 = vmatpush2.msra.mxu0 %v717_v24  ;;  %1053 = vmatpush2.msra.mxu1 %v845_v25  ;;  %v819_v12 = vld [vmem:[#allocation8 + $0x570] sm:$0xff]  ;;  %v816_v14 = vld [vmem:[#allocation8 + $0x558] sm:$0xff] }
  0xf1   : > { %983 = vmatprep.subr.mxu0 %v714_v26  ;;  %1054 = vmatprep.subr.mxu1 %v842_v27  ;;  %v687_v15 = vld [vmem:[#allocation8 + $0x150] sm:$0xff]  ;;  %v684_v17 = vld [vmem:[#allocation8 + $0x138] sm:$0xff] }
  0xf2   : > { %984 = vmatpush2.msra.mxu0 %v713_v28  ;;  %1055 = vmatpush2.msra.mxu1 %v841_v29  ;;  %v815_v16 = vld [vmem:[#allocation8 + $0x550] sm:$0xff]  ;;  %v812_v18 = vld [vmem:[#allocation8 + $0x538] sm:$0xff] }
  0xf3   : > { %985 = vmatprep.subr.mxu0 %v710_v30  ;;  %1056 = vmatprep.subr.mxu1 %v838_v31  ;;  %v683_v19 = vld [vmem:[#allocation8 + $0x130] sm:$0xff]  ;;  %v680_v21 = vld [vmem:[#allocation8 + $0x118] sm:$0xff] }
  0xf4   : > { %986 = vmatpush2.msra.mxu0 %v709_v32  ;;  %1057 = vmatpush2.msra.mxu1 %v837_v33  ;;  %v811_v20 = vld [vmem:[#allocation8 + $0x530] sm:$0xff]  ;;  %v808_v22 = vld [vmem:[#allocation8 + $0x518] sm:$0xff] }
  0xf5   : > { %1065 = vmatprep.subr.mxu0 %v708_v34  ;;  %1136 = vmatprep.subr.mxu1 %v836_v35  ;;  %v679_v23 = vld [vmem:[#allocation8 + $0x110] sm:$0xff]  ;;  %v676_v25 = vld [vmem:[#allocation8 + $0xf8] sm:$0xff] }
  0xf6   : > { %v807_v24 = vld [vmem:[#allocation8 + $0x510] sm:$0xff]  ;;  %v804_v26 = vld [vmem:[#allocation8 + $0x4f8] sm:$0xff] }
  0xf7   : > { %v675_v27 = vld [vmem:[#allocation8 + $0xf0] sm:$0xff]  ;;  %v672_v29 = vld [vmem:[#allocation8 + $0xd8] sm:$0xff] }
  0xf8   : > { %v803_v28 = vld [vmem:[#allocation8 + $0x4f0] sm:$0xff]  ;;  %v800_v30 = vld [vmem:[#allocation8 + $0x4d8] sm:$0xff] }
  0xf9   : > { %v671_v31 = vld [vmem:[#allocation8 + $0xd0] sm:$0xff]  ;;  %v668_v33 = vld [vmem:[#allocation8 + $0xb8] sm:$0xff] }
  0xfa   : > { %v799_v32 = vld [vmem:[#allocation8 + $0x4d0] sm:$0xff]  ;;  %v796_v34 = vld [vmem:[#allocation8 + $0x4b8] sm:$0xff] }
  0xfb   : > { %v667_v35 = vld [vmem:[#allocation8 + $0xb0] sm:$0xff] }
 0x174   : > { %v565_v47 = vpop.f32.mrf.mxu0  ;;  %v636_v48 = vpop.f32.mrf.mxu1 }
 0x175   : > { %v5999_v49 = vadd.f32 %v636_v48, %v486_v43  ;;  %v6001_v50 = vadd.f32 %v565_v47, %v478_v44  ;;  %v792_v43 = vld [vmem:[#allocation8 + $0x498] sm:$0xff]  ;;  %v663_v44 = vld [vmem:[#allocation8 + $0x90] sm:$0xff] }
 0x176   : > { %v567_v51 = vpop.f32.mrf.mxu0  ;;  %v638_v52 = vpop.f32.mrf.mxu1  ;;  %v788_v47 = vld [vmem:[#allocation8 + $0x478] sm:$0xff]  ;;  %v659_v48 = vld [vmem:[#allocation8 + $0x70] sm:$0xff] }
 0x177   : > { %v568_v53 = vadd.f32 %v567_v51, %v482_v45  ;;  %v639_v54 = vadd.f32 %v638_v52, %v490_v46  ;;  %v643_v55 = vmax.f32 %v5999_v49, 0.0  ;;  %v641_v58 = vmax.f32 %v6001_v50, 0.0  ;;  %v791_v45 = vld [vmem:[#allocation8 + $0x490] sm:$0xff]  ;;  %v660_v46 = vld [vmem:[#allocation8 + $0x78] sm:$0xff]  ;;  %v1401_v50 = vld [vmem:[#allocation8 + $0xde8] sm:$0xff] }
 0x178   : > { %v787_v51 = vld [vmem:[#allocation8 + $0x470] sm:$0xff]  ;;  %v656_v52 = vld [vmem:[#allocation8 + $0x58] sm:$0xff]  ;;  %v1400_v49 = vld [vmem:[#allocation8 + $0xde0] sm:$0xff] }
 0x179   : > { %v642_v56 = vmax.f32 %v568_v53, 0.0  ;;  %v644_v57 = vmax.f32 %v639_v54, 0.0  ;;  %v784_v53 = vld [vmem:[#allocation8 + $0x458] sm:$0xff]  ;;  %v655_v54 = vld [vmem:[#allocation8 + $0x50] sm:$0xff] }
 0x17b   : > { %987 = vmatprep.mubr.f32.mxu0 %v642_v56  ;;  %1058 = vmatprep.mubr.f32.mxu1 %v644_v57 }
 0x17c   : > { %988 = vmatmul.mubr.f32.vlgmr.msra.gmra.mxu0 %v641_v58  ;;  %1059 = vmatmul.mubr.f32.vlgmr.msra.gmra.mxu1 %v643_v55 }
 0x17d   : > { %1066 = vmatpush1.msra.mxu0 %v707_v59  ;;  %1137 = vmatpush1.msra.mxu1 %v835_v60  ;;  %v780_v59 = vld [vmem:[#allocation8 + $0x438] sm:$0xff]  ;;  %v651_v60 = vld [vmem:[#allocation8 + $0x30] sm:$0xff] }
 0x17e   : > { %1067 = vmatprep.subr.mxu0 %v704_v61  ;;  %1129 = vmatprep.mubr.f32.mxu0 %v642_v56  ;;  %v783_v56 = vld [vmem:[#allocation8 + $0x450] sm:$0xff] }
 0x17f   : > { %1138 = vmatprep.subr.mxu1 %v832_v62  ;;  %1200 = vmatprep.mubr.f32.mxu1 %v644_v57  ;;  %v652_v57 = vld [vmem:[#allocation8 + $0x38] sm:$0xff]  ;;  %v779_v61 = vld [vmem:[#allocation8 + $0x430] sm:$0xff] }
 0x180   : > { %1068 = vmatpush1.msra.mxu0 %v703_v63  ;;  %1139 = vmatpush1.msra.mxu1 %v831_v0  ;;  %v648_v62 = vld [vmem:[#allocation8 + $0x18] sm:$0xff]  ;;  %v647_v0 = vld [vmem:[#allocation8 + $0x10] sm:$0xff] }
 0x181   : > { %1069 = vmatprep.subr.mxu0 %v700_v1  ;;  %1140 = vmatprep.subr.mxu1 %v828_v2  ;;  %v776_v63 = vld [vmem:[#allocation8 + $0x418] sm:$0xff]  ;;  %v775_v1 = vld [vmem:[#allocation8 + $0x410] sm:$0xff] }
 0x182   : > { %1070 = vmatpush1.msra.mxu0 %v699_v3  ;;  %1141 = vmatpush1.msra.mxu1 %v827_v4  ;;  %v772_v2 = vld [vmem:[#allocation8 + $0x3f8] sm:$0xff]  ;;  %v771_v4 = vld [vmem:[#allocation8 + $0x3f0] sm:$0xff] }
 0x183   : > { %1071 = vmatprep.subr.mxu0 %v696_v5  ;;  %1142 = vmatprep.subr.mxu1 %v824_v6  ;;  %v900_v3 = vld [vmem:[#allocation8 + $0x7f8] sm:$0xff]  ;;  %v899_v5 = vld [vmem:[#allocation8 + $0x7f0] sm:$0xff] }
 0x184   : > { %1072 = vmatpush1.msra.mxu0 %v695_v7  ;;  %1143 = vmatpush1.msra.mxu1 %v823_v8  ;;  %v768_v6 = vld [vmem:[#allocation8 + $0x3d8] sm:$0xff]  ;;  %v767_v8 = vld [vmem:[#allocation8 + $0x3d0] sm:$0xff] }
 0x185   : > { %1073 = vmatprep.subr.mxu0 %v692_v9  ;;  %1144 = vmatprep.subr.mxu1 %v820_v10  ;;  %v896_v7 = vld [vmem:[#allocation8 + $0x7d8] sm:$0xff]  ;;  %v895_v9 = vld [vmem:[#allocation8 + $0x7d0] sm:$0xff] }
 0x186   : > { %1074 = vmatpush1.msra.mxu0 %v691_v11  ;;  %1145 = vmatpush1.msra.mxu1 %v819_v12  ;;  %v764_v10 = vld [vmem:[#allocation8 + $0x3b8] sm:$0xff]  ;;  %v763_v12 = vld [vmem:[#allocation8 + $0x3b0] sm:$0xff] }
 0x187   : > { %1075 = vmatprep.subr.mxu0 %v688_v13  ;;  %1146 = vmatprep.subr.mxu1 %v816_v14  ;;  %v892_v11 = vld [vmem:[#allocation8 + $0x7b8] sm:$0xff]  ;;  %v891_v13 = vld [vmem:[#allocation8 + $0x7b0] sm:$0xff] }
 0x188   : > { %1076 = vmatpush1.msra.mxu0 %v687_v15  ;;  %1147 = vmatpush1.msra.mxu1 %v815_v16  ;;  %v760_v14 = vld [vmem:[#allocation8 + $0x398] sm:$0xff]  ;;  %v759_v16 = vld [vmem:[#allocation8 + $0x390] sm:$0xff] }
 0x189   : > { %1077 = vmatprep.subr.mxu0 %v684_v17  ;;  %1148 = vmatprep.subr.mxu1 %v812_v18  ;;  %v888_v15 = vld [vmem:[#allocation8 + $0x798] sm:$0xff]  ;;  %v887_v17 = vld [vmem:[#allocation8 + $0x790] sm:$0xff] }
 0x18a   : > { %1078 = vmatpush1.msra.mxu0 %v683_v19  ;;  %1149 = vmatpush1.msra.mxu1 %v811_v20  ;;  %v756_v18 = vld [vmem:[#allocation8 + $0x378] sm:$0xff]  ;;  %v755_v20 = vld [vmem:[#allocation8 + $0x370] sm:$0xff] }
 0x18b   : > { %1079 = vmatprep.subr.mxu0 %v680_v21  ;;  %1150 = vmatprep.subr.mxu1 %v808_v22  ;;  %v884_v19 = vld [vmem:[#allocation8 + $0x778] sm:$0xff]  ;;  %v883_v21 = vld [vmem:[#allocation8 + $0x770] sm:$0xff] }
 0x18c   : > { %1080 = vmatpush1.msra.mxu0 %v679_v23  ;;  %1151 = vmatpush1.msra.mxu1 %v807_v24  ;;  %v752_v22 = vld [vmem:[#allocation8 + $0x358] sm:$0xff]  ;;  %v751_v24 = vld [vmem:[#allocation8 + $0x350] sm:$0xff] }
 0x18d   : > { %1081 = vmatprep.subr.mxu0 %v676_v25  ;;  %1152 = vmatprep.subr.mxu1 %v804_v26  ;;  %v880_v23 = vld [vmem:[#allocation8 + $0x758] sm:$0xff]  ;;  %v879_v25 = vld [vmem:[#allocation8 + $0x750] sm:$0xff] }
 0x18e   : > { %1082 = vmatpush1.msra.mxu0 %v675_v27  ;;  %1153 = vmatpush1.msra.mxu1 %v803_v28  ;;  %v748_v26 = vld [vmem:[#allocation8 + $0x338] sm:$0xff]  ;;  %v747_v28 = vld [vmem:[#allocation8 + $0x330] sm:$0xff] }
 0x18f   : > { %1083 = vmatprep.subr.mxu0 %v672_v29  ;;  %1154 = vmatprep.subr.mxu1 %v800_v30  ;;  %v876_v27 = vld [vmem:[#allocation8 + $0x738] sm:$0xff]  ;;  %v875_v29 = vld [vmem:[#allocation8 + $0x730] sm:$0xff] }
 0x190   : > { %1084 = vmatpush1.msra.mxu0 %v671_v31  ;;  %1155 = vmatpush1.msra.mxu1 %v799_v32  ;;  %v744_v30 = vld [vmem:[#allocation8 + $0x318] sm:$0xff]  ;;  %v743_v32 = vld [vmem:[#allocation8 + $0x310] sm:$0xff] }
 0x191   : > { %1085 = vmatprep.subr.mxu0 %v668_v33  ;;  %1156 = vmatprep.subr.mxu1 %v796_v34  ;;  %v872_v31 = vld [vmem:[#allocation8 + $0x718] sm:$0xff]  ;;  %v871_v33 = vld [vmem:[#allocation8 + $0x710] sm:$0xff] }
 0x192   : > { %1086 = vmatpush1.msra.mxu0 %v667_v35  ;;  %1157 = vmatpush1.msra.mxu1 %v795_v36  ;;  %v740_v34 = vld [vmem:[#allocation8 + $0x2f8] sm:$0xff]  ;;  %v739_v36 = vld [vmem:[#allocation8 + $0x2f0] sm:$0xff] }
 0x193   : > { %1087 = vmatprep.subr.mxu0 %v664_v40  ;;  %1158 = vmatprep.subr.mxu1 %v792_v43  ;;  %v868_v35 = vld [vmem:[#allocation8 + $0x6f8] sm:$0xff]  ;;  %v867_v40 = vld [vmem:[#allocation8 + $0x6f0] sm:$0xff] }
 0x194   : > { %1088 = vmatpush1.msra.mxu0 %v663_v44  ;;  %1159 = vmatpush1.msra.mxu1 %v791_v45  ;;  %v736_v43 = vld [vmem:[#allocation8 + $0x2d8] sm:$0xff]  ;;  %v735_v45 = vld [vmem:[#allocation8 + $0x2d0] sm:$0xff] }
 0x195   : > { %1089 = vmatprep.subr.mxu0 %v660_v46  ;;  %1160 = vmatprep.subr.mxu1 %v788_v47  ;;  %v864_v44 = vld [vmem:[#allocation8 + $0x6d8] sm:$0xff]  ;;  %v863_v46 = vld [vmem:[#allocation8 + $0x6d0] sm:$0xff] }
 0x196   : > { %1090 = vmatpush1.msra.mxu0 %v659_v48  ;;  %1161 = vmatpush1.msra.mxu1 %v787_v51  ;;  %v732_v47 = vld [vmem:[#allocation8 + $0x2b8] sm:$0xff]  ;;  %v731_v51 = vld [vmem:[#allocation8 + $0x2b0] sm:$0xff] }
 0x197   : > { %1091 = vmatprep.subr.mxu0 %v656_v52  ;;  %1162 = vmatprep.subr.mxu1 %v784_v53  ;;  %v860_v48 = vld [vmem:[#allocation8 + $0x6b8] sm:$0xff]  ;;  %v859_v52 = vld [vmem:[#allocation8 + $0x6b0] sm:$0xff] }
 0x198   : > { %1092 = vmatpush1.msra.mxu0 %v655_v54  ;;  %1163 = vmatpush1.msra.mxu1 %v783_v56  ;;  %v728_v53 = vld [vmem:[#allocation8 + $0x298] sm:$0xff]  ;;  %v727_v56 = vld [vmem:[#allocation8 + $0x290] sm:$0xff] }
 0x199   : > { %1093 = vmatprep.subr.mxu0 %v652_v57  ;;  %1164 = vmatprep.subr.mxu1 %v780_v59  ;;  %v856_v54 = vld [vmem:[#allocation8 + $0x698] sm:$0xff]  ;;  %v855_v57 = vld [vmem:[#allocation8 + $0x690] sm:$0xff] }
 0x19a   : > { %1094 = vmatpush1.msra.mxu0 %v651_v60  ;;  %1165 = vmatpush1.msra.mxu1 %v779_v61  ;;  %v724_v59 = vld [vmem:[#allocation8 + $0x278] sm:$0xff]  ;;  %v723_v61 = vld [vmem:[#allocation8 + $0x270] sm:$0xff] }
 0x19b   : > { %1095 = vmatprep.subr.mxu0 %v648_v62  ;;  %1166 = vmatprep.subr.mxu1 %v776_v63  ;;  %v852_v60 = vld [vmem:[#allocation8 + $0x678] sm:$0xff]  ;;  %v851_v62 = vld [vmem:[#allocation8 + $0x670] sm:$0xff] }
 0x19c   : > { %1096 = vmatpush1.msra.mxu0 %v647_v0  ;;  %1167 = vmatpush1.msra.mxu1 %v775_v1  ;;  %v720_v63 = vld [vmem:[#allocation8 + $0x258] sm:$0xff]  ;;  %v719_v1 = vld [vmem:[#allocation8 + $0x250] sm:$0xff] }
 0x19d   : > { %1097 = vmatprep.subr.mxu0 %v772_v2  ;;  %1168 = vmatprep.subr.mxu1 %v900_v3  ;;  %v848_v0 = vld [vmem:[#allocation8 + $0x658] sm:$0xff]  ;;  %v847_v2 = vld [vmem:[#allocation8 + $0x650] sm:$0xff] }
 0x19e   : > { %1098 = vmatpush2.msra.mxu0 %v771_v4  ;;  %1169 = vmatpush2.msra.mxu1 %v899_v5  ;;  %v716_v3 = vld [vmem:[#allocation8 + $0x238] sm:$0xff]  ;;  %v715_v5 = vld [vmem:[#allocation8 + $0x230] sm:$0xff] }
 0x19f   : > { %1099 = vmatprep.subr.mxu0 %v768_v6  ;;  %1170 = vmatprep.subr.mxu1 %v896_v7  ;;  %v844_v4 = vld [vmem:[#allocation8 + $0x638] sm:$0xff]  ;;  %v843_v6 = vld [vmem:[#allocation8 + $0x630] sm:$0xff] }
 0x1a0   : > { %1100 = vmatpush2.msra.mxu0 %v767_v8  ;;  %1171 = vmatpush2.msra.mxu1 %v895_v9  ;;  %v712_v7 = vld [vmem:[#allocation8 + $0x218] sm:$0xff]  ;;  %v711_v9 = vld [vmem:[#allocation8 + $0x210] sm:$0xff] }
 0x1a1   : > { %1101 = vmatprep.subr.mxu0 %v764_v10  ;;  %1172 = vmatprep.subr.mxu1 %v892_v11  ;;  %v840_v8 = vld [vmem:[#allocation8 + $0x618] sm:$0xff]  ;;  %v839_v10 = vld [vmem:[#allocation8 + $0x610] sm:$0xff]  ;;  %v1273_v11 = vld [vmem:[#allocation8 + $0x9e8] sm:$0xff] }
 0x1a2   : > { %1102 = vmatpush2.msra.mxu0 %v763_v12  ;;  %1173 = vmatpush2.msra.mxu1 %v891_v13  ;;  %v1272_v12 = vld [vmem:[#allocation8 + $0x9e0] sm:$0xff]  ;;  %v1269_v13 = vld [vmem:[#allocation8 + $0x9c8] sm:$0xff] }
 0x1a3   : > { %1103 = vmatprep.subr.mxu0 %v760_v14  ;;  %1174 = vmatprep.subr.mxu1 %v888_v15  ;;  %v1268_v14 = vld [vmem:[#allocation8 + $0x9c0] sm:$0xff]  ;;  %v1265_v15 = vld [vmem:[#allocation8 + $0x9a8] sm:$0xff] }
 0x1a4   : > { %1104 = vmatpush2.msra.mxu0 %v759_v16  ;;  %1175 = vmatpush2.msra.mxu1 %v887_v17  ;;  %v1264_v16 = vld [vmem:[#allocation8 + $0x9a0] sm:$0xff]  ;;  %v1261_v17 = vld [vmem:[#allocation8 + $0x988] sm:$0xff] }
 0x1a5   : > { %1105 = vmatprep.subr.mxu0 %v756_v18  ;;  %1176 = vmatprep.subr.mxu1 %v884_v19  ;;  %v1260_v18 = vld [vmem:[#allocation8 + $0x980] sm:$0xff]  ;;  %v1257_v19 = vld [vmem:[#allocation8 + $0x968] sm:$0xff] }
 0x1a6   : > { %1106 = vmatpush2.msra.mxu0 %v755_v20  ;;  %1177 = vmatpush2.msra.mxu1 %v883_v21  ;;  %v1256_v20 = vld [vmem:[#allocation8 + $0x960] sm:$0xff]  ;;  %v1397_v21 = vld [vmem:[#allocation8 + $0xdc8] sm:$0xff] }
 0x1a7   : > { %1107 = vmatprep.subr.mxu0 %v752_v22  ;;  %1178 = vmatprep.subr.mxu1 %v880_v23  ;;  %v1249_v22 = vld [vmem:[#allocation8 + $0x928] sm:$0xff]  ;;  %v1396_v23 = vld [vmem:[#allocation8 + $0xdc0] sm:$0xff] }
 0x1a8   : > { %1108 = vmatpush2.msra.mxu0 %v751_v24  ;;  %1179 = vmatpush2.msra.mxu1 %v879_v25  ;;  %v1248_v24 = vld [vmem:[#allocation8 + $0x920] sm:$0xff]  ;;  %v1393_v25 = vld [vmem:[#allocation8 + $0xda8] sm:$0xff] }
 0x1a9   : > { %1109 = vmatprep.subr.mxu0 %v748_v26  ;;  %1180 = vmatprep.subr.mxu1 %v876_v27  ;;  %v1245_v26 = vld [vmem:[#allocation8 + $0x908] sm:$0xff]  ;;  %v1392_v27 = vld [vmem:[#allocation8 + $0xda0] sm:$0xff] }
 0x1aa   : > { %1110 = vmatpush2.msra.mxu0 %v747_v28  ;;  %1181 = vmatpush2.msra.mxu1 %v875_v29  ;;  %v1244_v28 = vld [vmem:[#allocation8 + $0x900] sm:$0xff]  ;;  %v1389_v29 = vld [vmem:[#allocation8 + $0xd88] sm:$0xff] }
 0x1ab   : > { %1111 = vmatprep.subr.mxu0 %v744_v30  ;;  %1182 = vmatprep.subr.mxu1 %v872_v31  ;;  %v1241_v30 = vld [vmem:[#allocation8 + $0x8e8] sm:$0xff]  ;;  %v1388_v31 = vld [vmem:[#allocation8 + $0xd80] sm:$0xff] }
 0x1ac   : > { %1112 = vmatpush2.msra.mxu0 %v743_v32  ;;  %1183 = vmatpush2.msra.mxu1 %v871_v33  ;;  %v1240_v32 = vld [vmem:[#allocation8 + $0x8e0] sm:$0xff]  ;;  %v1385_v33 = vld [vmem:[#allocation8 + $0xd68] sm:$0xff] }
 0x1ad   : > { %1113 = vmatprep.subr.mxu0 %v740_v34  ;;  %1184 = vmatprep.subr.mxu1 %v868_v35  ;;  %v1237_v34 = vld [vmem:[#allocation8 + $0x8c8] sm:$0xff]  ;;  %v1384_v35 = vld [vmem:[#allocation8 + $0xd60] sm:$0xff] }
 0x1ae   : > { %1114 = vmatpush2.msra.mxu0 %v739_v36  ;;  %1185 = vmatpush2.msra.mxu1 %v867_v40  ;;  %v1236_v36 = vld [vmem:[#allocation8 + $0x8c0] sm:$0xff]  ;;  %v1381_v40 = vld [vmem:[#allocation8 + $0xd48] sm:$0xff] }
 0x1af   : > { %1115 = vmatprep.subr.mxu0 %v736_v43  ;;  %1186 = vmatprep.subr.mxu1 %v864_v44  ;;  %v1233_v43 = vld [vmem:[#allocation8 + $0x8a8] sm:$0xff]  ;;  %v1380_v44 = vld [vmem:[#allocation8 + $0xd40] sm:$0xff] }
 0x1b0   : > { %1116 = vmatpush2.msra.mxu0 %v735_v45  ;;  %1187 = vmatpush2.msra.mxu1 %v863_v46  ;;  %v1232_v45 = vld [vmem:[#allocation8 + $0x8a0] sm:$0xff]  ;;  %v1377_v46 = vld [vmem:[#allocation8 + $0xd28] sm:$0xff] }
 0x1b1   : > { %1117 = vmatprep.subr.mxu0 %v732_v47  ;;  %1188 = vmatprep.subr.mxu1 %v860_v48  ;;  %v1229_v47 = vld [vmem:[#allocation8 + $0x888] sm:$0xff]  ;;  %v1376_v48 = vld [vmem:[#allocation8 + $0xd20] sm:$0xff] }
 0x1b2   : > { %1118 = vmatpush2.msra.mxu0 %v731_v51  ;;  %1189 = vmatpush2.msra.mxu1 %v859_v52  ;;  %v1228_v51 = vld [vmem:[#allocation8 + $0x880] sm:$0xff]  ;;  %v1373_v52 = vld [vmem:[#allocation8 + $0xd08] sm:$0xff] }
 0x1b3   : > { %1119 = vmatprep.subr.mxu0 %v728_v53  ;;  %1190 = vmatprep.subr.mxu1 %v856_v54  ;;  %v1225_v53 = vld [vmem:[#allocation8 + $0x868] sm:$0xff]  ;;  %v1372_v54 = vld [vmem:[#allocation8 + $0xd00] sm:$0xff] }
 0x1b4   : > { %1120 = vmatpush2.msra.mxu0 %v727_v56  ;;  %1191 = vmatpush2.msra.mxu1 %v855_v57  ;;  %v1224_v56 = vld [vmem:[#allocation8 + $0x860] sm:$0xff]  ;;  %v1369_v57 = vld [vmem:[#allocation8 + $0xce8] sm:$0xff] }
 0x1b5   : > { %1121 = vmatprep.subr.mxu0 %v724_v59  ;;  %1192 = vmatprep.subr.mxu1 %v852_v60  ;;  %v1221_v59 = vld [vmem:[#allocation8 + $0x848] sm:$0xff]  ;;  %v1368_v60 = vld [vmem:[#allocation8 + $0xce0] sm:$0xff] }
 0x1b6   : > { %1122 = vmatpush2.msra.mxu0 %v723_v61  ;;  %1193 = vmatpush2.msra.mxu1 %v851_v62  ;;  %v1220_v61 = vld [vmem:[#allocation8 + $0x840] sm:$0xff]  ;;  %v1365_v62 = vld [vmem:[#allocation8 + $0xcc8] sm:$0xff] }
 0x1b7   : > { %1123 = vmatprep.subr.mxu0 %v720_v63  ;;  %1194 = vmatprep.subr.mxu1 %v848_v0  ;;  %v1217_v63 = vld [vmem:[#allocation8 + $0x828] sm:$0xff]  ;;  %v1364_v0 = vld [vmem:[#allocation8 + $0xcc0] sm:$0xff] }
 0x1b8   : > { %1124 = vmatpush2.msra.mxu0 %v719_v1  ;;  %1195 = vmatpush2.msra.mxu1 %v847_v2  ;;  %v1216_v1 = vld [vmem:[#allocation8 + $0x820] sm:$0xff]  ;;  %v1361_v2 = vld [vmem:[#allocation8 + $0xca8] sm:$0xff] }
 0x1b9   : > { %1125 = vmatprep.subr.mxu0 %v716_v3  ;;  %1196 = vmatprep.subr.mxu1 %v844_v4  ;;  %v1213_v3 = vld [vmem:[#allocation8 + $0x808] sm:$0xff]  ;;  %v1360_v4 = vld [vmem:[#allocation8 + $0xca0] sm:$0xff] }
 0x1ba   : > { %1126 = vmatpush2.msra.mxu0 %v715_v5  ;;  %1197 = vmatpush2.msra.mxu1 %v843_v6  ;;  %v1212_v5 = vld [vmem:[#allocation8 + $0x800] sm:$0xff]  ;;  %v1357_v6 = vld [vmem:[#allocation8 + $0xc88] sm:$0xff] }
 0x1bb   : > { %1127 = vmatprep.subr.mxu0 %v712_v7  ;;  %1198 = vmatprep.subr.mxu1 %v840_v8  ;;  %v1337_v7 = vld [vmem:[#allocation8 + $0xbe8] sm:$0xff]  ;;  %v1356_v8 = vld [vmem:[#allocation8 + $0xc80] sm:$0xff] }
 0x1bc   : > { %1128 = vmatpush2.msra.mxu0 %v711_v9  ;;  %1199 = vmatpush2.msra.mxu1 %v839_v10  ;;  %v1336_v9 = vld [vmem:[#allocation8 + $0xbe0] sm:$0xff]  ;;  %v1353_v10 = vld [vmem:[#allocation8 + $0xc68] sm:$0xff] }
 0x1bd   : > { %1130 = vmatmul.mubr.f32.vlgmr.msra.gmra.mxu0 %v641_v58  ;;  %1201 = vmatmul.mubr.f32.vlgmr.msra.gmra.mxu1 %v643_v55  ;;  %v1253_v58 = vld [vmem:[#allocation8 + $0x948] sm:$0xff]  ;;  %v1252_v55 = vld [vmem:[#allocation8 + $0x940] sm:$0xff] }
 0x1be   : > { %1491 = vmatprep.subr.mxu0 %v1273_v11  ;;  %1562 = vmatprep.subr.mxu1 %v1401_v50  ;;  %v1333_v11 = vld [vmem:[#allocation8 + $0xbc8] sm:$0xff]  ;;  %v1324_v50 = vld [vmem:[#allocation8 + $0xb80] sm:$0xff] }
 0x1bf   : > { %1492 = vmatpush1.msra.mxu0 %v1272_v12  ;;  %1563 = vmatpush1.msra.mxu1 %v1400_v49  ;;  %v1352_v12 = vld [vmem:[#allocation8 + $0xc60] sm:$0xff]  ;;  %v1321_v49 = vld [vmem:[#allocation8 + $0xb68] sm:$0xff] }
 0x1c0   : > { %1493 = vmatprep.subr.mxu0 %v1269_v13  ;;  %1564 = vmatprep.subr.mxu1 %v1397_v21  ;;  %v1332_v13 = vld [vmem:[#allocation8 + $0xbc0] sm:$0xff] }
 0x1c1   : > { %1494 = vmatpush1.msra.mxu0 %v1268_v14  ;;  %1565 = vmatpush1.msra.mxu1 %v1396_v23  ;;  %v1349_v14 = vld [vmem:[#allocation8 + $0xc48] sm:$0xff]  ;;  %v1320_v21 = vld [vmem:[#allocation8 + $0xb60] sm:$0xff] }
 0x1c2   : > { %1495 = vmatprep.subr.mxu0 %v1265_v15  ;;  %1566 = vmatprep.subr.mxu1 %v1393_v25  ;;  %v1329_v15 = vld [vmem:[#allocation8 + $0xba8] sm:$0xff]  ;;  %v1316_v25 = vld [vmem:[#allocation8 + $0xb40] sm:$0xff] }
 0x1c3   : > { %1496 = vmatpush1.msra.mxu0 %v1264_v16  ;;  %1567 = vmatpush1.msra.mxu1 %v1392_v27  ;;  %v1348_v16 = vld [vmem:[#allocation8 + $0xc40] sm:$0xff]  ;;  %v1317_v23 = vld [vmem:[#allocation8 + $0xb48] sm:$0xff] }
 0x1c4   : > { %1497 = vmatprep.subr.mxu0 %v1261_v17  ;;  %1568 = vmatprep.subr.mxu1 %v1389_v29  ;;  %v1328_v17 = vld [vmem:[#allocation8 + $0xba0] sm:$0xff]  ;;  %v1313_v27 = vld [vmem:[#allocation8 + $0xb28] sm:$0xff] }
 0x1c5   : > { %1498 = vmatpush1.msra.mxu0 %v1260_v18  ;;  %1569 = vmatpush1.msra.mxu1 %v1388_v31  ;;  %v1345_v18 = vld [vmem:[#allocation8 + $0xc28] sm:$0xff]  ;;  %v1312_v29 = vld [vmem:[#allocation8 + $0xb20] sm:$0xff] }
 0x1c6   : > { %1499 = vmatprep.subr.mxu0 %v1257_v19  ;;  %1570 = vmatprep.subr.mxu1 %v1385_v33  ;;  %v1325_v19 = vld [vmem:[#allocation8 + $0xb88] sm:$0xff]  ;;  %v1308_v33 = vld [vmem:[#allocation8 + $0xb00] sm:$0xff] }
 0x1c7   : > { %1500 = vmatpush1.msra.mxu0 %v1256_v20  ;;  %1571 = vmatpush1.msra.mxu1 %v1384_v35  ;;  %v1344_v20 = vld [vmem:[#allocation8 + $0xc20] sm:$0xff]  ;;  %v1309_v31 = vld [vmem:[#allocation8 + $0xb08] sm:$0xff] }
 0x1c8   : > { %1501 = vmatprep.subr.mxu0 %v1253_v58  ;;  %1572 = vmatprep.subr.mxu1 %v1381_v40  ;;  %v1341_v58 = vld [vmem:[#allocation8 + $0xc08] sm:$0xff]  ;;  %v1304_v40 = vld [vmem:[#allocation8 + $0xae0] sm:$0xff] }
 0x1c9   : > { %1502 = vmatpush1.msra.mxu0 %v1252_v55  ;;  %1573 = vmatpush1.msra.mxu1 %v1380_v44  ;;  %v1340_v55 = vld [vmem:[#allocation8 + $0xc00] sm:$0xff]  ;;  %v1305_v35 = vld [vmem:[#allocation8 + $0xae8] sm:$0xff] }
 0x1ca   : > { %1503 = vmatprep.subr.mxu0 %v1249_v22  ;;  %1574 = vmatprep.subr.mxu1 %v1377_v46  ;;  %v1465_v22 = vld [vmem:[#allocation8 + $0xfe8] sm:$0xff]  ;;  %v1300_v46 = vld [vmem:[#allocation8 + $0xac0] sm:$0xff] }
 0x1cb   : > { %1504 = vmatpush1.msra.mxu0 %v1248_v24  ;;  %1575 = vmatpush1.msra.mxu1 %v1376_v48  ;;  %v1464_v24 = vld [vmem:[#allocation8 + $0xfe0] sm:$0xff]  ;;  %v1301_v44 = vld [vmem:[#allocation8 + $0xac8] sm:$0xff] }
 0x1cc   : > { %1505 = vmatprep.subr.mxu0 %v1245_v26  ;;  %1576 = vmatprep.subr.mxu1 %v1373_v52  ;;  %v1461_v26 = vld [vmem:[#allocation8 + $0xfc8] sm:$0xff]  ;;  %v1296_v52 = vld [vmem:[#allocation8 + $0xaa0] sm:$0xff] }
 0x1cd   : > { %1506 = vmatpush1.msra.mxu0 %v1244_v28  ;;  %1577 = vmatpush1.msra.mxu1 %v1372_v54  ;;  %v1460_v28 = vld [vmem:[#allocation8 + $0xfc0] sm:$0xff]  ;;  %v1297_v48 = vld [vmem:[#allocation8 + $0xaa8] sm:$0xff] }
 0x1ce   : > { %1507 = vmatprep.subr.mxu0 %v1241_v30  ;;  %1578 = vmatprep.subr.mxu1 %v1369_v57  ;;  %v1457_v30 = vld [vmem:[#allocation8 + $0xfa8] sm:$0xff]  ;;  %v1292_v57 = vld [vmem:[#allocation8 + $0xa80] sm:$0xff] }
 0x1cf   : > { %1508 = vmatpush1.msra.mxu0 %v1240_v32  ;;  %1579 = vmatpush1.msra.mxu1 %v1368_v60  ;;  %v1456_v32 = vld [vmem:[#allocation8 + $0xfa0] sm:$0xff]  ;;  %v1293_v54 = vld [vmem:[#allocation8 + $0xa88] sm:$0xff] }
 0x1d0   : > { %1509 = vmatprep.subr.mxu0 %v1237_v34  ;;  %1580 = vmatprep.subr.mxu1 %v1365_v62  ;;  %v1453_v34 = vld [vmem:[#allocation8 + $0xf88] sm:$0xff]  ;;  %v1288_v62 = vld [vmem:[#allocation8 + $0xa60] sm:$0xff] }
 0x1d1   : > { %1510 = vmatpush1.msra.mxu0 %v1236_v36  ;;  %1581 = vmatpush1.msra.mxu1 %v1364_v0  ;;  %v1452_v36 = vld [vmem:[#allocation8 + $0xf80] sm:$0xff]  ;;  %v1289_v60 = vld [vmem:[#allocation8 + $0xa68] sm:$0xff] }
 0x1d2   : > { %1511 = vmatprep.subr.mxu0 %v1233_v43  ;;  %1582 = vmatprep.subr.mxu1 %v1361_v2  ;;  %v1449_v43 = vld [vmem:[#allocation8 + $0xf68] sm:$0xff]  ;;  %v1284_v2 = vld [vmem:[#allocation8 + $0xa40] sm:$0xff] }
 0x1d3   : > { %1512 = vmatpush1.msra.mxu0 %v1232_v45  ;;  %1583 = vmatpush1.msra.mxu1 %v1360_v4  ;;  %v1448_v45 = vld [vmem:[#allocation8 + $0xf60] sm:$0xff]  ;;  %v1285_v0 = vld [vmem:[#allocation8 + $0xa48] sm:$0xff] }
 0x1d4   : > { %1513 = vmatprep.subr.mxu0 %v1229_v47  ;;  %1584 = vmatprep.subr.mxu1 %v1357_v6  ;;  %v1445_v47 = vld [vmem:[#allocation8 + $0xf48] sm:$0xff]  ;;  %v1280_v6 = vld [vmem:[#allocation8 + $0xa20] sm:$0xff] }
 0x1d5   : > { %1514 = vmatpush1.msra.mxu0 %v1228_v51  ;;  %1585 = vmatpush1.msra.mxu1 %v1356_v8  ;;  %v1444_v51 = vld [vmem:[#allocation8 + $0xf40] sm:$0xff]  ;;  %v1281_v4 = vld [vmem:[#allocation8 + $0xa28] sm:$0xff] }
 0x1d6   : > { %1515 = vmatprep.subr.mxu0 %v1225_v53  ;;  %1586 = vmatprep.subr.mxu1 %v1353_v10  ;;  %v1441_v53 = vld [vmem:[#allocation8 + $0xf28] sm:$0xff]  ;;  %v1276_v10 = vld [vmem:[#allocation8 + $0xa00] sm:$0xff] }
 0x1d7   : > { %1516 = vmatpush1.msra.mxu0 %v1224_v56  ;;  %1587 = vmatpush1.msra.mxu1 %v1352_v12  ;;  %v1440_v56 = vld [vmem:[#allocation8 + $0xf20] sm:$0xff]  ;;  %v1277_v8 = vld [vmem:[#allocation8 + $0xa08] sm:$0xff]  ;;  %v1275_v12 = vld [vmem:[#allocation8 + $0x9f8] sm:$0xff] }
 0x1d8   : > { %1517 = vmatprep.subr.mxu0 %v1221_v59  ;;  %1588 = vmatprep.subr.mxu1 %v1349_v14  ;;  %v1437_v59 = vld [vmem:[#allocation8 + $0xf08] sm:$0xff] }
 0x1d9   : > { %1518 = vmatpush1.msra.mxu0 %v1220_v61  ;;  %1589 = vmatpush1.msra.mxu1 %v1348_v16  ;;  %v1436_v61 = vld [vmem:[#allocation8 + $0xf00] sm:$0xff]  ;;  %v1417_v14 = vld [vmem:[#allocation8 + $0xe68] sm:$0xff] }
 0x1da   : > { %1519 = vmatprep.subr.mxu0 %v1217_v63  ;;  %1590 = vmatprep.subr.mxu1 %v1345_v18  ;;  %v1433_v63 = vld [vmem:[#allocation8 + $0xee8] sm:$0xff] }
 0x1db   : > { %1520 = vmatpush1.msra.mxu0 %v1216_v1  ;;  %1591 = vmatpush1.msra.mxu1 %v1344_v20  ;;  %v1432_v1 = vld [vmem:[#allocation8 + $0xee0] sm:$0xff]  ;;  %v1413_v16 = vld [vmem:[#allocation8 + $0xe48] sm:$0xff] }
 0x1dc   : > { %1521 = vmatprep.subr.mxu0 %v1213_v3  ;;  %1592 = vmatprep.subr.mxu1 %v1341_v58  ;;  %v1429_v3 = vld [vmem:[#allocation8 + $0xec8] sm:$0xff]  ;;  %v1403_v58 = vld [vmem:[#allocation8 + $0xdf8] sm:$0xff] }
 0x1dd   : > { %1522 = vmatpush1.msra.mxu0 %v1212_v5  ;;  %1593 = vmatpush1.msra.mxu1 %v1340_v55  ;;  %v1428_v5 = vld [vmem:[#allocation8 + $0xec0] sm:$0xff]  ;;  %v1409_v18 = vld [vmem:[#allocation8 + $0xe28] sm:$0xff] }
 0x1de   : > { %1523 = vmatprep.subr.mxu0 %v1337_v7  ;;  %1594 = vmatprep.subr.mxu1 %v1465_v22  ;;  %v1425_v7 = vld [vmem:[#allocation8 + $0xea8] sm:$0xff] }
 0x1df   : > { %1524 = vmatpush2.msra.mxu0 %v1336_v9  ;;  %1595 = vmatpush2.msra.mxu1 %v1464_v24  ;;  %v1424_v9 = vld [vmem:[#allocation8 + $0xea0] sm:$0xff]  ;;  %v1405_v20 = vld [vmem:[#allocation8 + $0xe08] sm:$0xff] }
 0x1e0   : > { %1525 = vmatprep.subr.mxu0 %v1333_v11  ;;  %1596 = vmatprep.subr.mxu1 %v1461_v26  ;;  %v1421_v11 = vld [vmem:[#allocation8 + $0xe88] sm:$0xff] }
 0x1e1   : > { %1526 = vmatpush2.msra.mxu0 %v1332_v13  ;;  %1597 = vmatpush2.msra.mxu1 %v1460_v28  ;;  %v1420_v13 = vld [vmem:[#allocation8 + $0xe80] sm:$0xff] }
 0x1e2   : > { %1527 = vmatprep.subr.mxu0 %v1329_v15  ;;  %1598 = vmatprep.subr.mxu1 %v1457_v30  ;;  %v1416_v15 = vld [vmem:[#allocation8 + $0xe60] sm:$0xff] }
 0x1e3   : > { %1528 = vmatpush2.msra.mxu0 %v1328_v17  ;;  %1599 = vmatpush2.msra.mxu1 %v1456_v32  ;;  %v1412_v17 = vld [vmem:[#allocation8 + $0xe40] sm:$0xff]  ;;  %v1274_v32 = vld [vmem:[#allocation8 + $0x9f0] sm:$0xff] }
 0x1e4   : > { %1529 = vmatprep.subr.mxu0 %v1325_v19  ;;  %1600 = vmatprep.subr.mxu1 %v1453_v34  ;;  %v1408_v19 = vld [vmem:[#allocation8 + $0xe20] sm:$0xff]  ;;  %v1270_v34 = vld [vmem:[#allocation8 + $0x9d0] sm:$0xff] }
 0x1e5   : > { %1530 = vmatpush2.msra.mxu0 %v1324_v50  ;;  %1601 = vmatpush2.msra.mxu1 %v1452_v36  ;;  %v1404_v50 = vld [vmem:[#allocation8 + $0xe00] sm:$0xff]  ;;  %v1266_v36 = vld [vmem:[#allocation8 + $0x9b0] sm:$0xff] }
 0x1e6   : > { %1531 = vmatprep.subr.mxu0 %v1321_v49  ;;  %1602 = vmatprep.subr.mxu1 %v1449_v43  ;;  %v6013_v49 = vld [vmem:[#allocation10] sm:$0xf]  ;;  %v1262_v43 = vld [vmem:[#allocation8 + $0x990] sm:$0xff] }
 0x1e7   : > { %1532 = vmatpush2.msra.mxu0 %v1320_v21  ;;  %1603 = vmatpush2.msra.mxu1 %v1448_v45  ;;  %v906_v55 = vrot.slane %v6013_v49, %v5987_v39  ;;  %v910_v21 = vrot.slane %v6013_v49, %v5990_v41  ;;  %v1258_v45 = vld [vmem:[#allocation8 + $0x970] sm:$0xff] }
 0x1e8   : > { %1533 = vmatprep.subr.mxu0 %v1317_v23  ;;  %1604 = vmatprep.subr.mxu1 %v1445_v47  ;;  %v1254_v47 = vld [vmem:[#allocation8 + $0x950] sm:$0xff] }
 0x1e9   : > { %1534 = vmatpush2.msra.mxu0 %v1316_v25  ;;  %1605 = vmatpush2.msra.mxu1 %v1444_v51  ;;  %v1250_v51 = vld [vmem:[#allocation8 + $0x930] sm:$0xff] }
 0x1ea   : > { %1535 = vmatprep.subr.mxu0 %v1313_v27  ;;  %1606 = vmatprep.subr.mxu1 %v1441_v53  ;;  %v1246_v53 = vld [vmem:[#allocation8 + $0x910] sm:$0xff] }
 0x1eb   : > { %1536 = vmatpush2.msra.mxu0 %v1312_v29  ;;  %1607 = vmatpush2.msra.mxu1 %v1440_v56  ;;  %v1242_v56 = vld [vmem:[#allocation8 + $0x8f0] sm:$0xff] }
 0x1ec   : > { %1537 = vmatprep.subr.mxu0 %v1309_v31  ;;  %1608 = vmatprep.subr.mxu1 %v1437_v59  ;;  %v1238_v59 = vld [vmem:[#allocation8 + $0x8d0] sm:$0xff] }
 0x1ed   : > { %1538 = vmatpush2.msra.mxu0 %v1308_v33  ;;  %1609 = vmatpush2.msra.mxu1 %v1436_v61  ;;  %v1271_v33 = vld [vmem:[#allocation8 + $0x9d8] sm:$0xff]  ;;  %v1234_v61 = vld [vmem:[#allocation8 + $0x8b0] sm:$0xff] }
 0x1ee   : > { %1539 = vmatprep.subr.mxu0 %v1305_v35  ;;  %1610 = vmatprep.subr.mxu1 %v1433_v63  ;;  %v1267_v35 = vld [vmem:[#allocation8 + $0x9b8] sm:$0xff]  ;;  %v1230_v63 = vld [vmem:[#allocation8 + $0x890] sm:$0xff] }
 0x1ef   : > { %1540 = vmatpush2.msra.mxu0 %v1304_v40  ;;  %1611 = vmatpush2.msra.mxu1 %v1432_v1  ;;  %v1263_v40 = vld [vmem:[#allocation8 + $0x998] sm:$0xff]  ;;  %v1226_v1 = vld [vmem:[#allocation8 + $0x870] sm:$0xff] }
 0x1f0   : > { %1541 = vmatprep.subr.mxu0 %v1301_v44  ;;  %1612 = vmatprep.subr.mxu1 %v1429_v3  ;;  %v1259_v44 = vld [vmem:[#allocation8 + $0x978] sm:$0xff]  ;;  %v1222_v3 = vld [vmem:[#allocation8 + $0x850] sm:$0xff] }
 0x1f1   : > { %1542 = vmatpush2.msra.mxu0 %v1300_v46  ;;  %1613 = vmatpush2.msra.mxu1 %v1428_v5  ;;  %v1255_v46 = vld [vmem:[#allocation8 + $0x958] sm:$0xff]  ;;  %v1218_v5 = vld [vmem:[#allocation8 + $0x830] sm:$0xff] }
 0x1f2   : > { %1543 = vmatprep.subr.mxu0 %v1297_v48  ;;  %1614 = vmatprep.subr.mxu1 %v1425_v7  ;;  %v1251_v48 = vld [vmem:[#allocation8 + $0x938] sm:$0xff]  ;;  %v1214_v7 = vld [vmem:[#allocation8 + $0x810] sm:$0xff] }
 0x1f3   : > { %1544 = vmatpush2.msra.mxu0 %v1296_v52  ;;  %1615 = vmatpush2.msra.mxu1 %v1424_v9  ;;  %v1247_v52 = vld [vmem:[#allocation8 + $0x918] sm:$0xff]  ;;  %v1338_v9 = vld [vmem:[#allocation8 + $0xbf0] sm:$0xff] }
 0x1f4   : > { %1545 = vmatprep.subr.mxu0 %v1293_v54  ;;  %1616 = vmatprep.subr.mxu1 %v1421_v11  ;;  %v1243_v54 = vld [vmem:[#allocation8 + $0x8f8] sm:$0xff]  ;;  %v1334_v11 = vld [vmem:[#allocation8 + $0xbd0] sm:$0xff] }
 0x1f5   : > { %1546 = vmatpush2.msra.mxu0 %v1292_v57  ;;  %1617 = vmatpush2.msra.mxu1 %v1420_v13  ;;  %v1239_v57 = vld [vmem:[#allocation8 + $0x8d8] sm:$0xff]  ;;  %v1330_v13 = vld [vmem:[#allocation8 + $0xbb0] sm:$0xff] }
 0x1f6   : > { %1547 = vmatprep.subr.mxu0 %v1289_v60  ;;  %1618 = vmatprep.subr.mxu1 %v1417_v14  ;;  %v1235_v60 = vld [vmem:[#allocation8 + $0x8b8] sm:$0xff] }
 0x1f7   : > { %1548 = vmatpush2.msra.mxu0 %v1288_v62  ;;  %1619 = vmatpush2.msra.mxu1 %v1416_v15  ;;  %v1231_v62 = vld [vmem:[#allocation8 + $0x898] sm:$0xff]  ;;  %v1326_v15 = vld [vmem:[#allocation8 + $0xb90] sm:$0xff] }
 0x1f8   : > { %1549 = vmatprep.subr.mxu0 %v1285_v0  ;;  %1620 = vmatprep.subr.mxu1 %v1413_v16  ;;  %v1227_v0 = vld [vmem:[#allocation8 + $0x878] sm:$0xff] }
 0x1f9   : > { %1550 = vmatpush2.msra.mxu0 %v1284_v2  ;;  %1621 = vmatpush2.msra.mxu1 %v1412_v17  ;;  %v1223_v2 = vld [vmem:[#allocation8 + $0x858] sm:$0xff]  ;;  %v1322_v17 = vld [vmem:[#allocation8 + $0xb70] sm:$0xff] }
 0x1fa   : > { %1551 = vmatprep.subr.mxu0 %v1281_v4  ;;  %1622 = vmatprep.subr.mxu1 %v1409_v18  ;;  %v1219_v4 = vld [vmem:[#allocation8 + $0x838] sm:$0xff] }
 0x1fb   : > { %1552 = vmatpush2.msra.mxu0 %v1280_v6  ;;  %1623 = vmatpush2.msra.mxu1 %v1408_v19  ;;  %v1215_v6 = vld [vmem:[#allocation8 + $0x818] sm:$0xff]  ;;  %v1318_v19 = vld [vmem:[#allocation8 + $0xb50] sm:$0xff] }
 0x1fc   : > { %1553 = vmatprep.subr.mxu0 %v1277_v8  ;;  %1624 = vmatprep.subr.mxu1 %v1405_v20  ;;  %v1339_v8 = vld [vmem:[#allocation8 + $0xbf8] sm:$0xff] }
 0x1fd   : > { %1554 = vmatpush2.msra.mxu0 %v1276_v10  ;;  %1625 = vmatpush2.msra.mxu1 %v1404_v50  ;;  %v1335_v10 = vld [vmem:[#allocation8 + $0xbd8] sm:$0xff]  ;;  %v1314_v50 = vld [vmem:[#allocation8 + $0xb30] sm:$0xff] }
 0x1fe   : > { %1633 = vmatprep.subr.mxu0 %v1275_v12  ;;  %1704 = vmatprep.subr.mxu1 %v1403_v58  ;;  %v1331_v12 = vld [vmem:[#allocation8 + $0xbb8] sm:$0xff] }
 0x1ff   : > { %v1327_v14 = vld [vmem:[#allocation8 + $0xb98] sm:$0xff] }
 0x200   : > { %v1323_v16 = vld [vmem:[#allocation8 + $0xb78] sm:$0xff] }
 0x201   : > { %v1319_v18 = vld [vmem:[#allocation8 + $0xb58] sm:$0xff] }
 0x202   : > { %v1315_v20 = vld [vmem:[#allocation8 + $0xb38] sm:$0xff] }
 0x203   : > { %v1311_v58 = vld [vmem:[#allocation8 + $0xb18] sm:$0xff] }
 0x23c   : > { %v989_v22 = vpop.f32.mrf.mxu0  ;;  %v1060_v23 = vpop.f32.mrf.mxu1 }
 0x23d   : > { %v990_v24 = vadd.f32 %v989_v22, %v906_v55  ;;  %v1310_v55 = vld [vmem:[#allocation8 + $0xb10] sm:$0xff] }
 0x23e   : > { %v991_v25 = vpop.f32.mrf.mxu0  ;;  %v1062_v28 = vpop.f32.mrf.mxu1  ;;  %v1306_v22 = vld [vmem:[#allocation8 + $0xaf0] sm:$0xff] }
 0x23f   : > { %v992_v26 = vadd.f32 %v991_v25, %v910_v21  ;;  %v6019_v27 = vadd.f32 %v1060_v23, %v990_v24  ;;  %v1307_v21 = vld [vmem:[#allocation8 + $0xaf8] sm:$0xff]  ;;  %v1302_v24 = vld [vmem:[#allocation8 + $0xad0] sm:$0xff] }
 0x240   : > { %v1303_v23 = vld [vmem:[#allocation8 + $0xad8] sm:$0xff] }
 0x241   : > { %v1063_v29 = vadd.f32 %v1062_v28, %v992_v26  ;;  %v1207_v31 = vmax.f32 %v6019_v27, 0.0  ;;  %v1299_v25 = vld [vmem:[#allocation8 + $0xab8] sm:$0xff]  ;;  %v1298_v26 = vld [vmem:[#allocation8 + $0xab0] sm:$0xff] }
 0x242   : > { %v1295_v28 = vld [vmem:[#allocation8 + $0xa98] sm:$0xff]  ;;  %v1390_v27 = vld [vmem:[#allocation8 + $0xd90] sm:$0xff] }
 0x243   : > { %v1208_v30 = vmax.f32 %v1063_v29, 0.0  ;;  %v914_v29 = vrot.slane %v6013_v49, %v5984_v38 }
 0x245   : > { %1555 = vmatprep.mubr.f32.mxu0 %v1208_v30 }
 0x246   : > { %1556 = vmatmul.mubr.f32.vlgmr.msra.gmra.mxu0 %v1207_v31 }
 0x247   : > { %1634 = vmatpush1.msra.mxu0 %v1274_v32  ;;  %1697 = vmatprep.mubr.f32.mxu0 %v1208_v30  ;;  %v1294_v30 = vld [vmem:[#allocation8 + $0xa90] sm:$0xff]  ;;  %v1291_v32 = vld [vmem:[#allocation8 + $0xa78] sm:$0xff] }
 0x248   : > { %1635 = vmatprep.subr.mxu0 %v1271_v33  ;;  %v918_v33 = vrot.slane %v6013_v49, %v5993_v42 }
 0x249   : > { %1636 = vmatpush1.msra.mxu0 %v1270_v34  ;;  %v1290_v34 = vld [vmem:[#allocation8 + $0xa70] sm:$0xff] }
 0x24a   : > { %1637 = vmatprep.subr.mxu0 %v1267_v35 }
 0x24b   : > { %1638 = vmatpush1.msra.mxu0 %v1266_v36 }
 0x24c   : > { %1639 = vmatprep.subr.mxu0 %v1263_v40  ;;  %v1287_v40 = vld [vmem:[#allocation8 + $0xa58] sm:$0xff] }
 0x24d   : > { %1640 = vmatpush1.msra.mxu0 %v1262_v43 }
 0x24e   : > { %1641 = vmatprep.subr.mxu0 %v1259_v44  ;;  %v1286_v44 = vld [vmem:[#allocation8 + $0xa50] sm:$0xff] }
 0x24f   : > { %1642 = vmatpush1.msra.mxu0 %v1258_v45 }
 0x250   : > { %1643 = vmatprep.subr.mxu0 %v1255_v46  ;;  %v1283_v46 = vld [vmem:[#allocation8 + $0xa38] sm:$0xff] }
 0x251   : > { %1644 = vmatpush1.msra.mxu0 %v1254_v47 }
 0x252   : > { %1645 = vmatprep.subr.mxu0 %v1251_v48  ;;  %v1282_v48 = vld [vmem:[#allocation8 + $0xa30] sm:$0xff] }
 0x253   : > { %1646 = vmatpush1.msra.mxu0 %v1250_v51 }
 0x254   : > { %1647 = vmatprep.subr.mxu0 %v1247_v52 }
 0x255   : > { %1648 = vmatpush1.msra.mxu0 %v1246_v53  ;;  %v1279_v53 = vld [vmem:[#allocation8 + $0xa18] sm:$0xff] }
 0x256   : > { %1649 = vmatprep.subr.mxu0 %v1243_v54  ;;  %v1278_v54 = vld [vmem:[#allocation8 + $0xa10] sm:$0xff] }
 0x257   : > { %1650 = vmatpush1.msra.mxu0 %v1242_v56 }
 0x258   : > { %1651 = vmatprep.subr.mxu0 %v1239_v57 }
 0x259   : > { %1652 = vmatpush1.msra.mxu0 %v1238_v59  ;;  %v1402_v59 = vld [vmem:[#allocation8 + $0xdf0] sm:$0xff] }
 0x25a   : > { %1653 = vmatprep.subr.mxu0 %v1235_v60  ;;  %v1399_v60 = vld [vmem:[#allocation8 + $0xdd8] sm:$0xff] }
 0x25b   : > { %1654 = vmatpush1.msra.mxu0 %v1234_v61  ;;  %v1398_v61 = vld [vmem:[#allocation8 + $0xdd0] sm:$0xff] }
 0x25c   : > { %1655 = vmatprep.subr.mxu0 %v1231_v62  ;;  %v1395_v62 = vld [vmem:[#allocation8 + $0xdb8] sm:$0xff] }
 0x25d   : > { %1656 = vmatpush1.msra.mxu0 %v1230_v63  ;;  %v1394_v63 = vld [vmem:[#allocation8 + $0xdb0] sm:$0xff] }
 0x25e   : > { %1657 = vmatprep.subr.mxu0 %v1227_v0  ;;  %v2020_v0 = vld [vmem:[#allocation11 + $0x788] sm:$0xff] }
 0x25f   : > { %1658 = vmatpush1.msra.mxu0 %v1226_v1  ;;  %v2019_v1 = vld [vmem:[#allocation11 + $0x780] sm:$0xff] }
 0x260   : > { %1659 = vmatprep.subr.mxu0 %v1223_v2  ;;  %v2004_v2 = vld [vmem:[#allocation11 + $0x708] sm:$0xff] }
 0x261   : > { %1660 = vmatpush1.msra.mxu0 %v1222_v3  ;;  %v1391_v3 = vld [vmem:[#allocation8 + $0xd98] sm:$0xff] }
 0x262   : > { %1661 = vmatprep.subr.mxu0 %v1219_v4  ;;  %v2003_v4 = vld [vmem:[#allocation11 + $0x700] sm:$0xff] }
 0x263   : > { %1662 = vmatpush1.msra.mxu0 %v1218_v5  ;;  %v1387_v5 = vld [vmem:[#allocation8 + $0xd78] sm:$0xff] }
 0x264   : > { %1663 = vmatprep.subr.mxu0 %v1215_v6  ;;  %v1987_v6 = vld [vmem:[#allocation11 + $0x680] sm:$0xff] }
 0x265   : > { %1664 = vmatpush1.msra.mxu0 %v1214_v7  ;;  %v1386_v7 = vld [vmem:[#allocation8 + $0xd70] sm:$0xff] }
 0x266   : > { %1665 = vmatprep.subr.mxu0 %v1339_v8  ;;  %v1972_v8 = vld [vmem:[#allocation11 + $0x608] sm:$0xff] }
 0x267   : > { %1666 = vmatpush2.msra.mxu0 %v1338_v9  ;;  %v1383_v9 = vld [vmem:[#allocation8 + $0xd58] sm:$0xff] }
 0x268   : > { %1667 = vmatprep.subr.mxu0 %v1335_v10  ;;  %v1971_v10 = vld [vmem:[#allocation11 + $0x600] sm:$0xff] }
 0x269   : > { %1668 = vmatpush2.msra.mxu0 %v1334_v11  ;;  %v1382_v11 = vld [vmem:[#allocation8 + $0xd50] sm:$0xff] }
 0x26a   : > { %1669 = vmatprep.subr.mxu0 %v1331_v12  ;;  %v1956_v12 = vld [vmem:[#allocation11 + $0x588] sm:$0xff] }
 0x26b   : > { %1670 = vmatpush2.msra.mxu0 %v1330_v13  ;;  %v1379_v13 = vld [vmem:[#allocation8 + $0xd38] sm:$0xff] }
 0x26c   : > { %1671 = vmatprep.subr.mxu0 %v1327_v14  ;;  %v1955_v14 = vld [vmem:[#allocation11 + $0x580] sm:$0xff] }
 0x26d   : > { %1672 = vmatpush2.msra.mxu0 %v1326_v15  ;;  %v1378_v15 = vld [vmem:[#allocation8 + $0xd30] sm:$0xff] }
 0x26e   : > { %1673 = vmatprep.subr.mxu0 %v1323_v16  ;;  %v1940_v16 = vld [vmem:[#allocation11 + $0x508] sm:$0xff] }
 0x26f   : > { %1674 = vmatpush2.msra.mxu0 %v1322_v17  ;;  %v1375_v17 = vld [vmem:[#allocation8 + $0xd18] sm:$0xff] }
 0x270   : > { %1675 = vmatprep.subr.mxu0 %v1319_v18  ;;  %v1939_v18 = vld [vmem:[#allocation11 + $0x500] sm:$0xff] }
 0x271   : > { %1676 = vmatpush2.msra.mxu0 %v1318_v19  ;;  %v1374_v19 = vld [vmem:[#allocation8 + $0xd10] sm:$0xff] }
 0x272   : > { %1677 = vmatprep.subr.mxu0 %v1315_v20  ;;  %v1924_v20 = vld [vmem:[#allocation11 + $0x488] sm:$0xff] }
 0x273   : > { %1678 = vmatpush2.msra.mxu0 %v1314_v50  ;;  %v1371_v50 = vld [vmem:[#allocation8 + $0xcf8] sm:$0xff] }
 0x274   : > { %1679 = vmatprep.subr.mxu0 %v1311_v58  ;;  %v1923_v58 = vld [vmem:[#allocation11 + $0x480] sm:$0xff] }
 0x275   : > { %1680 = vmatpush2.msra.mxu0 %v1310_v55  ;;  %v1370_v55 = vld [vmem:[#allocation8 + $0xcf0] sm:$0xff] }
 0x276   : > { %1681 = vmatprep.subr.mxu0 %v1307_v21  ;;  %v1908_v21 = vld [vmem:[#allocation11 + $0x408] sm:$0xff] }
 0x277   : > { %1682 = vmatpush2.msra.mxu0 %v1306_v22  ;;  %v1367_v22 = vld [vmem:[#allocation8 + $0xcd8] sm:$0xff] }
 0x278   : > { %1683 = vmatprep.subr.mxu0 %v1303_v23  ;;  %v1907_v23 = vld [vmem:[#allocation11 + $0x400] sm:$0xff] }
 0x279   : > { %1684 = vmatpush2.msra.mxu0 %v1302_v24  ;;  %v1366_v24 = vld [vmem:[#allocation8 + $0xcd0] sm:$0xff] }
 0x27a   : > { %1685 = vmatprep.subr.mxu0 %v1299_v25  ;;  %v1892_v25 = vld [vmem:[#allocation11 + $0x388] sm:$0xff] }
 0x27b   : > { %1686 = vmatpush2.msra.mxu0 %v1298_v26  ;;  %v1363_v26 = vld [vmem:[#allocation8 + $0xcb8] sm:$0xff] }
 0x27c   : > { %1687 = vmatprep.subr.mxu0 %v1295_v28  ;;  %v1891_v28 = vld [vmem:[#allocation11 + $0x380] sm:$0xff] }
 0x27d   : > { %v1131_v35 = vpop.f32.mrf.mxu0  ;;  %v1202_v36 = vpop.f32.mrf.mxu1  ;;  %1688 = vmatpush2.msra.mxu0 %v1294_v30  ;;  %v1876_v30 = vld [vmem:[#allocation11 + $0x308] sm:$0xff] }
 0x27e   : > { %v1132_v43 = vadd.f32 %v1131_v35, %v914_v29  ;;  %1689 = vmatprep.subr.mxu0 %v1291_v32  ;;  %v1362_v29 = vld [vmem:[#allocation8 + $0xcb0] sm:$0xff]  ;;  %v1359_v32 = vld [vmem:[#allocation8 + $0xc98] sm:$0xff] }
 0x27f   : > { %v1133_v45 = vpop.f32.mrf.mxu0  ;;  %1690 = vmatpush2.msra.mxu0 %v1290_v34  ;;  %v1204_v52 = vpop.f32.mrf.mxu1  ;;  %v1358_v34 = vld [vmem:[#allocation8 + $0xc90] sm:$0xff] }
 0x280   : > { %v1134_v47 = vadd.f32 %v1133_v45, %v918_v33  ;;  %1691 = vmatprep.subr.mxu0 %v1287_v40  ;;  %v6028_v51 = vadd.f32 %v1202_v36, %v1132_v43  ;;  %v1875_v33 = vld [vmem:[#allocation11 + $0x300] sm:$0xff]  ;;  %v1860_v35 = vld [vmem:[#allocation11 + $0x288] sm:$0xff]  ;;  %v1355_v36 = vld [vmem:[#allocation8 + $0xc78] sm:$0xff] }
 0x281   : > { %1692 = vmatpush2.msra.mxu0 %v1286_v44  ;;  %v1859_v40 = vld [vmem:[#allocation11 + $0x280] sm:$0xff]  ;;  %v1354_v43 = vld [vmem:[#allocation8 + $0xc70] sm:$0xff]  ;;  %v1351_v45 = vld [vmem:[#allocation8 + $0xc58] sm:$0xff] }
 0x282   : > { %v1205_v49 = vadd.f32 %v1204_v52, %v1134_v47  ;;  %1693 = vmatprep.subr.mxu0 %v1283_v46  ;;  %v1209_v57 = vmax.f32 %v6028_v51, 0.0  ;;  %v1844_v44 = vld [vmem:[#allocation11 + $0x208] sm:$0xff]  ;;  %v1843_v46 = vld [vmem:[#allocation11 + $0x200] sm:$0xff]  ;;  %v1347_v52 = vld [vmem:[#allocation8 + $0xc38] sm:$0xff] }
 0x283   : > { %1694 = vmatpush2.msra.mxu0 %v1282_v48  ;;  %v1350_v47 = vld [vmem:[#allocation8 + $0xc50] sm:$0xff] }
 0x284   : > { %v1210_v56 = vmax.f32 %v1205_v49, 0.0  ;;  %1695 = vmatprep.subr.mxu0 %v1279_v53  ;;  %v1828_v48 = vld [vmem:[#allocation11 + $0x188] sm:$0xff]  ;;  %v1827_v53 = vld [vmem:[#allocation11 + $0x180] sm:$0xff] }
 0x285   : > { %1696 = vmatpush2.msra.mxu0 %v1278_v54  ;;  %v1346_v49 = vld [vmem:[#allocation8 + $0xc30] sm:$0xff] }
 0x286   : > { %1626 = vmatprep.mubr.f32.mxu1 %v1210_v56  ;;  %1698 = vmatmul.mubr.f32.vlgmr.msra.gmra.mxu0 %v1207_v31  ;;  %v1988_v31 = vld [vmem:[#allocation11 + $0x688] sm:$0xff] }
 0x287   : > { %1627 = vmatmul.mubr.f32.vlgmr.msra.gmra.mxu1 %v1209_v57  ;;  %2887 = vmatprep.subr.mxu0 %v2020_v0  ;;  %v1812_v54 = vld [vmem:[#allocation11 + $0x108] sm:$0xff] }
 0x288   : > { %1705 = vmatpush1.msra.mxu1 %v1402_v59  ;;  %1768 = vmatprep.mubr.f32.mxu1 %v1210_v56  ;;  %v1343_v56 = vld [vmem:[#allocation8 + $0xc18] sm:$0xff]  ;;  %v1811_v59 = vld [vmem:[#allocation11 + $0x100] sm:$0xff]  ;;  %v1466_v0 = vld [vmem:[#allocation8 + $0xff0] sm:$0xff] }
 0x289   : > { %1706 = vmatprep.subr.mxu1 %v1399_v60  ;;  %2888 = vmatpush1.msra.mxu0 %v2019_v1  ;;  %v1342_v60 = vld [vmem:[#allocation8 + $0xc10] sm:$0xff] }
 0x28a   : > { %1707 = vmatpush1.msra.mxu1 %v1398_v61  ;;  %2889 = vmatprep.subr.mxu0 %v2004_v2  ;;  %v1796_v61 = vld [vmem:[#allocation11 + $0x88] sm:$0xff]  ;;  %v1463_v2 = vld [vmem:[#allocation8 + $0xfd8] sm:$0xff] }
 0x28b   : > { %1708 = vmatprep.subr.mxu1 %v1395_v62  ;;  %2890 = vmatpush1.msra.mxu0 %v2003_v4  ;;  %v1467_v62 = vld [vmem:[#allocation8 + $0xff8] sm:$0xff]  ;;  %v1780_v1 = vld [vmem:[#allocation11 + $0x8] sm:$0xff] }
 0x28c   : > { %1709 = vmatpush1.msra.mxu1 %v1394_v63  ;;  %2891 = vmatprep.subr.mxu0 %v1988_v31  ;;  %v1795_v63 = vld [vmem:[#allocation11 + $0x80] sm:$0xff]  ;;  %v1462_v4 = vld [vmem:[#allocation8 + $0xfd0] sm:$0xff]  ;;  %v1459_v31 = vld [vmem:[#allocation8 + $0xfb8] sm:$0xff] }
 0x28d   : > { %1710 = vmatprep.subr.mxu1 %v1391_v3  ;;  %2892 = vmatpush1.msra.mxu0 %v1987_v6  ;;  %v1779_v3 = vld [vmem:[#allocation11] sm:$0xff]  ;;  %v1458_v6 = vld [vmem:[#allocation8 + $0xfb0] sm:$0xff] }
 0x28e   : > { %1711 = vmatpush1.msra.mxu1 %v1390_v27  ;;  %2893 = vmatprep.subr.mxu0 %v1972_v8  ;;  %v2276_v27 = vld [vmem:[#allocation11 + $0xf88] sm:$0xff]  ;;  %v1455_v8 = vld [vmem:[#allocation8 + $0xf98] sm:$0xff] }
 0x28f   : > { %1712 = vmatprep.subr.mxu1 %v1387_v5  ;;  %2894 = vmatpush1.msra.mxu0 %v1971_v10  ;;  %v2275_v5 = vld [vmem:[#allocation11 + $0xf80] sm:$0xff]  ;;  %v1454_v10 = vld [vmem:[#allocation8 + $0xf90] sm:$0xff] }
 0x290   : > { %1713 = vmatpush1.msra.mxu1 %v1386_v7  ;;  %2895 = vmatprep.subr.mxu0 %v1956_v12  ;;  %v2260_v7 = vld [vmem:[#allocation11 + $0xf08] sm:$0xff]  ;;  %v1451_v12 = vld [vmem:[#allocation8 + $0xf78] sm:$0xff] }
 0x291   : > { %1714 = vmatprep.subr.mxu1 %v1383_v9  ;;  %2896 = vmatpush1.msra.mxu0 %v1955_v14  ;;  %v2259_v9 = vld [vmem:[#allocation11 + $0xf00] sm:$0xff]  ;;  %v1450_v14 = vld [vmem:[#allocation8 + $0xf70] sm:$0xff] }
 0x292   : > { %1715 = vmatpush1.msra.mxu1 %v1382_v11  ;;  %2897 = vmatprep.subr.mxu0 %v1940_v16  ;;  %v2244_v11 = vld [vmem:[#allocation11 + $0xe88] sm:$0xff]  ;;  %v1447_v16 = vld [vmem:[#allocation8 + $0xf58] sm:$0xff] }
 0x293   : > { %1716 = vmatprep.subr.mxu1 %v1379_v13  ;;  %2898 = vmatpush1.msra.mxu0 %v1939_v18  ;;  %v2243_v13 = vld [vmem:[#allocation11 + $0xe80] sm:$0xff]  ;;  %v1446_v18 = vld [vmem:[#allocation8 + $0xf50] sm:$0xff] }
 0x294   : > { %1717 = vmatpush1.msra.mxu1 %v1378_v15  ;;  %2899 = vmatprep.subr.mxu0 %v1924_v20  ;;  %v2228_v15 = vld [vmem:[#allocation11 + $0xe08] sm:$0xff]  ;;  %v1443_v20 = vld [vmem:[#allocation8 + $0xf38] sm:$0xff] }
 0x295   : > { %1718 = vmatprep.subr.mxu1 %v1375_v17  ;;  %2900 = vmatpush1.msra.mxu0 %v1923_v58  ;;  %v2227_v17 = vld [vmem:[#allocation11 + $0xe00] sm:$0xff]  ;;  %v1442_v58 = vld [vmem:[#allocation8 + $0xf30] sm:$0xff] }
 0x296   : > { %1719 = vmatpush1.msra.mxu1 %v1374_v19  ;;  %2901 = vmatprep.subr.mxu0 %v1908_v21  ;;  %v2212_v19 = vld [vmem:[#allocation11 + $0xd88] sm:$0xff]  ;;  %v1439_v21 = vld [vmem:[#allocation8 + $0xf18] sm:$0xff] }
 0x297   : > { %1720 = vmatprep.subr.mxu1 %v1371_v50  ;;  %2902 = vmatpush1.msra.mxu0 %v1907_v23  ;;  %v2211_v50 = vld [vmem:[#allocation11 + $0xd80] sm:$0xff]  ;;  %v1438_v23 = vld [vmem:[#allocation8 + $0xf10] sm:$0xff] }
 0x298   : > { %1721 = vmatpush1.msra.mxu1 %v1370_v55  ;;  %2903 = vmatprep.subr.mxu0 %v1892_v25  ;;  %v2196_v55 = vld [vmem:[#allocation11 + $0xd08] sm:$0xff]  ;;  %v1435_v25 = vld [vmem:[#allocation8 + $0xef8] sm:$0xff] }
 0x299   : > { %1722 = vmatprep.subr.mxu1 %v1367_v22  ;;  %2904 = vmatpush1.msra.mxu0 %v1891_v28  ;;  %v2195_v22 = vld [vmem:[#allocation11 + $0xd00] sm:$0xff]  ;;  %v1434_v28 = vld [vmem:[#allocation8 + $0xef0] sm:$0xff] }
 0x29a   : > { %1723 = vmatpush1.msra.mxu1 %v1366_v24  ;;  %2905 = vmatprep.subr.mxu0 %v1876_v30  ;;  %v2180_v24 = vld [vmem:[#allocation11 + $0xc88] sm:$0xff]  ;;  %v1431_v30 = vld [vmem:[#allocation8 + $0xed8] sm:$0xff] }
 0x29b   : > { %1724 = vmatprep.subr.mxu1 %v1363_v26  ;;  %2906 = vmatpush1.msra.mxu0 %v1875_v33  ;;  %v2179_v26 = vld [vmem:[#allocation11 + $0xc80] sm:$0xff]  ;;  %v1430_v33 = vld [vmem:[#allocation8 + $0xed0] sm:$0xff] }
 0x29c   : > { %1725 = vmatpush1.msra.mxu1 %v1362_v29  ;;  %2907 = vmatprep.subr.mxu0 %v1860_v35  ;;  %v2164_v29 = vld [vmem:[#allocation11 + $0xc08] sm:$0xff]  ;;  %v1427_v35 = vld [vmem:[#allocation8 + $0xeb8] sm:$0xff] }
 0x29d   : > { %1726 = vmatprep.subr.mxu1 %v1359_v32  ;;  %2908 = vmatpush1.msra.mxu0 %v1859_v40  ;;  %v2163_v32 = vld [vmem:[#allocation11 + $0xc00] sm:$0xff]  ;;  %v1426_v40 = vld [vmem:[#allocation8 + $0xeb0] sm:$0xff] }
 0x29e   : > { %1727 = vmatpush1.msra.mxu1 %v1358_v34  ;;  %2909 = vmatprep.subr.mxu0 %v1844_v44  ;;  %v2148_v34 = vld [vmem:[#allocation11 + $0xb88] sm:$0xff]  ;;  %v1423_v44 = vld [vmem:[#allocation8 + $0xe98] sm:$0xff] }
 0x29f   : > { %1728 = vmatprep.subr.mxu1 %v1355_v36  ;;  %2910 = vmatpush1.msra.mxu0 %v1843_v46  ;;  %v2147_v36 = vld [vmem:[#allocation11 + $0xb80] sm:$0xff]  ;;  %v1422_v46 = vld [vmem:[#allocation8 + $0xe90] sm:$0xff] }
 0x2a0   : > { %1729 = vmatpush1.msra.mxu1 %v1354_v43  ;;  %2911 = vmatprep.subr.mxu0 %v1828_v48  ;;  %v2132_v43 = vld [vmem:[#allocation11 + $0xb08] sm:$0xff]  ;;  %v1419_v48 = vld [vmem:[#allocation8 + $0xe78] sm:$0xff] }
 0x2a1   : > { %1730 = vmatprep.subr.mxu1 %v1351_v45  ;;  %2912 = vmatpush1.msra.mxu0 %v1827_v53  ;;  %v2131_v45 = vld [vmem:[#allocation11 + $0xb00] sm:$0xff]  ;;  %v1418_v53 = vld [vmem:[#allocation8 + $0xe70] sm:$0xff] }
 0x2a2   : > { %1731 = vmatpush1.msra.mxu1 %v1350_v47  ;;  %2913 = vmatprep.subr.mxu0 %v1812_v54  ;;  %v2116_v47 = vld [vmem:[#allocation11 + $0xa88] sm:$0xff]  ;;  %v1415_v54 = vld [vmem:[#allocation8 + $0xe58] sm:$0xff] }
 0x2a3   : > { %1732 = vmatprep.subr.mxu1 %v1347_v52  ;;  %2914 = vmatpush1.msra.mxu0 %v1811_v59  ;;  %v2115_v52 = vld [vmem:[#allocation11 + $0xa80] sm:$0xff]  ;;  %v1414_v59 = vld [vmem:[#allocation8 + $0xe50] sm:$0xff] }
 0x2a4   : > { %1733 = vmatpush1.msra.mxu1 %v1346_v49  ;;  %2915 = vmatprep.subr.mxu0 %v1796_v61  ;;  %v2100_v49 = vld [vmem:[#allocation11 + $0xa08] sm:$0xff]  ;;  %v1411_v61 = vld [vmem:[#allocation8 + $0xe38] sm:$0xff] }
 0x2a5   : > { %1734 = vmatprep.subr.mxu1 %v1343_v56  ;;  %2916 = vmatpush1.msra.mxu0 %v1795_v63  ;;  %v2099_v56 = vld [vmem:[#allocation11 + $0xa00] sm:$0xff]  ;;  %v1407_v63 = vld [vmem:[#allocation8 + $0xe18] sm:$0xff]  ;;  %v2516_v51 = vld [vmem:[#allocation11 + $0x1708] sm:$0xff] }
 0x2a6   : > { %1735 = vmatpush1.msra.mxu1 %v1342_v60  ;;  %2917 = vmatprep.subr.mxu0 %v1780_v1  ;;  %v2084_v60 = vld [vmem:[#allocation11 + $0x988] sm:$0xff]  ;;  %v2083_v1 = vld [vmem:[#allocation11 + $0x980] sm:$0xff] }
 0x2a7   : > { %1736 = vmatprep.subr.mxu1 %v1467_v62  ;;  %2918 = vmatpush1.msra.mxu0 %v1779_v3  ;;  %v1410_v62 = vld [vmem:[#allocation8 + $0xe30] sm:$0xff]  ;;  %v2067_v3 = vld [vmem:[#allocation11 + $0x900] sm:$0xff] }
 0x2a8   : > { %1737 = vmatpush2.msra.mxu1 %v1466_v0  ;;  %2919 = vmatprep.subr.mxu0 %v2276_v27  ;;  %v1406_v0 = vld [vmem:[#allocation8 + $0xe10] sm:$0xff]  ;;  %v2051_v27 = vld [vmem:[#allocation11 + $0x880] sm:$0xff] }
 0x2a9   : > { %1738 = vmatprep.subr.mxu1 %v1463_v2  ;;  %2920 = vmatpush2.msra.mxu0 %v2275_v5  ;;  %v2068_v2 = vld [vmem:[#allocation11 + $0x908] sm:$0xff]  ;;  %v2035_v5 = vld [vmem:[#allocation11 + $0x800] sm:$0xff] }
 0x2aa   : > { %1739 = vmatpush2.msra.mxu1 %v1462_v4  ;;  %2921 = vmatprep.subr.mxu0 %v2260_v7  ;;  %v2052_v4 = vld [vmem:[#allocation11 + $0x888] sm:$0xff]  ;;  %v2531_v7 = vld [vmem:[#allocation11 + $0x1780] sm:$0xff] }
 0x2ab   : > { %1740 = vmatprep.subr.mxu1 %v1459_v31  ;;  %2922 = vmatpush2.msra.mxu0 %v2259_v9  ;;  %v2036_v31 = vld [vmem:[#allocation11 + $0x808] sm:$0xff] }
 0x2ac   : > { %1741 = vmatpush2.msra.mxu1 %v1458_v6  ;;  %2923 = vmatprep.subr.mxu0 %v2244_v11  ;;  %v2532_v6 = vld [vmem:[#allocation11 + $0x1788] sm:$0xff] }
 0x2ad   : > { %1742 = vmatprep.subr.mxu1 %v1455_v8  ;;  %2924 = vmatpush2.msra.mxu0 %v2243_v13  ;;  %v2022_v8 = vld [vmem:[#allocation11 + $0x798] sm:$0xff]  ;;  %v2500_v9 = vld [vmem:[#allocation11 + $0x1688] sm:$0xff] }
 0x2ae   : > { %1743 = vmatpush2.msra.mxu1 %v1454_v10  ;;  %2925 = vmatprep.subr.mxu0 %v2228_v15  ;;  %v2499_v10 = vld [vmem:[#allocation11 + $0x1680] sm:$0xff]  ;;  %v2484_v11 = vld [vmem:[#allocation11 + $0x1608] sm:$0xff] }
 0x2af   : > { %1744 = vmatprep.subr.mxu1 %v1451_v12  ;;  %2926 = vmatpush2.msra.mxu0 %v2227_v17  ;;  %v2483_v12 = vld [vmem:[#allocation11 + $0x1600] sm:$0xff]  ;;  %v2468_v13 = vld [vmem:[#allocation11 + $0x1588] sm:$0xff] }
 0x2b0   : > { %1745 = vmatpush2.msra.mxu1 %v1450_v14  ;;  %2927 = vmatprep.subr.mxu0 %v2212_v19  ;;  %v2467_v14 = vld [vmem:[#allocation11 + $0x1580] sm:$0xff]  ;;  %v2452_v15 = vld [vmem:[#allocation11 + $0x1508] sm:$0xff] }
 0x2b1   : > { %1746 = vmatprep.subr.mxu1 %v1447_v16  ;;  %2928 = vmatpush2.msra.mxu0 %v2211_v50  ;;  %v2451_v16 = vld [vmem:[#allocation11 + $0x1500] sm:$0xff]  ;;  %v2436_v17 = vld [vmem:[#allocation11 + $0x1488] sm:$0xff] }
 0x2b2   : > { %1747 = vmatpush2.msra.mxu1 %v1446_v18  ;;  %2929 = vmatprep.subr.mxu0 %v2196_v55  ;;  %v2435_v18 = vld [vmem:[#allocation11 + $0x1480] sm:$0xff]  ;;  %v2420_v19 = vld [vmem:[#allocation11 + $0x1408] sm:$0xff] }
 0x2b3   : > { %1748 = vmatprep.subr.mxu1 %v1443_v20  ;;  %2930 = vmatpush2.msra.mxu0 %v2195_v22  ;;  %v2419_v20 = vld [vmem:[#allocation11 + $0x1400] sm:$0xff]  ;;  %v2404_v50 = vld [vmem:[#allocation11 + $0x1388] sm:$0xff] }
 0x2b4   : > { %1749 = vmatpush2.msra.mxu1 %v1442_v58  ;;  %2931 = vmatprep.subr.mxu0 %v2180_v24  ;;  %v2403_v58 = vld [vmem:[#allocation11 + $0x1380] sm:$0xff]  ;;  %v2388_v55 = vld [vmem:[#allocation11 + $0x1308] sm:$0xff] }
 0x2b5   : > { %1750 = vmatprep.subr.mxu1 %v1439_v21  ;;  %2932 = vmatpush2.msra.mxu0 %v2179_v26  ;;  %v2387_v21 = vld [vmem:[#allocation11 + $0x1300] sm:$0xff]  ;;  %v2372_v22 = vld [vmem:[#allocation11 + $0x1288] sm:$0xff] }
 0x2b6   : > { %1751 = vmatpush2.msra.mxu1 %v1438_v23  ;;  %2933 = vmatprep.subr.mxu0 %v2164_v29  ;;  %v2371_v23 = vld [vmem:[#allocation11 + $0x1280] sm:$0xff]  ;;  %v2356_v24 = vld [vmem:[#allocation11 + $0x1208] sm:$0xff] }
 0x2b7   : > { %1752 = vmatprep.subr.mxu1 %v1435_v25  ;;  %2934 = vmatpush2.msra.mxu0 %v2163_v32  ;;  %v2355_v25 = vld [vmem:[#allocation11 + $0x1200] sm:$0xff]  ;;  %v2340_v26 = vld [vmem:[#allocation11 + $0x1188] sm:$0xff] }
 0x2b8   : > { %1753 = vmatpush2.msra.mxu1 %v1434_v28  ;;  %2935 = vmatprep.subr.mxu0 %v2148_v34  ;;  %v2339_v28 = vld [vmem:[#allocation11 + $0x1180] sm:$0xff]  ;;  %v2324_v29 = vld [vmem:[#allocation11 + $0x1108] sm:$0xff] }
 0x2b9   : > { %1754 = vmatprep.subr.mxu1 %v1431_v30  ;;  %2936 = vmatpush2.msra.mxu0 %v2147_v36  ;;  %v2323_v30 = vld [vmem:[#allocation11 + $0x1100] sm:$0xff]  ;;  %v2308_v32 = vld [vmem:[#allocation11 + $0x1088] sm:$0xff] }
 0x2ba   : > { %1755 = vmatpush2.msra.mxu1 %v1430_v33  ;;  %2937 = vmatprep.subr.mxu0 %v2132_v43  ;;  %v2307_v33 = vld [vmem:[#allocation11 + $0x1080] sm:$0xff]  ;;  %v2292_v34 = vld [vmem:[#allocation11 + $0x1008] sm:$0xff] }
 0x2bb   : > { %1756 = vmatprep.subr.mxu1 %v1427_v35  ;;  %2938 = vmatpush2.msra.mxu0 %v2131_v45  ;;  %v2291_v35 = vld [vmem:[#allocation11 + $0x1000] sm:$0xff]  ;;  %v2788_v36 = vld [vmem:[#allocation11 + $0x1f88] sm:$0xff] }
 0x2bc   : > { %1757 = vmatpush2.msra.mxu1 %v1426_v40  ;;  %2939 = vmatprep.subr.mxu0 %v2116_v47  ;;  %v2787_v40 = vld [vmem:[#allocation11 + $0x1f80] sm:$0xff]  ;;  %v2772_v43 = vld [vmem:[#allocation11 + $0x1f08] sm:$0xff] }
 0x2bd   : > { %1758 = vmatprep.subr.mxu1 %v1423_v44  ;;  %2940 = vmatpush2.msra.mxu0 %v2115_v52  ;;  %v2771_v44 = vld [vmem:[#allocation11 + $0x1f00] sm:$0xff]  ;;  %v2756_v45 = vld [vmem:[#allocation11 + $0x1e88] sm:$0xff] }
 0x2be   : > { %1759 = vmatpush2.msra.mxu1 %v1422_v46  ;;  %2941 = vmatprep.subr.mxu0 %v2100_v49  ;;  %v2755_v46 = vld [vmem:[#allocation11 + $0x1e80] sm:$0xff]  ;;  %v2740_v47 = vld [vmem:[#allocation11 + $0x1e08] sm:$0xff] }
 0x2bf   : > { %1760 = vmatprep.subr.mxu1 %v1419_v48  ;;  %2942 = vmatpush2.msra.mxu0 %v2099_v56  ;;  %v2739_v48 = vld [vmem:[#allocation11 + $0x1e00] sm:$0xff]  ;;  %v2724_v52 = vld [vmem:[#allocation11 + $0x1d88] sm:$0xff] }
 0x2c0   : > { %1761 = vmatpush2.msra.mxu1 %v1418_v53  ;;  %2943 = vmatprep.subr.mxu0 %v2084_v60  ;;  %v2723_v53 = vld [vmem:[#allocation11 + $0x1d80] sm:$0xff]  ;;  %v2708_v49 = vld [vmem:[#allocation11 + $0x1d08] sm:$0xff] }
 0x2c1   : > { %1762 = vmatprep.subr.mxu1 %v1415_v54  ;;  %2944 = vmatpush2.msra.mxu0 %v2083_v1  ;;  %v2707_v54 = vld [vmem:[#allocation11 + $0x1d00] sm:$0xff]  ;;  %v2692_v56 = vld [vmem:[#allocation11 + $0x1c88] sm:$0xff] }
 0x2c2   : > { %1763 = vmatpush2.msra.mxu1 %v1414_v59  ;;  %2945 = vmatprep.subr.mxu0 %v2068_v2  ;;  %v2691_v59 = vld [vmem:[#allocation11 + $0x1c80] sm:$0xff]  ;;  %v2676_v60 = vld [vmem:[#allocation11 + $0x1c08] sm:$0xff] }
 0x2c3   : > { %1764 = vmatprep.subr.mxu1 %v1411_v61  ;;  %2946 = vmatpush2.msra.mxu0 %v2067_v3  ;;  %v2675_v61 = vld [vmem:[#allocation11 + $0x1c00] sm:$0xff]  ;;  %v2628_v2 = vld [vmem:[#allocation11 + $0x1a88] sm:$0xff] }
 0x2c4   : > { %1765 = vmatpush2.msra.mxu1 %v1410_v62  ;;  %2947 = vmatprep.subr.mxu0 %v2052_v4  ;;  %v2660_v62 = vld [vmem:[#allocation11 + $0x1b88] sm:$0xff]  ;;  %v2643_v1 = vld [vmem:[#allocation11 + $0x1b00] sm:$0xff] }
 0x2c5   : > { %1766 = vmatprep.subr.mxu1 %v1407_v63  ;;  %2948 = vmatpush2.msra.mxu0 %v2051_v27  ;;  %v2659_v63 = vld [vmem:[#allocation11 + $0x1b80] sm:$0xff]  ;;  %v2612_v4 = vld [vmem:[#allocation11 + $0x1a08] sm:$0xff] }
 0x2c6   : > { %1767 = vmatpush2.msra.mxu1 %v1406_v0  ;;  %2949 = vmatprep.subr.mxu0 %v2036_v31  ;;  %v2644_v0 = vld [vmem:[#allocation11 + $0x1b08] sm:$0xff]  ;;  %v2627_v3 = vld [vmem:[#allocation11 + $0x1a80] sm:$0xff] }
 0x2c7   : > { %1769 = vmatmul.mubr.f32.vlgmr.msra.gmra.mxu1 %v1209_v57  ;;  %2958 = vmatprep.subr.mxu1 %v2532_v6  ;;  %v2515_v57 = vld [vmem:[#allocation11 + $0x1700] sm:$0xff]  ;;  %v2596_v31 = vld [vmem:[#allocation11 + $0x1988] sm:$0xff] }
 0x2c8   : > { %2950 = vmatpush2.msra.mxu0 %v2035_v5  ;;  %2959 = vmatpush1.msra.mxu1 %v2531_v7  ;;  %v2611_v27 = vld [vmem:[#allocation11 + $0x1a00] sm:$0xff]  ;;  %v2580_v6 = vld [vmem:[#allocation11 + $0x1908] sm:$0xff] }
 0x2c9   : > { %3029 = vmatprep.subr.mxu0 %v2022_v8  ;;  %2960 = vmatprep.subr.mxu1 %v2516_v51  ;;  %v2595_v5 = vld [vmem:[#allocation11 + $0x1980] sm:$0xff]  ;;  %v2564_v8 = vld [vmem:[#allocation11 + $0x1888] sm:$0xff] }
 0x2ca   : > { %2961 = vmatpush1.msra.mxu1 %v2515_v57  ;;  %v2579_v7 = vld [vmem:[#allocation11 + $0x1900] sm:$0xff]  ;;  %v2548_v57 = vld [vmem:[#allocation11 + $0x1808] sm:$0xff] }
 0x2cb   : > { %2962 = vmatprep.subr.mxu1 %v2500_v9  ;;  %v2563_v51 = vld [vmem:[#allocation11 + $0x1880] sm:$0xff] }
 0x2cc   : > { %2963 = vmatpush1.msra.mxu1 %v2499_v10  ;;  %v2547_v9 = vld [vmem:[#allocation11 + $0x1800] sm:$0xff]  ;;  %v2534_v10 = vld [vmem:[#allocation11 + $0x1798] sm:$0xff] }
 0x2cd   : > { %2964 = vmatprep.subr.mxu1 %v2484_v11  ;;  %v6037_v11 = vld [vmem:[#allocation10 + $0x4] sm:$0xf] }
 0x2ce   : > { %2965 = vmatpush1.msra.mxu1 %v2483_v12 }
 0x2cf   : > { %2966 = vmatprep.subr.mxu1 %v2468_v13  ;;  %v1474_v13 = vrot.slane %v6037_v11, %v5987_v39 }
 0x2d0   : > { %2967 = vmatpush1.msra.mxu1 %v2467_v14  ;;  %v1478_v14 = vrot.slane %v6037_v11, %v5990_v41 }
 0x2d1   : > { %2968 = vmatprep.subr.mxu1 %v2452_v15 }
 0x2d2   : > { %2969 = vmatpush1.msra.mxu1 %v2451_v16 }
 0x2d3   : > { %2970 = vmatprep.subr.mxu1 %v2436_v17 }
 0x2d4   : > { %2971 = vmatpush1.msra.mxu1 %v2435_v18 }
 0x2d5   : > { %2972 = vmatprep.subr.mxu1 %v2420_v19 }
 0x2d6   : > { %2973 = vmatpush1.msra.mxu1 %v2419_v20 }
 0x2d7   : > { %2974 = vmatprep.subr.mxu1 %v2404_v50 }
 0x2d8   : > { %2975 = vmatpush1.msra.mxu1 %v2403_v58 }
 0x2d9   : > { %2976 = vmatprep.subr.mxu1 %v2388_v55 }
 0x2da   : > { %2977 = vmatpush1.msra.mxu1 %v2387_v21  ;;  %v2021_v21 = vld [vmem:[#allocation11 + $0x790] sm:$0xff] }
 0x2db   : > { %2978 = vmatprep.subr.mxu1 %v2372_v22  ;;  %v2006_v22 = vld [vmem:[#allocation11 + $0x718] sm:$0xff] }
 0x2dc   : > { %2979 = vmatpush1.msra.mxu1 %v2371_v23  ;;  %v2005_v23 = vld [vmem:[#allocation11 + $0x710] sm:$0xff] }
 0x2dd   : > { %2980 = vmatprep.subr.mxu1 %v2356_v24  ;;  %v1990_v24 = vld [vmem:[#allocation11 + $0x698] sm:$0xff] }
 0x2de   : > { %2981 = vmatpush1.msra.mxu1 %v2355_v25  ;;  %v1989_v25 = vld [vmem:[#allocation11 + $0x690] sm:$0xff] }
 0x2df   : > { %2982 = vmatprep.subr.mxu1 %v2340_v26  ;;  %v1974_v26 = vld [vmem:[#allocation11 + $0x618] sm:$0xff] }
 0x2e0   : > { %2983 = vmatpush1.msra.mxu1 %v2339_v28  ;;  %v1973_v28 = vld [vmem:[#allocation11 + $0x610] sm:$0xff] }
 0x2e1   : > { %2984 = vmatprep.subr.mxu1 %v2324_v29  ;;  %v1958_v29 = vld [vmem:[#allocation11 + $0x598] sm:$0xff] }
 0x2e2   : > { %2985 = vmatpush1.msra.mxu1 %v2323_v30  ;;  %v1957_v30 = vld [vmem:[#allocation11 + $0x590] sm:$0xff] }
 0x2e3   : > { %2986 = vmatprep.subr.mxu1 %v2308_v32  ;;  %v1942_v32 = vld [vmem:[#allocation11 + $0x518] sm:$0xff] }
 0x2e4   : > { %2987 = vmatpush1.msra.mxu1 %v2307_v33  ;;  %v1941_v33 = vld [vmem:[#allocation11 + $0x510] sm:$0xff] }
 0x2e5   : > { %2988 = vmatprep.subr.mxu1 %v2292_v34  ;;  %v1926_v34 = vld [vmem:[#allocation11 + $0x498] sm:$0xff] }
 0x2e6   : > { %2989 = vmatpush1.msra.mxu1 %v2291_v35  ;;  %v1925_v35 = vld [vmem:[#allocation11 + $0x490] sm:$0xff] }
 0x2e7   : > { %2990 = vmatprep.subr.mxu1 %v2788_v36  ;;  %v1910_v36 = vld [vmem:[#allocation11 + $0x418] sm:$0xff] }
 0x2e8   : > { %2991 = vmatpush2.msra.mxu1 %v2787_v40  ;;  %v1909_v40 = vld [vmem:[#allocation11 + $0x410] sm:$0xff] }
 0x2e9   : > { %2992 = vmatprep.subr.mxu1 %v2772_v43  ;;  %v1894_v43 = vld [vmem:[#allocation11 + $0x398] sm:$0xff] }
 0x2ea   : > { %2993 = vmatpush2.msra.mxu1 %v2771_v44  ;;  %v1893_v44 = vld [vmem:[#allocation11 + $0x390] sm:$0xff] }
 0x2eb   : > { %2994 = vmatprep.subr.mxu1 %v2756_v45  ;;  %v1878_v45 = vld [vmem:[#allocation11 + $0x318] sm:$0xff] }
 0x2ec   : > { %2995 = vmatpush2.msra.mxu1 %v2755_v46  ;;  %v1877_v46 = vld [vmem:[#allocation11 + $0x310] sm:$0xff] }
 0x2ed   : > { %2996 = vmatprep.subr.mxu1 %v2740_v47  ;;  %v1862_v47 = vld [vmem:[#allocation11 + $0x298] sm:$0xff] }
 0x2ee   : > { %2997 = vmatpush2.msra.mxu1 %v2739_v48  ;;  %v1861_v48 = vld [vmem:[#allocation11 + $0x290] sm:$0xff] }
 0x2ef   : > { %2998 = vmatprep.subr.mxu1 %v2724_v52  ;;  %v1846_v52 = vld [vmem:[#allocation11 + $0x218] sm:$0xff] }
 0x2f0   : > { %2999 = vmatpush2.msra.mxu1 %v2723_v53  ;;  %v1845_v53 = vld [vmem:[#allocation11 + $0x210] sm:$0xff] }
 0x2f1   : > { %3000 = vmatprep.subr.mxu1 %v2708_v49  ;;  %v1830_v49 = vld [vmem:[#allocation11 + $0x198] sm:$0xff] }
 0x2f2   : > { %3001 = vmatpush2.msra.mxu1 %v2707_v54  ;;  %v1829_v54 = vld [vmem:[#allocation11 + $0x190] sm:$0xff] }
 0x2f3   : > { %3002 = vmatprep.subr.mxu1 %v2692_v56  ;;  %v1814_v56 = vld [vmem:[#allocation11 + $0x118] sm:$0xff] }
 0x2f4   : > { %3003 = vmatpush2.msra.mxu1 %v2691_v59  ;;  %v1813_v59 = vld [vmem:[#allocation11 + $0x110] sm:$0xff] }
 0x2f5   : > { %3004 = vmatprep.subr.mxu1 %v2676_v60  ;;  %v1798_v60 = vld [vmem:[#allocation11 + $0x98] sm:$0xff] }
 0x2f6   : > { %3005 = vmatpush2.msra.mxu1 %v2675_v61  ;;  %v1797_v61 = vld [vmem:[#allocation11 + $0x90] sm:$0xff] }
 0x2f7   : > { %3006 = vmatprep.subr.mxu1 %v2660_v62  ;;  %v1782_v62 = vld [vmem:[#allocation11 + $0x18] sm:$0xff] }
 0x2f8   : > { %3007 = vmatpush2.msra.mxu1 %v2659_v63  ;;  %v1781_v63 = vld [vmem:[#allocation11 + $0x10] sm:$0xff] }
 0x2f9   : > { %3008 = vmatprep.subr.mxu1 %v2644_v0  ;;  %v2278_v0 = vld [vmem:[#allocation11 + $0xf98] sm:$0xff] }
 0x2fa   : > { %3009 = vmatpush2.msra.mxu1 %v2643_v1  ;;  %v2277_v1 = vld [vmem:[#allocation11 + $0xf90] sm:$0xff] }
 0x2fb   : > { %3010 = vmatprep.subr.mxu1 %v2628_v2  ;;  %v2262_v2 = vld [vmem:[#allocation11 + $0xf18] sm:$0xff] }
 0x2fc   : > { %3011 = vmatpush2.msra.mxu1 %v2627_v3  ;;  %v2261_v3 = vld [vmem:[#allocation11 + $0xf10] sm:$0xff] }
 0x2fd   : > { %3012 = vmatprep.subr.mxu1 %v2612_v4  ;;  %v2246_v4 = vld [vmem:[#allocation11 + $0xe98] sm:$0xff] }
 0x2fe   : > { %3013 = vmatpush2.msra.mxu1 %v2611_v27  ;;  %v2245_v27 = vld [vmem:[#allocation11 + $0xe90] sm:$0xff] }
 0x2ff   : > { %3014 = vmatprep.subr.mxu1 %v2596_v31  ;;  %v2230_v31 = vld [vmem:[#allocation11 + $0xe18] sm:$0xff] }
 0x300   : > { %3015 = vmatpush2.msra.mxu1 %v2595_v5  ;;  %v2229_v5 = vld [vmem:[#allocation11 + $0xe10] sm:$0xff] }
 0x301   : > { %3016 = vmatprep.subr.mxu1 %v2580_v6  ;;  %v2214_v6 = vld [vmem:[#allocation11 + $0xd98] sm:$0xff] }
 0x302   : > { %3017 = vmatpush2.msra.mxu1 %v2579_v7  ;;  %v2213_v7 = vld [vmem:[#allocation11 + $0xd90] sm:$0xff] }
 0x303   : > { %3018 = vmatprep.subr.mxu1 %v2564_v8  ;;  %v2198_v8 = vld [vmem:[#allocation11 + $0xd18] sm:$0xff] }
 0x304   : > { %3019 = vmatpush2.msra.mxu1 %v2563_v51  ;;  %v2197_v51 = vld [vmem:[#allocation11 + $0xd10] sm:$0xff] }
 0x305   : > { %3020 = vmatprep.subr.mxu1 %v2548_v57  ;;  %v2182_v57 = vld [vmem:[#allocation11 + $0xc98] sm:$0xff] }
 0x306   : > { %3021 = vmatpush2.msra.mxu1 %v2547_v9  ;;  %v1557_v12 = vpop.f32.mrf.mxu0  ;;  %v2181_v9 = vld [vmem:[#allocation11 + $0xc90] sm:$0xff] }
 0x307   : > { %3100 = vmatprep.subr.mxu1 %v2534_v10  ;;  %v1558_v16 = vadd.f32 %v1557_v12, %v1474_v13  ;;  %v2166_v10 = vld [vmem:[#allocation11 + $0xc18] sm:$0xff]  ;;  %v2165_v12 = vld [vmem:[#allocation11 + $0xc10] sm:$0xff] }
 0x308   : > { %v1559_v15 = vpop.f32.mrf.mxu0  ;;  %v2150_v13 = vld [vmem:[#allocation11 + $0xb98] sm:$0xff] }
 0x309   : > { %v1560_v18 = vadd.f32 %v1559_v15, %v1478_v14  ;;  %v2149_v14 = vld [vmem:[#allocation11 + $0xb90] sm:$0xff]  ;;  %v2134_v15 = vld [vmem:[#allocation11 + $0xb18] sm:$0xff] }
 0x347   : > { %v1628_v17 = vpop.f32.mrf.mxu1 }
 0x348   : > { %v1629_v19 = vadd.f32 %v1628_v17, %v1558_v16  ;;  %v2133_v16 = vld [vmem:[#allocation11 + $0xb10] sm:$0xff]  ;;  %v2118_v17 = vld [vmem:[#allocation11 + $0xa98] sm:$0xff] }
 0x349   : > { %v1630_v20 = vpop.f32.mrf.mxu1 }
 0x34a   : > { %v1631_v50 = vadd.f32 %v1630_v20, %v1560_v18  ;;  %v6045_v55 = vmax.f32 %v1629_v19, 0.0  ;;  %v1699_v18 = vpop.f32.mrf.mxu0  ;;  %v2117_v19 = vld [vmem:[#allocation11 + $0xa90] sm:$0xff]  ;;  %v2102_v20 = vld [vmem:[#allocation11 + $0xa18] sm:$0xff] }
 0x34c   : > { %v6043_v58 = vmax.f32 %v1631_v50, 0.0  ;;  %v1482_v50 = vrot.slane %v6037_v11, %v5984_v38 }
 0x34e   : > { %2951 = vmatprep.mubr.f32.mxu0 %v6043_v58 }
 0x34f   : > { %2952 = vmatmul.mubr.f32.vlgmr.msra.gmra.mxu0 %v6045_v55 }
 0x350   : > { %3030 = vmatpush1.msra.mxu0 %v2021_v21  ;;  %3093 = vmatprep.mubr.f32.mxu0 %v6043_v58  ;;  %v2101_v21 = vld [vmem:[#allocation11 + $0xa10] sm:$0xff] }
 0x351   : > { %3031 = vmatprep.subr.mxu0 %v2006_v22  ;;  %v1486_v22 = vrot.slane %v6037_v11, %v5993_v42  ;;  %v2038_v11 = vld [vmem:[#allocation11 + $0x818] sm:$0xff] }
 0x352   : > { %3032 = vmatpush1.msra.mxu0 %v2005_v23  ;;  %v2086_v23 = vld [vmem:[#allocation11 + $0x998] sm:$0xff] }
 0x353   : > { %3033 = vmatprep.subr.mxu0 %v1990_v24  ;;  %v1701_v24 = vpop.f32.mrf.mxu0 }
 0x354   : > { %3034 = vmatpush1.msra.mxu0 %v1989_v25  ;;  %v2085_v25 = vld [vmem:[#allocation11 + $0x990] sm:$0xff] }
 0x355   : > { %3035 = vmatprep.subr.mxu0 %v1974_v26  ;;  %v2070_v26 = vld [vmem:[#allocation11 + $0x918] sm:$0xff] }
 0x356   : > { %3036 = vmatpush1.msra.mxu0 %v1973_v28  ;;  %v1700_v28 = vadd.f32 %v1699_v18, %v1482_v50  ;;  %v2390_v18 = vld [vmem:[#allocation11 + $0x1318] sm:$0xff]  ;;  %v1880_v50 = vld [vmem:[#allocation11 + $0x328] sm:$0xff] }
 0x357   : > { %3037 = vmatprep.subr.mxu0 %v1958_v29 }
 0x358   : > { %3038 = vmatpush1.msra.mxu0 %v1957_v30  ;;  %v2069_v30 = vld [vmem:[#allocation11 + $0x910] sm:$0xff] }
 0x359   : > { %3039 = vmatprep.subr.mxu0 %v1942_v32  ;;  %v1702_v32 = vadd.f32 %v1701_v24, %v1486_v22  ;;  %v1879_v22 = vld [vmem:[#allocation11 + $0x320] sm:$0xff]  ;;  %v1864_v24 = vld [vmem:[#allocation11 + $0x2a8] sm:$0xff] }
 0x35a   : > { %3040 = vmatpush1.msra.mxu0 %v1941_v33  ;;  %v2054_v33 = vld [vmem:[#allocation11 + $0x898] sm:$0xff] }
 0x35b   : > { %3041 = vmatprep.subr.mxu0 %v1926_v34 }
 0x35c   : > { %3042 = vmatpush1.msra.mxu0 %v1925_v35 }
 0x35d   : > { %3043 = vmatprep.subr.mxu0 %v1910_v36  ;;  %v2053_v36 = vld [vmem:[#allocation11 + $0x890] sm:$0xff] }
 0x35e   : > { %3044 = vmatpush1.msra.mxu0 %v1909_v40 }
 0x35f   : > { %3045 = vmatprep.subr.mxu0 %v1894_v43  ;;  %v2037_v43 = vld [vmem:[#allocation11 + $0x810] sm:$0xff] }
 0x360   : > { %3046 = vmatpush1.msra.mxu0 %v1893_v44 }
 0x361   : > { %3047 = vmatprep.subr.mxu0 %v1878_v45 }
 0x362   : > { %3048 = vmatpush1.msra.mxu0 %v1877_v46  ;;  %v2533_v46 = vld [vmem:[#allocation11 + $0x1790] sm:$0xff] }
 0x363   : > { %3049 = vmatprep.subr.mxu0 %v1862_v47  ;;  %v2024_v47 = vld [vmem:[#allocation11 + $0x7a8] sm:$0xff] }
 0x364   : > { %3050 = vmatpush1.msra.mxu0 %v1861_v48  ;;  %v2518_v48 = vld [vmem:[#allocation11 + $0x1718] sm:$0xff] }
 0x365   : > { %3051 = vmatprep.subr.mxu0 %v1846_v52  ;;  %v2023_v52 = vld [vmem:[#allocation11 + $0x7a0] sm:$0xff] }
 0x366   : > { %3052 = vmatpush1.msra.mxu0 %v1845_v53  ;;  %v2517_v53 = vld [vmem:[#allocation11 + $0x1710] sm:$0xff] }
 0x367   : > { %3053 = vmatprep.subr.mxu0 %v1830_v49  ;;  %v2008_v49 = vld [vmem:[#allocation11 + $0x728] sm:$0xff] }
 0x368   : > { %3054 = vmatpush1.msra.mxu0 %v1829_v54  ;;  %v2502_v54 = vld [vmem:[#allocation11 + $0x1698] sm:$0xff] }
 0x369   : > { %3055 = vmatprep.subr.mxu0 %v1814_v56  ;;  %v2007_v56 = vld [vmem:[#allocation11 + $0x720] sm:$0xff] }
 0x36a   : > { %3056 = vmatpush1.msra.mxu0 %v1813_v59  ;;  %v2501_v59 = vld [vmem:[#allocation11 + $0x1690] sm:$0xff] }
 0x36b   : > { %3057 = vmatprep.subr.mxu0 %v1798_v60  ;;  %v1992_v60 = vld [vmem:[#allocation11 + $0x6a8] sm:$0xff] }
 0x36c   : > { %3058 = vmatpush1.msra.mxu0 %v1797_v61  ;;  %v2486_v61 = vld [vmem:[#allocation11 + $0x1618] sm:$0xff] }
 0x36d   : > { %3059 = vmatprep.subr.mxu0 %v1782_v62  ;;  %v1991_v62 = vld [vmem:[#allocation11 + $0x6a0] sm:$0xff] }
 0x36e   : > { %3060 = vmatpush1.msra.mxu0 %v1781_v63  ;;  %v2485_v63 = vld [vmem:[#allocation11 + $0x1610] sm:$0xff] }
 0x36f   : > { %3061 = vmatprep.subr.mxu0 %v2278_v0  ;;  %v1976_v0 = vld [vmem:[#allocation11 + $0x628] sm:$0xff] }
 0x370   : > { %3062 = vmatpush2.msra.mxu0 %v2277_v1  ;;  %v2470_v1 = vld [vmem:[#allocation11 + $0x1598] sm:$0xff] }
 0x371   : > { %3063 = vmatprep.subr.mxu0 %v2262_v2  ;;  %v1975_v2 = vld [vmem:[#allocation11 + $0x620] sm:$0xff] }
 0x372   : > { %3064 = vmatpush2.msra.mxu0 %v2261_v3  ;;  %v2469_v3 = vld [vmem:[#allocation11 + $0x1590] sm:$0xff] }
 0x373   : > { %3065 = vmatprep.subr.mxu0 %v2246_v4  ;;  %v1960_v4 = vld [vmem:[#allocation11 + $0x5a8] sm:$0xff] }
 0x374   : > { %3066 = vmatpush2.msra.mxu0 %v2245_v27  ;;  %v2454_v27 = vld [vmem:[#allocation11 + $0x1518] sm:$0xff] }
 0x375   : > { %3067 = vmatprep.subr.mxu0 %v2230_v31  ;;  %v1959_v31 = vld [vmem:[#allocation11 + $0x5a0] sm:$0xff] }
 0x376   : > { %3068 = vmatpush2.msra.mxu0 %v2229_v5  ;;  %v2453_v5 = vld [vmem:[#allocation11 + $0x1510] sm:$0xff] }
 0x377   : > { %3069 = vmatprep.subr.mxu0 %v2214_v6  ;;  %v1944_v6 = vld [vmem:[#allocation11 + $0x528] sm:$0xff] }
 0x378   : > { %3070 = vmatpush2.msra.mxu0 %v2213_v7  ;;  %v2438_v7 = vld [vmem:[#allocation11 + $0x1498] sm:$0xff] }
 0x379   : > { %3071 = vmatprep.subr.mxu0 %v2198_v8  ;;  %v1943_v8 = vld [vmem:[#allocation11 + $0x520] sm:$0xff] }
 0x37a   : > { %3072 = vmatpush2.msra.mxu0 %v2197_v51  ;;  %v2437_v51 = vld [vmem:[#allocation11 + $0x1490] sm:$0xff] }
 0x37b   : > { %3073 = vmatprep.subr.mxu0 %v2182_v57  ;;  %v1928_v57 = vld [vmem:[#allocation11 + $0x4a8] sm:$0xff] }
 0x37c   : > { %3074 = vmatpush2.msra.mxu0 %v2181_v9  ;;  %v2422_v9 = vld [vmem:[#allocation11 + $0x1418] sm:$0xff] }
 0x37d   : > { %3075 = vmatprep.subr.mxu0 %v2166_v10  ;;  %v1927_v10 = vld [vmem:[#allocation11 + $0x4a0] sm:$0xff] }
 0x37e   : > { %3076 = vmatpush2.msra.mxu0 %v2165_v12  ;;  %v2421_v12 = vld [vmem:[#allocation11 + $0x1410] sm:$0xff] }
 0x37f   : > { %3077 = vmatprep.subr.mxu0 %v2150_v13  ;;  %v1912_v13 = vld [vmem:[#allocation11 + $0x428] sm:$0xff] }
 0x380   : > { %3078 = vmatpush2.msra.mxu0 %v2149_v14  ;;  %v2406_v14 = vld [vmem:[#allocation11 + $0x1398] sm:$0xff] }
 0x381   : > { %3079 = vmatprep.subr.mxu0 %v2134_v15  ;;  %v1911_v15 = vld [vmem:[#allocation11 + $0x420] sm:$0xff] }
 0x382   : > { %3080 = vmatpush2.msra.mxu0 %v2133_v16  ;;  %v2405_v16 = vld [vmem:[#allocation11 + $0x1390] sm:$0xff] }
 0x383   : > { %3081 = vmatprep.subr.mxu0 %v2118_v17  ;;  %v1896_v17 = vld [vmem:[#allocation11 + $0x3a8] sm:$0xff] }
 0x384   : > { %3082 = vmatpush2.msra.mxu0 %v2117_v19  ;;  %v1895_v19 = vld [vmem:[#allocation11 + $0x3a0] sm:$0xff] }
 0x385   : > { %3083 = vmatprep.subr.mxu0 %v2102_v20  ;;  %v2389_v20 = vld [vmem:[#allocation11 + $0x1310] sm:$0xff] }
 0x386   : > { %3084 = vmatpush2.msra.mxu0 %v2101_v21  ;;  %v2374_v21 = vld [vmem:[#allocation11 + $0x1298] sm:$0xff] }
 0x387   : > { %v1770_v29 = vpop.f32.mrf.mxu1  ;;  %3085 = vmatprep.subr.mxu0 %v2086_v23  ;;  %v2373_v23 = vld [vmem:[#allocation11 + $0x1290] sm:$0xff] }
 0x388   : > { %3086 = vmatpush2.msra.mxu0 %v2085_v25  ;;  %v1771_v34 = vadd.f32 %v1770_v29, %v1700_v28  ;;  %v2358_v25 = vld [vmem:[#allocation11 + $0x1218] sm:$0xff]  ;;  %v2357_v28 = vld [vmem:[#allocation11 + $0x1210] sm:$0xff]  ;;  %v1848_v29 = vld [vmem:[#allocation11 + $0x228] sm:$0xff] }
 0x389   : > { %v1772_v35 = vpop.f32.mrf.mxu1  ;;  %3087 = vmatprep.subr.mxu0 %v2070_v26  ;;  %v1863_v26 = vld [vmem:[#allocation11 + $0x2a0] sm:$0xff] }
 0x38a   : > { %v1773_v40 = vadd.f32 %v1772_v35, %v1702_v32  ;;  %3088 = vmatpush2.msra.mxu0 %v2069_v30  ;;  %v6056_v45 = vmax.f32 %v1771_v34, 0.0  ;;  %v2342_v30 = vld [vmem:[#allocation11 + $0x1198] sm:$0xff]  ;;  %v1847_v32 = vld [vmem:[#allocation11 + $0x220] sm:$0xff]  ;;  %v1832_v34 = vld [vmem:[#allocation11 + $0x1a8] sm:$0xff] }
 0x38b   : > { %3089 = vmatprep.subr.mxu0 %v2054_v33  ;;  %v2341_v33 = vld [vmem:[#allocation11 + $0x1190] sm:$0xff]  ;;  %v2326_v35 = vld [vmem:[#allocation11 + $0x1118] sm:$0xff] }
 0x38c   : > { %v6054_v44 = vmax.f32 %v1773_v40, 0.0  ;;  %3090 = vmatpush2.msra.mxu0 %v2053_v36  ;;  %v1831_v36 = vld [vmem:[#allocation11 + $0x1a0] sm:$0xff]  ;;  %v2325_v40 = vld [vmem:[#allocation11 + $0x1110] sm:$0xff] }
 0x38d   : > { %3091 = vmatprep.subr.mxu0 %v2038_v11  ;;  %v1816_v11 = vld [vmem:[#allocation11 + $0x128] sm:$0xff] }
 0x38e   : > { %3022 = vmatprep.mubr.f32.mxu1 %v6054_v44  ;;  %3092 = vmatpush2.msra.mxu0 %v2037_v43  ;;  %v2310_v43 = vld [vmem:[#allocation11 + $0x1098] sm:$0xff] }
 0x38f   : > { %3023 = vmatmul.mubr.f32.vlgmr.msra.gmra.mxu1 %v6056_v45  ;;  %3094 = vmatmul.mubr.f32.vlgmr.msra.gmra.mxu0 %v6045_v55 }
 0x390   : > { %3101 = vmatpush1.msra.mxu1 %v2533_v46  ;;  %3171 = vmatprep.subr.mxu0 %v2024_v47  ;;  %v1815_v46 = vld [vmem:[#allocation11 + $0x120] sm:$0xff]  ;;  %v2309_v47 = vld [vmem:[#allocation11 + $0x1090] sm:$0xff] }
 0x391   : > { %3102 = vmatprep.subr.mxu1 %v2518_v48  ;;  %3164 = vmatprep.mubr.f32.mxu1 %v6054_v44  ;;  %v1800_v48 = vld [vmem:[#allocation11 + $0xa8] sm:$0xff] }
 0x392   : > { %3172 = vmatpush1.msra.mxu0 %v2023_v52  ;;  %3235 = vmatprep.mubr.f32.mxu0 %v6043_v58  ;;  %v2294_v52 = vld [vmem:[#allocation11 + $0x1018] sm:$0xff] }
 0x393   : > { %3103 = vmatpush1.msra.mxu1 %v2517_v53  ;;  %3173 = vmatprep.subr.mxu0 %v2008_v49  ;;  %v1799_v53 = vld [vmem:[#allocation11 + $0xa0] sm:$0xff]  ;;  %v2293_v49 = vld [vmem:[#allocation11 + $0x1010] sm:$0xff] }
 0x394   : > { %3104 = vmatprep.subr.mxu1 %v2502_v54  ;;  %3174 = vmatpush1.msra.mxu0 %v2007_v56  ;;  %v1784_v54 = vld [vmem:[#allocation11 + $0x28] sm:$0xff]  ;;  %v2790_v56 = vld [vmem:[#allocation11 + $0x1f98] sm:$0xff] }
 0x395   : > { %3105 = vmatpush1.msra.mxu1 %v2501_v59  ;;  %3175 = vmatprep.subr.mxu0 %v1992_v60  ;;  %v1783_v59 = vld [vmem:[#allocation11 + $0x20] sm:$0xff]  ;;  %v2789_v60 = vld [vmem:[#allocation11 + $0x1f90] sm:$0xff] }
 0x396   : > { %3106 = vmatprep.subr.mxu1 %v2486_v61  ;;  %3176 = vmatpush1.msra.mxu0 %v1991_v62  ;;  %v2280_v61 = vld [vmem:[#allocation11 + $0xfa8] sm:$0xff]  ;;  %v2774_v62 = vld [vmem:[#allocation11 + $0x1f18] sm:$0xff] }
 0x397   : > { %3107 = vmatpush1.msra.mxu1 %v2485_v63  ;;  %3177 = vmatprep.subr.mxu0 %v1976_v0  ;;  %v2279_v63 = vld [vmem:[#allocation11 + $0xfa0] sm:$0xff]  ;;  %v2773_v0 = vld [vmem:[#allocation11 + $0x1f10] sm:$0xff] }
 0x398   : > { %3108 = vmatprep.subr.mxu1 %v2470_v1  ;;  %3178 = vmatpush1.msra.mxu0 %v1975_v2  ;;  %v2264_v1 = vld [vmem:[#allocation11 + $0xf28] sm:$0xff]  ;;  %v2758_v2 = vld [vmem:[#allocation11 + $0x1e98] sm:$0xff] }
 0x399   : > { %3109 = vmatpush1.msra.mxu1 %v2469_v3  ;;  %3179 = vmatprep.subr.mxu0 %v1960_v4  ;;  %v2263_v3 = vld [vmem:[#allocation11 + $0xf20] sm:$0xff]  ;;  %v2757_v4 = vld [vmem:[#allocation11 + $0x1e90] sm:$0xff] }
 0x39a   : > { %3110 = vmatprep.subr.mxu1 %v2454_v27  ;;  %3180 = vmatpush1.msra.mxu0 %v1959_v31  ;;  %v2248_v27 = vld [vmem:[#allocation11 + $0xea8] sm:$0xff]  ;;  %v2742_v31 = vld [vmem:[#allocation11 + $0x1e18] sm:$0xff] }
 0x39b   : > { %3111 = vmatpush1.msra.mxu1 %v2453_v5  ;;  %3181 = vmatprep.subr.mxu0 %v1944_v6  ;;  %v2247_v5 = vld [vmem:[#allocation11 + $0xea0] sm:$0xff]  ;;  %v2741_v6 = vld [vmem:[#allocation11 + $0x1e10] sm:$0xff] }
 0x39c   : > { %3112 = vmatprep.subr.mxu1 %v2438_v7  ;;  %3182 = vmatpush1.msra.mxu0 %v1943_v8  ;;  %v2232_v7 = vld [vmem:[#allocation11 + $0xe28] sm:$0xff]  ;;  %v2726_v8 = vld [vmem:[#allocation11 + $0x1d98] sm:$0xff] }
 0x39d   : > { %3113 = vmatpush1.msra.mxu1 %v2437_v51  ;;  %3183 = vmatprep.subr.mxu0 %v1928_v57  ;;  %v2231_v51 = vld [vmem:[#allocation11 + $0xe20] sm:$0xff]  ;;  %v2725_v57 = vld [vmem:[#allocation11 + $0x1d90] sm:$0xff] }
 0x39e   : > { %3114 = vmatprep.subr.mxu1 %v2422_v9  ;;  %3184 = vmatpush1.msra.mxu0 %v1927_v10  ;;  %v2216_v9 = vld [vmem:[#allocation11 + $0xda8] sm:$0xff]  ;;  %v2710_v10 = vld [vmem:[#allocation11 + $0x1d18] sm:$0xff] }
 0x39f   : > { %3115 = vmatpush1.msra.mxu1 %v2421_v12  ;;  %3185 = vmatprep.subr.mxu0 %v1912_v13  ;;  %v2215_v12 = vld [vmem:[#allocation11 + $0xda0] sm:$0xff]  ;;  %v2709_v13 = vld [vmem:[#allocation11 + $0x1d10] sm:$0xff] }
 0x3a0   : > { %3116 = vmatprep.subr.mxu1 %v2406_v14  ;;  %3186 = vmatpush1.msra.mxu0 %v1911_v15  ;;  %v2200_v14 = vld [vmem:[#allocation11 + $0xd28] sm:$0xff]  ;;  %v2694_v15 = vld [vmem:[#allocation11 + $0x1c98] sm:$0xff] }
 0x3a1   : > { %3117 = vmatpush1.msra.mxu1 %v2405_v16  ;;  %3187 = vmatprep.subr.mxu0 %v1896_v17  ;;  %v2199_v16 = vld [vmem:[#allocation11 + $0xd20] sm:$0xff]  ;;  %v2693_v17 = vld [vmem:[#allocation11 + $0x1c90] sm:$0xff] }
 0x3a2   : > { %3118 = vmatprep.subr.mxu1 %v2390_v18  ;;  %3188 = vmatpush1.msra.mxu0 %v1895_v19  ;;  %v2184_v18 = vld [vmem:[#allocation11 + $0xca8] sm:$0xff]  ;;  %v2678_v19 = vld [vmem:[#allocation11 + $0x1c18] sm:$0xff] }
 0x3a3   : > { %3119 = vmatpush1.msra.mxu1 %v2389_v20  ;;  %3189 = vmatprep.subr.mxu0 %v1880_v50  ;;  %v2183_v20 = vld [vmem:[#allocation11 + $0xca0] sm:$0xff]  ;;  %v2677_v50 = vld [vmem:[#allocation11 + $0x1c10] sm:$0xff] }
 0x3a4   : > { %3120 = vmatprep.subr.mxu1 %v2374_v21  ;;  %3190 = vmatpush1.msra.mxu0 %v1879_v22  ;;  %v2168_v21 = vld [vmem:[#allocation11 + $0xc28] sm:$0xff]  ;;  %v2662_v22 = vld [vmem:[#allocation11 + $0x1b98] sm:$0xff] }
 0x3a5   : > { %3121 = vmatpush1.msra.mxu1 %v2373_v23  ;;  %3191 = vmatprep.subr.mxu0 %v1864_v24  ;;  %v2167_v23 = vld [vmem:[#allocation11 + $0xc20] sm:$0xff]  ;;  %v2661_v24 = vld [vmem:[#allocation11 + $0x1b90] sm:$0xff] }
 0x3a6   : > { %3122 = vmatprep.subr.mxu1 %v2358_v25  ;;  %3192 = vmatpush1.msra.mxu0 %v1863_v26  ;;  %v2152_v25 = vld [vmem:[#allocation11 + $0xba8] sm:$0xff]  ;;  %v2646_v26 = vld [vmem:[#allocation11 + $0x1b18] sm:$0xff] }
 0x3a7   : > { %3123 = vmatpush1.msra.mxu1 %v2357_v28  ;;  %3193 = vmatprep.subr.mxu0 %v1848_v29  ;;  %v2151_v28 = vld [vmem:[#allocation11 + $0xba0] sm:$0xff]  ;;  %v2645_v29 = vld [vmem:[#allocation11 + $0x1b10] sm:$0xff] }
 0x3a8   : > { %3124 = vmatprep.subr.mxu1 %v2342_v30  ;;  %3194 = vmatpush1.msra.mxu0 %v1847_v32  ;;  %v2136_v30 = vld [vmem:[#allocation11 + $0xb28] sm:$0xff]  ;;  %v2630_v32 = vld [vmem:[#allocation11 + $0x1a98] sm:$0xff] }
 0x3a9   : > { %3125 = vmatpush1.msra.mxu1 %v2341_v33  ;;  %3195 = vmatprep.subr.mxu0 %v1832_v34  ;;  %v2135_v33 = vld [vmem:[#allocation11 + $0xb20] sm:$0xff]  ;;  %v2629_v34 = vld [vmem:[#allocation11 + $0x1a90] sm:$0xff] }
 0x3aa   : > { %3126 = vmatprep.subr.mxu1 %v2326_v35  ;;  %3196 = vmatpush1.msra.mxu0 %v1831_v36  ;;  %v2120_v35 = vld [vmem:[#allocation11 + $0xaa8] sm:$0xff]  ;;  %v2614_v36 = vld [vmem:[#allocation11 + $0x1a18] sm:$0xff] }
 0x3ab   : > { %3127 = vmatpush1.msra.mxu1 %v2325_v40  ;;  %3197 = vmatprep.subr.mxu0 %v1816_v11  ;;  %v2119_v40 = vld [vmem:[#allocation11 + $0xaa0] sm:$0xff]  ;;  %v2613_v11 = vld [vmem:[#allocation11 + $0x1a10] sm:$0xff] }
 0x3ac   : > { %3128 = vmatprep.subr.mxu1 %v2310_v43  ;;  %3198 = vmatpush1.msra.mxu0 %v1815_v46  ;;  %v2104_v43 = vld [vmem:[#allocation11 + $0xa28] sm:$0xff]  ;;  %v2598_v46 = vld [vmem:[#allocation11 + $0x1998] sm:$0xff] }
 0x3ad   : > { %3129 = vmatpush1.msra.mxu1 %v2309_v47  ;;  %3199 = vmatprep.subr.mxu0 %v1800_v48  ;;  %v2103_v47 = vld [vmem:[#allocation11 + $0xa20] sm:$0xff]  ;;  %v2597_v48 = vld [vmem:[#allocation11 + $0x1990] sm:$0xff] }
 0x3ae   : > { %3130 = vmatprep.subr.mxu1 %v2294_v52  ;;  %3200 = vmatpush1.msra.mxu0 %v1799_v53  ;;  %v2088_v52 = vld [vmem:[#allocation11 + $0x9a8] sm:$0xff]  ;;  %v2582_v53 = vld [vmem:[#allocation11 + $0x1918] sm:$0xff] }
 0x3af   : > { %3131 = vmatpush1.msra.mxu1 %v2293_v49  ;;  %3201 = vmatprep.subr.mxu0 %v1784_v54  ;;  %v2087_v49 = vld [vmem:[#allocation11 + $0x9a0] sm:$0xff]  ;;  %v2581_v54 = vld [vmem:[#allocation11 + $0x1910] sm:$0xff] }
 0x3b0   : > { %3132 = vmatprep.subr.mxu1 %v2790_v56  ;;  %3202 = vmatpush1.msra.mxu0 %v1783_v59  ;;  %v2072_v56 = vld [vmem:[#allocation11 + $0x928] sm:$0xff]  ;;  %v2566_v59 = vld [vmem:[#allocation11 + $0x1898] sm:$0xff] }
 0x3b1   : > { %3133 = vmatpush2.msra.mxu1 %v2789_v60  ;;  %3203 = vmatprep.subr.mxu0 %v2280_v61  ;;  %v2071_v60 = vld [vmem:[#allocation11 + $0x920] sm:$0xff]  ;;  %v2565_v61 = vld [vmem:[#allocation11 + $0x1890] sm:$0xff] }
 0x3b2   : > { %3134 = vmatprep.subr.mxu1 %v2774_v62  ;;  %3204 = vmatpush2.msra.mxu0 %v2279_v63  ;;  %v2056_v62 = vld [vmem:[#allocation11 + $0x8a8] sm:$0xff]  ;;  %v2550_v63 = vld [vmem:[#allocation11 + $0x1818] sm:$0xff] }
 0x3b3   : > { %3135 = vmatpush2.msra.mxu1 %v2773_v0  ;;  %3205 = vmatprep.subr.mxu0 %v2264_v1  ;;  %v2055_v0 = vld [vmem:[#allocation11 + $0x8a0] sm:$0xff]  ;;  %v2549_v1 = vld [vmem:[#allocation11 + $0x1810] sm:$0xff] }
 0x3b4   : > { %3136 = vmatprep.subr.mxu1 %v2758_v2  ;;  %3206 = vmatpush2.msra.mxu0 %v2263_v3  ;;  %v2040_v2 = vld [vmem:[#allocation11 + $0x828] sm:$0xff]  ;;  %v2039_v3 = vld [vmem:[#allocation11 + $0x820] sm:$0xff] }
 0x3b5   : > { %3137 = vmatpush2.msra.mxu1 %v2757_v4  ;;  %3207 = vmatprep.subr.mxu0 %v2248_v27  ;;  %v2536_v4 = vld [vmem:[#allocation11 + $0x17a8] sm:$0xff]  ;;  %v2535_v27 = vld [vmem:[#allocation11 + $0x17a0] sm:$0xff] }
 0x3b6   : > { %3138 = vmatprep.subr.mxu1 %v2742_v31  ;;  %3208 = vmatpush2.msra.mxu0 %v2247_v5  ;;  %v2026_v31 = vld [vmem:[#allocation11 + $0x7b8] sm:$0xff]  ;;  %v2520_v5 = vld [vmem:[#allocation11 + $0x1728] sm:$0xff] }
 0x3b7   : > { %3139 = vmatpush2.msra.mxu1 %v2741_v6  ;;  %3209 = vmatprep.subr.mxu0 %v2232_v7  ;;  %v2025_v6 = vld [vmem:[#allocation11 + $0x7b0] sm:$0xff]  ;;  %v2519_v7 = vld [vmem:[#allocation11 + $0x1720] sm:$0xff] }
 0x3b8   : > { %3140 = vmatprep.subr.mxu1 %v2726_v8  ;;  %3210 = vmatpush2.msra.mxu0 %v2231_v51  ;;  %v2010_v8 = vld [vmem:[#allocation11 + $0x738] sm:$0xff]  ;;  %v2504_v51 = vld [vmem:[#allocation11 + $0x16a8] sm:$0xff] }
 0x3b9   : > { %3141 = vmatpush2.msra.mxu1 %v2725_v57  ;;  %3211 = vmatprep.subr.mxu0 %v2216_v9  ;;  %v2009_v57 = vld [vmem:[#allocation11 + $0x730] sm:$0xff]  ;;  %v2503_v9 = vld [vmem:[#allocation11 + $0x16a0] sm:$0xff] }
 0x3ba   : > { %3142 = vmatprep.subr.mxu1 %v2710_v10  ;;  %3212 = vmatpush2.msra.mxu0 %v2215_v12  ;;  %v1994_v10 = vld [vmem:[#allocation11 + $0x6b8] sm:$0xff]  ;;  %v2488_v12 = vld [vmem:[#allocation11 + $0x1628] sm:$0xff] }
 0x3bb   : > { %3143 = vmatpush2.msra.mxu1 %v2709_v13  ;;  %3213 = vmatprep.subr.mxu0 %v2200_v14  ;;  %v1993_v13 = vld [vmem:[#allocation11 + $0x6b0] sm:$0xff]  ;;  %v2487_v14 = vld [vmem:[#allocation11 + $0x1620] sm:$0xff] }
 0x3bc   : > { %3144 = vmatprep.subr.mxu1 %v2694_v15  ;;  %3214 = vmatpush2.msra.mxu0 %v2199_v16  ;;  %v1978_v15 = vld [vmem:[#allocation11 + $0x638] sm:$0xff]  ;;  %v2472_v16 = vld [vmem:[#allocation11 + $0x15a8] sm:$0xff] }
 0x3bd   : > { %3145 = vmatpush2.msra.mxu1 %v2693_v17  ;;  %3215 = vmatprep.subr.mxu0 %v2184_v18  ;;  %v1977_v17 = vld [vmem:[#allocation11 + $0x630] sm:$0xff]  ;;  %v2471_v18 = vld [vmem:[#allocation11 + $0x15a0] sm:$0xff] }
 0x3be   : > { %3146 = vmatprep.subr.mxu1 %v2678_v19  ;;  %3216 = vmatpush2.msra.mxu0 %v2183_v20  ;;  %v1962_v19 = vld [vmem:[#allocation11 + $0x5b8] sm:$0xff]  ;;  %v2456_v20 = vld [vmem:[#allocation11 + $0x1528] sm:$0xff] }
 0x3bf   : > { %3147 = vmatpush2.msra.mxu1 %v2677_v50  ;;  %3217 = vmatprep.subr.mxu0 %v2168_v21  ;;  %v1961_v50 = vld [vmem:[#allocation11 + $0x5b0] sm:$0xff]  ;;  %v2455_v21 = vld [vmem:[#allocation11 + $0x1520] sm:$0xff] }
 0x3c0   : > { %3148 = vmatprep.subr.mxu1 %v2662_v22  ;;  %3218 = vmatpush2.msra.mxu0 %v2167_v23  ;;  %v1946_v22 = vld [vmem:[#allocation11 + $0x538] sm:$0xff]  ;;  %v2440_v23 = vld [vmem:[#allocation11 + $0x14a8] sm:$0xff] }
 0x3c1   : > { %3149 = vmatpush2.msra.mxu1 %v2661_v24  ;;  %3219 = vmatprep.subr.mxu0 %v2152_v25  ;;  %v1945_v24 = vld [vmem:[#allocation11 + $0x530] sm:$0xff]  ;;  %v2439_v25 = vld [vmem:[#allocation11 + $0x14a0] sm:$0xff] }
 0x3c2   : > { %3150 = vmatprep.subr.mxu1 %v2646_v26  ;;  %3220 = vmatpush2.msra.mxu0 %v2151_v28  ;;  %v1930_v26 = vld [vmem:[#allocation11 + $0x4b8] sm:$0xff]  ;;  %v2424_v28 = vld [vmem:[#allocation11 + $0x1428] sm:$0xff] }
 0x3c3   : > { %3151 = vmatpush2.msra.mxu1 %v2645_v29  ;;  %3221 = vmatprep.subr.mxu0 %v2136_v30  ;;  %v1929_v29 = vld [vmem:[#allocation11 + $0x4b0] sm:$0xff]  ;;  %v2423_v30 = vld [vmem:[#allocation11 + $0x1420] sm:$0xff] }
 0x3c4   : > { %3152 = vmatprep.subr.mxu1 %v2630_v32  ;;  %3222 = vmatpush2.msra.mxu0 %v2135_v33  ;;  %v1914_v32 = vld [vmem:[#allocation11 + $0x438] sm:$0xff]  ;;  %v2408_v33 = vld [vmem:[#allocation11 + $0x13a8] sm:$0xff] }
 0x3c5   : > { %3153 = vmatpush2.msra.mxu1 %v2629_v34  ;;  %3223 = vmatprep.subr.mxu0 %v2120_v35  ;;  %v1913_v34 = vld [vmem:[#allocation11 + $0x430] sm:$0xff]  ;;  %v2407_v35 = vld [vmem:[#allocation11 + $0x13a0] sm:$0xff] }
 0x3c6   : > { %3154 = vmatprep.subr.mxu1 %v2614_v36  ;;  %3224 = vmatpush2.msra.mxu0 %v2119_v40  ;;  %v1898_v36 = vld [vmem:[#allocation11 + $0x3b8] sm:$0xff]  ;;  %v2392_v40 = vld [vmem:[#allocation11 + $0x1328] sm:$0xff] }
 0x3c7   : > { %3155 = vmatpush2.msra.mxu1 %v2613_v11  ;;  %3225 = vmatprep.subr.mxu0 %v2104_v43  ;;  %v1897_v11 = vld [vmem:[#allocation11 + $0x3b0] sm:$0xff]  ;;  %v2391_v43 = vld [vmem:[#allocation11 + $0x1320] sm:$0xff] }
 0x3c8   : > { %3156 = vmatprep.subr.mxu1 %v2598_v46  ;;  %3226 = vmatpush2.msra.mxu0 %v2103_v47  ;;  %v1882_v46 = vld [vmem:[#allocation11 + $0x338] sm:$0xff]  ;;  %v2376_v47 = vld [vmem:[#allocation11 + $0x12a8] sm:$0xff] }
 0x3c9   : > { %3157 = vmatpush2.msra.mxu1 %v2597_v48  ;;  %3227 = vmatprep.subr.mxu0 %v2088_v52  ;;  %v1881_v48 = vld [vmem:[#allocation11 + $0x330] sm:$0xff]  ;;  %v2375_v52 = vld [vmem:[#allocation11 + $0x12a0] sm:$0xff] }
 0x3ca   : > { %3158 = vmatprep.subr.mxu1 %v2582_v53  ;;  %3228 = vmatpush2.msra.mxu0 %v2087_v49  ;;  %v1866_v53 = vld [vmem:[#allocation11 + $0x2b8] sm:$0xff]  ;;  %v2360_v49 = vld [vmem:[#allocation11 + $0x1228] sm:$0xff] }
 0x3cb   : > { %3159 = vmatpush2.msra.mxu1 %v2581_v54  ;;  %3229 = vmatprep.subr.mxu0 %v2072_v56  ;;  %v1865_v54 = vld [vmem:[#allocation11 + $0x2b0] sm:$0xff]  ;;  %v2359_v56 = vld [vmem:[#allocation11 + $0x1220] sm:$0xff] }
 0x3cc   : > { %3160 = vmatprep.subr.mxu1 %v2566_v59  ;;  %3230 = vmatpush2.msra.mxu0 %v2071_v60  ;;  %v1850_v59 = vld [vmem:[#allocation11 + $0x238] sm:$0xff]  ;;  %v2344_v60 = vld [vmem:[#allocation11 + $0x11a8] sm:$0xff] }
 0x3cd   : > { %3161 = vmatpush2.msra.mxu1 %v2565_v61  ;;  %3231 = vmatprep.subr.mxu0 %v2056_v62  ;;  %v1849_v61 = vld [vmem:[#allocation11 + $0x230] sm:$0xff]  ;;  %v2343_v62 = vld [vmem:[#allocation11 + $0x11a0] sm:$0xff] }
 0x3ce   : > { %3162 = vmatprep.subr.mxu1 %v2550_v63  ;;  %3232 = vmatpush2.msra.mxu0 %v2055_v0  ;;  %v1834_v63 = vld [vmem:[#allocation11 + $0x1b8] sm:$0xff]  ;;  %v2328_v0 = vld [vmem:[#allocation11 + $0x1128] sm:$0xff] }
 0x3cf   : > { %3163 = vmatpush2.msra.mxu1 %v2549_v1  ;;  %3233 = vmatprep.subr.mxu0 %v2040_v2  ;;  %v1833_v1 = vld [vmem:[#allocation11 + $0x1b0] sm:$0xff]  ;;  %v2327_v2 = vld [vmem:[#allocation11 + $0x1120] sm:$0xff] }
 0x3d0   : > { %3165 = vmatmul.mubr.f32.vlgmr.msra.gmra.mxu1 %v6056_v45  ;;  %3234 = vmatpush2.msra.mxu0 %v2039_v3  ;;  %v1818_v3 = vld [vmem:[#allocation11 + $0x138] sm:$0xff] }
 0x3d1   : > { %3242 = vmatprep.subr.mxu1 %v2536_v4  ;;  %3236 = vmatmul.mubr.f32.vlgmr.msra.gmra.mxu0 %v6045_v55  ;;  %v2312_v4 = vld [vmem:[#allocation11 + $0x10a8] sm:$0xff] }
 0x3d2   : > { %3243 = vmatpush1.msra.mxu1 %v2535_v27  ;;  %3306 = vmatprep.mubr.f32.mxu1 %v6054_v44  ;;  %v1817_v27 = vld [vmem:[#allocation11 + $0x130] sm:$0xff] }
 0x3d3   : > { %3313 = vmatprep.subr.mxu0 %v2026_v31  ;;  %3244 = vmatprep.subr.mxu1 %v2520_v5  ;;  %v2311_v31 = vld [vmem:[#allocation11 + $0x10a0] sm:$0xff]  ;;  %v1802_v5 = vld [vmem:[#allocation11 + $0xb8] sm:$0xff] }
 0x3d4   : > { %3314 = vmatpush1.msra.mxu0 %v2025_v6  ;;  %3377 = vmatprep.mubr.f32.mxu0 %v6043_v58  ;;  %v2296_v6 = vld [vmem:[#allocation11 + $0x1028] sm:$0xff] }
 0x3d5   : > { %3245 = vmatpush1.msra.mxu1 %v2519_v7  ;;  %3315 = vmatprep.subr.mxu0 %v2010_v8  ;;  %v1801_v7 = vld [vmem:[#allocation11 + $0xb0] sm:$0xff]  ;;  %v2295_v8 = vld [vmem:[#allocation11 + $0x1020] sm:$0xff] }
 0x3d6   : > { %3246 = vmatprep.subr.mxu1 %v2504_v51  ;;  %3316 = vmatpush1.msra.mxu0 %v2009_v57  ;;  %v1786_v51 = vld [vmem:[#allocation11 + $0x38] sm:$0xff]  ;;  %v2792_v57 = vld [vmem:[#allocation11 + $0x1fa8] sm:$0xff] }
 0x3d7   : > { %3247 = vmatpush1.msra.mxu1 %v2503_v9  ;;  %3317 = vmatprep.subr.mxu0 %v1994_v10  ;;  %v1785_v9 = vld [vmem:[#allocation11 + $0x30] sm:$0xff]  ;;  %v2791_v10 = vld [vmem:[#allocation11 + $0x1fa0] sm:$0xff] }
 0x3d8   : > { %3248 = vmatprep.subr.mxu1 %v2488_v12  ;;  %3318 = vmatpush1.msra.mxu0 %v1993_v13  ;;  %v2282_v12 = vld [vmem:[#allocation11 + $0xfb8] sm:$0xff]  ;;  %v2776_v13 = vld [vmem:[#allocation11 + $0x1f28] sm:$0xff] }
 0x3d9   : > { %3249 = vmatpush1.msra.mxu1 %v2487_v14  ;;  %3319 = vmatprep.subr.mxu0 %v1978_v15  ;;  %v2281_v14 = vld [vmem:[#allocation11 + $0xfb0] sm:$0xff]  ;;  %v2775_v15 = vld [vmem:[#allocation11 + $0x1f20] sm:$0xff] }
 0x3da   : > { %3250 = vmatprep.subr.mxu1 %v2472_v16  ;;  %3320 = vmatpush1.msra.mxu0 %v1977_v17  ;;  %v2266_v16 = vld [vmem:[#allocation11 + $0xf38] sm:$0xff]  ;;  %v2760_v17 = vld [vmem:[#allocation11 + $0x1ea8] sm:$0xff] }
 0x3db   : > { %3251 = vmatpush1.msra.mxu1 %v2471_v18  ;;  %3321 = vmatprep.subr.mxu0 %v1962_v19  ;;  %v2265_v18 = vld [vmem:[#allocation11 + $0xf30] sm:$0xff]  ;;  %v2759_v19 = vld [vmem:[#allocation11 + $0x1ea0] sm:$0xff] }
 0x3dc   : > { %3252 = vmatprep.subr.mxu1 %v2456_v20  ;;  %3322 = vmatpush1.msra.mxu0 %v1961_v50  ;;  %v2250_v20 = vld [vmem:[#allocation11 + $0xeb8] sm:$0xff]  ;;  %v2744_v50 = vld [vmem:[#allocation11 + $0x1e28] sm:$0xff] }
 0x3dd   : > { %3253 = vmatpush1.msra.mxu1 %v2455_v21  ;;  %3323 = vmatprep.subr.mxu0 %v1946_v22  ;;  %v2249_v21 = vld [vmem:[#allocation11 + $0xeb0] sm:$0xff]  ;;  %v2743_v22 = vld [vmem:[#allocation11 + $0x1e20] sm:$0xff] }
 0x3de   : > { %3254 = vmatprep.subr.mxu1 %v2440_v23  ;;  %3324 = vmatpush1.msra.mxu0 %v1945_v24  ;;  %v2234_v23 = vld [vmem:[#allocation11 + $0xe38] sm:$0xff]  ;;  %v2728_v24 = vld [vmem:[#allocation11 + $0x1da8] sm:$0xff] }
 0x3df   : > { %3255 = vmatpush1.msra.mxu1 %v2439_v25  ;;  %3325 = vmatprep.subr.mxu0 %v1930_v26  ;;  %v2233_v25 = vld [vmem:[#allocation11 + $0xe30] sm:$0xff]  ;;  %v2727_v26 = vld [vmem:[#allocation11 + $0x1da0] sm:$0xff] }
 0x3e0   : > { %3256 = vmatprep.subr.mxu1 %v2424_v28  ;;  %3326 = vmatpush1.msra.mxu0 %v1929_v29  ;;  %v2218_v28 = vld [vmem:[#allocation11 + $0xdb8] sm:$0xff]  ;;  %v2712_v29 = vld [vmem:[#allocation11 + $0x1d28] sm:$0xff] }
 0x3e1   : > { %3257 = vmatpush1.msra.mxu1 %v2423_v30  ;;  %3327 = vmatprep.subr.mxu0 %v1914_v32  ;;  %v2217_v30 = vld [vmem:[#allocation11 + $0xdb0] sm:$0xff]  ;;  %v2711_v32 = vld [vmem:[#allocation11 + $0x1d20] sm:$0xff] }
 0x3e2   : > { %3258 = vmatprep.subr.mxu1 %v2408_v33  ;;  %3328 = vmatpush1.msra.mxu0 %v1913_v34  ;;  %v2202_v33 = vld [vmem:[#allocation11 + $0xd38] sm:$0xff]  ;;  %v2696_v34 = vld [vmem:[#allocation11 + $0x1ca8] sm:$0xff] }
 0x3e3   : > { %3259 = vmatpush1.msra.mxu1 %v2407_v35  ;;  %3329 = vmatprep.subr.mxu0 %v1898_v36  ;;  %v2201_v35 = vld [vmem:[#allocation11 + $0xd30] sm:$0xff]  ;;  %v2695_v36 = vld [vmem:[#allocation11 + $0x1ca0] sm:$0xff] }
 0x3e4   : > { %3260 = vmatprep.subr.mxu1 %v2392_v40  ;;  %3330 = vmatpush1.msra.mxu0 %v1897_v11  ;;  %v2186_v40 = vld [vmem:[#allocation11 + $0xcb8] sm:$0xff]  ;;  %v2680_v11 = vld [vmem:[#allocation11 + $0x1c28] sm:$0xff] }
 0x3e5   : > { %3261 = vmatpush1.msra.mxu1 %v2391_v43  ;;  %3331 = vmatprep.subr.mxu0 %v1882_v46  ;;  %v2185_v43 = vld [vmem:[#allocation11 + $0xcb0] sm:$0xff]  ;;  %v2679_v46 = vld [vmem:[#allocation11 + $0x1c20] sm:$0xff] }
 0x3e6   : > { %3262 = vmatprep.subr.mxu1 %v2376_v47  ;;  %3332 = vmatpush1.msra.mxu0 %v1881_v48  ;;  %v2170_v47 = vld [vmem:[#allocation11 + $0xc38] sm:$0xff]  ;;  %v2664_v48 = vld [vmem:[#allocation11 + $0x1ba8] sm:$0xff] }
 0x3e7   : > { %3263 = vmatpush1.msra.mxu1 %v2375_v52  ;;  %3333 = vmatprep.subr.mxu0 %v1866_v53  ;;  %v2169_v52 = vld [vmem:[#allocation11 + $0xc30] sm:$0xff]  ;;  %v2663_v53 = vld [vmem:[#allocation11 + $0x1ba0] sm:$0xff] }
 0x3e8   : > { %3264 = vmatprep.subr.mxu1 %v2360_v49  ;;  %3334 = vmatpush1.msra.mxu0 %v1865_v54  ;;  %v2154_v49 = vld [vmem:[#allocation11 + $0xbb8] sm:$0xff]  ;;  %v2648_v54 = vld [vmem:[#allocation11 + $0x1b28] sm:$0xff] }
 0x3e9   : > { %3265 = vmatpush1.msra.mxu1 %v2359_v56  ;;  %3335 = vmatprep.subr.mxu0 %v1850_v59  ;;  %v2153_v56 = vld [vmem:[#allocation11 + $0xbb0] sm:$0xff]  ;;  %v2647_v59 = vld [vmem:[#allocation11 + $0x1b20] sm:$0xff] }
 0x3ea   : > { %3266 = vmatprep.subr.mxu1 %v2344_v60  ;;  %3336 = vmatpush1.msra.mxu0 %v1849_v61  ;;  %v2138_v60 = vld [vmem:[#allocation11 + $0xb38] sm:$0xff]  ;;  %v2632_v61 = vld [vmem:[#allocation11 + $0x1aa8] sm:$0xff] }
 0x3eb   : > { %3267 = vmatpush1.msra.mxu1 %v2343_v62  ;;  %3337 = vmatprep.subr.mxu0 %v1834_v63  ;;  %v2137_v62 = vld [vmem:[#allocation11 + $0xb30] sm:$0xff]  ;;  %v2631_v63 = vld [vmem:[#allocation11 + $0x1aa0] sm:$0xff] }
 0x3ec   : > { %3268 = vmatprep.subr.mxu1 %v2328_v0  ;;  %3338 = vmatpush1.msra.mxu0 %v1833_v1  ;;  %v2122_v0 = vld [vmem:[#allocation11 + $0xab8] sm:$0xff]  ;;  %v2616_v1 = vld [vmem:[#allocation11 + $0x1a28] sm:$0xff] }
 0x3ed   : > { %3269 = vmatpush1.msra.mxu1 %v2327_v2  ;;  %3339 = vmatprep.subr.mxu0 %v1818_v3  ;;  %v2121_v2 = vld [vmem:[#allocation11 + $0xab0] sm:$0xff]  ;;  %v2615_v3 = vld [vmem:[#allocation11 + $0x1a20] sm:$0xff] }
 0x3ee   : > { %3270 = vmatprep.subr.mxu1 %v2312_v4  ;;  %3340 = vmatpush1.msra.mxu0 %v1817_v27  ;;  %v2106_v4 = vld [vmem:[#allocation11 + $0xa38] sm:$0xff]  ;;  %v2600_v27 = vld [vmem:[#allocation11 + $0x19a8] sm:$0xff] }
 0x3ef   : > { %3271 = vmatpush1.msra.mxu1 %v2311_v31  ;;  %3341 = vmatprep.subr.mxu0 %v1802_v5  ;;  %v2105_v31 = vld [vmem:[#allocation11 + $0xa30] sm:$0xff]  ;;  %v2599_v5 = vld [vmem:[#allocation11 + $0x19a0] sm:$0xff] }
 0x3f0   : > { %3272 = vmatprep.subr.mxu1 %v2296_v6  ;;  %3342 = vmatpush1.msra.mxu0 %v1801_v7  ;;  %v2090_v6 = vld [vmem:[#allocation11 + $0x9b8] sm:$0xff]  ;;  %v2584_v7 = vld [vmem:[#allocation11 + $0x1928] sm:$0xff] }
 0x3f1   : > { %3273 = vmatpush1.msra.mxu1 %v2295_v8  ;;  %3343 = vmatprep.subr.mxu0 %v1786_v51  ;;  %v2089_v8 = vld [vmem:[#allocation11 + $0x9b0] sm:$0xff]  ;;  %v2583_v51 = vld [vmem:[#allocation11 + $0x1920] sm:$0xff] }
 0x3f2   : > { %3274 = vmatprep.subr.mxu1 %v2792_v57  ;;  %3344 = vmatpush1.msra.mxu0 %v1785_v9  ;;  %v2074_v57 = vld [vmem:[#allocation11 + $0x938] sm:$0xff]  ;;  %v2568_v9 = vld [vmem:[#allocation11 + $0x18a8] sm:$0xff] }
 0x3f3   : > { %3275 = vmatpush2.msra.mxu1 %v2791_v10  ;;  %3345 = vmatprep.subr.mxu0 %v2282_v12  ;;  %v2073_v10 = vld [vmem:[#allocation11 + $0x930] sm:$0xff]  ;;  %v2567_v12 = vld [vmem:[#allocation11 + $0x18a0] sm:$0xff] }
 0x3f4   : > { %3276 = vmatprep.subr.mxu1 %v2776_v13  ;;  %3346 = vmatpush2.msra.mxu0 %v2281_v14  ;;  %v2058_v13 = vld [vmem:[#allocation11 + $0x8b8] sm:$0xff]  ;;  %v2552_v14 = vld [vmem:[#allocation11 + $0x1828] sm:$0xff] }
 0x3f5   : > { %3277 = vmatpush2.msra.mxu1 %v2775_v15  ;;  %3347 = vmatprep.subr.mxu0 %v2266_v16  ;;  %v2057_v15 = vld [vmem:[#allocation11 + $0x8b0] sm:$0xff]  ;;  %v2551_v16 = vld [vmem:[#allocation11 + $0x1820] sm:$0xff] }
 0x3f6   : > { %3278 = vmatprep.subr.mxu1 %v2760_v17  ;;  %3348 = vmatpush2.msra.mxu0 %v2265_v18  ;;  %v2042_v17 = vld [vmem:[#allocation11 + $0x838] sm:$0xff]  ;;  %v2041_v18 = vld [vmem:[#allocation11 + $0x830] sm:$0xff] }
 0x3f7   : > { %3279 = vmatpush2.msra.mxu1 %v2759_v19  ;;  %3349 = vmatprep.subr.mxu0 %v2250_v20  ;;  %v2538_v19 = vld [vmem:[#allocation11 + $0x17b8] sm:$0xff]  ;;  %v2537_v20 = vld [vmem:[#allocation11 + $0x17b0] sm:$0xff] }
 0x3f8   : > { %3280 = vmatprep.subr.mxu1 %v2744_v50  ;;  %3350 = vmatpush2.msra.mxu0 %v2249_v21  ;;  %v2028_v50 = vld [vmem:[#allocation11 + $0x7c8] sm:$0xff]  ;;  %v2522_v21 = vld [vmem:[#allocation11 + $0x1738] sm:$0xff] }
 0x3f9   : > { %3281 = vmatpush2.msra.mxu1 %v2743_v22  ;;  %3351 = vmatprep.subr.mxu0 %v2234_v23  ;;  %v2027_v22 = vld [vmem:[#allocation11 + $0x7c0] sm:$0xff]  ;;  %v2521_v23 = vld [vmem:[#allocation11 + $0x1730] sm:$0xff] }
 0x3fa   : > { %3282 = vmatprep.subr.mxu1 %v2728_v24  ;;  %3352 = vmatpush2.msra.mxu0 %v2233_v25  ;;  %v2012_v24 = vld [vmem:[#allocation11 + $0x748] sm:$0xff]  ;;  %v2506_v25 = vld [vmem:[#allocation11 + $0x16b8] sm:$0xff] }
 0x3fb   : > { %3283 = vmatpush2.msra.mxu1 %v2727_v26  ;;  %3353 = vmatprep.subr.mxu0 %v2218_v28  ;;  %v2011_v26 = vld [vmem:[#allocation11 + $0x740] sm:$0xff]  ;;  %v2505_v28 = vld [vmem:[#allocation11 + $0x16b0] sm:$0xff] }
 0x3fc   : > { %3284 = vmatprep.subr.mxu1 %v2712_v29  ;;  %3354 = vmatpush2.msra.mxu0 %v2217_v30  ;;  %v1996_v29 = vld [vmem:[#allocation11 + $0x6c8] sm:$0xff]  ;;  %v2490_v30 = vld [vmem:[#allocation11 + $0x1638] sm:$0xff] }
 0x3fd   : > { %3285 = vmatpush2.msra.mxu1 %v2711_v32  ;;  %3355 = vmatprep.subr.mxu0 %v2202_v33  ;;  %v1995_v32 = vld [vmem:[#allocation11 + $0x6c0] sm:$0xff]  ;;  %v2489_v33 = vld [vmem:[#allocation11 + $0x1630] sm:$0xff] }
 0x3fe   : > { %3286 = vmatprep.subr.mxu1 %v2696_v34  ;;  %3356 = vmatpush2.msra.mxu0 %v2201_v35  ;;  %v1980_v34 = vld [vmem:[#allocation11 + $0x648] sm:$0xff]  ;;  %v2474_v35 = vld [vmem:[#allocation11 + $0x15b8] sm:$0xff] }
 0x3ff   : > { %3287 = vmatpush2.msra.mxu1 %v2695_v36  ;;  %3357 = vmatprep.subr.mxu0 %v2186_v40  ;;  %v1979_v36 = vld [vmem:[#allocation11 + $0x640] sm:$0xff]  ;;  %v2473_v40 = vld [vmem:[#allocation11 + $0x15b0] sm:$0xff] }
 0x400   : > { %3288 = vmatprep.subr.mxu1 %v2680_v11  ;;  %3358 = vmatpush2.msra.mxu0 %v2185_v43  ;;  %v1964_v11 = vld [vmem:[#allocation11 + $0x5c8] sm:$0xff]  ;;  %v2458_v43 = vld [vmem:[#allocation11 + $0x1538] sm:$0xff] }
 0x401   : > { %3289 = vmatpush2.msra.mxu1 %v2679_v46  ;;  %3359 = vmatprep.subr.mxu0 %v2170_v47  ;;  %v1963_v46 = vld [vmem:[#allocation11 + $0x5c0] sm:$0xff]  ;;  %v2457_v47 = vld [vmem:[#allocation11 + $0x1530] sm:$0xff] }
 0x402   : > { %3290 = vmatprep.subr.mxu1 %v2664_v48  ;;  %3360 = vmatpush2.msra.mxu0 %v2169_v52  ;;  %v1948_v48 = vld [vmem:[#allocation11 + $0x548] sm:$0xff]  ;;  %v2442_v52 = vld [vmem:[#allocation11 + $0x14b8] sm:$0xff] }
 0x403   : > { %3291 = vmatpush2.msra.mxu1 %v2663_v53  ;;  %3361 = vmatprep.subr.mxu0 %v2154_v49  ;;  %v1947_v53 = vld [vmem:[#allocation11 + $0x540] sm:$0xff]  ;;  %v2441_v49 = vld [vmem:[#allocation11 + $0x14b0] sm:$0xff] }
 0x404   : > { %3292 = vmatprep.subr.mxu1 %v2648_v54  ;;  %3362 = vmatpush2.msra.mxu0 %v2153_v56  ;;  %v1932_v54 = vld [vmem:[#allocation11 + $0x4c8] sm:$0xff]  ;;  %v2426_v56 = vld [vmem:[#allocation11 + $0x1438] sm:$0xff] }
 0x405   : > { %3293 = vmatpush2.msra.mxu1 %v2647_v59  ;;  %3363 = vmatprep.subr.mxu0 %v2138_v60  ;;  %v1931_v59 = vld [vmem:[#allocation11 + $0x4c0] sm:$0xff]  ;;  %v2425_v60 = vld [vmem:[#allocation11 + $0x1430] sm:$0xff] }
 0x406   : > { %3294 = vmatprep.subr.mxu1 %v2632_v61  ;;  %3364 = vmatpush2.msra.mxu0 %v2137_v62  ;;  %v1916_v61 = vld [vmem:[#allocation11 + $0x448] sm:$0xff]  ;;  %v2410_v62 = vld [vmem:[#allocation11 + $0x13b8] sm:$0xff] }
 0x407   : > { %3295 = vmatpush2.msra.mxu1 %v2631_v63  ;;  %3365 = vmatprep.subr.mxu0 %v2122_v0  ;;  %v1915_v63 = vld [vmem:[#allocation11 + $0x440] sm:$0xff]  ;;  %v2409_v0 = vld [vmem:[#allocation11 + $0x13b0] sm:$0xff] }
 0x408   : > { %3296 = vmatprep.subr.mxu1 %v2616_v1  ;;  %3366 = vmatpush2.msra.mxu0 %v2121_v2  ;;  %v1900_v1 = vld [vmem:[#allocation11 + $0x3c8] sm:$0xff]  ;;  %v2394_v2 = vld [vmem:[#allocation11 + $0x1338] sm:$0xff] }
 0x409   : > { %3297 = vmatpush2.msra.mxu1 %v2615_v3  ;;  %3367 = vmatprep.subr.mxu0 %v2106_v4  ;;  %v1899_v3 = vld [vmem:[#allocation11 + $0x3c0] sm:$0xff]  ;;  %v2393_v4 = vld [vmem:[#allocation11 + $0x1330] sm:$0xff] }
 0x40a   : > { %3298 = vmatprep.subr.mxu1 %v2600_v27  ;;  %3368 = vmatpush2.msra.mxu0 %v2105_v31  ;;  %v1884_v27 = vld [vmem:[#allocation11 + $0x348] sm:$0xff]  ;;  %v2378_v31 = vld [vmem:[#allocation11 + $0x12b8] sm:$0xff] }
 0x40b   : > { %3299 = vmatpush2.msra.mxu1 %v2599_v5  ;;  %3369 = vmatprep.subr.mxu0 %v2090_v6  ;;  %v1883_v5 = vld [vmem:[#allocation11 + $0x340] sm:$0xff]  ;;  %v2377_v6 = vld [vmem:[#allocation11 + $0x12b0] sm:$0xff] }
 0x40c   : > { %3300 = vmatprep.subr.mxu1 %v2584_v7  ;;  %3370 = vmatpush2.msra.mxu0 %v2089_v8  ;;  %v1868_v7 = vld [vmem:[#allocation11 + $0x2c8] sm:$0xff]  ;;  %v2362_v8 = vld [vmem:[#allocation11 + $0x1238] sm:$0xff] }
 0x40d   : > { %3301 = vmatpush2.msra.mxu1 %v2583_v51  ;;  %3371 = vmatprep.subr.mxu0 %v2074_v57  ;;  %v1867_v51 = vld [vmem:[#allocation11 + $0x2c0] sm:$0xff]  ;;  %v2361_v57 = vld [vmem:[#allocation11 + $0x1230] sm:$0xff] }
 0x40e   : > { %3302 = vmatprep.subr.mxu1 %v2568_v9  ;;  %3372 = vmatpush2.msra.mxu0 %v2073_v10  ;;  %v1852_v9 = vld [vmem:[#allocation11 + $0x248] sm:$0xff]  ;;  %v2346_v10 = vld [vmem:[#allocation11 + $0x11b8] sm:$0xff] }
 0x40f   : > { %3303 = vmatpush2.msra.mxu1 %v2567_v12  ;;  %3373 = vmatprep.subr.mxu0 %v2058_v13  ;;  %v1851_v12 = vld [vmem:[#allocation11 + $0x240] sm:$0xff]  ;;  %v2345_v13 = vld [vmem:[#allocation11 + $0x11b0] sm:$0xff] }
 0x410   : > { %3304 = vmatprep.subr.mxu1 %v2552_v14  ;;  %3374 = vmatpush2.msra.mxu0 %v2057_v15  ;;  %v1836_v14 = vld [vmem:[#allocation11 + $0x1c8] sm:$0xff]  ;;  %v2330_v15 = vld [vmem:[#allocation11 + $0x1138] sm:$0xff] }
 0x411   : > { %3305 = vmatpush2.msra.mxu1 %v2551_v16  ;;  %3375 = vmatprep.subr.mxu0 %v2042_v17  ;;  %v1835_v16 = vld [vmem:[#allocation11 + $0x1c0] sm:$0xff]  ;;  %v2329_v17 = vld [vmem:[#allocation11 + $0x1130] sm:$0xff] }
 0x412   : > { %3307 = vmatmul.mubr.f32.vlgmr.msra.gmra.mxu1 %v6056_v45  ;;  %3376 = vmatpush2.msra.mxu0 %v2041_v18  ;;  %v1820_v18 = vld [vmem:[#allocation11 + $0x148] sm:$0xff] }
 0x413   : > { %3384 = vmatprep.subr.mxu1 %v2538_v19  ;;  %3378 = vmatmul.mubr.f32.vlgmr.msra.gmra.mxu0 %v6045_v55  ;;  %v2314_v19 = vld [vmem:[#allocation11 + $0x10b8] sm:$0xff] }
 0x414   : > { %3385 = vmatpush1.msra.mxu1 %v2537_v20  ;;  %3448 = vmatprep.mubr.f32.mxu1 %v6054_v44  ;;  %v1819_v20 = vld [vmem:[#allocation11 + $0x140] sm:$0xff] }
 0x415   : > { %3455 = vmatprep.subr.mxu0 %v2028_v50  ;;  %3386 = vmatprep.subr.mxu1 %v2522_v21  ;;  %v2313_v50 = vld [vmem:[#allocation11 + $0x10b0] sm:$0xff]  ;;  %v1804_v21 = vld [vmem:[#allocation11 + $0xc8] sm:$0xff] }
 0x416   : > { %3456 = vmatpush1.msra.mxu0 %v2027_v22  ;;  %3519 = vmatprep.mubr.f32.mxu0 %v6043_v58  ;;  %v2298_v22 = vld [vmem:[#allocation11 + $0x1038] sm:$0xff] }
 0x417   : > { %3387 = vmatpush1.msra.mxu1 %v2521_v23  ;;  %3457 = vmatprep.subr.mxu0 %v2012_v24  ;;  %v1803_v23 = vld [vmem:[#allocation11 + $0xc0] sm:$0xff]  ;;  %v2297_v24 = vld [vmem:[#allocation11 + $0x1030] sm:$0xff] }
 0x418   : > { %3388 = vmatprep.subr.mxu1 %v2506_v25  ;;  %3458 = vmatpush1.msra.mxu0 %v2011_v26  ;;  %v1788_v25 = vld [vmem:[#allocation11 + $0x48] sm:$0xff]  ;;  %v2794_v26 = vld [vmem:[#allocation11 + $0x1fb8] sm:$0xff] }
 0x419   : > { %3389 = vmatpush1.msra.mxu1 %v2505_v28  ;;  %3459 = vmatprep.subr.mxu0 %v1996_v29  ;;  %v1787_v28 = vld [vmem:[#allocation11 + $0x40] sm:$0xff]  ;;  %v2793_v29 = vld [vmem:[#allocation11 + $0x1fb0] sm:$0xff] }
 0x41a   : > { %3390 = vmatprep.subr.mxu1 %v2490_v30  ;;  %3460 = vmatpush1.msra.mxu0 %v1995_v32  ;;  %v2284_v30 = vld [vmem:[#allocation11 + $0xfc8] sm:$0xff]  ;;  %v2778_v32 = vld [vmem:[#allocation11 + $0x1f38] sm:$0xff] }
 0x41b   : > { %3391 = vmatpush1.msra.mxu1 %v2489_v33  ;;  %3461 = vmatprep.subr.mxu0 %v1980_v34  ;;  %v2283_v33 = vld [vmem:[#allocation11 + $0xfc0] sm:$0xff]  ;;  %v2777_v34 = vld [vmem:[#allocation11 + $0x1f30] sm:$0xff] }
 0x41c   : > { %3392 = vmatprep.subr.mxu1 %v2474_v35  ;;  %3462 = vmatpush1.msra.mxu0 %v1979_v36  ;;  %v2268_v35 = vld [vmem:[#allocation11 + $0xf48] sm:$0xff]  ;;  %v2762_v36 = vld [vmem:[#allocation11 + $0x1eb8] sm:$0xff] }
 0x41d   : > { %3393 = vmatpush1.msra.mxu1 %v2473_v40  ;;  %3463 = vmatprep.subr.mxu0 %v1964_v11  ;;  %v2267_v40 = vld [vmem:[#allocation11 + $0xf40] sm:$0xff]  ;;  %v2761_v11 = vld [vmem:[#allocation11 + $0x1eb0] sm:$0xff] }
 0x41e   : > { %3394 = vmatprep.subr.mxu1 %v2458_v43  ;;  %3464 = vmatpush1.msra.mxu0 %v1963_v46  ;;  %v2252_v43 = vld [vmem:[#allocation11 + $0xec8] sm:$0xff]  ;;  %v2746_v46 = vld [vmem:[#allocation11 + $0x1e38] sm:$0xff] }
 0x41f   : > { %3395 = vmatpush1.msra.mxu1 %v2457_v47  ;;  %3465 = vmatprep.subr.mxu0 %v1948_v48  ;;  %v2251_v47 = vld [vmem:[#allocation11 + $0xec0] sm:$0xff]  ;;  %v2745_v48 = vld [vmem:[#allocation11 + $0x1e30] sm:$0xff] }
 0x420   : > { %3396 = vmatprep.subr.mxu1 %v2442_v52  ;;  %3466 = vmatpush1.msra.mxu0 %v1947_v53  ;;  %v2236_v52 = vld [vmem:[#allocation11 + $0xe48] sm:$0xff]  ;;  %v2730_v53 = vld [vmem:[#allocation11 + $0x1db8] sm:$0xff] }
 0x421   : > { %3397 = vmatpush1.msra.mxu1 %v2441_v49  ;;  %3467 = vmatprep.subr.mxu0 %v1932_v54  ;;  %v2235_v49 = vld [vmem:[#allocation11 + $0xe40] sm:$0xff]  ;;  %v2729_v54 = vld [vmem:[#allocation11 + $0x1db0] sm:$0xff] }
 0x422   : > { %3398 = vmatprep.subr.mxu1 %v2426_v56  ;;  %3468 = vmatpush1.msra.mxu0 %v1931_v59  ;;  %v2220_v56 = vld [vmem:[#allocation11 + $0xdc8] sm:$0xff]  ;;  %v2714_v59 = vld [vmem:[#allocation11 + $0x1d38] sm:$0xff] }
 0x423   : > { %3399 = vmatpush1.msra.mxu1 %v2425_v60  ;;  %3469 = vmatprep.subr.mxu0 %v1916_v61  ;;  %v2219_v60 = vld [vmem:[#allocation11 + $0xdc0] sm:$0xff]  ;;  %v2713_v61 = vld [vmem:[#allocation11 + $0x1d30] sm:$0xff] }
 0x424   : > { %3400 = vmatprep.subr.mxu1 %v2410_v62  ;;  %3470 = vmatpush1.msra.mxu0 %v1915_v63  ;;  %v2204_v62 = vld [vmem:[#allocation11 + $0xd48] sm:$0xff]  ;;  %v2698_v63 = vld [vmem:[#allocation11 + $0x1cb8] sm:$0xff] }
 0x425   : > { %3401 = vmatpush1.msra.mxu1 %v2409_v0  ;;  %3471 = vmatprep.subr.mxu0 %v1900_v1  ;;  %v2203_v0 = vld [vmem:[#allocation11 + $0xd40] sm:$0xff]  ;;  %v2697_v1 = vld [vmem:[#allocation11 + $0x1cb0] sm:$0xff] }
 0x426   : > { %3402 = vmatprep.subr.mxu1 %v2394_v2  ;;  %3472 = vmatpush1.msra.mxu0 %v1899_v3  ;;  %v2188_v2 = vld [vmem:[#allocation11 + $0xcc8] sm:$0xff]  ;;  %v2682_v3 = vld [vmem:[#allocation11 + $0x1c38] sm:$0xff] }
 0x427   : > { %3403 = vmatpush1.msra.mxu1 %v2393_v4  ;;  %3473 = vmatprep.subr.mxu0 %v1884_v27  ;;  %v2187_v4 = vld [vmem:[#allocation11 + $0xcc0] sm:$0xff]  ;;  %v2681_v27 = vld [vmem:[#allocation11 + $0x1c30] sm:$0xff] }
 0x428   : > { %3404 = vmatprep.subr.mxu1 %v2378_v31  ;;  %3474 = vmatpush1.msra.mxu0 %v1883_v5  ;;  %v2172_v31 = vld [vmem:[#allocation11 + $0xc48] sm:$0xff]  ;;  %v2666_v5 = vld [vmem:[#allocation11 + $0x1bb8] sm:$0xff] }
 0x429   : > { %3405 = vmatpush1.msra.mxu1 %v2377_v6  ;;  %3475 = vmatprep.subr.mxu0 %v1868_v7  ;;  %v2171_v6 = vld [vmem:[#allocation11 + $0xc40] sm:$0xff]  ;;  %v2665_v7 = vld [vmem:[#allocation11 + $0x1bb0] sm:$0xff] }
 0x42a   : > { %3406 = vmatprep.subr.mxu1 %v2362_v8  ;;  %3476 = vmatpush1.msra.mxu0 %v1867_v51  ;;  %v2156_v8 = vld [vmem:[#allocation11 + $0xbc8] sm:$0xff]  ;;  %v2650_v51 = vld [vmem:[#allocation11 + $0x1b38] sm:$0xff] }
 0x42b   : > { %3407 = vmatpush1.msra.mxu1 %v2361_v57  ;;  %3477 = vmatprep.subr.mxu0 %v1852_v9  ;;  %v2155_v57 = vld [vmem:[#allocation11 + $0xbc0] sm:$0xff]  ;;  %v2649_v9 = vld [vmem:[#allocation11 + $0x1b30] sm:$0xff] }
 0x42c   : > { %3408 = vmatprep.subr.mxu1 %v2346_v10  ;;  %3478 = vmatpush1.msra.mxu0 %v1851_v12  ;;  %v2140_v10 = vld [vmem:[#allocation11 + $0xb48] sm:$0xff]  ;;  %v2634_v12 = vld [vmem:[#allocation11 + $0x1ab8] sm:$0xff] }
 0x42d   : > { %3409 = vmatpush1.msra.mxu1 %v2345_v13  ;;  %3479 = vmatprep.subr.mxu0 %v1836_v14  ;;  %v2139_v13 = vld [vmem:[#allocation11 + $0xb40] sm:$0xff]  ;;  %v2633_v14 = vld [vmem:[#allocation11 + $0x1ab0] sm:$0xff] }
 0x42e   : > { %3410 = vmatprep.subr.mxu1 %v2330_v15  ;;  %3480 = vmatpush1.msra.mxu0 %v1835_v16  ;;  %v2124_v15 = vld [vmem:[#allocation11 + $0xac8] sm:$0xff]  ;;  %v2618_v16 = vld [vmem:[#allocation11 + $0x1a38] sm:$0xff] }
 0x42f   : > { %3411 = vmatpush1.msra.mxu1 %v2329_v17  ;;  %3481 = vmatprep.subr.mxu0 %v1820_v18  ;;  %v2123_v17 = vld [vmem:[#allocation11 + $0xac0] sm:$0xff]  ;;  %v2617_v18 = vld [vmem:[#allocation11 + $0x1a30] sm:$0xff] }
 0x430   : > { %3412 = vmatprep.subr.mxu1 %v2314_v19  ;;  %3482 = vmatpush1.msra.mxu0 %v1819_v20  ;;  %v2108_v19 = vld [vmem:[#allocation11 + $0xa48] sm:$0xff]  ;;  %v2602_v20 = vld [vmem:[#allocation11 + $0x19b8] sm:$0xff] }
 0x431   : > { %3413 = vmatpush1.msra.mxu1 %v2313_v50  ;;  %3483 = vmatprep.subr.mxu0 %v1804_v21  ;;  %v2107_v50 = vld [vmem:[#allocation11 + $0xa40] sm:$0xff]  ;;  %v2601_v21 = vld [vmem:[#allocation11 + $0x19b0] sm:$0xff] }
 0x432   : > { %3414 = vmatprep.subr.mxu1 %v2298_v22  ;;  %3484 = vmatpush1.msra.mxu0 %v1803_v23  ;;  %v2092_v22 = vld [vmem:[#allocation11 + $0x9c8] sm:$0xff]  ;;  %v2586_v23 = vld [vmem:[#allocation11 + $0x1938] sm:$0xff] }
 0x433   : > { %3415 = vmatpush1.msra.mxu1 %v2297_v24  ;;  %3485 = vmatprep.subr.mxu0 %v1788_v25  ;;  %v2091_v24 = vld [vmem:[#allocation11 + $0x9c0] sm:$0xff]  ;;  %v2585_v25 = vld [vmem:[#allocation11 + $0x1930] sm:$0xff] }
 0x434   : > { %3416 = vmatprep.subr.mxu1 %v2794_v26  ;;  %3486 = vmatpush1.msra.mxu0 %v1787_v28  ;;  %v2076_v26 = vld [vmem:[#allocation11 + $0x948] sm:$0xff]  ;;  %v2570_v28 = vld [vmem:[#allocation11 + $0x18b8] sm:$0xff] }
 0x435   : > { %3417 = vmatpush2.msra.mxu1 %v2793_v29  ;;  %3487 = vmatprep.subr.mxu0 %v2284_v30  ;;  %v2075_v29 = vld [vmem:[#allocation11 + $0x940] sm:$0xff]  ;;  %v2569_v30 = vld [vmem:[#allocation11 + $0x18b0] sm:$0xff] }
 0x436   : > { %3418 = vmatprep.subr.mxu1 %v2778_v32  ;;  %3488 = vmatpush2.msra.mxu0 %v2283_v33  ;;  %v2060_v32 = vld [vmem:[#allocation11 + $0x8c8] sm:$0xff]  ;;  %v2554_v33 = vld [vmem:[#allocation11 + $0x1838] sm:$0xff] }
 0x437   : > { %3419 = vmatpush2.msra.mxu1 %v2777_v34  ;;  %3489 = vmatprep.subr.mxu0 %v2268_v35  ;;  %v2059_v34 = vld [vmem:[#allocation11 + $0x8c0] sm:$0xff]  ;;  %v2553_v35 = vld [vmem:[#allocation11 + $0x1830] sm:$0xff] }
 0x438   : > { %3420 = vmatprep.subr.mxu1 %v2762_v36  ;;  %3490 = vmatpush2.msra.mxu0 %v2267_v40  ;;  %v2044_v36 = vld [vmem:[#allocation11 + $0x848] sm:$0xff]  ;;  %v2043_v40 = vld [vmem:[#allocation11 + $0x840] sm:$0xff] }
 0x439   : > { %3421 = vmatpush2.msra.mxu1 %v2761_v11  ;;  %3491 = vmatprep.subr.mxu0 %v2252_v43  ;;  %v2540_v11 = vld [vmem:[#allocation11 + $0x17c8] sm:$0xff]  ;;  %v2539_v43 = vld [vmem:[#allocation11 + $0x17c0] sm:$0xff] }
 0x43a   : > { %3422 = vmatprep.subr.mxu1 %v2746_v46  ;;  %3492 = vmatpush2.msra.mxu0 %v2251_v47  ;;  %v2030_v46 = vld [vmem:[#allocation11 + $0x7d8] sm:$0xff]  ;;  %v2524_v47 = vld [vmem:[#allocation11 + $0x1748] sm:$0xff] }
 0x43b   : > { %3423 = vmatpush2.msra.mxu1 %v2745_v48  ;;  %3493 = vmatprep.subr.mxu0 %v2236_v52  ;;  %v2029_v48 = vld [vmem:[#allocation11 + $0x7d0] sm:$0xff]  ;;  %v2523_v52 = vld [vmem:[#allocation11 + $0x1740] sm:$0xff] }
 0x43c   : > { %3424 = vmatprep.subr.mxu1 %v2730_v53  ;;  %3494 = vmatpush2.msra.mxu0 %v2235_v49  ;;  %v2014_v53 = vld [vmem:[#allocation11 + $0x758] sm:$0xff]  ;;  %v2508_v49 = vld [vmem:[#allocation11 + $0x16c8] sm:$0xff] }
 0x43d   : > { %3425 = vmatpush2.msra.mxu1 %v2729_v54  ;;  %3495 = vmatprep.subr.mxu0 %v2220_v56  ;;  %v2013_v54 = vld [vmem:[#allocation11 + $0x750] sm:$0xff]  ;;  %v2507_v56 = vld [vmem:[#allocation11 + $0x16c0] sm:$0xff] }
 0x43e   : > { %3426 = vmatprep.subr.mxu1 %v2714_v59  ;;  %3496 = vmatpush2.msra.mxu0 %v2219_v60  ;;  %v1998_v59 = vld [vmem:[#allocation11 + $0x6d8] sm:$0xff]  ;;  %v2492_v60 = vld [vmem:[#allocation11 + $0x1648] sm:$0xff] }
 0x43f   : > { %3427 = vmatpush2.msra.mxu1 %v2713_v61  ;;  %3497 = vmatprep.subr.mxu0 %v2204_v62  ;;  %v1997_v61 = vld [vmem:[#allocation11 + $0x6d0] sm:$0xff]  ;;  %v2491_v62 = vld [vmem:[#allocation11 + $0x1640] sm:$0xff] }
 0x440   : > { %3428 = vmatprep.subr.mxu1 %v2698_v63  ;;  %3498 = vmatpush2.msra.mxu0 %v2203_v0  ;;  %v1982_v63 = vld [vmem:[#allocation11 + $0x658] sm:$0xff]  ;;  %v2476_v0 = vld [vmem:[#allocation11 + $0x15c8] sm:$0xff] }
 0x441   : > { %3429 = vmatpush2.msra.mxu1 %v2697_v1  ;;  %3499 = vmatprep.subr.mxu0 %v2188_v2  ;;  %v1981_v1 = vld [vmem:[#allocation11 + $0x650] sm:$0xff]  ;;  %v2475_v2 = vld [vmem:[#allocation11 + $0x15c0] sm:$0xff] }
 0x442   : > { %3430 = vmatprep.subr.mxu1 %v2682_v3  ;;  %3500 = vmatpush2.msra.mxu0 %v2187_v4  ;;  %v1966_v3 = vld [vmem:[#allocation11 + $0x5d8] sm:$0xff]  ;;  %v2460_v4 = vld [vmem:[#allocation11 + $0x1548] sm:$0xff] }
 0x443   : > { %3431 = vmatpush2.msra.mxu1 %v2681_v27  ;;  %3501 = vmatprep.subr.mxu0 %v2172_v31  ;;  %v1965_v27 = vld [vmem:[#allocation11 + $0x5d0] sm:$0xff]  ;;  %v2459_v31 = vld [vmem:[#allocation11 + $0x1540] sm:$0xff] }
 0x444   : > { %3432 = vmatprep.subr.mxu1 %v2666_v5  ;;  %3502 = vmatpush2.msra.mxu0 %v2171_v6  ;;  %v1950_v5 = vld [vmem:[#allocation11 + $0x558] sm:$0xff]  ;;  %v2444_v6 = vld [vmem:[#allocation11 + $0x14c8] sm:$0xff] }
 0x445   : > { %3433 = vmatpush2.msra.mxu1 %v2665_v7  ;;  %3503 = vmatprep.subr.mxu0 %v2156_v8  ;;  %v1949_v7 = vld [vmem:[#allocation11 + $0x550] sm:$0xff]  ;;  %v2443_v8 = vld [vmem:[#allocation11 + $0x14c0] sm:$0xff] }
 0x446   : > { %3434 = vmatprep.subr.mxu1 %v2650_v51  ;;  %3504 = vmatpush2.msra.mxu0 %v2155_v57  ;;  %v1934_v51 = vld [vmem:[#allocation11 + $0x4d8] sm:$0xff]  ;;  %v2428_v57 = vld [vmem:[#allocation11 + $0x1448] sm:$0xff] }
 0x447   : > { %3435 = vmatpush2.msra.mxu1 %v2649_v9  ;;  %3505 = vmatprep.subr.mxu0 %v2140_v10  ;;  %v1933_v9 = vld [vmem:[#allocation11 + $0x4d0] sm:$0xff]  ;;  %v2427_v10 = vld [vmem:[#allocation11 + $0x1440] sm:$0xff] }
 0x448   : > { %3436 = vmatprep.subr.mxu1 %v2634_v12  ;;  %3506 = vmatpush2.msra.mxu0 %v2139_v13  ;;  %v1918_v12 = vld [vmem:[#allocation11 + $0x458] sm:$0xff]  ;;  %v2412_v13 = vld [vmem:[#allocation11 + $0x13c8] sm:$0xff] }
 0x449   : > { %3437 = vmatpush2.msra.mxu1 %v2633_v14  ;;  %3507 = vmatprep.subr.mxu0 %v2124_v15  ;;  %v1917_v14 = vld [vmem:[#allocation11 + $0x450] sm:$0xff]  ;;  %v2411_v15 = vld [vmem:[#allocation11 + $0x13c0] sm:$0xff] }
 0x44a   : > { %3438 = vmatprep.subr.mxu1 %v2618_v16  ;;  %3508 = vmatpush2.msra.mxu0 %v2123_v17  ;;  %v1902_v16 = vld [vmem:[#allocation11 + $0x3d8] sm:$0xff]  ;;  %v2396_v17 = vld [vmem:[#allocation11 + $0x1348] sm:$0xff] }
 0x44b   : > { %3439 = vmatpush2.msra.mxu1 %v2617_v18  ;;  %3509 = vmatprep.subr.mxu0 %v2108_v19  ;;  %v1901_v18 = vld [vmem:[#allocation11 + $0x3d0] sm:$0xff]  ;;  %v2395_v19 = vld [vmem:[#allocation11 + $0x1340] sm:$0xff] }
 0x44c   : > { %3440 = vmatprep.subr.mxu1 %v2602_v20  ;;  %3510 = vmatpush2.msra.mxu0 %v2107_v50  ;;  %v1886_v20 = vld [vmem:[#allocation11 + $0x358] sm:$0xff]  ;;  %v2380_v50 = vld [vmem:[#allocation11 + $0x12c8] sm:$0xff] }
 0x44d   : > { %3441 = vmatpush2.msra.mxu1 %v2601_v21  ;;  %3511 = vmatprep.subr.mxu0 %v2092_v22  ;;  %v1885_v21 = vld [vmem:[#allocation11 + $0x350] sm:$0xff]  ;;  %v2379_v22 = vld [vmem:[#allocation11 + $0x12c0] sm:$0xff] }
 0x44e   : > { %3442 = vmatprep.subr.mxu1 %v2586_v23  ;;  %3512 = vmatpush2.msra.mxu0 %v2091_v24  ;;  %v1870_v23 = vld [vmem:[#allocation11 + $0x2d8] sm:$0xff]  ;;  %v2364_v24 = vld [vmem:[#allocation11 + $0x1248] sm:$0xff] }
 0x44f   : > { %3443 = vmatpush2.msra.mxu1 %v2585_v25  ;;  %3513 = vmatprep.subr.mxu0 %v2076_v26  ;;  %v1869_v25 = vld [vmem:[#allocation11 + $0x2d0] sm:$0xff]  ;;  %v2363_v26 = vld [vmem:[#allocation11 + $0x1240] sm:$0xff] }
 0x450   : > { %3444 = vmatprep.subr.mxu1 %v2570_v28  ;;  %3514 = vmatpush2.msra.mxu0 %v2075_v29  ;;  %v1854_v28 = vld [vmem:[#allocation11 + $0x258] sm:$0xff]  ;;  %v2348_v29 = vld [vmem:[#allocation11 + $0x11c8] sm:$0xff] }
 0x451   : > { %3445 = vmatpush2.msra.mxu1 %v2569_v30  ;;  %3515 = vmatprep.subr.mxu0 %v2060_v32  ;;  %v1853_v30 = vld [vmem:[#allocation11 + $0x250] sm:$0xff]  ;;  %v2347_v32 = vld [vmem:[#allocation11 + $0x11c0] sm:$0xff] }
 0x452   : > { %3446 = vmatprep.subr.mxu1 %v2554_v33  ;;  %3516 = vmatpush2.msra.mxu0 %v2059_v34  ;;  %v1838_v33 = vld [vmem:[#allocation11 + $0x1d8] sm:$0xff]  ;;  %v2332_v34 = vld [vmem:[#allocation11 + $0x1148] sm:$0xff] }
 0x453   : > { %3447 = vmatpush2.msra.mxu1 %v2553_v35  ;;  %3517 = vmatprep.subr.mxu0 %v2044_v36  ;;  %v1837_v35 = vld [vmem:[#allocation11 + $0x1d0] sm:$0xff]  ;;  %v2331_v36 = vld [vmem:[#allocation11 + $0x1140] sm:$0xff] }
 0x454   : > { %3449 = vmatmul.mubr.f32.vlgmr.msra.gmra.mxu1 %v6056_v45  ;;  %3518 = vmatpush2.msra.mxu0 %v2043_v40  ;;  %v1822_v40 = vld [vmem:[#allocation11 + $0x158] sm:$0xff] }
 0x455   : > { %3526 = vmatprep.subr.mxu1 %v2540_v11  ;;  %3520 = vmatmul.mubr.f32.vlgmr.msra.gmra.mxu0 %v6045_v55  ;;  %v2316_v11 = vld [vmem:[#allocation11 + $0x10c8] sm:$0xff] }
 0x456   : > { %3527 = vmatpush1.msra.mxu1 %v2539_v43  ;;  %3590 = vmatprep.mubr.f32.mxu1 %v6054_v44  ;;  %v1821_v43 = vld [vmem:[#allocation11 + $0x150] sm:$0xff] }
 0x457   : > { %3597 = vmatprep.subr.mxu0 %v2030_v46  ;;  %3528 = vmatprep.subr.mxu1 %v2524_v47  ;;  %v2315_v46 = vld [vmem:[#allocation11 + $0x10c0] sm:$0xff]  ;;  %v1806_v47 = vld [vmem:[#allocation11 + $0xd8] sm:$0xff] }
 0x458   : > { %3598 = vmatpush1.msra.mxu0 %v2029_v48  ;;  %3661 = vmatprep.mubr.f32.mxu0 %v6043_v58  ;;  %v2300_v48 = vld [vmem:[#allocation11 + $0x1048] sm:$0xff] }
 0x459   : > { %3529 = vmatpush1.msra.mxu1 %v2523_v52  ;;  %3599 = vmatprep.subr.mxu0 %v2014_v53  ;;  %v1805_v52 = vld [vmem:[#allocation11 + $0xd0] sm:$0xff]  ;;  %v2299_v53 = vld [vmem:[#allocation11 + $0x1040] sm:$0xff] }
 0x45a   : > { %3530 = vmatprep.subr.mxu1 %v2508_v49  ;;  %3600 = vmatpush1.msra.mxu0 %v2013_v54  ;;  %v1790_v49 = vld [vmem:[#allocation11 + $0x58] sm:$0xff]  ;;  %v2796_v54 = vld [vmem:[#allocation11 + $0x1fc8] sm:$0xff] }
 0x45b   : > { %3531 = vmatpush1.msra.mxu1 %v2507_v56  ;;  %3601 = vmatprep.subr.mxu0 %v1998_v59  ;;  %v1789_v56 = vld [vmem:[#allocation11 + $0x50] sm:$0xff]  ;;  %v2795_v59 = vld [vmem:[#allocation11 + $0x1fc0] sm:$0xff] }
 0x45c   : > { %3532 = vmatprep.subr.mxu1 %v2492_v60  ;;  %3602 = vmatpush1.msra.mxu0 %v1997_v61  ;;  %v2286_v60 = vld [vmem:[#allocation11 + $0xfd8] sm:$0xff]  ;;  %v2780_v61 = vld [vmem:[#allocation11 + $0x1f48] sm:$0xff] }
 0x45d   : > { %3533 = vmatpush1.msra.mxu1 %v2491_v62  ;;  %3603 = vmatprep.subr.mxu0 %v1982_v63  ;;  %v2285_v62 = vld [vmem:[#allocation11 + $0xfd0] sm:$0xff]  ;;  %v2779_v63 = vld [vmem:[#allocation11 + $0x1f40] sm:$0xff] }
 0x45e   : > { %3534 = vmatprep.subr.mxu1 %v2476_v0  ;;  %3604 = vmatpush1.msra.mxu0 %v1981_v1  ;;  %v2270_v0 = vld [vmem:[#allocation11 + $0xf58] sm:$0xff]  ;;  %v2764_v1 = vld [vmem:[#allocation11 + $0x1ec8] sm:$0xff] }
 0x45f   : > { %3535 = vmatpush1.msra.mxu1 %v2475_v2  ;;  %3605 = vmatprep.subr.mxu0 %v1966_v3  ;;  %v2269_v2 = vld [vmem:[#allocation11 + $0xf50] sm:$0xff]  ;;  %v2763_v3 = vld [vmem:[#allocation11 + $0x1ec0] sm:$0xff] }
 0x460   : > { %3536 = vmatprep.subr.mxu1 %v2460_v4  ;;  %3606 = vmatpush1.msra.mxu0 %v1965_v27  ;;  %v2254_v4 = vld [vmem:[#allocation11 + $0xed8] sm:$0xff]  ;;  %v2748_v27 = vld [vmem:[#allocation11 + $0x1e48] sm:$0xff] }
 0x461   : > { %3537 = vmatpush1.msra.mxu1 %v2459_v31  ;;  %3607 = vmatprep.subr.mxu0 %v1950_v5  ;;  %v2253_v31 = vld [vmem:[#allocation11 + $0xed0] sm:$0xff]  ;;  %v2747_v5 = vld [vmem:[#allocation11 + $0x1e40] sm:$0xff] }
 0x462   : > { %3538 = vmatprep.subr.mxu1 %v2444_v6  ;;  %3608 = vmatpush1.msra.mxu0 %v1949_v7  ;;  %v2238_v6 = vld [vmem:[#allocation11 + $0xe58] sm:$0xff]  ;;  %v2732_v7 = vld [vmem:[#allocation11 + $0x1dc8] sm:$0xff] }
 0x463   : > { %3539 = vmatpush1.msra.mxu1 %v2443_v8  ;;  %3609 = vmatprep.subr.mxu0 %v1934_v51  ;;  %v2237_v8 = vld [vmem:[#allocation11 + $0xe50] sm:$0xff]  ;;  %v2731_v51 = vld [vmem:[#allocation11 + $0x1dc0] sm:$0xff] }
 0x464   : > { %3540 = vmatprep.subr.mxu1 %v2428_v57  ;;  %3610 = vmatpush1.msra.mxu0 %v1933_v9  ;;  %v2222_v57 = vld [vmem:[#allocation11 + $0xdd8] sm:$0xff]  ;;  %v2716_v9 = vld [vmem:[#allocation11 + $0x1d48] sm:$0xff] }
 0x465   : > { %3541 = vmatpush1.msra.mxu1 %v2427_v10  ;;  %3611 = vmatprep.subr.mxu0 %v1918_v12  ;;  %v2221_v10 = vld [vmem:[#allocation11 + $0xdd0] sm:$0xff]  ;;  %v2715_v12 = vld [vmem:[#allocation11 + $0x1d40] sm:$0xff] }
 0x466   : > { %3542 = vmatprep.subr.mxu1 %v2412_v13  ;;  %3612 = vmatpush1.msra.mxu0 %v1917_v14  ;;  %v2206_v13 = vld [vmem:[#allocation11 + $0xd58] sm:$0xff]  ;;  %v2700_v14 = vld [vmem:[#allocation11 + $0x1cc8] sm:$0xff] }
 0x467   : > { %3543 = vmatpush1.msra.mxu1 %v2411_v15  ;;  %3613 = vmatprep.subr.mxu0 %v1902_v16  ;;  %v2205_v15 = vld [vmem:[#allocation11 + $0xd50] sm:$0xff]  ;;  %v2699_v16 = vld [vmem:[#allocation11 + $0x1cc0] sm:$0xff] }
 0x468   : > { %3544 = vmatprep.subr.mxu1 %v2396_v17  ;;  %3614 = vmatpush1.msra.mxu0 %v1901_v18  ;;  %v2190_v17 = vld [vmem:[#allocation11 + $0xcd8] sm:$0xff]  ;;  %v2684_v18 = vld [vmem:[#allocation11 + $0x1c48] sm:$0xff] }
 0x469   : > { %3545 = vmatpush1.msra.mxu1 %v2395_v19  ;;  %3615 = vmatprep.subr.mxu0 %v1886_v20  ;;  %v2189_v19 = vld [vmem:[#allocation11 + $0xcd0] sm:$0xff]  ;;  %v2683_v20 = vld [vmem:[#allocation11 + $0x1c40] sm:$0xff] }
 0x46a   : > { %3546 = vmatprep.subr.mxu1 %v2380_v50  ;;  %3616 = vmatpush1.msra.mxu0 %v1885_v21  ;;  %v2174_v50 = vld [vmem:[#allocation11 + $0xc58] sm:$0xff]  ;;  %v2668_v21 = vld [vmem:[#allocation11 + $0x1bc8] sm:$0xff] }
 0x46b   : > { %3547 = vmatpush1.msra.mxu1 %v2379_v22  ;;  %3617 = vmatprep.subr.mxu0 %v1870_v23  ;;  %v2173_v22 = vld [vmem:[#allocation11 + $0xc50] sm:$0xff]  ;;  %v2667_v23 = vld [vmem:[#allocation11 + $0x1bc0] sm:$0xff] }
 0x46c   : > { %3548 = vmatprep.subr.mxu1 %v2364_v24  ;;  %3618 = vmatpush1.msra.mxu0 %v1869_v25  ;;  %v2158_v24 = vld [vmem:[#allocation11 + $0xbd8] sm:$0xff]  ;;  %v2652_v25 = vld [vmem:[#allocation11 + $0x1b48] sm:$0xff] }
 0x46d   : > { %3549 = vmatpush1.msra.mxu1 %v2363_v26  ;;  %3619 = vmatprep.subr.mxu0 %v1854_v28  ;;  %v2157_v26 = vld [vmem:[#allocation11 + $0xbd0] sm:$0xff]  ;;  %v6075_v28 = vpop.f32.mrf.mxu0 }
 0x46e   : > { %3550 = vmatprep.subr.mxu1 %v2348_v29  ;;  %3620 = vmatpush1.msra.mxu0 %v1853_v30  ;;  %v2651_v29 = vld [vmem:[#allocation11 + $0x1b40] sm:$0xff]  ;;  %v2142_v30 = vld [vmem:[#allocation11 + $0xb58] sm:$0xff] }
 0x46f   : > { %3551 = vmatpush1.msra.mxu1 %v2347_v32  ;;  %3621 = vmatprep.subr.mxu0 %v1838_v33  ;;  %v2636_v32 = vld [vmem:[#allocation11 + $0x1ac8] sm:$0xff]  ;;  %v2141_v33 = vld [vmem:[#allocation11 + $0xb50] sm:$0xff] }
 0x470   : > { %3552 = vmatprep.subr.mxu1 %v2332_v34  ;;  %3622 = vmatpush1.msra.mxu0 %v1837_v35  ;;  %v2635_v34 = vld [vmem:[#allocation11 + $0x1ac0] sm:$0xff]  ;;  %v2126_v35 = vld [vmem:[#allocation11 + $0xad8] sm:$0xff] }
 0x471   : > { %3553 = vmatpush1.msra.mxu1 %v2331_v36  ;;  %3623 = vmatprep.subr.mxu0 %v1822_v40  ;;  %v2620_v36 = vld [vmem:[#allocation11 + $0x1a48] sm:$0xff]  ;;  %v2125_v40 = vld [vmem:[#allocation11 + $0xad0] sm:$0xff] }
 0x472   : > { %3554 = vmatprep.subr.mxu1 %v2316_v11  ;;  %3624 = vmatpush1.msra.mxu0 %v1821_v43  ;;  %v2803_v11 = vld [vmem:[#allocation13] sm:$0xff]  ;;  %v6077_v43 = vpop.f32.mrf.mxu0 }
 0x473   : > { %3555 = vmatpush1.msra.mxu1 %v2315_v46  ;;  %3625 = vmatprep.subr.mxu0 %v1806_v47  ;;  %v6079_v46 = vpop.f32.mrf.mxu1  ;;  %v2619_v47 = vld [vmem:[#allocation11 + $0x1a40] sm:$0xff] }
 0x474   : > { %3556 = vmatprep.subr.mxu1 %v2300_v48  ;;  %3626 = vmatpush1.msra.mxu0 %v1805_v52  ;;  %v2110_v48 = vld [vmem:[#allocation11 + $0xa58] sm:$0xff]  ;;  %v2818_v52 = vrot.slane %v2803_v11, %v5984_v38  ;;  %v1936_v11 = vld [vmem:[#allocation11 + $0x4e8] sm:$0xff] }
 0x475   : > { %3557 = vmatpush1.msra.mxu1 %v2299_v53  ;;  %3627 = vmatprep.subr.mxu0 %v1790_v49  ;;  %v2604_v53 = vld [vmem:[#allocation11 + $0x19c8] sm:$0xff]  ;;  %v2109_v49 = vld [vmem:[#allocation11 + $0xa50] sm:$0xff] }
 0x476   : > { %3558 = vmatprep.subr.mxu1 %v2796_v54  ;;  %3628 = vmatpush1.msra.mxu0 %v1789_v56  ;;  %v3095_v54 = vpop.f32.mrf.mxu0  ;;  %v2603_v56 = vld [vmem:[#allocation11 + $0x19c0] sm:$0xff] }
 0x477   : > { %3559 = vmatpush2.msra.mxu1 %v2795_v59  ;;  %3629 = vmatprep.subr.mxu0 %v2286_v60  ;;  %v2094_v59 = vld [vmem:[#allocation11 + $0x9d8] sm:$0xff]  ;;  %v2588_v60 = vld [vmem:[#allocation11 + $0x1948] sm:$0xff] }
 0x478   : > { %3560 = vmatprep.subr.mxu1 %v2780_v61  ;;  %3630 = vmatpush2.msra.mxu0 %v2285_v62  ;;  %v2093_v61 = vld [vmem:[#allocation11 + $0x9d0] sm:$0xff]  ;;  %v6082_v62 = vpop.f32.mrf.mxu1 }
 0x479   : > { %3561 = vmatpush2.msra.mxu1 %v2779_v63  ;;  %3631 = vmatprep.subr.mxu0 %v2270_v0  ;;  %v2587_v63 = vld [vmem:[#allocation11 + $0x1940] sm:$0xff]  ;;  %v2078_v0 = vld [vmem:[#allocation11 + $0x958] sm:$0xff] }
 0x47a   : > { %3562 = vmatprep.subr.mxu1 %v2764_v1  ;;  %3632 = vmatpush2.msra.mxu0 %v2269_v2  ;;  %v3096_v1 = vadd.f32 %v3095_v54, %v2818_v52  ;;  %v2572_v2 = vld [vmem:[#allocation11 + $0x18c8] sm:$0xff]  ;;  %v2429_v52 = vld [vmem:[#allocation11 + $0x1450] sm:$0xff]  ;;  %v1919_v54 = vld [vmem:[#allocation11 + $0x460] sm:$0xff] }
 0x47b   : > { %3563 = vmatpush2.msra.mxu1 %v2763_v3  ;;  %3633 = vmatprep.subr.mxu0 %v2254_v4  ;;  %v2077_v3 = vld [vmem:[#allocation11 + $0x950] sm:$0xff]  ;;  %v2571_v4 = vld [vmem:[#allocation11 + $0x18c0] sm:$0xff] }
 0x47c   : > { %3564 = vmatprep.subr.mxu1 %v2748_v27  ;;  %3634 = vmatpush2.msra.mxu0 %v2253_v31  ;;  %v2062_v27 = vld [vmem:[#allocation11 + $0x8d8] sm:$0xff] }
 0x47d   : > { %3565 = vmatpush2.msra.mxu1 %v2747_v5  ;;  %3635 = vmatprep.subr.mxu0 %v2238_v6  ;;  %v2556_v5 = vld [vmem:[#allocation11 + $0x1848] sm:$0xff]  ;;  %v2061_v6 = vld [vmem:[#allocation11 + $0x8d0] sm:$0xff] }
 0x47e   : > { %3566 = vmatprep.subr.mxu1 %v2732_v7  ;;  %3636 = vmatpush2.msra.mxu0 %v2237_v8  ;;  %v2555_v8 = vld [vmem:[#allocation11 + $0x1840] sm:$0xff] }
 0x47f   : > { %3567 = vmatpush2.msra.mxu1 %v2731_v51  ;;  %3637 = vmatprep.subr.mxu0 %v2222_v57  ;;  %v2046_v51 = vld [vmem:[#allocation11 + $0x858] sm:$0xff]  ;;  %v2045_v57 = vld [vmem:[#allocation11 + $0x850] sm:$0xff] }
 0x480   : > { %3568 = vmatprep.subr.mxu1 %v2716_v9  ;;  %3638 = vmatpush2.msra.mxu0 %v2221_v10  ;;  %v2542_v9 = vld [vmem:[#allocation11 + $0x17d8] sm:$0xff]  ;;  %v2541_v10 = vld [vmem:[#allocation11 + $0x17d0] sm:$0xff] }
 0x481   : > { %3569 = vmatpush2.msra.mxu1 %v2715_v12  ;;  %3639 = vmatprep.subr.mxu0 %v2206_v13  ;;  %v2032_v12 = vld [vmem:[#allocation11 + $0x7e8] sm:$0xff]  ;;  %v2526_v13 = vld [vmem:[#allocation11 + $0x1758] sm:$0xff] }
 0x482   : > { %3570 = vmatprep.subr.mxu1 %v2700_v14  ;;  %3640 = vmatpush2.msra.mxu0 %v2205_v15  ;;  %v2031_v14 = vld [vmem:[#allocation11 + $0x7e0] sm:$0xff]  ;;  %v2525_v15 = vld [vmem:[#allocation11 + $0x1750] sm:$0xff] }
 0x483   : > { %3571 = vmatpush2.msra.mxu1 %v2699_v16  ;;  %3641 = vmatprep.subr.mxu0 %v2190_v17  ;;  %v2016_v16 = vld [vmem:[#allocation11 + $0x768] sm:$0xff]  ;;  %v2510_v17 = vld [vmem:[#allocation11 + $0x16d8] sm:$0xff] }
 0x484   : > { %3572 = vmatprep.subr.mxu1 %v2684_v18  ;;  %3642 = vmatpush2.msra.mxu0 %v2189_v19  ;;  %v2015_v18 = vld [vmem:[#allocation11 + $0x760] sm:$0xff]  ;;  %v2509_v19 = vld [vmem:[#allocation11 + $0x16d0] sm:$0xff] }
 0x485   : > { %3573 = vmatpush2.msra.mxu1 %v2683_v20  ;;  %3643 = vmatprep.subr.mxu0 %v2174_v50  ;;  %v2000_v20 = vld [vmem:[#allocation11 + $0x6e8] sm:$0xff]  ;;  %v2494_v50 = vld [vmem:[#allocation11 + $0x1658] sm:$0xff] }
 0x486   : > { %3574 = vmatprep.subr.mxu1 %v2668_v21  ;;  %3644 = vmatpush2.msra.mxu0 %v2173_v22  ;;  %v1999_v21 = vld [vmem:[#allocation11 + $0x6e0] sm:$0xff]  ;;  %v2493_v22 = vld [vmem:[#allocation11 + $0x1650] sm:$0xff] }
 0x487   : > { %3575 = vmatpush2.msra.mxu1 %v2667_v23  ;;  %3645 = vmatprep.subr.mxu0 %v2158_v24  ;;  %v1984_v23 = vld [vmem:[#allocation11 + $0x668] sm:$0xff]  ;;  %v2478_v24 = vld [vmem:[#allocation11 + $0x15d8] sm:$0xff] }
 0x488   : > { %3576 = vmatprep.subr.mxu1 %v2652_v25  ;;  %3646 = vmatpush2.msra.mxu0 %v2157_v26  ;;  %v1983_v25 = vld [vmem:[#allocation11 + $0x660] sm:$0xff]  ;;  %v2477_v26 = vld [vmem:[#allocation11 + $0x15d0] sm:$0xff] }
 0x489   : > { %3577 = vmatpush2.msra.mxu1 %v2651_v29  ;;  %3647 = vmatprep.subr.mxu0 %v2142_v30  ;;  %v1968_v29 = vld [vmem:[#allocation11 + $0x5e8] sm:$0xff]  ;;  %v2462_v30 = vld [vmem:[#allocation11 + $0x1558] sm:$0xff] }
 0x48a   : > { %3578 = vmatprep.subr.mxu1 %v2636_v32  ;;  %3648 = vmatpush2.msra.mxu0 %v2141_v33  ;;  %v1967_v32 = vld [vmem:[#allocation11 + $0x5e0] sm:$0xff]  ;;  %v2461_v33 = vld [vmem:[#allocation11 + $0x1550] sm:$0xff] }
 0x48b   : > { %3579 = vmatpush2.msra.mxu1 %v2635_v34  ;;  %3649 = vmatprep.subr.mxu0 %v2126_v35  ;;  %v1952_v34 = vld [vmem:[#allocation11 + $0x568] sm:$0xff]  ;;  %v2446_v35 = vld [vmem:[#allocation11 + $0x14d8] sm:$0xff] }
 0x48c   : > { %3580 = vmatprep.subr.mxu1 %v2620_v36  ;;  %3650 = vmatpush2.msra.mxu0 %v2125_v40  ;;  %v1951_v36 = vld [vmem:[#allocation11 + $0x560] sm:$0xff]  ;;  %v2445_v40 = vld [vmem:[#allocation11 + $0x14d0] sm:$0xff] }
 0x48d   : > { %3581 = vmatpush2.msra.mxu1 %v2619_v47  ;;  %3651 = vmatprep.subr.mxu0 %v2110_v48  ;;  %v2430_v47 = vld [vmem:[#allocation11 + $0x1458] sm:$0xff]  ;;  %v1935_v48 = vld [vmem:[#allocation11 + $0x4e0] sm:$0xff] }
 0x48e   : > { %3582 = vmatprep.subr.mxu1 %v2604_v53  ;;  %3652 = vmatpush2.msra.mxu0 %v2109_v49  ;;  %v1920_v53 = vld [vmem:[#allocation11 + $0x468] sm:$0xff]  ;;  %v2414_v49 = vld [vmem:[#allocation11 + $0x13d8] sm:$0xff] }
 0x48f   : > { %3583 = vmatpush2.msra.mxu1 %v2603_v56  ;;  %3653 = vmatprep.subr.mxu0 %v2094_v59  ;;  %v2413_v56 = vld [vmem:[#allocation11 + $0x13d0] sm:$0xff]  ;;  %v1904_v59 = vld [vmem:[#allocation11 + $0x3e8] sm:$0xff] }
 0x490   : > { %3584 = vmatprep.subr.mxu1 %v2588_v60  ;;  %3654 = vmatpush2.msra.mxu0 %v2093_v61  ;;  %v3166_v31 = vpop.f32.mrf.mxu1  ;;  %v2398_v60 = vld [vmem:[#allocation11 + $0x1358] sm:$0xff]  ;;  %v1903_v61 = vld [vmem:[#allocation11 + $0x3e0] sm:$0xff] }
 0x491   : > { %3585 = vmatpush2.msra.mxu1 %v2587_v63  ;;  %3655 = vmatprep.subr.mxu0 %v2078_v0  ;;  %v6084_v7 = vadd.f32 %v3166_v31, %v3096_v1  ;;  %v2397_v63 = vld [vmem:[#allocation11 + $0x1350] sm:$0xff]  ;;  %v1888_v0 = vld [vmem:[#allocation11 + $0x368] sm:$0xff]  ;;  %v2382_v1 = vld [vmem:[#allocation11 + $0x12d8] sm:$0xff] }
 0x492   : > { %3586 = vmatprep.subr.mxu1 %v2572_v2  ;;  %3656 = vmatpush2.msra.mxu0 %v2077_v3  ;;  %v1887_v2 = vld [vmem:[#allocation11 + $0x360] sm:$0xff]  ;;  %v2381_v3 = vld [vmem:[#allocation11 + $0x12d0] sm:$0xff] }
 0x493   : > { %3587 = vmatpush2.msra.mxu1 %v2571_v4  ;;  %3657 = vmatprep.subr.mxu0 %v2062_v27  ;;  %v1872_v4 = vld [vmem:[#allocation11 + $0x2e8] sm:$0xff]  ;;  %v2366_v27 = vld [vmem:[#allocation11 + $0x1258] sm:$0xff]  ;;  %v1871_v31 = vld [vmem:[#allocation11 + $0x2e0] sm:$0xff] }
 0x494   : > { %3588 = vmatprep.subr.mxu1 %v2556_v5  ;;  %3658 = vmatpush2.msra.mxu0 %v2061_v6  ;;  %v2365_v5 = vld [vmem:[#allocation11 + $0x1250] sm:$0xff]  ;;  %v1856_v6 = vld [vmem:[#allocation11 + $0x268] sm:$0xff] }
 0x495   : > { %3589 = vmatpush2.msra.mxu1 %v2555_v8  ;;  %3659 = vmatprep.subr.mxu0 %v2046_v51  ;;  %v2350_v8 = vld [vmem:[#allocation11 + $0x11d8] sm:$0xff]  ;;  %v1855_v51 = vld [vmem:[#allocation11 + $0x260] sm:$0xff] }
 0x496   : > { %3591 = vmatmul.mubr.f32.vlgmr.msra.gmra.mxu1 %v6056_v45  ;;  %3660 = vmatpush2.msra.mxu0 %v2045_v57  ;;  %v2349_v57 = vld [vmem:[#allocation11 + $0x11d0] sm:$0xff] }
 0x497   : > { %3668 = vmatprep.subr.mxu1 %v2542_v9  ;;  %3662 = vmatmul.mubr.f32.vlgmr.msra.gmra.mxu0 %v6045_v55  ;;  %v1840_v9 = vld [vmem:[#allocation11 + $0x1e8] sm:$0xff] }
 0x498   : > { %3669 = vmatpush1.msra.mxu1 %v2541_v10  ;;  %3732 = vmatprep.mubr.f32.mxu1 %v6054_v44  ;;  %v2334_v10 = vld [vmem:[#allocation11 + $0x1158] sm:$0xff] }
 0x499   : > { %3739 = vmatprep.subr.mxu0 %v2032_v12  ;;  %3670 = vmatprep.subr.mxu1 %v2526_v13  ;;  %v1839_v12 = vld [vmem:[#allocation11 + $0x1e0] sm:$0xff]  ;;  %v2333_v13 = vld [vmem:[#allocation11 + $0x1150] sm:$0xff] }
 0x49a   : > { %3740 = vmatpush1.msra.mxu0 %v2031_v14  ;;  %3803 = vmatprep.mubr.f32.mxu0 %v6043_v58  ;;  %v1824_v14 = vld [vmem:[#allocation11 + $0x168] sm:$0xff] }
 0x49b   : > { %3671 = vmatpush1.msra.mxu1 %v2525_v15  ;;  %3741 = vmatprep.subr.mxu0 %v2016_v16  ;;  %v2318_v15 = vld [vmem:[#allocation11 + $0x10d8] sm:$0xff]  ;;  %v1823_v16 = vld [vmem:[#allocation11 + $0x160] sm:$0xff] }
 0x49c   : > { %3672 = vmatprep.subr.mxu1 %v2510_v17  ;;  %3742 = vmatpush1.msra.mxu0 %v2015_v18  ;;  %v2317_v17 = vld [vmem:[#allocation11 + $0x10d0] sm:$0xff]  ;;  %v1808_v18 = vld [vmem:[#allocation11 + $0xe8] sm:$0xff] }
 0x49d   : > { %3673 = vmatpush1.msra.mxu1 %v2509_v19  ;;  %3743 = vmatprep.subr.mxu0 %v2000_v20  ;;  %v2302_v19 = vld [vmem:[#allocation11 + $0x1058] sm:$0xff]  ;;  %v1807_v20 = vld [vmem:[#allocation11 + $0xe0] sm:$0xff] }
 0x49e   : > { %3674 = vmatprep.subr.mxu1 %v2494_v50  ;;  %3744 = vmatpush1.msra.mxu0 %v1999_v21  ;;  %v2301_v50 = vld [vmem:[#allocation11 + $0x1050] sm:$0xff]  ;;  %v1792_v21 = vld [vmem:[#allocation11 + $0x68] sm:$0xff] }
 0x49f   : > { %3675 = vmatpush1.msra.mxu1 %v2493_v22  ;;  %3745 = vmatprep.subr.mxu0 %v1984_v23  ;;  %v2798_v22 = vld [vmem:[#allocation11 + $0x1fd8] sm:$0xff]  ;;  %v1791_v23 = vld [vmem:[#allocation11 + $0x60] sm:$0xff] }
 0x4a0   : > { %3676 = vmatprep.subr.mxu1 %v2478_v24  ;;  %3746 = vmatpush1.msra.mxu0 %v1983_v25  ;;  %v2797_v24 = vld [vmem:[#allocation11 + $0x1fd0] sm:$0xff]  ;;  %v2288_v25 = vld [vmem:[#allocation11 + $0xfe8] sm:$0xff] }
 0x4a1   : > { %3677 = vmatpush1.msra.mxu1 %v2477_v26  ;;  %3747 = vmatprep.subr.mxu0 %v1968_v29  ;;  %v2782_v26 = vld [vmem:[#allocation11 + $0x1f58] sm:$0xff]  ;;  %v2287_v29 = vld [vmem:[#allocation11 + $0xfe0] sm:$0xff] }
 0x4a2   : > { %3678 = vmatprep.subr.mxu1 %v2462_v30  ;;  %3748 = vmatpush1.msra.mxu0 %v1967_v32  ;;  %v2781_v30 = vld [vmem:[#allocation11 + $0x1f50] sm:$0xff]  ;;  %v2272_v32 = vld [vmem:[#allocation11 + $0xf68] sm:$0xff] }
 0x4a3   : > { %3679 = vmatpush1.msra.mxu1 %v2461_v33  ;;  %3749 = vmatprep.subr.mxu0 %v1952_v34  ;;  %v2766_v33 = vld [vmem:[#allocation11 + $0x1ed8] sm:$0xff]  ;;  %v2271_v34 = vld [vmem:[#allocation11 + $0xf60] sm:$0xff] }
 0x4a4   : > { %3680 = vmatprep.subr.mxu1 %v2446_v35  ;;  %3750 = vmatpush1.msra.mxu0 %v1951_v36  ;;  %v2765_v35 = vld [vmem:[#allocation11 + $0x1ed0] sm:$0xff]  ;;  %v2256_v36 = vld [vmem:[#allocation11 + $0xee8] sm:$0xff] }
 0x4a5   : > { %3681 = vmatpush1.msra.mxu1 %v2445_v40  ;;  %3751 = vmatprep.subr.mxu0 %v1936_v11  ;;  %v2750_v40 = vld [vmem:[#allocation11 + $0x1e58] sm:$0xff]  ;;  %v2255_v11 = vld [vmem:[#allocation11 + $0xee0] sm:$0xff] }
 0x4a6   : > { %3682 = vmatprep.subr.mxu1 %v2430_v47  ;;  %3752 = vmatpush1.msra.mxu0 %v1935_v48  ;;  %v2749_v47 = vld [vmem:[#allocation11 + $0x1e50] sm:$0xff]  ;;  %v2240_v48 = vld [vmem:[#allocation11 + $0xe68] sm:$0xff] }
 0x4a7   : > { %3683 = vmatpush1.msra.mxu1 %v2429_v52  ;;  %3753 = vmatprep.subr.mxu0 %v1920_v53  ;;  %v2734_v52 = vld [vmem:[#allocation11 + $0x1dd8] sm:$0xff]  ;;  %v2239_v53 = vld [vmem:[#allocation11 + $0xe60] sm:$0xff] }
 0x4a8   : > { %3684 = vmatprep.subr.mxu1 %v2414_v49  ;;  %3754 = vmatpush1.msra.mxu0 %v1919_v54  ;;  %v2733_v49 = vld [vmem:[#allocation11 + $0x1dd0] sm:$0xff]  ;;  %v2224_v54 = vld [vmem:[#allocation11 + $0xde8] sm:$0xff] }
 0x4a9   : > { %3685 = vmatpush1.msra.mxu1 %v2413_v56  ;;  %3755 = vmatprep.subr.mxu0 %v1904_v59  ;;  %v2718_v56 = vld [vmem:[#allocation11 + $0x1d58] sm:$0xff]  ;;  %v2223_v59 = vld [vmem:[#allocation11 + $0xde0] sm:$0xff] }
 0x4aa   : > { %3686 = vmatprep.subr.mxu1 %v2398_v60  ;;  %3756 = vmatpush1.msra.mxu0 %v1903_v61  ;;  %v2717_v60 = vld [vmem:[#allocation11 + $0x1d50] sm:$0xff]  ;;  %v2208_v61 = vld [vmem:[#allocation11 + $0xd68] sm:$0xff] }
 0x4ab   : > { %3687 = vmatpush1.msra.mxu1 %v2397_v63  ;;  %3757 = vmatprep.subr.mxu0 %v1888_v0  ;;  %v2702_v63 = vld [vmem:[#allocation11 + $0x1cd8] sm:$0xff]  ;;  %v2207_v0 = vld [vmem:[#allocation11 + $0xd60] sm:$0xff] }
 0x4ac   : > { %3688 = vmatprep.subr.mxu1 %v2382_v1  ;;  %3758 = vmatpush1.msra.mxu0 %v1887_v2  ;;  %v2701_v1 = vld [vmem:[#allocation11 + $0x1cd0] sm:$0xff]  ;;  %v2192_v2 = vld [vmem:[#allocation11 + $0xce8] sm:$0xff] }
 0x4ad   : > { %3689 = vmatpush1.msra.mxu1 %v2381_v3  ;;  %3759 = vmatprep.subr.mxu0 %v1872_v4  ;;  %v2686_v3 = vld [vmem:[#allocation11 + $0x1c58] sm:$0xff]  ;;  %v2191_v4 = vld [vmem:[#allocation11 + $0xce0] sm:$0xff] }
 0x4ae   : > { %3690 = vmatprep.subr.mxu1 %v2366_v27  ;;  %3760 = vmatpush1.msra.mxu0 %v1871_v31  ;;  %v2685_v27 = vld [vmem:[#allocation11 + $0x1c50] sm:$0xff]  ;;  %v2176_v31 = vld [vmem:[#allocation11 + $0xc68] sm:$0xff] }
 0x4af   : > { %3691 = vmatpush1.msra.mxu1 %v2365_v5  ;;  %3761 = vmatprep.subr.mxu0 %v1856_v6  ;;  %v2670_v5 = vld [vmem:[#allocation11 + $0x1bd8] sm:$0xff]  ;;  %v2175_v6 = vld [vmem:[#allocation11 + $0xc60] sm:$0xff] }
 0x4b0   : > { %3692 = vmatprep.subr.mxu1 %v2350_v8  ;;  %3762 = vmatpush1.msra.mxu0 %v1855_v51  ;;  %v2669_v8 = vld [vmem:[#allocation11 + $0x1bd0] sm:$0xff]  ;;  %v2160_v51 = vld [vmem:[#allocation11 + $0xbe8] sm:$0xff] }
 0x4b1   : > { %3693 = vmatpush1.msra.mxu1 %v2349_v57  ;;  %3763 = vmatprep.subr.mxu0 %v1840_v9  ;;  %v2654_v57 = vld [vmem:[#allocation11 + $0x1b58] sm:$0xff]  ;;  %v2159_v9 = vld [vmem:[#allocation11 + $0xbe0] sm:$0xff] }
 0x4b2   : > { %3694 = vmatprep.subr.mxu1 %v2334_v10  ;;  %3764 = vmatpush1.msra.mxu0 %v1839_v12  ;;  %v2653_v10 = vld [vmem:[#allocation11 + $0x1b50] sm:$0xff]  ;;  %v2144_v12 = vld [vmem:[#allocation11 + $0xb68] sm:$0xff] }
 0x4b3   : > { %3695 = vmatpush1.msra.mxu1 %v2333_v13  ;;  %3765 = vmatprep.subr.mxu0 %v1824_v14  ;;  %v2638_v13 = vld [vmem:[#allocation11 + $0x1ad8] sm:$0xff]  ;;  %v2143_v14 = vld [vmem:[#allocation11 + $0xb60] sm:$0xff] }
 0x4b4   : > { %3696 = vmatprep.subr.mxu1 %v2318_v15  ;;  %3766 = vmatpush1.msra.mxu0 %v1823_v16  ;;  %v2637_v15 = vld [vmem:[#allocation11 + $0x1ad0] sm:$0xff]  ;;  %v2128_v16 = vld [vmem:[#allocation11 + $0xae8] sm:$0xff] }
 0x4b5   : > { %3697 = vmatpush1.msra.mxu1 %v2317_v17  ;;  %3767 = vmatprep.subr.mxu0 %v1808_v18  ;;  %v2622_v17 = vld [vmem:[#allocation11 + $0x1a58] sm:$0xff]  ;;  %v2127_v18 = vld [vmem:[#allocation11 + $0xae0] sm:$0xff] }
 0x4b6   : > { %3698 = vmatprep.subr.mxu1 %v2302_v19  ;;  %3768 = vmatpush1.msra.mxu0 %v1807_v20  ;;  %v2621_v19 = vld [vmem:[#allocation11 + $0x1a50] sm:$0xff]  ;;  %v2112_v20 = vld [vmem:[#allocation11 + $0xa68] sm:$0xff] }
 0x4b7   : > { %3699 = vmatpush1.msra.mxu1 %v2301_v50  ;;  %3769 = vmatprep.subr.mxu0 %v1792_v21  ;;  %v2606_v50 = vld [vmem:[#allocation11 + $0x19d8] sm:$0xff]  ;;  %v2111_v21 = vld [vmem:[#allocation11 + $0xa60] sm:$0xff] }
 0x4b8   : > { %3700 = vmatprep.subr.mxu1 %v2798_v22  ;;  %3770 = vmatpush1.msra.mxu0 %v1791_v23  ;;  %v2605_v22 = vld [vmem:[#allocation11 + $0x19d0] sm:$0xff]  ;;  %v2096_v23 = vld [vmem:[#allocation11 + $0x9e8] sm:$0xff] }
 0x4b9   : > { %3701 = vmatpush2.msra.mxu1 %v2797_v24  ;;  %3771 = vmatprep.subr.mxu0 %v2288_v25  ;;  %v2590_v24 = vld [vmem:[#allocation11 + $0x1958] sm:$0xff]  ;;  %v2095_v25 = vld [vmem:[#allocation11 + $0x9e0] sm:$0xff] }
 0x4ba   : > { %3702 = vmatprep.subr.mxu1 %v2782_v26  ;;  %3772 = vmatpush2.msra.mxu0 %v2287_v29  ;;  %v2589_v26 = vld [vmem:[#allocation11 + $0x1950] sm:$0xff]  ;;  %v2080_v29 = vld [vmem:[#allocation11 + $0x968] sm:$0xff] }
 0x4bb   : > { %3703 = vmatpush2.msra.mxu1 %v2781_v30  ;;  %3773 = vmatprep.subr.mxu0 %v2272_v32  ;;  %v2574_v30 = vld [vmem:[#allocation11 + $0x18d8] sm:$0xff]  ;;  %v2079_v32 = vld [vmem:[#allocation11 + $0x960] sm:$0xff] }
 0x4bc   : > { %3704 = vmatprep.subr.mxu1 %v2766_v33  ;;  %3774 = vmatpush2.msra.mxu0 %v2271_v34  ;;  %v2573_v33 = vld [vmem:[#allocation11 + $0x18d0] sm:$0xff]  ;;  %v2064_v34 = vld [vmem:[#allocation11 + $0x8e8] sm:$0xff] }
 0x4bd   : > { %3705 = vmatpush2.msra.mxu1 %v2765_v35  ;;  %3775 = vmatprep.subr.mxu0 %v2256_v36  ;;  %v2558_v35 = vld [vmem:[#allocation11 + $0x1858] sm:$0xff]  ;;  %v2063_v36 = vld [vmem:[#allocation11 + $0x8e0] sm:$0xff] }
 0x4be   : > { %3706 = vmatprep.subr.mxu1 %v2750_v40  ;;  %3776 = vmatpush2.msra.mxu0 %v2255_v11  ;;  %v2557_v40 = vld [vmem:[#allocation11 + $0x1850] sm:$0xff]  ;;  %v2048_v11 = vld [vmem:[#allocation11 + $0x868] sm:$0xff] }
 0x4bf   : > { %3707 = vmatpush2.msra.mxu1 %v2749_v47  ;;  %3777 = vmatprep.subr.mxu0 %v2240_v48  ;;  %v2047_v47 = vld [vmem:[#allocation11 + $0x860] sm:$0xff]  ;;  %v2544_v48 = vld [vmem:[#allocation11 + $0x17e8] sm:$0xff] }
 0x4c0   : > { %3708 = vmatprep.subr.mxu1 %v2734_v52  ;;  %3778 = vmatpush2.msra.mxu0 %v2239_v53  ;;  %v2543_v52 = vld [vmem:[#allocation11 + $0x17e0] sm:$0xff]  ;;  %v2034_v53 = vld [vmem:[#allocation11 + $0x7f8] sm:$0xff] }
 0x4c1   : > { %3709 = vmatpush2.msra.mxu1 %v2733_v49  ;;  %3779 = vmatprep.subr.mxu0 %v2224_v54  ;;  %v2528_v49 = vld [vmem:[#allocation11 + $0x1768] sm:$0xff]  ;;  %v2033_v54 = vld [vmem:[#allocation11 + $0x7f0] sm:$0xff] }
 0x4c2   : > { %3710 = vmatprep.subr.mxu1 %v2718_v56  ;;  %3780 = vmatpush2.msra.mxu0 %v2223_v59  ;;  %v2527_v56 = vld [vmem:[#allocation11 + $0x1760] sm:$0xff]  ;;  %v2018_v59 = vld [vmem:[#allocation11 + $0x778] sm:$0xff] }
 0x4c3   : > { %3711 = vmatpush2.msra.mxu1 %v2717_v60  ;;  %3781 = vmatprep.subr.mxu0 %v2208_v61  ;;  %v2512_v60 = vld [vmem:[#allocation11 + $0x16e8] sm:$0xff]  ;;  %v2017_v61 = vld [vmem:[#allocation11 + $0x770] sm:$0xff] }
 0x4c4   : > { %3712 = vmatprep.subr.mxu1 %v2702_v63  ;;  %3782 = vmatpush2.msra.mxu0 %v2207_v0  ;;  %v2511_v63 = vld [vmem:[#allocation11 + $0x16e0] sm:$0xff]  ;;  %v2002_v0 = vld [vmem:[#allocation11 + $0x6f8] sm:$0xff] }
 0x4c5   : > { %3713 = vmatpush2.msra.mxu1 %v2701_v1  ;;  %3783 = vmatprep.subr.mxu0 %v2192_v2  ;;  %v2496_v1 = vld [vmem:[#allocation11 + $0x1668] sm:$0xff]  ;;  %v2001_v2 = vld [vmem:[#allocation11 + $0x6f0] sm:$0xff] }
 0x4c6   : > { %3714 = vmatprep.subr.mxu1 %v2686_v3  ;;  %3784 = vmatpush2.msra.mxu0 %v2191_v4  ;;  %v2495_v3 = vld [vmem:[#allocation11 + $0x1660] sm:$0xff]  ;;  %v1986_v4 = vld [vmem:[#allocation11 + $0x678] sm:$0xff] }
 0x4c7   : > { %3715 = vmatpush2.msra.mxu1 %v2685_v27  ;;  %3785 = vmatprep.subr.mxu0 %v2176_v31  ;;  %v2480_v27 = vld [vmem:[#allocation11 + $0x15e8] sm:$0xff]  ;;  %v1985_v31 = vld [vmem:[#allocation11 + $0x670] sm:$0xff] }
 0x4c8   : > { %3716 = vmatprep.subr.mxu1 %v2670_v5  ;;  %3786 = vmatpush2.msra.mxu0 %v2175_v6  ;;  %v2479_v5 = vld [vmem:[#allocation11 + $0x15e0] sm:$0xff]  ;;  %v1970_v6 = vld [vmem:[#allocation11 + $0x5f8] sm:$0xff] }
 0x4c9   : > { %3717 = vmatpush2.msra.mxu1 %v2669_v8  ;;  %3787 = vmatprep.subr.mxu0 %v2160_v51  ;;  %v1969_v8 = vld [vmem:[#allocation11 + $0x5f0] sm:$0xff]  ;;  %v2463_v51 = vld [vmem:[#allocation11 + $0x1560] sm:$0xff] }
 0x4ca   : > { %3718 = vmatprep.subr.mxu1 %v2654_v57  ;;  %3788 = vmatpush2.msra.mxu0 %v2159_v9  ;;  %v1954_v57 = vld [vmem:[#allocation11 + $0x578] sm:$0xff]  ;;  %v2448_v9 = vld [vmem:[#allocation11 + $0x14e8] sm:$0xff] }
 0x4cb   : > { %3719 = vmatpush2.msra.mxu1 %v2653_v10  ;;  %3789 = vmatprep.subr.mxu0 %v2144_v12  ;;  %v1953_v10 = vld [vmem:[#allocation11 + $0x570] sm:$0xff]  ;;  %v2447_v12 = vld [vmem:[#allocation11 + $0x14e0] sm:$0xff] }
 0x4cc   : > { %3720 = vmatprep.subr.mxu1 %v2638_v13  ;;  %3790 = vmatpush2.msra.mxu0 %v2143_v14  ;;  %v1938_v13 = vld [vmem:[#allocation11 + $0x4f8] sm:$0xff]  ;;  %v2432_v14 = vld [vmem:[#allocation11 + $0x1468] sm:$0xff] }
 0x4cd   : > { %3721 = vmatpush2.msra.mxu1 %v2637_v15  ;;  %3791 = vmatprep.subr.mxu0 %v2128_v16  ;;  %v1937_v15 = vld [vmem:[#allocation11 + $0x4f0] sm:$0xff]  ;;  %v2431_v16 = vld [vmem:[#allocation11 + $0x1460] sm:$0xff] }
 0x4ce   : > { %3722 = vmatprep.subr.mxu1 %v2622_v17  ;;  %3792 = vmatpush2.msra.mxu0 %v2127_v18  ;;  %v1922_v17 = vld [vmem:[#allocation11 + $0x478] sm:$0xff]  ;;  %v2416_v18 = vld [vmem:[#allocation11 + $0x13e8] sm:$0xff] }
 0x4cf   : > { %3723 = vmatpush2.msra.mxu1 %v2621_v19  ;;  %3793 = vmatprep.subr.mxu0 %v2112_v20  ;;  %v1921_v19 = vld [vmem:[#allocation11 + $0x470] sm:$0xff]  ;;  %v2415_v20 = vld [vmem:[#allocation11 + $0x13e0] sm:$0xff] }
 0x4d0   : > { %3724 = vmatprep.subr.mxu1 %v2606_v50  ;;  %3794 = vmatpush2.msra.mxu0 %v2111_v21  ;;  %v1906_v50 = vld [vmem:[#allocation11 + $0x3f8] sm:$0xff]  ;;  %v2400_v21 = vld [vmem:[#allocation11 + $0x1368] sm:$0xff] }
 0x4d1   : > { %3725 = vmatpush2.msra.mxu1 %v2605_v22  ;;  %3795 = vmatprep.subr.mxu0 %v2096_v23  ;;  %v1905_v22 = vld [vmem:[#allocation11 + $0x3f0] sm:$0xff]  ;;  %v2399_v23 = vld [vmem:[#allocation11 + $0x1360] sm:$0xff] }
 0x4d2   : > { %3726 = vmatprep.subr.mxu1 %v2590_v24  ;;  %3796 = vmatpush2.msra.mxu0 %v2095_v25  ;;  %v1890_v24 = vld [vmem:[#allocation11 + $0x378] sm:$0xff]  ;;  %v2384_v25 = vld [vmem:[#allocation11 + $0x12e8] sm:$0xff] }
 0x4d3   : > { %3727 = vmatpush2.msra.mxu1 %v2589_v26  ;;  %3797 = vmatprep.subr.mxu0 %v2080_v29  ;;  %v1889_v26 = vld [vmem:[#allocation11 + $0x370] sm:$0xff]  ;;  %v2383_v29 = vld [vmem:[#allocation11 + $0x12e0] sm:$0xff] }
 0x4d4   : > { %3728 = vmatprep.subr.mxu1 %v2574_v30  ;;  %3798 = vmatpush2.msra.mxu0 %v2079_v32  ;;  %v1874_v30 = vld [vmem:[#allocation11 + $0x2f8] sm:$0xff]  ;;  %v2368_v32 = vld [vmem:[#allocation11 + $0x1268] sm:$0xff] }
 0x4d5   : > { %3729 = vmatpush2.msra.mxu1 %v2573_v33  ;;  %3799 = vmatprep.subr.mxu0 %v2064_v34  ;;  %v1873_v33 = vld [vmem:[#allocation11 + $0x2f0] sm:$0xff]  ;;  %v2367_v34 = vld [vmem:[#allocation11 + $0x1260] sm:$0xff] }
 0x4d6   : > { %3730 = vmatprep.subr.mxu1 %v2558_v35  ;;  %3800 = vmatpush2.msra.mxu0 %v2063_v36  ;;  %v1858_v35 = vld [vmem:[#allocation11 + $0x278] sm:$0xff]  ;;  %v2352_v36 = vld [vmem:[#allocation11 + $0x11e8] sm:$0xff] }
 0x4d7   : > { %3731 = vmatpush2.msra.mxu1 %v2557_v40  ;;  %3801 = vmatprep.subr.mxu0 %v2048_v11  ;;  %v1857_v40 = vld [vmem:[#allocation11 + $0x270] sm:$0xff]  ;;  %v2351_v11 = vld [vmem:[#allocation11 + $0x11e0] sm:$0xff] }
 0x4d8   : > { %3733 = vmatmul.mubr.f32.vlgmr.msra.gmra.mxu1 %v6056_v45  ;;  %3802 = vmatpush2.msra.mxu0 %v2047_v47  ;;  %v1842_v47 = vld [vmem:[#allocation11 + $0x1f8] sm:$0xff] }
 0x4d9   : > { %3810 = vmatprep.subr.mxu1 %v2544_v48  ;;  %3804 = vmatmul.mubr.f32.vlgmr.msra.gmra.mxu0 %v6045_v55  ;;  %v2336_v48 = vld [vmem:[#allocation11 + $0x1168] sm:$0xff] }
 0x4da   : > { %3811 = vmatpush1.msra.mxu1 %v2543_v52  ;;  %3874 = vmatprep.mubr.f32.mxu1 %v6054_v44  ;;  %v1841_v52 = vld [vmem:[#allocation11 + $0x1f0] sm:$0xff] }
 0x4db   : > { %3881 = vmatprep.subr.mxu0 %v2034_v53  ;;  %3812 = vmatprep.subr.mxu1 %v2528_v49  ;;  %v2335_v53 = vld [vmem:[#allocation11 + $0x1160] sm:$0xff]  ;;  %v1826_v49 = vld [vmem:[#allocation11 + $0x178] sm:$0xff] }
 0x4dc   : > { %3882 = vmatpush1.msra.mxu0 %v2033_v54  ;;  %3945 = vmatprep.mubr.f32.mxu0 %v6043_v58  ;;  %v2464_v58 = vld [vmem:[#allocation11 + $0x1568] sm:$0xff] }
 0x4dd   : > { %3813 = vmatpush1.msra.mxu1 %v2527_v56  ;;  %3883 = vmatprep.subr.mxu0 %v2018_v59  ;;  %v2320_v54 = vld [vmem:[#allocation11 + $0x10e8] sm:$0xff]  ;;  %v1825_v56 = vld [vmem:[#allocation11 + $0x170] sm:$0xff]  ;;  %v2319_v59 = vld [vmem:[#allocation11 + $0x10e0] sm:$0xff] }
 0x4de   : > { %3814 = vmatprep.subr.mxu1 %v2512_v60  ;;  %3884 = vmatpush1.msra.mxu0 %v2017_v61  ;;  %v1810_v60 = vld [vmem:[#allocation11 + $0xf8] sm:$0xff]  ;;  %v2304_v61 = vld [vmem:[#allocation11 + $0x1068] sm:$0xff] }
 0x4df   : > { %3815 = vmatpush1.msra.mxu1 %v2511_v63  ;;  %3885 = vmatprep.subr.mxu0 %v2002_v0  ;;  %v1809_v63 = vld [vmem:[#allocation11 + $0xf0] sm:$0xff]  ;;  %v2303_v0 = vld [vmem:[#allocation11 + $0x1060] sm:$0xff] }
 0x4e0   : > { %3816 = vmatprep.subr.mxu1 %v2496_v1  ;;  %3886 = vmatpush1.msra.mxu0 %v2001_v2  ;;  %v1794_v1 = vld [vmem:[#allocation11 + $0x78] sm:$0xff]  ;;  %v2800_v2 = vld [vmem:[#allocation11 + $0x1fe8] sm:$0xff] }
 0x4e1   : > { %3817 = vmatpush1.msra.mxu1 %v2495_v3  ;;  %3887 = vmatprep.subr.mxu0 %v1986_v4  ;;  %v1793_v3 = vld [vmem:[#allocation11 + $0x70] sm:$0xff]  ;;  %v2799_v4 = vld [vmem:[#allocation11 + $0x1fe0] sm:$0xff] }
 0x4e2   : > { %3818 = vmatprep.subr.mxu1 %v2480_v27  ;;  %3888 = vmatpush1.msra.mxu0 %v1985_v31  ;;  %v2290_v27 = vld [vmem:[#allocation11 + $0xff8] sm:$0xff]  ;;  %v2784_v31 = vld [vmem:[#allocation11 + $0x1f68] sm:$0xff] }
 0x4e3   : > { %3819 = vmatpush1.msra.mxu1 %v2479_v5  ;;  %3889 = vmatprep.subr.mxu0 %v1970_v6  ;;  %v2289_v5 = vld [vmem:[#allocation11 + $0xff0] sm:$0xff]  ;;  %v2783_v6 = vld [vmem:[#allocation11 + $0x1f60] sm:$0xff] }
 0x4e4   : > { %3820 = vmatprep.subr.mxu1 %v2464_v58  ;;  %3890 = vmatpush1.msra.mxu0 %v1969_v8  ;;  %v2274_v58 = vld [vmem:[#allocation11 + $0xf78] sm:$0xff]  ;;  %v2768_v8 = vld [vmem:[#allocation11 + $0x1ee8] sm:$0xff] }
 0x4e5   : > { %3821 = vmatpush1.msra.mxu1 %v2463_v51  ;;  %3891 = vmatprep.subr.mxu0 %v1954_v57  ;;  %v2273_v51 = vld [vmem:[#allocation11 + $0xf70] sm:$0xff]  ;;  %v2767_v57 = vld [vmem:[#allocation11 + $0x1ee0] sm:$0xff] }
 0x4e6   : > { %3822 = vmatprep.subr.mxu1 %v2448_v9  ;;  %3892 = vmatpush1.msra.mxu0 %v1953_v10  ;;  %v2258_v9 = vld [vmem:[#allocation11 + $0xef8] sm:$0xff]  ;;  %v2752_v10 = vld [vmem:[#allocation11 + $0x1e68] sm:$0xff] }
 0x4e7   : > { %3823 = vmatpush1.msra.mxu1 %v2447_v12  ;;  %3893 = vmatprep.subr.mxu0 %v1938_v13  ;;  %v2257_v12 = vld [vmem:[#allocation11 + $0xef0] sm:$0xff]  ;;  %v2751_v13 = vld [vmem:[#allocation11 + $0x1e60] sm:$0xff] }
 0x4e8   : > { %3824 = vmatprep.subr.mxu1 %v2432_v14  ;;  %3894 = vmatpush1.msra.mxu0 %v1937_v15  ;;  %v2242_v14 = vld [vmem:[#allocation11 + $0xe78] sm:$0xff]  ;;  %v2736_v15 = vld [vmem:[#allocation11 + $0x1de8] sm:$0xff] }
 0x4e9   : > { %3825 = vmatpush1.msra.mxu1 %v2431_v16  ;;  %3895 = vmatprep.subr.mxu0 %v1922_v17  ;;  %v2241_v16 = vld [vmem:[#allocation11 + $0xe70] sm:$0xff]  ;;  %v2735_v17 = vld [vmem:[#allocation11 + $0x1de0] sm:$0xff] }
 0x4ea   : > { %3826 = vmatprep.subr.mxu1 %v2416_v18  ;;  %3896 = vmatpush1.msra.mxu0 %v1921_v19  ;;  %v2226_v18 = vld [vmem:[#allocation11 + $0xdf8] sm:$0xff]  ;;  %v2720_v19 = vld [vmem:[#allocation11 + $0x1d68] sm:$0xff] }
 0x4eb   : > { %3827 = vmatpush1.msra.mxu1 %v2415_v20  ;;  %3897 = vmatprep.subr.mxu0 %v1906_v50  ;;  %v2225_v20 = vld [vmem:[#allocation11 + $0xdf0] sm:$0xff]  ;;  %v2719_v50 = vld [vmem:[#allocation11 + $0x1d60] sm:$0xff] }
 0x4ec   : > { %3828 = vmatprep.subr.mxu1 %v2400_v21  ;;  %3898 = vmatpush1.msra.mxu0 %v1905_v22  ;;  %v2210_v21 = vld [vmem:[#allocation11 + $0xd78] sm:$0xff]  ;;  %v2704_v22 = vld [vmem:[#allocation11 + $0x1ce8] sm:$0xff] }
 0x4ed   : > { %3829 = vmatpush1.msra.mxu1 %v2399_v23  ;;  %3899 = vmatprep.subr.mxu0 %v1890_v24  ;;  %v2209_v23 = vld [vmem:[#allocation11 + $0xd70] sm:$0xff]  ;;  %v2703_v24 = vld [vmem:[#allocation11 + $0x1ce0] sm:$0xff] }
 0x4ee   : > { %3830 = vmatprep.subr.mxu1 %v2384_v25  ;;  %3900 = vmatpush1.msra.mxu0 %v1889_v26  ;;  %v2194_v25 = vld [vmem:[#allocation11 + $0xcf8] sm:$0xff]  ;;  %v2688_v26 = vld [vmem:[#allocation11 + $0x1c68] sm:$0xff] }
 0x4ef   : > { %3831 = vmatpush1.msra.mxu1 %v2383_v29  ;;  %3901 = vmatprep.subr.mxu0 %v1874_v30  ;;  %v2193_v29 = vld [vmem:[#allocation11 + $0xcf0] sm:$0xff]  ;;  %v2687_v30 = vld [vmem:[#allocation11 + $0x1c60] sm:$0xff] }
 0x4f0   : > { %3832 = vmatprep.subr.mxu1 %v2368_v32  ;;  %3902 = vmatpush1.msra.mxu0 %v1873_v33  ;;  %v2178_v32 = vld [vmem:[#allocation11 + $0xc78] sm:$0xff]  ;;  %v2672_v33 = vld [vmem:[#allocation11 + $0x1be8] sm:$0xff] }
 0x4f1   : > { %3833 = vmatpush1.msra.mxu1 %v2367_v34  ;;  %3903 = vmatprep.subr.mxu0 %v1858_v35  ;;  %v2177_v34 = vld [vmem:[#allocation11 + $0xc70] sm:$0xff]  ;;  %v6094_v35 = vpop.f32.mrf.mxu0 }
 0x4f2   : > { %3834 = vmatprep.subr.mxu1 %v2352_v36  ;;  %3904 = vmatpush1.msra.mxu0 %v1857_v40  ;;  %v2671_v36 = vld [vmem:[#allocation11 + $0x1be0] sm:$0xff]  ;;  %v2162_v40 = vld [vmem:[#allocation11 + $0xbf8] sm:$0xff] }
 0x4f3   : > { %3835 = vmatpush1.msra.mxu1 %v2351_v11  ;;  %3905 = vmatprep.subr.mxu0 %v1842_v47  ;;  %v2656_v11 = vld [vmem:[#allocation11 + $0x1b68] sm:$0xff]  ;;  %v2161_v47 = vld [vmem:[#allocation11 + $0xbf0] sm:$0xff] }
 0x4f4   : > { %3836 = vmatprep.subr.mxu1 %v2336_v48  ;;  %3906 = vmatpush1.msra.mxu0 %v1841_v52  ;;  %v6096_v48 = vpop.f32.mrf.mxu0  ;;  %v2655_v52 = vld [vmem:[#allocation11 + $0x1b60] sm:$0xff] }
 0x4f5   : > { %3837 = vmatpush1.msra.mxu1 %v2335_v53  ;;  %3907 = vmatprep.subr.mxu0 %v1826_v49  ;;  %v2146_v53 = vld [vmem:[#allocation11 + $0xb78] sm:$0xff]  ;;  %v2833_v49 = vsub.s32 6, %v5981_v37 }
 0x4f6   : > { %3838 = vmatprep.subr.mxu1 %v2320_v54  ;;  %3908 = vmatpush1.msra.mxu0 %v1825_v56  ;;  %v2640_v54 = vld [vmem:[#allocation11 + $0x1ae8] sm:$0xff]  ;;  %v2145_v56 = vld [vmem:[#allocation11 + $0xb70] sm:$0xff] }
 0x4f7   : > { %3839 = vmatpush1.msra.mxu1 %v2319_v59  ;;  %3909 = vmatprep.subr.mxu0 %v1810_v60  ;;  %v6099_v59 = vpop.f32.mrf.mxu1  ;;  %v2639_v60 = vld [vmem:[#allocation11 + $0x1ae0] sm:$0xff] }
 0x4f8   : > { %3840 = vmatprep.subr.mxu1 %v2304_v61  ;;  %3910 = vmatpush1.msra.mxu0 %v1809_v63  ;;  %v2130_v61 = vld [vmem:[#allocation11 + $0xaf8] sm:$0xff]  ;;  %v2624_v63 = vld [vmem:[#allocation11 + $0x1a68] sm:$0xff] }
 0x4f9   : > { %3841 = vmatpush1.msra.mxu1 %v2303_v0  ;;  %3911 = vmatprep.subr.mxu0 %v1794_v1  ;;  %v2129_v0 = vld [vmem:[#allocation11 + $0xaf0] sm:$0xff]  ;;  %v6101_v1 = vpop.f32.mrf.mxu0 }
 0x4fa   : > { %3842 = vmatprep.subr.mxu1 %v2800_v2  ;;  %3912 = vmatpush1.msra.mxu0 %v1793_v3  ;;  %v6103_v2 = vpop.f32.mrf.mxu1  ;;  %v2623_v3 = vld [vmem:[#allocation11 + $0x1a60] sm:$0xff] }
 0x4fb   : > { %3843 = vmatpush2.msra.mxu1 %v2799_v4  ;;  %3913 = vmatprep.subr.mxu0 %v2290_v27  ;;  %v2114_v4 = vld [vmem:[#allocation11 + $0xa78] sm:$0xff]  ;;  %v6105_v27 = vld [vmem:[#allocation13] sm:$0xff] }
 0x4fc   : > { %3844 = vmatprep.subr.mxu1 %v2784_v31  ;;  %3914 = vmatpush2.msra.mxu0 %v2289_v5  ;;  %v2834_v31 = vrot.slane %v6105_v27, %v2833_v49  ;;  %v2608_v5 = vld [vmem:[#allocation11 + $0x19e8] sm:$0xff] }
 0x4fd   : > { %3845 = vmatpush2.msra.mxu1 %v2783_v6  ;;  %3915 = vmatprep.subr.mxu0 %v2274_v58  ;;  %v2113_v6 = vld [vmem:[#allocation11 + $0xa70] sm:$0xff]  ;;  %v3379_v58 = vpop.f32.mrf.mxu0 }
 0x4fe   : > { %3846 = vmatprep.subr.mxu1 %v2768_v8  ;;  %3916 = vmatpush2.msra.mxu0 %v2273_v51  ;;  %v2607_v8 = vld [vmem:[#allocation11 + $0x19e0] sm:$0xff]  ;;  %v2098_v51 = vld [vmem:[#allocation11 + $0x9f8] sm:$0xff] }
 0x4ff   : > { %3847 = vmatpush2.msra.mxu1 %v2767_v57  ;;  %3917 = vmatprep.subr.mxu0 %v2258_v9  ;;  %v2592_v57 = vld [vmem:[#allocation11 + $0x1968] sm:$0xff]  ;;  %v2097_v9 = vld [vmem:[#allocation11 + $0x9f0] sm:$0xff] }
 0x500   : > { %3848 = vmatprep.subr.mxu1 %v2752_v10  ;;  %3918 = vmatpush2.msra.mxu0 %v2257_v12  ;;  %v2814_v10 = vrot.slane %v6105_v27, %v5990_v41  ;;  %v6112_v12 = vpop.f32.mrf.mxu1 }
 0x501   : > { %3849 = vmatpush2.msra.mxu1 %v2751_v13  ;;  %3919 = vmatprep.subr.mxu0 %v2242_v14  ;;  %v2591_v13 = vld [vmem:[#allocation11 + $0x1960] sm:$0xff]  ;;  %v2082_v14 = vld [vmem:[#allocation11 + $0x978] sm:$0xff] }
 0x502   : > { %3850 = vmatprep.subr.mxu1 %v2736_v15  ;;  %3920 = vmatpush2.msra.mxu0 %v2241_v16  ;;  %v3380_v15 = vadd.f32 %v3379_v58, %v2834_v31  ;;  %v2576_v16 = vld [vmem:[#allocation11 + $0x18e8] sm:$0xff]  ;;  %v2465_v31 = vld [vmem:[#allocation11 + $0x1570] sm:$0xff] }
 0x503   : > { %3851 = vmatpush2.msra.mxu1 %v2735_v17  ;;  %3921 = vmatprep.subr.mxu0 %v2226_v18  ;;  %v2081_v17 = vld [vmem:[#allocation11 + $0x970] sm:$0xff]  ;;  %v2575_v18 = vld [vmem:[#allocation11 + $0x18e0] sm:$0xff] }
 0x504   : > { %3852 = vmatprep.subr.mxu1 %v2720_v19  ;;  %3922 = vmatpush2.msra.mxu0 %v2225_v20  ;;  %v2066_v19 = vld [vmem:[#allocation11 + $0x8f8] sm:$0xff]  ;;  %v4049_v58 = vld [vmem:[%s6999_s7 + $0x50] sm:$0xff] }
 0x505   : > { %3853 = vmatpush2.msra.mxu1 %v2719_v50  ;;  %3923 = vmatprep.subr.mxu0 %v2210_v21  ;;  %v2560_v50 = vld [vmem:[#allocation11 + $0x1868] sm:$0xff]  ;;  %v2065_v21 = vld [vmem:[#allocation11 + $0x8f0] sm:$0xff] }
 0x506   : > { %3854 = vmatprep.subr.mxu1 %v2704_v22  ;;  %3924 = vmatpush2.msra.mxu0 %v2209_v23  ;;  %v2956_v23 = vadd.f32 %v6077_v43, %v2814_v10  ;;  %v4070_v43 = vld [vmem:[%s6999_s7 + $0xf8] sm:$0xff] }
 0x507   : > { %3855 = vmatpush2.msra.mxu1 %v2703_v24  ;;  %3925 = vmatprep.subr.mxu0 %v2194_v25  ;;  %v2559_v24 = vld [vmem:[#allocation11 + $0x1860] sm:$0xff]  ;;  %v2050_v25 = vld [vmem:[#allocation11 + $0x878] sm:$0xff]  ;;  %v2433_v10 = vld [vmem:[#allocation11 + $0x1470] sm:$0xff] }
 0x508   : > { %3856 = vmatprep.subr.mxu1 %v2688_v26  ;;  %3926 = vmatpush2.msra.mxu0 %v2193_v29  ;;  %v2049_v26 = vld [vmem:[#allocation11 + $0x870] sm:$0xff]  ;;  %v3027_v29 = vadd.f32 %v6082_v62, %v2956_v23  ;;  %v4045_v23 = vld [vmem:[%s6999_s7 + $0x30] sm:$0xff] }
 0x509   : > { %3857 = vmatpush2.msra.mxu1 %v2687_v30  ;;  %3927 = vmatprep.subr.mxu0 %v2178_v32  ;;  %v2546_v30 = vld [vmem:[#allocation11 + $0x17f8] sm:$0xff]  ;;  %v2545_v32 = vld [vmem:[#allocation11 + $0x17f0] sm:$0xff] }
 0x50a   : > { %3858 = vmatprep.subr.mxu1 %v2672_v33  ;;  %3928 = vmatpush2.msra.mxu0 %v2177_v34  ;;  %v2530_v33 = vld [vmem:[#allocation11 + $0x1778] sm:$0xff]  ;;  %v4054_v62 = vld [vmem:[%s6999_s7 + $0x78] sm:$0xff]  ;;  %v4024_v34 = vmax.f32 %v3027_v29, 0.0 }
 0x50b   : > { %3859 = vmatpush2.msra.mxu1 %v2671_v36  ;;  %3929 = vmatprep.subr.mxu0 %v2162_v40  ;;  %v2529_v36 = vld [vmem:[#allocation11 + $0x1770] sm:$0xff]  ;;  %v4069_v40 = vld [vmem:[%s6999_s7 + $0xf0] sm:$0xff]  ;;  %v2370_v29 = vld [vmem:[#allocation11 + $0x1278] sm:$0xff] }
 0x50c   : > { %3860 = vmatprep.subr.mxu1 %v2656_v11  ;;  %3930 = vmatpush2.msra.mxu0 %v2161_v47  ;;  %v2514_v11 = vld [vmem:[#allocation11 + $0x16f8] sm:$0xff]  ;;  %v2513_v47 = vld [vmem:[#allocation11 + $0x16f0] sm:$0xff] }
 0x50d   : > { %3861 = vmatpush2.msra.mxu1 %v2655_v52  ;;  %3931 = vmatprep.subr.mxu0 %v2146_v53  ;;  %v4068_v52 = vld [vmem:[%s6999_s7 + $0xe8] sm:$0xff] }
 0x50e   : > { %3862 = vmatprep.subr.mxu1 %v2640_v54  ;;  %3932 = vmatpush2.msra.mxu0 %v2145_v56  ;;  %v4052_v53 = vld [vmem:[%s6999_s7 + $0x68] sm:$0xff]  ;;  %v2497_v54 = vld [vmem:[#allocation11 + $0x1670] sm:$0xff] }
 0x50f   : > { %3863 = vmatpush2.msra.mxu1 %v2639_v60  ;;  %3933 = vmatprep.subr.mxu0 %v2130_v61  ;;  %v4067_v56 = vld [vmem:[%s6999_s7 + $0xe0] sm:$0xff] }
 0x510   : > { %3864 = vmatprep.subr.mxu1 %v2624_v63  ;;  %3934 = vmatpush2.msra.mxu0 %v2129_v0  ;;  %v2482_v60 = vld [vmem:[#allocation11 + $0x15f8] sm:$0xff]  ;;  %v2481_v63 = vld [vmem:[#allocation11 + $0x15f0] sm:$0xff] }
 0x511   : > { %3865 = vmatpush2.msra.mxu1 %v2623_v3  ;;  %3935 = vmatprep.subr.mxu0 %v2114_v4  ;;  %v4051_v61 = vld [vmem:[%s6999_s7 + $0x60] sm:$0xff]  ;;  %v4066_v0 = vld [vmem:[%s6999_s7 + $0xd8] sm:$0xff] }
 0x512   : > { %3866 = vmatprep.subr.mxu1 %v2608_v5  ;;  %3936 = vmatpush2.msra.mxu0 %v2113_v6  ;;  %v2466_v3 = vld [vmem:[#allocation11 + $0x1578] sm:$0xff]  ;;  %v4050_v4 = vld [vmem:[%s6999_s7 + $0x58] sm:$0xff]  ;;  %v4065_v5 = vld [vmem:[%s6999_s7 + $0xd0] sm:$0xff] }
 0x513   : > { %3867 = vmatpush2.msra.mxu1 %v2607_v8  ;;  %3937 = vmatprep.subr.mxu0 %v2098_v51  ;;  %v2450_v6 = vld [vmem:[#allocation11 + $0x14f8] sm:$0xff]  ;;  %v2449_v8 = vld [vmem:[#allocation11 + $0x14f0] sm:$0xff] }
 0x514   : > { %3868 = vmatprep.subr.mxu1 %v2592_v57  ;;  %3938 = vmatpush2.msra.mxu0 %v2097_v9  ;;  %v3450_v20 = vpop.f32.mrf.mxu1  ;;  %v4064_v51 = vld [vmem:[%s6999_s7 + $0xc8] sm:$0xff] }
 0x515   : > { %3869 = vmatpush2.msra.mxu1 %v2591_v13  ;;  %3939 = vmatprep.subr.mxu0 %v2082_v14  ;;  %v6114_v22 = vadd.f32 %v3450_v20, %v3380_v15  ;;  %v2434_v57 = vld [vmem:[#allocation11 + $0x1478] sm:$0xff]  ;;  %v2401_v20 = vld [vmem:[#allocation11 + $0x1370] sm:$0xff] }
 0x516   : > { %3870 = vmatprep.subr.mxu1 %v2576_v16  ;;  %3940 = vmatpush2.msra.mxu0 %v2081_v17  ;;  %v4048_v9 = vld [vmem:[%s6999_s7 + $0x48] sm:$0xff]  ;;  %v4063_v13 = vld [vmem:[%s6999_s7 + $0xc0] sm:$0xff]  ;;  %v4062_v17 = vld [vmem:[%s6999_s7 + $0xb8] sm:$0xff] }
 0x517   : > { %3871 = vmatpush2.msra.mxu1 %v2575_v18  ;;  %3941 = vmatprep.subr.mxu0 %v2066_v19  ;;  %v2418_v14 = vld [vmem:[#allocation11 + $0x13f8] sm:$0xff]  ;;  %v2417_v16 = vld [vmem:[#allocation11 + $0x13f0] sm:$0xff] }
 0x518   : > { %3872 = vmatprep.subr.mxu1 %v2560_v50  ;;  %3942 = vmatpush2.msra.mxu0 %v2065_v21  ;;  %v4047_v15 = vld [vmem:[%s6999_s7 + $0x40] sm:$0xff]  ;;  %v4046_v19 = vld [vmem:[%s6999_s7 + $0x38] sm:$0xff]  ;;  %v4061_v50 = vld [vmem:[%s6999_s7 + $0xb0] sm:$0xff] }
 0x519   : > { %3873 = vmatpush2.msra.mxu1 %v2559_v24  ;;  %3943 = vmatprep.subr.mxu0 %v2050_v25  ;;  %v2402_v18 = vld [vmem:[#allocation11 + $0x1378] sm:$0xff]  ;;  %v2385_v24 = vld [vmem:[#allocation11 + $0x12f0] sm:$0xff] }
 0x51a   : > { %3875 = vmatmul.mubr.f32.vlgmr.msra.gmra.mxu1 %v6056_v45  ;;  %3944 = vmatpush2.msra.mxu0 %v2049_v26  ;;  %v2386_v21 = vld [vmem:[#allocation11 + $0x12f8] sm:$0xff]  ;;  %v2829_v26 = vsub.s32 5, %v5981_v37 }
 0x51b   : > { %3952 = vmatprep.subr.mxu1 %v2546_v30  ;;  %3946 = vmatmul.mubr.f32.vlgmr.msra.gmra.mxu0 %v6045_v55  ;;  %v4053_v55 = vld [vmem:[%s6999_s7 + $0x70] sm:$0xff]  ;;  %v4060_v25 = vld [vmem:[%s6999_s7 + $0xa8] sm:$0xff] }
 0x51c   : > { %3953 = vmatpush1.msra.mxu1 %v2545_v32  ;;  %4016 = vmatprep.mubr.f32.mxu1 %v6054_v44  ;;  %v2498_v44 = vld [vmem:[#allocation11 + $0x1678] sm:$0xff]  ;;  %v2369_v32 = vld [vmem:[#allocation11 + $0x1270] sm:$0xff] }
 0x51d   : > { %5025 = vmatprep.subr.mxu0 %v4070_v43  ;;  %3954 = vmatprep.subr.mxu1 %v2530_v33  ;;  %v4044_v30 = vld [vmem:[%s6999_s7 + $0x28] sm:$0xff]  ;;  %v4059_v43 = vld [vmem:[%s6999_s7 + $0xa0] sm:$0xff]  ;;  %v2810_v33 = vrot.slane %v6105_v27, %v5987_v39 }
 0x51e   : > { %5026 = vmatpush3.msra.mxu0 %v4054_v62  ;;  %4360 = vmatprep.mubr.f32.mxu0 %v4024_v34  ;;  %v2354_v62 = vld [vmem:[#allocation11 + $0x11f8] sm:$0xff] }
 0x51f   : > { %3955 = vmatpush1.msra.mxu1 %v2529_v36  ;;  %5027 = vmatprep.subr.mxu0 %v4069_v40  ;;  %v4043_v34 = vld [vmem:[%s6999_s7 + $0x20] sm:$0xff]  ;;  %v4058_v40 = vld [vmem:[%s6999_s7 + $0x98] sm:$0xff] }
 0x520   : > { %3956 = vmatprep.subr.mxu1 %v2514_v11  ;;  %5028 = vmatpush3.msra.mxu0 %v4053_v55  ;;  %v2353_v36 = vld [vmem:[#allocation11 + $0x11f0] sm:$0xff]  ;;  %v2830_v11 = vrot.slane %v6105_v27, %v2829_v26  ;;  %v2338_v55 = vld [vmem:[#allocation11 + $0x1178] sm:$0xff] }
 0x521   : > { %3957 = vmatpush1.msra.mxu1 %v2513_v47  ;;  %5029 = vmatprep.subr.mxu0 %v4068_v52  ;;  %v4042_v47 = vld [vmem:[%s6999_s7 + $0x18] sm:$0xff] }
 0x522   : > { %3958 = vmatprep.subr.mxu1 %v2498_v44  ;;  %5030 = vmatpush3.msra.mxu0 %v4052_v53  ;;  %v2337_v52 = vld [vmem:[#allocation11 + $0x1170] sm:$0xff]  ;;  %v4057_v44 = vld [vmem:[%s6999_s7 + $0x90] sm:$0xff]  ;;  %v2954_v53 = vadd.f32 %v6075_v28, %v2810_v33  ;;  %v2306_v28 = vld [vmem:[#allocation11 + $0x1078] sm:$0xff] }
 0x523   : > { %3959 = vmatpush1.msra.mxu1 %v2497_v54  ;;  %5031 = vmatprep.subr.mxu0 %v4067_v56  ;;  %v2322_v54 = vld [vmem:[#allocation11 + $0x10f8] sm:$0xff]  ;;  %v4041_v56 = vld [vmem:[%s6999_s7 + $0x10] sm:$0xff] }
 0x524   : > { %3960 = vmatprep.subr.mxu1 %v2482_v60  ;;  %5032 = vmatpush3.msra.mxu0 %v4051_v61  ;;  %v2321_v60 = vld [vmem:[#allocation11 + $0x10f0] sm:$0xff]  ;;  %v4056_v61 = vld [vmem:[%s6999_s7 + $0x88] sm:$0xff]  ;;  %v4113_v33 = vld [vmem:[%s6999_s7 + $0x250] sm:$0xff] }
 0x525   : > { %3961 = vmatpush1.msra.mxu1 %v2481_v63  ;;  %5033 = vmatprep.subr.mxu0 %v4066_v0  ;;  %v3025_v63 = vadd.f32 %v6079_v46, %v2954_v53  ;;  %v3240_v0 = vadd.f32 %v6101_v1, %v2830_v11  ;;  %v2802_v46 = vld [vmem:[#allocation11 + $0x1ff8] sm:$0xff]  ;;  %v2689_v11 = vld [vmem:[#allocation11 + $0x1c70] sm:$0xff] }
 0x526   : > { %3962 = vmatprep.subr.mxu1 %v2466_v3  ;;  %5034 = vmatpush3.msra.mxu0 %v4050_v4  ;;  %v4040_v3 = vld [vmem:[%s6999_s7 + $0x8] sm:$0xff]  ;;  %v2305_v4 = vld [vmem:[#allocation11 + $0x1070] sm:$0xff] }
 0x527   : > { %3963 = vmatpush1.msra.mxu1 %v2465_v31  ;;  %5035 = vmatprep.subr.mxu0 %v4065_v5  ;;  %v4055_v31 = vld [vmem:[%s6999_s7 + $0x80] sm:$0xff]  ;;  %v3311_v5 = vadd.f32 %v6112_v12, %v3240_v0  ;;  %v4118_v12 = vld [vmem:[%s6999_s7 + $0x278] sm:$0xff]  ;;  %v4109_v0 = vld [vmem:[%s6999_s7 + $0x230] sm:$0xff] }
 0x528   : > { %3964 = vmatprep.subr.mxu1 %v2450_v6  ;;  %5036 = vmatpush3.msra.mxu0 %v4049_v58  ;;  %v4039_v1 = vld [vmem:[%s6999_s7] sm:$0xff]  ;;  %v4023_v58 = vmax.f32 %v3025_v63, 0.0  ;;  %v4126_v53 = vld [vmem:[%s6999_s7 + $0x2b8] sm:$0xff] }
 0x529   : > { %3965 = vmatpush1.msra.mxu1 %v2449_v8  ;;  %5037 = vmatprep.subr.mxu0 %v4064_v51  ;;  %v2801_v6 = vld [vmem:[#allocation11 + $0x1ff0] sm:$0xff]  ;;  %v2786_v51 = vld [vmem:[#allocation11 + $0x1f78] sm:$0xff] }
 0x52a   : > { %3966 = vmatprep.subr.mxu1 %v2434_v57  ;;  %5038 = vmatpush3.msra.mxu0 %v4048_v9  ;;  %v4134_v8 = vld [vmem:[%s6999_s7 + $0x2f8] sm:$0xff]  ;;  %v4028_v57 = vmax.f32 %v3311_v5, 0.0  ;;  %v2642_v63 = vld [vmem:[#allocation11 + $0x1af8] sm:$0xff] }
 0x52b   : > { %3967 = vmatpush1.msra.mxu1 %v2433_v10  ;;  %5039 = vmatprep.subr.mxu0 %v4063_v13  ;;  %v2785_v9 = vld [vmem:[#allocation11 + $0x1f70] sm:$0xff]  ;;  %v4133_v10 = vld [vmem:[%s6999_s7 + $0x2f0] sm:$0xff]  ;;  %v2770_v13 = vld [vmem:[#allocation11 + $0x1ef8] sm:$0xff] }
 0x52c   : > { %3968 = vmatprep.subr.mxu1 %v2418_v14  ;;  %5040 = vmatpush3.msra.mxu0 %v4047_v15  ;;  %v4117_v14 = vld [vmem:[%s6999_s7 + $0x270] sm:$0xff]  ;;  %v2769_v15 = vld [vmem:[#allocation11 + $0x1ef0] sm:$0xff]  ;;  %v4108_v5 = vld [vmem:[%s6999_s7 + $0x228] sm:$0xff] }
 0x52d   : > { %3969 = vmatpush1.msra.mxu1 %v2417_v16  ;;  %5041 = vmatprep.subr.mxu0 %v4062_v17  ;;  %v4132_v16 = vld [vmem:[%s6999_s7 + $0x2e8] sm:$0xff] }
 0x52e   : > { %3970 = vmatprep.subr.mxu1 %v2402_v18  ;;  %5042 = vmatpush3.msra.mxu0 %v4046_v19  ;;  %v2754_v17 = vld [vmem:[#allocation11 + $0x1e78] sm:$0xff]  ;;  %v2753_v19 = vld [vmem:[#allocation11 + $0x1e70] sm:$0xff] }
 0x52f   : > { %3971 = vmatpush1.msra.mxu1 %v2401_v20  ;;  %5043 = vmatprep.subr.mxu0 %v4061_v50  ;;  %v4116_v18 = vld [vmem:[%s6999_s7 + $0x268] sm:$0xff]  ;;  %v4131_v20 = vld [vmem:[%s6999_s7 + $0x2e0] sm:$0xff] }
 0x530   : > { %3972 = vmatprep.subr.mxu1 %v2386_v21  ;;  %5044 = vmatpush3.msra.mxu0 %v4045_v23  ;;  %v2738_v50 = vld [vmem:[#allocation11 + $0x1df8] sm:$0xff]  ;;  %v2737_v23 = vld [vmem:[#allocation11 + $0x1df0] sm:$0xff] }
 0x531   : > { %3973 = vmatpush1.msra.mxu1 %v2385_v24  ;;  %5045 = vmatprep.subr.mxu0 %v4060_v25  ;;  %v4115_v21 = vld [vmem:[%s6999_s7 + $0x260] sm:$0xff]  ;;  %v4130_v24 = vld [vmem:[%s6999_s7 + $0x2d8] sm:$0xff] }
 0x532   : > { %3974 = vmatprep.subr.mxu1 %v2370_v29  ;;  %5046 = vmatpush3.msra.mxu0 %v4044_v30  ;;  %v2722_v25 = vld [vmem:[#allocation11 + $0x1d78] sm:$0xff]  ;;  %v4114_v29 = vld [vmem:[%s6999_s7 + $0x258] sm:$0xff] }
 0x533   : > { %3975 = vmatpush1.msra.mxu1 %v2369_v32  ;;  %5047 = vmatprep.subr.mxu0 %v4059_v43  ;;  %v2721_v30 = vld [vmem:[#allocation11 + $0x1d70] sm:$0xff]  ;;  %v4129_v32 = vld [vmem:[%s6999_s7 + $0x2d0] sm:$0xff]  ;;  %v2706_v43 = vld [vmem:[#allocation11 + $0x1cf8] sm:$0xff] }
 0x534   : > { %3976 = vmatprep.subr.mxu1 %v2354_v62  ;;  %5048 = vmatpush3.msra.mxu0 %v4043_v34  ;;  %v2705_v62 = vld [vmem:[#allocation11 + $0x1cf0] sm:$0xff]  ;;  %v4128_v34 = vld [vmem:[%s6999_s7 + $0x2c8] sm:$0xff] }
 0x535   : > { %3977 = vmatpush1.msra.mxu1 %v2353_v36  ;;  %5049 = vmatprep.subr.mxu0 %v4058_v40  ;;  %v2690_v36 = vld [vmem:[#allocation11 + $0x1c78] sm:$0xff] }
 0x536   : > { %3978 = vmatprep.subr.mxu1 %v2338_v55  ;;  %5050 = vmatpush3.msra.mxu0 %v4042_v47  ;;  %v4112_v40 = vld [vmem:[%s6999_s7 + $0x248] sm:$0xff]  ;;  %v4127_v55 = vld [vmem:[%s6999_s7 + $0x2c0] sm:$0xff] }
 0x537   : > { %3979 = vmatpush1.msra.mxu1 %v2337_v52  ;;  %5051 = vmatprep.subr.mxu0 %v4057_v44  ;;  %v2674_v47 = vld [vmem:[#allocation11 + $0x1bf8] sm:$0xff]  ;;  %v2673_v44 = vld [vmem:[#allocation11 + $0x1bf0] sm:$0xff] }
 0x538   : > { %3980 = vmatprep.subr.mxu1 %v2322_v54  ;;  %5052 = vmatpush3.msra.mxu0 %v4041_v56  ;;  %v4111_v52 = vld [vmem:[%s6999_s7 + $0x240] sm:$0xff]  ;;  %v4110_v56 = vld [vmem:[%s6999_s7 + $0x238] sm:$0xff] }
 0x539   : > { %3981 = vmatpush1.msra.mxu1 %v2321_v60  ;;  %5053 = vmatprep.subr.mxu0 %v4056_v61  ;;  %v2658_v54 = vld [vmem:[#allocation11 + $0x1b78] sm:$0xff]  ;;  %v2657_v60 = vld [vmem:[#allocation11 + $0x1b70] sm:$0xff]  ;;  %v4125_v61 = vld [vmem:[%s6999_s7 + $0x2b0] sm:$0xff] }
 0x53a   : > { %3982 = vmatprep.subr.mxu1 %v2306_v28  ;;  %5054 = vmatpush3.msra.mxu0 %v4040_v3  ;;  %v2825_v28 = vsub.s32 4, %v5981_v37  ;;  %v2641_v3 = vld [vmem:[#allocation11 + $0x1af0] sm:$0xff] }
 0x53b   : > { %3983 = vmatpush1.msra.mxu1 %v2305_v4  ;;  %5055 = vmatprep.subr.mxu0 %v4055_v31  ;;  %v4124_v4 = vld [vmem:[%s6999_s7 + $0x2a8] sm:$0xff] }
 0x53c   : > { %3984 = vmatprep.subr.mxu1 %v2802_v46  ;;  %5056 = vmatpush3.msra.mxu0 %v4039_v1  ;;  %v2626_v31 = vld [vmem:[#allocation11 + $0x1a78] sm:$0xff]  ;;  %v2625_v46 = vld [vmem:[#allocation11 + $0x1a70] sm:$0xff] }
 0x53d   : > { %3985 = vmatpush2.msra.mxu1 %v2801_v6  ;;  %4361 = vmatmul.mubr.f32.vlgmr.msra.gmra.mxu0 %v4023_v58  ;;  %v4123_v1 = vld [vmem:[%s6999_s7 + $0x2a0] sm:$0xff] }
 0x53e   : > { %5095 = vmatprep.subr.mxu0 %v4134_v8  ;;  %3986 = vmatprep.subr.mxu1 %v2786_v51  ;;  %v2610_v6 = vld [vmem:[#allocation11 + $0x19f8] sm:$0xff]  ;;  %v2822_v8 = vrot.slane %v6105_v27, %v5993_v42  ;;  %v2826_v51 = vrot.slane %v6105_v27, %v2825_v28 }
 0x53f   : > { %5096 = vmatpush3.msra.mxu0 %v4118_v12  ;;  %4500 = vmatprep.mubr.f32.mxu0 %v4028_v57  ;;  %v4107_v58 = vld [vmem:[%s6999_s7 + $0x220] sm:$0xff]  ;;  %v6305_v12 = vpop.f32.mrf.mxu0 }
 0x540   : > { %3987 = vmatpush2.msra.mxu1 %v2785_v9  ;;  %5097 = vmatprep.subr.mxu0 %v4133_v10  ;;  %v2609_v57 = vld [vmem:[#allocation11 + $0x19f0] sm:$0xff]  ;;  %v2594_v10 = vld [vmem:[#allocation11 + $0x1978] sm:$0xff] }
 0x541   : > { %3988 = vmatprep.subr.mxu1 %v2770_v13  ;;  %5098 = vmatpush3.msra.mxu0 %v4117_v14  ;;  %v4122_v9 = vld [vmem:[%s6999_s7 + $0x298] sm:$0xff]  ;;  %v6313_v14 = vpop.f32.mrf.mxu0 }
 0x542   : > { %3989 = vmatpush2.msra.mxu1 %v2769_v15  ;;  %5099 = vmatprep.subr.mxu0 %v4132_v16  ;;  %v4106_v13 = vld [vmem:[%s6999_s7 + $0x218] sm:$0xff]  ;;  %v6315_v15 = vpop.f32.mrf.mxu1 }
 0x543   : > { %3990 = vmatprep.subr.mxu1 %v2754_v17  ;;  %5100 = vmatpush3.msra.mxu0 %v4116_v18  ;;  %v2593_v16 = vld [vmem:[#allocation11 + $0x1970] sm:$0xff]  ;;  %v4121_v17 = vld [vmem:[%s6999_s7 + $0x290] sm:$0xff]  ;;  %v2578_v18 = vld [vmem:[#allocation11 + $0x18f8] sm:$0xff] }
 0x544   : > { %3991 = vmatpush2.msra.mxu1 %v2753_v19  ;;  %5101 = vmatprep.subr.mxu0 %v4131_v20  ;;  %v4105_v19 = vld [vmem:[%s6999_s7 + $0x210] sm:$0xff]  ;;  %v3098_v20 = vadd.f32 %v6094_v35, %v2822_v8  ;;  %v4104_v35 = vld [vmem:[%s6999_s7 + $0x208] sm:$0xff]  ;;  %v4178_v8 = vld [vmem:[%s6999_s7 + $0x458] sm:$0xff] }
 0x545   : > { %3992 = vmatprep.subr.mxu1 %v2738_v50  ;;  %5102 = vmatpush3.msra.mxu0 %v4115_v21  ;;  %v3238_v50 = vadd.f32 %v6096_v48, %v2826_v51  ;;  %v6325_v21 = vld [vmem:[#allocation13 + $0x8] sm:$0xff] }
 0x546   : > { %3993 = vmatpush2.msra.mxu1 %v2737_v23  ;;  %5103 = vmatprep.subr.mxu0 %v4130_v24  ;;  %v2577_v23 = vld [vmem:[#allocation11 + $0x18f0] sm:$0xff]  ;;  %v4120_v24 = vld [vmem:[%s6999_s7 + $0x288] sm:$0xff]  ;;  %v3169_v48 = vadd.f32 %v6099_v59, %v3098_v20  ;;  %v4081_v51 = vld [vmem:[%s6999_s7 + $0x150] sm:$0xff] }
 0x547   : > { %3994 = vmatprep.subr.mxu1 %v2722_v25  ;;  %5104 = vmatpush3.msra.mxu0 %v4114_v29  ;;  %v2846_v29 = vrot.slane %v6325_v21, %v5990_v41  ;;  %v4102_v41 = vld [vmem:[%s6999_s7 + $0x1f8] sm:$0xff]  ;;  %v4103_v59 = vld [vmem:[%s6999_s7 + $0x200] sm:$0xff] }
 0x548   : > { %3995 = vmatpush2.msra.mxu1 %v2721_v30  ;;  %5105 = vmatprep.subr.mxu0 %v4129_v32  ;;  %v2562_v30 = vld [vmem:[#allocation11 + $0x1878] sm:$0xff]  ;;  %v3309_v32 = vadd.f32 %v6103_v2, %v3238_v50  ;;  %v4086_v2 = vld [vmem:[%s6999_s7 + $0x178] sm:$0xff] }
 0x549   : > { %3996 = vmatprep.subr.mxu1 %v2706_v43  ;;  %5106 = vmatpush3.msra.mxu0 %v4113_v33  ;;  %v3523_v43 = vpop.f32.mrf.mxu0  ;;  %v2561_v33 = vld [vmem:[#allocation11 + $0x1870] sm:$0xff] }
 0x54a   : > { %3997 = vmatpush2.msra.mxu1 %v2705_v62  ;;  %5107 = vmatprep.subr.mxu0 %v4128_v34  ;;  %v4119_v62 = vld [vmem:[%s6999_s7 + $0x280] sm:$0xff]  ;;  %v4094_v50 = vld [vmem:[%s6999_s7 + $0x1b8] sm:$0xff] }
 0x54b   : > { %3998 = vmatprep.subr.mxu1 %v2690_v36  ;;  %5108 = vmatpush3.msra.mxu0 %v4112_v40  ;;  %v3524_v36 = vadd.f32 %v3523_v43, %v2846_v29  ;;  %v4026_v40 = vmax.f32 %v3169_v48, 0.0  ;;  %v4191_v20 = vld [vmem:[%s6999_s7 + $0x4c0] sm:$0xff]  ;;  %v4190_v29 = vld [vmem:[%s6999_s7 + $0x4b8] sm:$0xff]  ;;  %v4077_v48 = vld [vmem:[%s6999_s7 + $0x130] sm:$0xff] }
 0x54c   : > { %3999 = vmatpush2.msra.mxu1 %v2689_v11  ;;  %5109 = vmatprep.subr.mxu0 %v4127_v55  ;;  %v4027_v11 = vmax.f32 %v3309_v32, 0.0  ;;  %v4198_v55 = vld [vmem:[%s6999_s7 + $0x4f8] sm:$0xff]  ;;  %v4189_v32 = vld [vmem:[%s6999_s7 + $0x4b0] sm:$0xff]  ;;  %v4092_v43 = vld [vmem:[%s6999_s7 + $0x1a8] sm:$0xff] }
 0x54d   : > { %4000 = vmatprep.subr.mxu1 %v2674_v47  ;;  %5110 = vmatpush3.msra.mxu0 %v4111_v52  ;;  %v4101_v47 = vld [vmem:[%s6999_s7 + $0x1f0] sm:$0xff] }
 0x54e   : > { %4001 = vmatpush2.msra.mxu1 %v2673_v44  ;;  %5111 = vmatprep.subr.mxu0 %v4126_v53  ;;  %v4182_v44 = vld [vmem:[%s6999_s7 + $0x478] sm:$0xff]  ;;  %v4197_v53 = vld [vmem:[%s6999_s7 + $0x4f0] sm:$0xff] }
 0x54f   : > { %4002 = vmatprep.subr.mxu1 %v2658_v54  ;;  %5112 = vmatpush3.msra.mxu0 %v4110_v56  ;;  %v4100_v54 = vld [vmem:[%s6999_s7 + $0x1e8] sm:$0xff]  ;;  %v4181_v56 = vld [vmem:[%s6999_s7 + $0x470] sm:$0xff] }
 0x550   : > { %4003 = vmatpush2.msra.mxu1 %v2657_v60  ;;  %5113 = vmatprep.subr.mxu0 %v4125_v61  ;;  %v4084_v60 = vld [vmem:[%s6999_s7 + $0x168] sm:$0xff] }
 0x551   : > { %4004 = vmatprep.subr.mxu1 %v2642_v63  ;;  %5114 = vmatpush3.msra.mxu0 %v4109_v0  ;;  %v4196_v61 = vld [vmem:[%s6999_s7 + $0x4e8] sm:$0xff]  ;;  %v4099_v63 = vld [vmem:[%s6999_s7 + $0x1e0] sm:$0xff] }
 0x552   : > { %4005 = vmatpush2.msra.mxu1 %v2641_v3  ;;  %5115 = vmatprep.subr.mxu0 %v4124_v4  ;;  %v4180_v3 = vld [vmem:[%s6999_s7 + $0x468] sm:$0xff]  ;;  %v4083_v4 = vld [vmem:[%s6999_s7 + $0x160] sm:$0xff] }
 0x553   : > { %4006 = vmatprep.subr.mxu1 %v2626_v31  ;;  %5116 = vmatpush3.msra.mxu0 %v4108_v5  ;;  %v4195_v31 = vld [vmem:[%s6999_s7 + $0x4e0] sm:$0xff]  ;;  %v4098_v5 = vld [vmem:[%s6999_s7 + $0x1d8] sm:$0xff] }
 0x554   : > { %4007 = vmatpush2.msra.mxu1 %v2625_v46  ;;  %5117 = vmatprep.subr.mxu0 %v4123_v1  ;;  %v4179_v46 = vld [vmem:[%s6999_s7 + $0x460] sm:$0xff]  ;;  %v4082_v1 = vld [vmem:[%s6999_s7 + $0x158] sm:$0xff] }
 0x555   : > { %4008 = vmatprep.subr.mxu1 %v2610_v6  ;;  %5118 = vmatpush3.msra.mxu0 %v4107_v58  ;;  %v4194_v6 = vld [vmem:[%s6999_s7 + $0x4d8] sm:$0xff]  ;;  %v4097_v58 = vld [vmem:[%s6999_s7 + $0x1d0] sm:$0xff] }
 0x556   : > { %4009 = vmatpush2.msra.mxu1 %v2609_v57  ;;  %5119 = vmatprep.subr.mxu0 %v4122_v9  ;;  %v6330_v25 = vpop.f32.mrf.mxu1  ;;  %v4193_v57 = vld [vmem:[%s6999_s7 + $0x4d0] sm:$0xff]  ;;  %v4096_v9 = vld [vmem:[%s6999_s7 + $0x1c8] sm:$0xff] }
 0x557   : > { %4010 = vmatprep.subr.mxu1 %v2594_v10  ;;  %5120 = vmatpush3.msra.mxu0 %v4106_v13  ;;  %v4177_v10 = vld [vmem:[%s6999_s7 + $0x450] sm:$0xff]  ;;  %v4080_v13 = vld [vmem:[%s6999_s7 + $0x148] sm:$0xff] }
 0x558   : > { %4011 = vmatpush2.msra.mxu1 %v2593_v16  ;;  %5121 = vmatprep.subr.mxu0 %v4121_v17  ;;  %v3594_v34 = vpop.f32.mrf.mxu1  ;;  %v4192_v16 = vld [vmem:[%s6999_s7 + $0x4c8] sm:$0xff]  ;;  %v4095_v17 = vld [vmem:[%s6999_s7 + $0x1c0] sm:$0xff] }
 0x559   : > { %4012 = vmatprep.subr.mxu1 %v2578_v18  ;;  %5122 = vmatpush3.msra.mxu0 %v4105_v19  ;;  %v3595_v52 = vadd.f32 %v3594_v34, %v3524_v36  ;;  %v4176_v18 = vld [vmem:[%s6999_s7 + $0x448] sm:$0xff]  ;;  %v4079_v19 = vld [vmem:[%s6999_s7 + $0x140] sm:$0xff] }
 0x55a   : > { %4013 = vmatpush2.msra.mxu1 %v2577_v23  ;;  %5123 = vmatprep.subr.mxu0 %v4120_v24  ;;  %v4175_v23 = vld [vmem:[%s6999_s7 + $0x440] sm:$0xff]  ;;  %v4078_v24 = vld [vmem:[%s6999_s7 + $0x138] sm:$0xff]  ;;  %v4172_v34 = vld [vmem:[%s6999_s7 + $0x428] sm:$0xff] }
 0x55b   : > { %4014 = vmatprep.subr.mxu1 %v2562_v30  ;;  %5124 = vmatpush3.msra.mxu0 %v4104_v35  ;;  %v4032_v0 = vmax.f32 %v3595_v52, 0.0  ;;  %v4093_v30 = vld [vmem:[%s6999_s7 + $0x1b0] sm:$0xff]  ;;  %v4174_v35 = vld [vmem:[%s6999_s7 + $0x438] sm:$0xff]  ;;  %v4075_v36 = vld [vmem:[%s6999_s7 + $0x120] sm:$0xff]  ;;  %v2842_v52 = vrot.slane %v6325_v21, %v5987_v39 }
 0x55c   : > { %4015 = vmatpush2.msra.mxu1 %v2561_v33  ;;  %5125 = vmatprep.subr.mxu0 %v4119_v62  ;;  %v4173_v33 = vld [vmem:[%s6999_s7 + $0x430] sm:$0xff]  ;;  %v2837_v62 = vsub.s32 7, %v5981_v37  ;;  %v4170_v39 = vld [vmem:[%s6999_s7 + $0x418] sm:$0xff] }
 0x55d   : > { %4017 = vmatmul.mubr.f32.vlgmr.msra.gmra.mxu1 %v6056_v45  ;;  %5060 = vmatprep.subr.mxu1 %v4102_v41  ;;  %v4085_v45 = vld [vmem:[%s6999_s7 + $0x170] sm:$0xff]  ;;  %v4076_v41 = vld [vmem:[%s6999_s7 + $0x128] sm:$0xff]  ;;  %v4295_v37 = vld [vmem:[#allocation14] sm:$0x1] }
 0x55e   : > { %5126 = vmatpush3.msra.mxu0 %v4103_v59  ;;  %5061 = vmatpush3.msra.mxu1 %v4086_v2  ;;  %v4188_v59 = vld [vmem:[%s6999_s7 + $0x4a8] sm:$0xff]  ;;  %v4091_v2 = vld [vmem:[%s6999_s7 + $0x1a0] sm:$0xff] }
 0x55f   : > { %4430 = vmatprep.mubr.f32.mxu1 %v4026_v40  ;;  %4501 = vmatmul.mubr.f32.vlgmr.msra.gmra.mxu0 %v4027_v11  ;;  %v4187_v40 = vld [vmem:[%s6999_s7 + $0x4a0] sm:$0xff]  ;;  %v4090_v11 = vld [vmem:[%s6999_s7 + $0x198] sm:$0xff] }
 0x560   : > { %5165 = vmatprep.subr.mxu0 %v4198_v55  ;;  %5062 = vmatprep.subr.mxu1 %v4101_v47  ;;  %v4171_v55 = vld [vmem:[%s6999_s7 + $0x420] sm:$0xff]  ;;  %v2838_v47 = vrot.slane %v6105_v27, %v2837_v62  ;;  %v4073_v27 = vld [vmem:[%s6999_s7 + $0x110] sm:$0xff] }
 0x561   : > { %5166 = vmatpush3.msra.mxu0 %v4182_v44  ;;  %5063 = vmatpush3.msra.mxu1 %v4085_v45  ;;  %v4074_v44 = vld [vmem:[%s6999_s7 + $0x118] sm:$0xff] }
 0x562   : > { %5167 = vmatprep.subr.mxu0 %v4197_v53  ;;  %5064 = vmatprep.subr.mxu1 %v4100_v54  ;;  %v4186_v45 = vld [vmem:[%s6999_s7 + $0x498] sm:$0xff]  ;;  %v4089_v53 = vld [vmem:[%s6999_s7 + $0x190] sm:$0xff] }
 0x563   : > { %5168 = vmatpush3.msra.mxu0 %v4181_v56  ;;  %5065 = vmatpush3.msra.mxu1 %v4084_v60  ;;  %v4185_v54 = vld [vmem:[%s6999_s7 + $0x490] sm:$0xff]  ;;  %v4088_v56 = vld [vmem:[%s6999_s7 + $0x188] sm:$0xff] }
 0x564   : > { %5169 = vmatprep.subr.mxu0 %v4196_v61  ;;  %5066 = vmatprep.subr.mxu1 %v4099_v63  ;;  %v4169_v60 = vld [vmem:[%s6999_s7 + $0x410] sm:$0xff]  ;;  %v3382_v61 = vadd.f32 %v6305_v12, %v2838_v47  ;;  %v3522_v63 = vadd.f32 %v6313_v14, %v2842_v52  ;;  %v4168_v12 = vld [vmem:[%s6999_s7 + $0x408] sm:$0xff]  ;;  %v4255_v47 = vld [vmem:[%s6999_s7 + $0x6c0] sm:$0xff] }
 0x565   : > { %5170 = vmatpush3.msra.mxu0 %v4180_v3  ;;  %5067 = vmatpush3.msra.mxu1 %v4083_v4  ;;  %v4184_v3 = vld [vmem:[%s6999_s7 + $0x488] sm:$0xff]  ;;  %v4087_v4 = vld [vmem:[%s6999_s7 + $0x180] sm:$0xff]  ;;  %v4142_v52 = vld [vmem:[%s6999_s7 + $0x338] sm:$0xff] }
 0x566   : > { %5171 = vmatprep.subr.mxu0 %v4195_v31  ;;  %4640 = vmatprep.mubr.f32.mxu0 %v4032_v0  ;;  %v4072_v0 = vld [vmem:[%s6999_s7 + $0x108] sm:$0xff]  ;;  %v3453_v14 = vadd.f32 %v6315_v15, %v3382_v61  ;;  %v3593_v31 = vadd.f32 %v6330_v25, %v3522_v63  ;;  %v4025_v15 = vmax.f32 %v6084_v7, 0.0  ;;  %v4167_v25 = vld [vmem:[%s6999_s7 + $0x400] sm:$0xff]  ;;  %v4165_v7 = vld [vmem:[%s6999_s7 + $0x3f0] sm:$0xff] }
 0x567   : > { %5068 = vmatprep.subr.mxu1 %v4098_v5  ;;  %5172 = vmatpush3.msra.mxu0 %v4179_v46  ;;  %v4071_v5 = vld [vmem:[%s6999_s7 + $0x100] sm:$0xff]  ;;  %v4140_v61 = vld [vmem:[%s6999_s7 + $0x328] sm:$0xff]  ;;  %v4237_v63 = vld [vmem:[%s6999_s7 + $0x630] sm:$0xff] }
 0x568   : > { %5069 = vmatpush3.msra.mxu1 %v4082_v1  ;;  %5173 = vmatprep.subr.mxu0 %v4194_v6  ;;  %v4183_v46 = vld [vmem:[%s6999_s7 + $0x480] sm:$0xff]  ;;  %v4166_v1 = vld [vmem:[%s6999_s7 + $0x3f8] sm:$0xff] }
 0x569   : > { %5070 = vmatprep.subr.mxu1 %v4097_v58  ;;  %5174 = vmatpush3.msra.mxu0 %v4178_v8  ;;  %v4150_v6 = vld [vmem:[%s6999_s7 + $0x378] sm:$0xff]  ;;  %v4030_v58 = vmax.f32 %v3453_v14, 0.0  ;;  %v4031_v8 = vmax.f32 %v3593_v31, 0.0  ;;  %v2854_v14 = vrot.slane %v6325_v21, %v5993_v42  ;;  %v4235_v42 = vld [vmem:[%s6999_s7 + $0x620] sm:$0xff] }
 0x56a   : > { %5071 = vmatpush3.msra.mxu1 %v4081_v51  ;;  %5175 = vmatprep.subr.mxu0 %v4193_v57  ;;  %v4262_v51 = vld [vmem:[%s6999_s7 + $0x6f8] sm:$0xff]  ;;  %v4149_v57 = vld [vmem:[%s6999_s7 + $0x370] sm:$0xff] }
 0x56b   : > { %5072 = vmatprep.subr.mxu1 %v4096_v9  ;;  %5176 = vmatpush3.msra.mxu0 %v4177_v10  ;;  %v4246_v9 = vld [vmem:[%s6999_s7 + $0x678] sm:$0xff]  ;;  %v4164_v10 = vld [vmem:[%s6999_s7 + $0x3e8] sm:$0xff] }
 0x56c   : > { %5073 = vmatpush3.msra.mxu1 %v4080_v13  ;;  %5177 = vmatprep.subr.mxu0 %v4192_v16  ;;  %v4261_v13 = vld [vmem:[%s6999_s7 + $0x6f0] sm:$0xff]  ;;  %v4148_v16 = vld [vmem:[%s6999_s7 + $0x368] sm:$0xff]  ;;  %v4154_v31 = vld [vmem:[%s6999_s7 + $0x398] sm:$0xff] }
 0x56d   : > { %5074 = vmatprep.subr.mxu1 %v4095_v17  ;;  %5178 = vmatpush3.msra.mxu0 %v4176_v18  ;;  %v4245_v17 = vld [vmem:[%s6999_s7 + $0x670] sm:$0xff]  ;;  %v4163_v18 = vld [vmem:[%s6999_s7 + $0x3e0] sm:$0xff] }
 0x56e   : > { %5075 = vmatpush3.msra.mxu1 %v4079_v19  ;;  %5179 = vmatprep.subr.mxu0 %v4191_v20  ;;  %v4260_v19 = vld [vmem:[%s6999_s7 + $0x6e8] sm:$0xff]  ;;  %v4147_v20 = vld [vmem:[%s6999_s7 + $0x360] sm:$0xff] }
 0x56f   : > { %5076 = vmatprep.subr.mxu1 %v4094_v50  ;;  %5180 = vmatpush3.msra.mxu0 %v4175_v23  ;;  %v4244_v50 = vld [vmem:[%s6999_s7 + $0x668] sm:$0xff]  ;;  %v4162_v23 = vld [vmem:[%s6999_s7 + $0x3d8] sm:$0xff] }
 0x570   : > { %5077 = vmatpush3.msra.mxu1 %v4078_v24  ;;  %5181 = vmatprep.subr.mxu0 %v4190_v29  ;;  %v4259_v24 = vld [vmem:[%s6999_s7 + $0x6e0] sm:$0xff]  ;;  %v4146_v29 = vld [vmem:[%s6999_s7 + $0x358] sm:$0xff] }
 0x571   : > { %5078 = vmatprep.subr.mxu1 %v4093_v30  ;;  %5182 = vmatpush3.msra.mxu0 %v4174_v35  ;;  %v4243_v30 = vld [vmem:[%s6999_s7 + $0x660] sm:$0xff]  ;;  %v4161_v35 = vld [vmem:[%s6999_s7 + $0x3d0] sm:$0xff] }
 0x572   : > { %5079 = vmatpush3.msra.mxu1 %v4077_v48  ;;  %5183 = vmatprep.subr.mxu0 %v4189_v32  ;;  %v4258_v48 = vld [vmem:[%s6999_s7 + $0x6d8] sm:$0xff]  ;;  %v4145_v32 = vld [vmem:[%s6999_s7 + $0x350] sm:$0xff] }
 0x573   : > { %5080 = vmatprep.subr.mxu1 %v4092_v43  ;;  %5184 = vmatpush3.msra.mxu0 %v4173_v33  ;;  %v4242_v43 = vld [vmem:[%s6999_s7 + $0x658] sm:$0xff]  ;;  %v4160_v33 = vld [vmem:[%s6999_s7 + $0x3c8] sm:$0xff] }
 0x574   : > { %5081 = vmatpush3.msra.mxu1 %v4076_v41  ;;  %5185 = vmatprep.subr.mxu0 %v4188_v59  ;;  %v4257_v41 = vld [vmem:[%s6999_s7 + $0x6d0] sm:$0xff]  ;;  %v4144_v59 = vld [vmem:[%s6999_s7 + $0x348] sm:$0xff] }
 0x575   : > { %5082 = vmatprep.subr.mxu1 %v4091_v2  ;;  %5186 = vmatpush3.msra.mxu0 %v4172_v34  ;;  %v4241_v2 = vld [vmem:[%s6999_s7 + $0x650] sm:$0xff]  ;;  %v4159_v34 = vld [vmem:[%s6999_s7 + $0x3c0] sm:$0xff] }
 0x576   : > { %5083 = vmatpush3.msra.mxu1 %v4075_v36  ;;  %5187 = vmatprep.subr.mxu0 %v4187_v40  ;;  %v4256_v36 = vld [vmem:[%s6999_s7 + $0x6c8] sm:$0xff]  ;;  %v4143_v40 = vld [vmem:[%s6999_s7 + $0x340] sm:$0xff] }
 0x577   : > { %5084 = vmatprep.subr.mxu1 %v4090_v11  ;;  %5188 = vmatpush3.msra.mxu0 %v4171_v55  ;;  %v4240_v11 = vld [vmem:[%s6999_s7 + $0x648] sm:$0xff]  ;;  %v4158_v55 = vld [vmem:[%s6999_s7 + $0x3b8] sm:$0xff] }
 0x578   : > { %5085 = vmatpush3.msra.mxu1 %v4074_v44  ;;  %5189 = vmatprep.subr.mxu0 %v4186_v45  ;;  %v4239_v44 = vld [vmem:[%s6999_s7 + $0x640] sm:$0xff]  ;;  %v4157_v45 = vld [vmem:[%s6999_s7 + $0x3b0] sm:$0xff] }
 0x579   : > { %5086 = vmatprep.subr.mxu1 %v4089_v53  ;;  %5190 = vmatpush3.msra.mxu0 %v4170_v39  ;;  %v4254_v53 = vld [vmem:[%s6999_s7 + $0x6b8] sm:$0xff]  ;;  %v4141_v39 = vld [vmem:[%s6999_s7 + $0x330] sm:$0xff] }
 0x57a   : > { %5087 = vmatpush3.msra.mxu1 %v4073_v27  ;;  %5191 = vmatprep.subr.mxu0 %v4185_v54  ;;  %v4238_v27 = vld [vmem:[%s6999_s7 + $0x638] sm:$0xff]  ;;  %v4156_v54 = vld [vmem:[%s6999_s7 + $0x3a8] sm:$0xff] }
 0x57b   : > { %5088 = vmatprep.subr.mxu1 %v4088_v56  ;;  %5192 = vmatpush3.msra.mxu0 %v4169_v60  ;;  %v4253_v56 = vld [vmem:[%s6999_s7 + $0x6b0] sm:$0xff]  ;;  %v6669_v60 = vpop.f32.mrf.mxu0 }
 0x57c   : > { %5089 = vmatpush3.msra.mxu1 %v4072_v0  ;;  %5193 = vmatprep.subr.mxu0 %v4184_v3  ;;  %v4155_v0 = vld [vmem:[%s6999_s7 + $0x3a0] sm:$0xff]  ;;  %v4252_v3 = vld [vmem:[%s6999_s7 + $0x6a8] sm:$0xff] }
 0x57d   : > { %5090 = vmatprep.subr.mxu1 %v4087_v4  ;;  %5194 = vmatpush3.msra.mxu0 %v4168_v12  ;;  %v4139_v4 = vld [vmem:[%s6999_s7 + $0x320] sm:$0xff]  ;;  %v4236_v12 = vld [vmem:[%s6999_s7 + $0x628] sm:$0xff] }
 0x57e   : > { %5091 = vmatpush3.msra.mxu1 %v4071_v5  ;;  %5195 = vmatprep.subr.mxu0 %v4183_v46  ;;  %v4251_v5 = vld [vmem:[%s6999_s7 + $0x6a0] sm:$0xff]  ;;  %v3665_v46 = vpop.f32.mrf.mxu0 }
 0x57f   : > { %4431 = vmatmul.mubr.f32.vlgmr.msra.gmra.mxu1 %v4025_v15  ;;  %5130 = vmatprep.subr.mxu1 %v4166_v1  ;;  %v4138_v1 = vld [vmem:[%s6999_s7 + $0x318] sm:$0xff]  ;;  %v4153_v15 = vld [vmem:[%s6999_s7 + $0x390] sm:$0xff] }
 0x580   : > { %5196 = vmatpush3.msra.mxu0 %v4167_v25  ;;  %5131 = vmatpush3.msra.mxu1 %v4150_v6  ;;  %v4250_v25 = vld [vmem:[%s6999_s7 + $0x698] sm:$0xff]  ;;  %v4137_v6 = vld [vmem:[%s6999_s7 + $0x310] sm:$0xff] }
 0x581   : > { %4570 = vmatprep.mubr.f32.mxu1 %v4030_v58  ;;  %4641 = vmatmul.mubr.f32.vlgmr.msra.gmra.mxu0 %v4031_v8  ;;  %v4234_v8 = vld [vmem:[%s6999_s7 + $0x618] sm:$0xff] }
 0x582   : > { %5132 = vmatprep.subr.mxu1 %v4165_v7  ;;  %5235 = vmatprep.subr.mxu0 %v4262_v51  ;;  %v3666_v7 = vadd.f32 %v3665_v46, %v2854_v14  ;;  %v4152_v51 = vld [vmem:[%s6999_s7 + $0x388] sm:$0xff]  ;;  %v4294_v46 = vld [vmem:[%s6999_s7 + $0x7f8] sm:$0xff] }
 0x583   : > { %5133 = vmatpush3.msra.mxu1 %v4149_v57  ;;  %5236 = vmatpush3.msra.mxu0 %v4246_v9  ;;  %v4249_v57 = vld [vmem:[%s6999_s7 + $0x690] sm:$0xff]  ;;  %v4136_v9 = vld [vmem:[%s6999_s7 + $0x308] sm:$0xff] }
 0x584   : > { %5134 = vmatprep.subr.mxu1 %v4164_v10  ;;  %5237 = vmatprep.subr.mxu0 %v4261_v13  ;;  %v4233_v13 = vld [vmem:[%s6999_s7 + $0x610] sm:$0xff] }
 0x585   : > { %5135 = vmatpush3.msra.mxu1 %v4148_v16  ;;  %5238 = vmatpush3.msra.mxu0 %v4245_v17  ;;  %v4151_v16 = vld [vmem:[%s6999_s7 + $0x380] sm:$0xff] }
 0x586   : > { %5136 = vmatprep.subr.mxu1 %v4163_v18  ;;  %5239 = vmatprep.subr.mxu0 %v4260_v19  ;;  %v4248_v18 = vld [vmem:[%s6999_s7 + $0x688] sm:$0xff]  ;;  %v4135_v19 = vld [vmem:[%s6999_s7 + $0x300] sm:$0xff] }
 0x587   : > { %5137 = vmatpush3.msra.mxu1 %v4147_v20  ;;  %5240 = vmatpush3.msra.mxu0 %v4244_v50  ;;  %v4232_v20 = vld [vmem:[%s6999_s7 + $0x608] sm:$0xff]  ;;  %v4230_v50 = vld [vmem:[%s6999_s7 + $0x5f8] sm:$0xff] }
 0x588   : > { %5138 = vmatprep.subr.mxu1 %v4162_v23  ;;  %5241 = vmatprep.subr.mxu0 %v4259_v24  ;;  %v4029_v24 = vmax.f32 %v6114_v22, 0.0  ;;  %v4213_v22 = vld [vmem:[%s6999_s7 + $0x570] sm:$0xff] }
 0x589   : > { %5139 = vmatpush3.msra.mxu1 %v4146_v29  ;;  %5242 = vmatpush3.msra.mxu0 %v4243_v30  ;;  %v4214_v29 = vld [vmem:[%s6999_s7 + $0x578] sm:$0xff]  ;;  %v4229_v30 = vld [vmem:[%s6999_s7 + $0x5f0] sm:$0xff] }
 0x58a   : > { %5140 = vmatprep.subr.mxu1 %v4161_v35  ;;  %5243 = vmatprep.subr.mxu0 %v4258_v48  ;;  %v4247_v35 = vld [vmem:[%s6999_s7 + $0x680] sm:$0xff] }
 0x58b   : > { %5141 = vmatpush3.msra.mxu1 %v4145_v32  ;;  %5244 = vmatpush3.msra.mxu0 %v4242_v43  ;;  %v4231_v48 = vld [vmem:[%s6999_s7 + $0x600] sm:$0xff]  ;;  %v4228_v32 = vld [vmem:[%s6999_s7 + $0x5e8] sm:$0xff] }
 0x58c   : > { %5142 = vmatprep.subr.mxu1 %v4160_v33  ;;  %5245 = vmatprep.subr.mxu0 %v4257_v41  ;;  %v4212_v43 = vld [vmem:[%s6999_s7 + $0x568] sm:$0xff]  ;;  %v4227_v33 = vld [vmem:[%s6999_s7 + $0x5e0] sm:$0xff] }
 0x58d   : > { %5143 = vmatpush3.msra.mxu1 %v4144_v59  ;;  %5246 = vmatpush3.msra.mxu0 %v4241_v2  ;;  %v4211_v41 = vld [vmem:[%s6999_s7 + $0x560] sm:$0xff]  ;;  %v4226_v59 = vld [vmem:[%s6999_s7 + $0x5d8] sm:$0xff] }
 0x58e   : > { %5144 = vmatprep.subr.mxu1 %v4159_v34  ;;  %5247 = vmatprep.subr.mxu0 %v4256_v36  ;;  %v4210_v2 = vld [vmem:[%s6999_s7 + $0x558] sm:$0xff]  ;;  %v4225_v34 = vld [vmem:[%s6999_s7 + $0x5d0] sm:$0xff] }
 0x58f   : > { %5145 = vmatpush3.msra.mxu1 %v4143_v40  ;;  %5248 = vmatpush3.msra.mxu0 %v4240_v11  ;;  %v4209_v36 = vld [vmem:[%s6999_s7 + $0x550] sm:$0xff]  ;;  %v4224_v40 = vld [vmem:[%s6999_s7 + $0x5c8] sm:$0xff] }
 0x590   : > { %5146 = vmatprep.subr.mxu1 %v4158_v55  ;;  %5249 = vmatprep.subr.mxu0 %v4255_v47  ;;  %v4208_v11 = vld [vmem:[%s6999_s7 + $0x548] sm:$0xff]  ;;  %v4223_v55 = vld [vmem:[%s6999_s7 + $0x5c0] sm:$0xff] }
 0x591   : > { %5147 = vmatpush3.msra.mxu1 %v4142_v52  ;;  %5250 = vmatpush3.msra.mxu0 %v4239_v44  ;;  %v4207_v47 = vld [vmem:[%s6999_s7 + $0x540] sm:$0xff]  ;;  %v4222_v52 = vld [vmem:[%s6999_s7 + $0x5b8] sm:$0xff] }
 0x592   : > { %5148 = vmatprep.subr.mxu1 %v4157_v45  ;;  %5251 = vmatprep.subr.mxu0 %v4254_v53  ;;  %v4206_v44 = vld [vmem:[%s6999_s7 + $0x538] sm:$0xff]  ;;  %v4221_v45 = vld [vmem:[%s6999_s7 + $0x5b0] sm:$0xff] }
 0x593   : > { %5149 = vmatpush3.msra.mxu1 %v4141_v39  ;;  %5252 = vmatpush3.msra.mxu0 %v4238_v27  ;;  %v4205_v53 = vld [vmem:[%s6999_s7 + $0x530] sm:$0xff]  ;;  %v4220_v39 = vld [vmem:[%s6999_s7 + $0x5a8] sm:$0xff] }
 0x594   : > { %5150 = vmatprep.subr.mxu1 %v4156_v54  ;;  %5253 = vmatprep.subr.mxu0 %v4253_v56  ;;  %v4204_v27 = vld [vmem:[%s6999_s7 + $0x528] sm:$0xff]  ;;  %v4219_v54 = vld [vmem:[%s6999_s7 + $0x5a0] sm:$0xff]  ;;  %v2850_v56 = vrot.slane %v6325_v21, %v5984_v38  ;;  %v4217_v38 = vld [vmem:[%s6999_s7 + $0x590] sm:$0xff] }
 0x595   : > { %5151 = vmatpush3.msra.mxu1 %v4140_v61  ;;  %5254 = vmatpush3.msra.mxu0 %v4237_v63  ;;  %v4203_v61 = vld [vmem:[%s6999_s7 + $0x520] sm:$0xff]  ;;  %v4218_v63 = vld [vmem:[%s6999_s7 + $0x598] sm:$0xff] }
 0x596   : > { %5152 = vmatprep.subr.mxu1 %v4155_v0  ;;  %5255 = vmatprep.subr.mxu0 %v4252_v3  ;;  %v4202_v0 = vld [vmem:[%s6999_s7 + $0x518] sm:$0xff]  ;;  %v3664_v3 = vadd.f32 %v6669_v60, %v2850_v56  ;;  %v4215_v60 = vld [vmem:[%s6999_s7 + $0x580] sm:$0xff] }
 0x597   : > { %5153 = vmatpush3.msra.mxu1 %v4139_v4  ;;  %5256 = vmatpush3.msra.mxu0 %v4236_v12  ;;  %v4201_v4 = vld [vmem:[%s6999_s7 + $0x510] sm:$0xff]  ;;  %v4216_v12 = vld [vmem:[%s6999_s7 + $0x588] sm:$0xff] }
 0x598   : > { %5154 = vmatprep.subr.mxu1 %v4154_v31  ;;  %v6712_v58 = vpop.f32.mrf.mxu1  ;;  %5257 = vmatprep.subr.mxu0 %v4251_v5  ;;  %v4200_v31 = vld [vmem:[%s6999_s7 + $0x508] sm:$0xff]  ;;  %v4199_v5 = vld [vmem:[%s6999_s7 + $0x500] sm:$0xff] }
 0x599   : > { %5155 = vmatpush3.msra.mxu1 %v4138_v1  ;;  %5258 = vmatpush3.msra.mxu0 %v4235_v42  ;;  %v3735_v14 = vadd.f32 %v6712_v58, %v3664_v3  ;;  %v4278_v42 = vld [vmem:[%s6999_s7 + $0x778] sm:$0xff]  ;;  %v4276_v58 = vld [vmem:[%s6999_s7 + $0x768] sm:$0xff] }
 0x59a   : > { %5156 = vmatprep.subr.mxu1 %v4153_v15  ;;  %v3736_v10 = vpop.f32.mrf.mxu1  ;;  %5259 = vmatprep.subr.mxu0 %v4250_v25  ;;  %v4293_v15 = vld [vmem:[%s6999_s7 + $0x7f0] sm:$0xff] }
 0x59b   : > { %5157 = vmatpush3.msra.mxu1 %v4137_v6  ;;  %v3737_v17 = vadd.f32 %v3736_v10, %v3666_v7  ;;  %5260 = vmatpush3.msra.mxu0 %v4234_v8  ;;  %v4033_v1 = vmax.f32 %v3735_v14, 0.0  ;;  %v4277_v25 = vld [vmem:[%s6999_s7 + $0x770] sm:$0xff]  ;;  %v4292_v6 = vld [vmem:[%s6999_s7 + $0x7e8] sm:$0xff]  ;;  %v4291_v8 = vld [vmem:[%s6999_s7 + $0x7e0] sm:$0xff] }
 0x59c   : > { %5158 = vmatprep.subr.mxu1 %v4152_v51  ;;  %5261 = vmatprep.subr.mxu0 %v4249_v57  ;;  %v4275_v7 = vld [vmem:[%s6999_s7 + $0x760] sm:$0xff]  ;;  %v4290_v51 = vld [vmem:[%s6999_s7 + $0x7d8] sm:$0xff]  ;;  %v4273_v10 = vld [vmem:[%s6999_s7 + $0x750] sm:$0xff] }
 0x59d   : > { %5159 = vmatpush3.msra.mxu1 %v4136_v9  ;;  %v4034_v23 = vmax.f32 %v3737_v17, 0.0  ;;  %5262 = vmatpush3.msra.mxu0 %v4233_v13  ;;  %v4274_v57 = vld [vmem:[%s6999_s7 + $0x758] sm:$0xff]  ;;  %v4289_v9 = vld [vmem:[%s6999_s7 + $0x7d0] sm:$0xff]  ;;  %v4288_v13 = vld [vmem:[%s6999_s7 + $0x7c8] sm:$0xff] }
 0x59e   : > { %5160 = vmatprep.subr.mxu1 %v4151_v16  ;;  %5263 = vmatprep.subr.mxu0 %v4248_v18  ;;  %v4272_v16 = vld [vmem:[%s6999_s7 + $0x748] sm:$0xff]  ;;  %v4287_v17 = vld [vmem:[%s6999_s7 + $0x7c0] sm:$0xff] }
 0x59f   : > { %5161 = vmatpush3.msra.mxu1 %v4135_v19  ;;  %5264 = vmatpush3.msra.mxu0 %v4232_v20  ;;  %v4271_v18 = vld [vmem:[%s6999_s7 + $0x740] sm:$0xff]  ;;  %v4286_v19 = vld [vmem:[%s6999_s7 + $0x7b8] sm:$0xff] }
 0x5a0   : > { %4571 = vmatmul.mubr.f32.vlgmr.msra.gmra.mxu1 %v4029_v24  ;;  %5200 = vmatprep.subr.mxu1 %v4230_v50  ;;  %v4270_v20 = vld [vmem:[%s6999_s7 + $0x738] sm:$0xff]  ;;  %v4285_v50 = vld [vmem:[%s6999_s7 + $0x7b0] sm:$0xff]  ;;  %v4284_v24 = vld [vmem:[%s6999_s7 + $0x7a8] sm:$0xff] }
 0x5a1   : > { %5201 = vmatpush3.msra.mxu1 %v4214_v29  ;;  %4710 = vmatprep.mubr.f32.mxu1 %v4034_v23  ;;  %v4269_v23 = vld [vmem:[%s6999_s7 + $0x730] sm:$0xff]  ;;  %v4268_v29 = vld [vmem:[%s6999_s7 + $0x728] sm:$0xff] }
 0x5a2   : > { %5202 = vmatprep.subr.mxu1 %v4229_v30  ;;  %5265 = vmatprep.subr.mxu0 %v4247_v35  ;;  %v4283_v30 = vld [vmem:[%s6999_s7 + $0x7a0] sm:$0xff]  ;;  %v3805_v35 = vpop.f32.mrf.mxu0 }
 0x5a3   : > { %5203 = vmatpush3.msra.mxu1 %v4213_v22  ;;  %5266 = vmatpush3.msra.mxu0 %v4231_v48  ;;  %v4267_v22 = vld [vmem:[%s6999_s7 + $0x720] sm:$0xff]  ;;  %v4282_v48 = vld [vmem:[%s6999_s7 + $0x798] sm:$0xff] }
 0x5a4   : > { %5204 = vmatprep.subr.mxu1 %v4228_v32  ;;  %v2858_v32 = vrot.slane %v6325_v21, %v2825_v28  ;;  %v4265_v28 = vld [vmem:[%s6999_s7 + $0x710] sm:$0xff] }
 0x5a5   : > { %5205 = vmatpush3.msra.mxu1 %v4212_v43  ;;  %v4266_v43 = vld [vmem:[%s6999_s7 + $0x718] sm:$0xff] }
 0x5a6   : > { %5206 = vmatprep.subr.mxu1 %v4227_v33  ;;  %v2862_v33 = vrot.slane %v6325_v21, %v2829_v26  ;;  %v4264_v26 = vld [vmem:[%s6999_s7 + $0x708] sm:$0xff] }
 0x5a7   : > { %5207 = vmatpush3.msra.mxu1 %v4211_v41  ;;  %v4281_v41 = vld [vmem:[%s6999_s7 + $0x790] sm:$0xff] }
 0x5a8   : > { %5208 = vmatprep.subr.mxu1 %v4226_v59  ;;  %v3807_v59 = vpop.f32.mrf.mxu0 }
 0x5a9   : > { %5209 = vmatpush3.msra.mxu1 %v4210_v2  ;;  %v4280_v2 = vld [vmem:[%s6999_s7 + $0x788] sm:$0xff] }
 0x5aa   : > { %5210 = vmatprep.subr.mxu1 %v4225_v34  ;;  %v3806_v34 = vadd.f32 %v3805_v35, %v2858_v32 }
 0x5ab   : > { %5211 = vmatpush3.msra.mxu1 %v4209_v36 }
 0x5ac   : > { %5212 = vmatprep.subr.mxu1 %v4224_v40  ;;  %v3808_v40 = vadd.f32 %v3807_v59, %v2862_v33 }
 0x5ad   : > { %5213 = vmatpush3.msra.mxu1 %v4208_v11  ;;  %v4279_v11 = vld [vmem:[%s6999_s7 + $0x780] sm:$0xff] }
 0x5ae   : > { %5214 = vmatprep.subr.mxu1 %v4223_v55 }
 0x5af   : > { %5215 = vmatpush3.msra.mxu1 %v4207_v47 }
 0x5b0   : > { %5216 = vmatprep.subr.mxu1 %v4222_v52  ;;  %v4263_v52 = vld [vmem:[%s6999_s7 + $0x700] sm:$0xff] }
 0x5b1   : > { %5217 = vmatpush3.msra.mxu1 %v4206_v44 }
 0x5b2   : > { %5218 = vmatprep.subr.mxu1 %v4221_v45 }
 0x5b3   : > { %5219 = vmatpush3.msra.mxu1 %v4205_v53 }
 0x5b4   : > { %5220 = vmatprep.subr.mxu1 %v4220_v39 }
 0x5b5   : > { %5221 = vmatpush3.msra.mxu1 %v4204_v27  ;;  %v2866_v27 = vrot.slane %v6325_v21, %v2833_v49 }
 0x5b6   : > { %5222 = vmatprep.subr.mxu1 %v4219_v54  ;;  %v2870_v54 = vrot.slane %v6325_v21, %v2837_v62 }
 0x5b7   : > { %5223 = vmatpush3.msra.mxu1 %v4203_v61 }
 0x5b8   : > { %5224 = vmatprep.subr.mxu1 %v4218_v63 }
 0x5b9   : > { %5225 = vmatpush3.msra.mxu1 %v4202_v0 }
 0x5ba   : > { %5226 = vmatprep.subr.mxu1 %v4217_v38 }
 0x5bb   : > { %5227 = vmatpush3.msra.mxu1 %v4201_v4 }
 0x5bc   : > { %5228 = vmatprep.subr.mxu1 %v4216_v12 }
 0x5bd   : > { %5229 = vmatpush3.msra.mxu1 %v4200_v31 }
 0x5be   : > { %5230 = vmatprep.subr.mxu1 %v4215_v60 }
 0x5bf   : > { %5231 = vmatpush3.msra.mxu1 %v4199_v5 }
 0x5c0   : > { %4711 = vmatmul.mubr.f32.vlgmr.msra.gmra.mxu1 %v4033_v1  ;;  %5270 = vmatprep.subr.mxu1 %v4294_v46 }
 0x5c1   : > { %5271 = vmatpush3.msra.mxu1 %v4278_v42 }
 0x5c2   : > { %5272 = vmatprep.subr.mxu1 %v4293_v15 }
 0x5c3   : > { %5273 = vmatpush3.msra.mxu1 %v4277_v25 }
 0x5c4   : > { %5274 = vmatprep.subr.mxu1 %v4292_v6 }
 0x5c5   : > { %5275 = vmatpush3.msra.mxu1 %v4276_v58 }
 0x5c6   : > { %5276 = vmatprep.subr.mxu1 %v4291_v8 }
 0x5c7   : > { %5277 = vmatpush3.msra.mxu1 %v4275_v7 }
 0x5c8   : > { %5278 = vmatprep.subr.mxu1 %v4290_v51 }
 0x5c9   : > { %5279 = vmatpush3.msra.mxu1 %v4274_v57 }
 0x5ca   : > { %5280 = vmatprep.subr.mxu1 %v4289_v9 }
 0x5cb   : > { %5281 = vmatpush3.msra.mxu1 %v4273_v10 }
 0x5cc   : > { %5282 = vmatprep.subr.mxu1 %v4288_v13 }
 0x5cd   : > { %5283 = vmatpush3.msra.mxu1 %v4272_v16 }
 0x5ce   : > { %5284 = vmatprep.subr.mxu1 %v4287_v17 }
 0x5cf   : > { %5285 = vmatpush3.msra.mxu1 %v4271_v18 }
 0x5d0   : > { %5286 = vmatprep.subr.mxu1 %v4286_v19 }
 0x5d1   : > { %5287 = vmatpush3.msra.mxu1 %v4270_v20 }
 0x5d2   : > { %5288 = vmatprep.subr.mxu1 %v4285_v50 }
 0x5d3   : > { %5289 = vmatpush3.msra.mxu1 %v4269_v23 }
 0x5d4   : > { %5290 = vmatprep.subr.mxu1 %v4284_v24 }
 0x5d5   : > { %5291 = vmatpush3.msra.mxu1 %v4268_v29 }
 0x5d6   : > { %5292 = vmatprep.subr.mxu1 %v4283_v30 }
 0x5d7   : > { %5293 = vmatpush3.msra.mxu1 %v4267_v22 }
 0x5d8   : > { %5294 = vmatprep.subr.mxu1 %v4282_v48 }
 0x5d9   : > { %5295 = vmatpush3.msra.mxu1 %v4266_v43 }
 0x5da   : > { %v3876_v36 = vpop.f32.mrf.mxu1  ;;  %5296 = vmatprep.subr.mxu1 %v4281_v41 }
 0x5db   : > { %5297 = vmatpush3.msra.mxu1 %v4265_v28  ;;  %v3877_v55 = vadd.f32 %v3876_v36, %v3806_v34  ;;  %v3947_v39 = vpop.f32.mrf.mxu0 }
 0x5dc   : > { %v3878_v47 = vpop.f32.mrf.mxu1  ;;  %5298 = vmatprep.subr.mxu1 %v4280_v2  ;;  %v3948_v61 = vadd.f32 %v3947_v39, %v2866_v27 }
 0x5dd   : > { %v3879_v44 = vadd.f32 %v3878_v47, %v3808_v40  ;;  %5299 = vmatpush3.msra.mxu1 %v4264_v26  ;;  %v4035_v53 = vmax.f32 %v3877_v55, 0.0  ;;  %v3949_v56 = vpop.f32.mrf.mxu0 }
 0x5de   : > { %5300 = vmatprep.subr.mxu1 %v4279_v11  ;;  %v3950_v0 = vadd.f32 %v3949_v56, %v2870_v54 }
 0x5df   : > { %v4036_v45 = vmax.f32 %v3879_v44, 0.0  ;;  %5301 = vmatpush3.msra.mxu1 %v4263_v52 }
 0x5e1   : > { %4780 = vmatprep.mubr.f32.mxu0 %v4036_v45 }
 0x5e2   : > { %4781 = vmatmul.mubr.f32.vlgmr.msra.gmra.mxu0 %v4035_v53 }
 0x5fd   : > { %v5057_v31 = vpop.f32.mrf.mxu0 }
 0x5ff   : > { %v5058_v60 = vpop.f32.mrf.mxu0 }
 0x600   : > { %v5059_v1 = vadd.f32 %v5058_v60, %v5057_v31 }
 0x602   : > { %v4363_v25 = vadd.f32 %v5059_v1, %v4295_v37 }
 0x61d   : > { %v4018_v63 = vpop.f32.mrf.mxu1 }
 0x61e   : > { %v4019_v38 = vadd.f32 %v4018_v63, %v3948_v61 }
 0x61f   : > { %v4020_v3 = vpop.f32.mrf.mxu1  ;;  %v5127_v46 = vpop.f32.mrf.mxu0 }
 0x620   : > { %v4021_v4 = vadd.f32 %v4020_v3, %v3950_v0  ;;  %v4037_v14 = vmax.f32 %v4019_v38, 0.0 }
 0x621   : > { %v5128_v42 = vpop.f32.mrf.mxu0 }
 0x622   : > { %v4038_v12 = vmax.f32 %v4021_v4, 0.0  ;;  %v5129_v51 = vadd.f32 %v5128_v42, %v5127_v46 }
 0x624   : > { %4850 = vmatprep.mubr.f32.mxu1 %v4038_v12 }
 0x625   : > { %4851 = vmatmul.mubr.f32.vlgmr.msra.gmra.mxu1 %v4037_v14 }
 0x63f   : > { %v5092_v5 = vpop.f32.mrf.mxu1 }
 0x641   : > { %v5093_v49 = vpop.f32.mrf.mxu1  ;;  %v5197_v15 = vpop.f32.mrf.mxu0 }
 0x642   : > { %v5094_v62 = vadd.f32 %v5093_v49, %v5092_v5 }
 0x643   : > { %v5198_v8 = vpop.f32.mrf.mxu0 }
 0x644   : > { %v4433_v58 = vadd.f32 %v5094_v62, %v4363_v25  ;;  %v5199_v18 = vadd.f32 %v5198_v8, %v5197_v15 }
 0x646   : > { %v4503_v10 = vadd.f32 %v5129_v51, %v4433_v58 }
 0x660   : > { %v5162_v21 = vpop.f32.mrf.mxu1 }
 0x662   : > { %v5163_v6 = vpop.f32.mrf.mxu1 }
 0x663   : > { %v5164_v57 = vadd.f32 %v5163_v6, %v5162_v21 }
 0x665   : > { %v4573_v16 = vadd.f32 %v5164_v57, %v4503_v10 }
 0x667   : > { %v4643_v20 = vadd.f32 %v5199_v18, %v4573_v16 }
 0x680   : > { %v5232_v7 = vpop.f32.mrf.mxu1 }
 0x682   : > { %v5233_v13 = vpop.f32.mrf.mxu1 }
 0x683   : > { %v5234_v19 = vadd.f32 %v5233_v13, %v5232_v7 }
 0x685   : > { %v4713_v24 = vadd.f32 %v5234_v19, %v4643_v20 }
 0x6a2   : > { %v5267_v9 = vpop.f32.mrf.mxu0 }
 0x6a4   : > { %v5268_v17 = vpop.f32.mrf.mxu0 }
 0x6a5   : > { %v5269_v50 = vadd.f32 %v5268_v17, %v5267_v9 }
 0x6a7   : > { %v4783_v30 = vadd.f32 %v5269_v50, %v4713_v24 }
 0x6e5   : > { %v5302_v23 = vpop.f32.mrf.mxu1 }
 0x6e7   : > { %v5303_v29 = vpop.f32.mrf.mxu1 }
 0x6e8   : > { %v5304_v35 = vadd.f32 %v5303_v29, %v5302_v23 }
 0x6ea   : > { %v4853_v22 = vadd.f32 %v5304_v35, %v4783_v30 }
 0x6ec   : > { %4857 = vst.msk [vmem:[%s439_s18] sm:$0x1] %vm4856_vm1, %v4853_v22 }
 0x6ed   : > { %5653 = shalt.err (!%p5650_p6)
}
 0x6ee   : > { %s5654_s25 = scalar_lea.hbm %s4869_s20, 16  ;;  %s5658_s23 = scalar_lea.hbm %s7001_s9, 32 }
 0x6ef   : > { %p5655_p12 = scmp.ne.s32.totalorder %s4869_s20, %s5654_s25  ;;  %p5659_p2 = scmp.lt.s32.totalorder %s4869_s20, %s7001_s9 }
 0x6f0   : > { %p5660_p5 = scmp.lt.s32.totalorder %s5658_s23, %s5654_s25 }
 0x6f1   : > { %p5656_p13 = pnand %p5655_p12, %p7032_p11 }
 0x6f2   : > { %p5661_p8 = por %p5660_p5, %p5659_p2 }
 0x6f3   : > { %p5657_p4 = pneg %p5656_p13 }
 0x6f5   : > { %p5662_p10 = pnand %p5661_p8, %p5657_p4 }
 0x6f7   : > { %5665 = shalt.err (!%p5662_p10)
}
 0x6f8   : > { %5335 = dma.vmem_to_hbm [thread:$0]  (%p7032_p11), %s4872_s21, 16, %s4869_s20, %s4859_s29  }
 0x6f9 PF: > { %s4883_s16 = sand.u32 1, %s5708_s30   ;;  %p7033_p0 = scmp.ne.s32.totalorder %s7020_s28, 0 }
 0x6fa   : > { %p7034_p1 = scmp.ge.s32.totalorder %s5720_s12, 2  ;;  %s4884_s18 = scalar_lea.sflag [#allocation4], %s4883_s16 }
 0x6fc   : > { %p5364_p3 = pnand %p7034_p1, %p7033_p0 }
 0x6fe   : > { %p5365_p7 = pneg %p5364_p3 }
 0x700   : > { %5703 = dma.done.wait (%p5365_p7), %s4884_s18, 16  }
 0x701   : > { %5705 = vsyncadd (%p5365_p7), %s4884_s18, 4294967280  ;;  %p26_p9 = scmp.ge.s32.totalorder %s5898_s19, 4   ;;  %s7035_s30 = smov %s5712_s10 }
 0x702   : > { %s7036_s10 = smov %s5716_s11  ;;  %s7037_s11 = smov %s5910_s26 }
 0x703   : > { %s7038_s12 = smov %s5898_s19  ;;  %28 = sbr.rel (!%p26_p9) target bundleno = 14 (0xe), region = 131 }
 0x708   :  { %4888 = vsyncpa [#allocation3], 1 }
 0x709   :  { %4890 = vsyncpa [#allocation3 + $0x1], 1 }
 0x70a   :  { %4891 = vsyncpa [#allocation6], 1 }
 0x70b   :  { %4892 = vsyncpa [#allocation9], 1 }
 0x70c   :  { %4893 = vsyncpa [#allocation12], 1 }
 0x70d   :  { %4894 = vsyncpa [#allocation15], 1 }
 0x70e   :  { %4895 = vsyncpa [#allocation4], 1 }
 0x70f   :  { %4897 = vsyncpa [#allocation4 + $0x1], 1 }

</bundles_post_ra>
